<compile_context>
chip_gen: v6e
topology: v6e:2x2x1
jax: 0.10.0
libtpu: 0.0.40
codegen_flags: <defaults>
</compile_context>

<pallas_src>
import jax
import jax.numpy as jnp
from jax import lax
from jax.experimental import pallas as pl
from jax.experimental.pallas import tpu as pltpu


_COL0 = 8   # 8-aligned sublane column at which the activation interior starts
_C = 32     # conv channel width (lane dimension)


# ------------------------------- fused kernel -------------------------------------
def _fused_vgg_part1_kernel(x_ref, w1_ref, b1_ref, w2_ref, b2_ref, w3_ref, b3_ref,
                            o_ref, pad_ref):
    """conv3x3+bias+ReLU (x3) then 2x2/2 maxpool for one batch block, all in VMEM.

    x_ref  : (B, H, W, cin)        raw input block (cin=3, NOT channel-padded)
    w*_ref : (9*C, C)   bf16       tap-major im2col weights, row = (3*dy+dx)*C + ci
    b*_ref : (1, C)     f32
    o_ref  : (B, H//2, W//2, C)
    pad_ref: (B, H+2, wbuf, C) f32 scratch; interior rows [1, H+1),
                                   cols [_COL0, _COL0+W), 1-wide zero halo around it.
    """
    B, H, W, cin = x_ref.shape
    C = pad_ref.shape[-1]
    Ho, Wo = H // 2, W // 2
    BHW = B * H * W
    f32 = jnp.float32
    c0 = _COL0

    # ---- refresh only the zero halo frame (every step: correct under 'parallel') --
    zrow = jnp.zeros((B, 1, W + 2, C), f32)
    pad_ref[:, 0:1, c0 - 1:c0 + W + 1, :] = zrow
    pad_ref[:, H + 1:H + 2, c0 - 1:c0 + W + 1, :] = zrow
    zcol = jnp.zeros((B, H, 1, C), f32)
    pad_ref[:, 1:H + 1, c0 - 1:c0, :] = zcol
    pad_ref[:, 1:H + 1, c0 + W:c0 + W + 1, :] = zcol

    # ---- place the cin-channel input into the first lanes of a zeroed interior ----
    if cin < C:
        pad_ref[:, 1:H + 1, c0:c0 + W, :] = jnp.zeros((B, H, W, C), f32)
        pad_ref[:, 1:H + 1, c0:c0 + W, 0:cin] = x_ref[...].astype(f32)
    else:
        pad_ref[:, 1:H + 1, c0:c0 + W, :] = x_ref[...].astype(f32)

    def im2col_bf16():
        # Gather the 9 shifted taps into one wide-K (BHW, 9*C) bf16 MXU operand.
        taps = []
        for dy in range(3):
            for dx in range(3):
                col = c0 - 1 + dx
                t = pad_ref[:, dy:dy + H, col:col + W, :]            # (B, H, W, C)
                taps.append(t.reshape(BHW, C))
        return jnp.concatenate(taps, axis=-1).astype(jnp.bfloat16)   # (BHW, 9*C)

    def conv3x3_relu(w_ref, b_ref):
        # Single wide-K matmul per conv, f32 accumulation; bias + ReLU in f32.
        y = jnp.dot(im2col_bf16(), w_ref[...], preferred_element_type=f32)
        return jnp.maximum(y + b_ref[...], 0.0)                      # (BHW, C) f32

    # conv1 -> conv2 -> conv3; activations never leave the VMEM scratch.
    y = conv3x3_relu(w1_ref, b1_ref)
    pad_ref[:, 1:H + 1, c0:c0 + W, :] = y.reshape(B, H, W, C)
    y = conv3x3_relu(w2_ref, b2_ref)
    pad_ref[:, 1:H + 1, c0:c0 + W, :] = y.reshape(B, H, W, C)
    y = conv3x3_relu(w3_ref, b3_ref)
    pad_ref[:, 1:H + 1, c0:c0 + W, :] = y.reshape(B, H, W, C)

    # ---- fused 2x2/2 maxpool: stride-2 column reads + row-pair reshape ------------
    even = pad_ref[:, 1:H + 1, pl.ds(c0, Wo, stride=2), :]           # (B, H, Wo, C)
    odd = pad_ref[:, 1:H + 1, pl.ds(c0 + 1, Wo, stride=2), :]
    cmax = jnp.maximum(even, odd).reshape(B, Ho, 2, Wo, C)           # h = 2*a + b
    pooled = jnp.maximum(cmax[:, :, 0], cmax[:, :, 1])               # (B, Ho, Wo, C)
    o_ref[...] = pooled.astype(o_ref.dtype)


# --------------------------------- wrapper -----------------------------------------
def _prep_conv_weight(w_hwio, c):
    """(3, 3, cin, cout) HWIO -> pad cin to c -> (9*c, cout) bf16, row=(3*dy+dx)*c+ci."""
    kh, kw, ci, co = w_hwio.shape
    w = jnp.pad(w_hwio.astype(jnp.float32), ((0, 0), (0, 0), (0, c - ci), (0, 0)))
    return w.reshape(kh * kw * c, co).astype(jnp.bfloat16)


def _pick_block_b(n):
    """Largest batch block <= 8 that divides n, preferring a grid of length >= 2."""
    divisors = [b for b in range(1, min(8, n) + 1) if n % b == 0]
    multi = [b for b in divisors if n // b >= 2]
    return max(multi) if multi else max(divisors)


@jax.jit
def vgg16small_part1(x_nchw, params):
    N, cin, H, W = x_nchw.shape
    C = _C
    assert H % 8 == 0 and W % 8 == 0, "spatial dims must be multiples of 8"

    # NCHW -> NHWC; input channels stay at cin (no channel-pad written to HBM).
    x = jnp.transpose(x_nchw, (0, 2, 3, 1)).astype(jnp.float32)

    w1 = _prep_conv_weight(params["w1"], C)
    w2 = _prep_conv_weight(params["w2"], C)
    w3 = _prep_conv_weight(params["w3"], C)
    b1 = params["b1"].reshape(1, C).astype(jnp.float32)
    b2 = params["b2"].reshape(1, C).astype(jnp.float32)
    b3 = params["b3"].reshape(1, C).astype(jnp.float32)

    Ho, Wo = H // 2, W // 2
    K = 9 * C
    Bb = _pick_block_b(N)
    wbuf = ((_COL0 + W + 1 + 7) // 8) * 8      # interior + right halo, rounded to 8

    out = pl.pallas_call(
        _fused_vgg_part1_kernel,
        out_shape=jax.ShapeDtypeStruct((N, Ho, Wo, C), jnp.float32),
        grid=(N // Bb,),
        in_specs=[
            pl.BlockSpec((Bb, H, W, cin), lambda n: (n, 0, 0, 0)),
            pl.BlockSpec((K, C), lambda n: (0, 0)),
            pl.BlockSpec((1, C), lambda n: (0, 0)),
            pl.BlockSpec((K, C), lambda n: (0, 0)),
            pl.BlockSpec((1, C), lambda n: (0, 0)),
            pl.BlockSpec((K, C), lambda n: (0, 0)),
            pl.BlockSpec((1, C), lambda n: (0, 0)),
        ],
        out_specs=pl.BlockSpec((Bb, Ho, Wo, C), lambda n: (n, 0, 0, 0)),
        scratch_shapes=[pltpu.VMEM((Bb, H + 2, wbuf, C), jnp.float32)],
        compiler_params=pltpu.CompilerParams(
            dimension_semantics=("parallel",),
            vmem_limit_bytes=32 * 1024 * 1024),
    )(x, w1, b1, w2, b2, w3, b3)

    return jnp.transpose(out, (0, 3, 1, 2))                          # NHWC -> NCHW


# ------------------------------ params & reference ---------------------------------
def init_params(key):
    """Deterministic parameter init (PyTorch-like uniform(-1/sqrt(fan_in), +))."""
    def conv_init(k, cin, cout):
        kw, kb = jax.random.split(k)
        bound = 1.0 / jnp.sqrt(cin * 3 * 3)
        w = jax.random.uniform(kw, (3, 3, cin, cout), jnp.float32, -bound, bound)
        b = jax.random.uniform(kb, (cout,), jnp.float32, -bound, bound)
        return w, b

    k1, k2, k3 = jax.random.split(key, 3)
    w1, b1 = conv_init(k1, 3, 32)
    w2, b2 = conv_init(k2, 32, 32)
    w3, b3 = conv_init(k3, 32, 32)
    return dict(w1=w1, b1=b1, w2=w2, b2=b2, w3=w3, b3=b3)


def vgg16small_part1_reference(x_nchw, params):
    """Pure-JAX f32 reference (lax.conv + reduce_window) for validation."""
    x = jnp.transpose(x_nchw, (0, 2, 3, 1)).astype(jnp.float32)
    for wn, bn in (("w1", "b1"), ("w2", "b2"), ("w3", "b3")):
        x = lax.conv_general_dilated(
            x, params[wn], window_strides=(1, 1), padding="SAME",
            dimension_numbers=("NHWC", "HWIO", "NHWC"),
            precision=lax.Precision.HIGHEST)
        x = jnp.maximum(x + params[bn], 0.0)
    x = lax.reduce_window(x, -jnp.inf, lax.max,
                          window_dimensions=(1, 2, 2, 1),
                          window_strides=(1, 2, 2, 1),
                          padding="VALID")
    return jnp.transpose(x, (0, 3, 1, 2))


if __name__ == "__main__":
    key = jax.random.PRNGKey(0)
    kx, kp = jax.random.split(key)

    # Small shapes consistent with the module: NCHW, 3 input channels.
    x = jax.random.normal(kx, (2, 3, 16, 16), jnp.float32)
    params = init_params(kp)

    out = jax.block_until_ready(vgg16small_part1(x, params))
    assert out.shape == (2, 32, 8, 8), out.shape

    ref = jax.block_until_ready(vgg16small_part1_reference(x, params))
    max_err = float(jnp.max(jnp.abs(out - ref)))
    # bf16 MXU inputs (f32 accumulation) -> loosen tolerance vs. pure-f32 reference.
    assert jnp.allclose(out, ref, atol=3e-2, rtol=3e-2), max_err

    print("KERNEL_OK")
</pallas_src>

<mosaic_0001>
module attributes {stable_mosaic.version = 11 : i64} {
  func.func @_fused_vgg_part1_kernel(%arg0: i32, %arg1: memref<1x16x16x3xf32, #tpu.memory_space<vmem>>, %arg2: memref<288x32xbf16, #tpu.memory_space<vmem>>, %arg3: memref<1x32xf32, #tpu.memory_space<vmem>>, %arg4: memref<288x32xbf16, #tpu.memory_space<vmem>>, %arg5: memref<1x32xf32, #tpu.memory_space<vmem>>, %arg6: memref<288x32xbf16, #tpu.memory_space<vmem>>, %arg7: memref<1x32xf32, #tpu.memory_space<vmem>>, %arg8: memref<1x8x8x32xf32, #tpu.memory_space<vmem>>, %arg9: memref<1x18x32x32xf32, #tpu.memory_space<vmem>>) attributes {dimension_semantics = [#tpu.dimension_semantics<parallel>], iteration_bounds = array<i64: 2>, scalar_prefetch = 0 : i64, scratch_operands = 1 : i64, tpu.core_type = #tpu.core_type<tc>, window_params = [{transform_indices = @transform_0, window_bounds = array<i64: 1, 16, 16, 3>}, {pipeline_mode = #tpu.pipeline_mode<synchronous>, transform_indices = @transform_1, window_bounds = array<i64: 288, 32>}, {pipeline_mode = #tpu.pipeline_mode<synchronous>, transform_indices = @transform_2, window_bounds = array<i64: 1, 32>}, {pipeline_mode = #tpu.pipeline_mode<synchronous>, transform_indices = @transform_3, window_bounds = array<i64: 288, 32>}, {pipeline_mode = #tpu.pipeline_mode<synchronous>, transform_indices = @transform_4, window_bounds = array<i64: 1, 32>}, {pipeline_mode = #tpu.pipeline_mode<synchronous>, transform_indices = @transform_5, window_bounds = array<i64: 288, 32>}, {pipeline_mode = #tpu.pipeline_mode<synchronous>, transform_indices = @transform_6, window_bounds = array<i64: 1, 32>}, {transform_indices = @transform_7, window_bounds = array<i64: 1, 8, 8, 32>}]} {
    %cst = arith.constant 0.000000e+00 : f32
    %0 = vector.broadcast %cst : f32 to vector<1x1x18x32xf32>
    %c0 = arith.constant 0 : index
    %c0_0 = arith.constant 0 : index
    %c7 = arith.constant 7 : index
    %c0_1 = arith.constant 0 : index
    %1 = vector.load %arg9[%c0, %c0_0, %c7, %c0_1] : memref<1x18x32x32xf32, #tpu.memory_space<vmem>>, vector<1x1x18x32xf32>
    tpu.vector_store %arg9[%c0, %c0_0, %c7, %c0_1], %0 {strides = array<i32>} : memref<1x18x32x32xf32, #tpu.memory_space<vmem>>, vector<1x1x18x32xf32>,
    %c0_2 = arith.constant 0 : index
    %c17 = arith.constant 17 : index
    %c7_3 = arith.constant 7 : index
    %c0_4 = arith.constant 0 : index
    %2 = vector.load %arg9[%c0_2, %c17, %c7_3, %c0_4] : memref<1x18x32x32xf32, #tpu.memory_space<vmem>>, vector<1x1x18x32xf32>
    tpu.vector_store %arg9[%c0_2, %c17, %c7_3, %c0_4], %0 {strides = array<i32>} : memref<1x18x32x32xf32, #tpu.memory_space<vmem>>, vector<1x1x18x32xf32>,
    %cst_5 = arith.constant 0.000000e+00 : f32
    %3 = vector.broadcast %cst_5 : f32 to vector<1x16x1x32xf32>
    %c0_6 = arith.constant 0 : index
    %c1 = arith.constant 1 : index
    %c7_7 = arith.constant 7 : index
    %c0_8 = arith.constant 0 : index
    %4 = vector.load %arg9[%c0_6, %c1, %c7_7, %c0_8] : memref<1x18x32x32xf32, #tpu.memory_space<vmem>>, vector<1x16x1x32xf32>
    tpu.vector_store %arg9[%c0_6, %c1, %c7_7, %c0_8], %3 {strides = array<i32>} : memref<1x18x32x32xf32, #tpu.memory_space<vmem>>, vector<1x16x1x32xf32>,
    %c0_9 = arith.constant 0 : index
    %c1_10 = arith.constant 1 : index
    %c24 = arith.constant 24 : index
    %c0_11 = arith.constant 0 : index
    %5 = vector.load %arg9[%c0_9, %c1_10, %c24, %c0_11] : memref<1x18x32x32xf32, #tpu.memory_space<vmem>>, vector<1x16x1x32xf32>
    tpu.vector_store %arg9[%c0_9, %c1_10, %c24, %c0_11], %3 {strides = array<i32>} : memref<1x18x32x32xf32, #tpu.memory_space<vmem>>, vector<1x16x1x32xf32>,
    %cst_12 = arith.constant 0.000000e+00 : f32
    %6 = vector.broadcast %cst_12 : f32 to vector<1x16x16x32xf32>
    %c0_13 = arith.constant 0 : index
    %c1_14 = arith.constant 1 : index
    %c8 = arith.constant 8 : index
    %c0_15 = arith.constant 0 : index
    %7 = vector.load %arg9[%c0_13, %c1_14, %c8, %c0_15] : memref<1x18x32x32xf32, #tpu.memory_space<vmem>>, vector<1x16x16x32xf32>
    tpu.vector_store %arg9[%c0_13, %c1_14, %c8, %c0_15], %6 {strides = array<i32>} : memref<1x18x32x32xf32, #tpu.memory_space<vmem>>, vector<1x16x16x32xf32>,
    %c0_16 = arith.constant 0 : index
    %c0_17 = arith.constant 0 : index
    %c0_18 = arith.constant 0 : index
    %c0_19 = arith.constant 0 : index
    %8 = vector.load %arg1[%c0_16, %c0_17, %c0_18, %c0_19] : memref<1x16x16x3xf32, #tpu.memory_space<vmem>>, vector<1x16x16x3xf32>
    %c0_20 = arith.constant 0 : index
    %c1_21 = arith.constant 1 : index
    %c8_22 = arith.constant 8 : index
    %c0_23 = arith.constant 0 : index
    %9 = vector.load %arg9[%c0_20, %c1_21, %c8_22, %c0_23] : memref<1x18x32x32xf32, #tpu.memory_space<vmem>>, vector<1x16x16x3xf32>
    tpu.vector_store %arg9[%c0_20, %c1_21, %c8_22, %c0_23], %8 {strides = array<i32>} : memref<1x18x32x32xf32, #tpu.memory_space<vmem>>, vector<1x16x16x3xf32>,
    %c0_24 = arith.constant 0 : index
    %c0_25 = arith.constant 0 : index
    %c7_26 = arith.constant 7 : index
    %c0_27 = arith.constant 0 : index
    %10 = vector.load %arg9[%c0_24, %c0_25, %c7_26, %c0_27] : memref<1x18x32x32xf32, #tpu.memory_space<vmem>>, vector<1x16x16x32xf32>
    %11 = vector.shape_cast %10 : vector<1x16x16x32xf32> to vector<256x32xf32>
    %c0_28 = arith.constant 0 : index
    %c0_29 = arith.constant 0 : index
    %c8_30 = arith.constant 8 : index
    %c0_31 = arith.constant 0 : index
    %12 = vector.load %arg9[%c0_28, %c0_29, %c8_30, %c0_31] : memref<1x18x32x32xf32, #tpu.memory_space<vmem>>, vector<1x16x16x32xf32>
    %13 = vector.shape_cast %12 : vector<1x16x16x32xf32> to vector<256x32xf32>
    %c0_32 = arith.constant 0 : index
    %c0_33 = arith.constant 0 : index
    %c9 = arith.constant 9 : index
    %c0_34 = arith.constant 0 : index
    %14 = vector.load %arg9[%c0_32, %c0_33, %c9, %c0_34] : memref<1x18x32x32xf32, #tpu.memory_space<vmem>>, vector<1x16x16x32xf32>
    %15 = vector.shape_cast %14 : vector<1x16x16x32xf32> to vector<256x32xf32>
    %c0_35 = arith.constant 0 : index
    %c1_36 = arith.constant 1 : index
    %c7_37 = arith.constant 7 : index
    %c0_38 = arith.constant 0 : index
    %16 = vector.load %arg9[%c0_35, %c1_36, %c7_37, %c0_38] : memref<1x18x32x32xf32, #tpu.memory_space<vmem>>, vector<1x16x16x32xf32>
    %17 = vector.shape_cast %16 : vector<1x16x16x32xf32> to vector<256x32xf32>
    %c0_39 = arith.constant 0 : index
    %c1_40 = arith.constant 1 : index
    %c8_41 = arith.constant 8 : index
    %c0_42 = arith.constant 0 : index
    %18 = vector.load %arg9[%c0_39, %c1_40, %c8_41, %c0_42] : memref<1x18x32x32xf32, #tpu.memory_space<vmem>>, vector<1x16x16x32xf32>
    %19 = vector.shape_cast %18 : vector<1x16x16x32xf32> to vector<256x32xf32>
    %c0_43 = arith.constant 0 : index
    %c1_44 = arith.constant 1 : index
    %c9_45 = arith.constant 9 : index
    %c0_46 = arith.constant 0 : index
    %20 = vector.load %arg9[%c0_43, %c1_44, %c9_45, %c0_46] : memref<1x18x32x32xf32, #tpu.memory_space<vmem>>, vector<1x16x16x32xf32>
    %21 = vector.shape_cast %20 : vector<1x16x16x32xf32> to vector<256x32xf32>
    %c0_47 = arith.constant 0 : index
    %c2 = arith.constant 2 : index
    %c7_48 = arith.constant 7 : index
    %c0_49 = arith.constant 0 : index
    %22 = vector.load %arg9[%c0_47, %c2, %c7_48, %c0_49] : memref<1x18x32x32xf32, #tpu.memory_space<vmem>>, vector<1x16x16x32xf32>
    %23 = vector.shape_cast %22 : vector<1x16x16x32xf32> to vector<256x32xf32>
    %c0_50 = arith.constant 0 : index
    %c2_51 = arith.constant 2 : index
    %c8_52 = arith.constant 8 : index
    %c0_53 = arith.constant 0 : index
    %24 = vector.load %arg9[%c0_50, %c2_51, %c8_52, %c0_53] : memref<1x18x32x32xf32, #tpu.memory_space<vmem>>, vector<1x16x16x32xf32>
    %25 = vector.shape_cast %24 : vector<1x16x16x32xf32> to vector<256x32xf32>
    %c0_54 = arith.constant 0 : index
    %c2_55 = arith.constant 2 : index
    %c9_56 = arith.constant 9 : index
    %c0_57 = arith.constant 0 : index
    %26 = vector.load %arg9[%c0_54, %c2_55, %c9_56, %c0_57] : memref<1x18x32x32xf32, #tpu.memory_space<vmem>>, vector<1x16x16x32xf32>
    %27 = vector.shape_cast %26 : vector<1x16x16x32xf32> to vector<256x32xf32>
    %28 = tpu.concatenate %11, %13, %15, %17, %19, %21, %23, %25, %27 in 1 : vector<256x32xf32>, vector<256x32xf32>, vector<256x32xf32>, vector<256x32xf32>, vector<256x32xf32>, vector<256x32xf32>, vector<256x32xf32>, vector<256x32xf32>, vector<256x32xf32> -> vector<256x288xf32>
    %29 = arith.truncf %28 : vector<256x288xf32> to vector<256x288xbf16>
    %c0_58 = arith.constant 0 : index
    %c0_59 = arith.constant 0 : index
    %30 = vector.load %arg2[%c0_58, %c0_59] : memref<288x32xbf16, #tpu.memory_space<vmem>>, vector<288x32xbf16>
    %cst_60 = arith.constant dense<0.000000e+00> : vector<256x32xf32>
    %31 = tpu.matmul %29, %30, %cst_60 {dimension_numbers = #tpu.dot_dimension_numbers<[1], [0], [0], [1], [0, 0, 1, 1], [], []>} : vector<256x288xbf16>, vector<288x32xbf16>, vector<256x32xf32> -> vector<256x32xf32>
    %c0_61 = arith.constant 0 : index
    %c0_62 = arith.constant 0 : index
    %32 = vector.load %arg3[%c0_61, %c0_62] : memref<1x32xf32, #tpu.memory_space<vmem>>, vector<1x32xf32>
    %33 = vector.broadcast %32 : vector<1x32xf32> to vector<256x32xf32>
    %34 = arith.addf %31, %33 : vector<256x32xf32>
    %cst_63 = arith.constant 0.000000e+00 : f32
    %35 = vector.broadcast %cst_63 : f32 to vector<256x32xf32>
    %36 = arith.maximumf %34, %35 : vector<256x32xf32>
    %37 = vector.shape_cast %36 : vector<256x32xf32> to vector<1x16x16x32xf32>
    %c0_64 = arith.constant 0 : index
    %c1_65 = arith.constant 1 : index
    %c8_66 = arith.constant 8 : index
    %c0_67 = arith.constant 0 : index
    %38 = vector.load %arg9[%c0_64, %c1_65, %c8_66, %c0_67] : memref<1x18x32x32xf32, #tpu.memory_space<vmem>>, vector<1x16x16x32xf32>
    tpu.vector_store %arg9[%c0_64, %c1_65, %c8_66, %c0_67], %37 {strides = array<i32>} : memref<1x18x32x32xf32, #tpu.memory_space<vmem>>, vector<1x16x16x32xf32>,
    %c0_68 = arith.constant 0 : index
    %c0_69 = arith.constant 0 : index
    %c7_70 = arith.constant 7 : index
    %c0_71 = arith.constant 0 : index
    %39 = vector.load %arg9[%c0_68, %c0_69, %c7_70, %c0_71] : memref<1x18x32x32xf32, #tpu.memory_space<vmem>>, vector<1x16x16x32xf32>
    %40 = vector.shape_cast %39 : vector<1x16x16x32xf32> to vector<256x32xf32>
    %c0_72 = arith.constant 0 : index
    %c0_73 = arith.constant 0 : index
    %c8_74 = arith.constant 8 : index
    %c0_75 = arith.constant 0 : index
    %41 = vector.load %arg9[%c0_72, %c0_73, %c8_74, %c0_75] : memref<1x18x32x32xf32, #tpu.memory_space<vmem>>, vector<1x16x16x32xf32>
    %42 = vector.shape_cast %41 : vector<1x16x16x32xf32> to vector<256x32xf32>
    %c0_76 = arith.constant 0 : index
    %c0_77 = arith.constant 0 : index
    %c9_78 = arith.constant 9 : index
    %c0_79 = arith.constant 0 : index
    %43 = vector.load %arg9[%c0_76, %c0_77, %c9_78, %c0_79] : memref<1x18x32x32xf32, #tpu.memory_space<vmem>>, vector<1x16x16x32xf32>
    %44 = vector.shape_cast %43 : vector<1x16x16x32xf32> to vector<256x32xf32>
    %c0_80 = arith.constant 0 : index
    %c1_81 = arith.constant 1 : index
    %c7_82 = arith.constant 7 : index
    %c0_83 = arith.constant 0 : index
    %45 = vector.load %arg9[%c0_80, %c1_81, %c7_82, %c0_83] : memref<1x18x32x32xf32, #tpu.memory_space<vmem>>, vector<1x16x16x32xf32>
    %46 = vector.shape_cast %45 : vector<1x16x16x32xf32> to vector<256x32xf32>
    %c0_84 = arith.constant 0 : index
    %c1_85 = arith.constant 1 : index
    %c8_86 = arith.constant 8 : index
    %c0_87 = arith.constant 0 : index
    %47 = vector.load %arg9[%c0_84, %c1_85, %c8_86, %c0_87] : memref<1x18x32x32xf32, #tpu.memory_space<vmem>>, vector<1x16x16x32xf32>
    %48 = vector.shape_cast %47 : vector<1x16x16x32xf32> to vector<256x32xf32>
    %c0_88 = arith.constant 0 : index
    %c1_89 = arith.constant 1 : index
    %c9_90 = arith.constant 9 : index
    %c0_91 = arith.constant 0 : index
    %49 = vector.load %arg9[%c0_88, %c1_89, %c9_90, %c0_91] : memref<1x18x32x32xf32, #tpu.memory_space<vmem>>, vector<1x16x16x32xf32>
    %50 = vector.shape_cast %49 : vector<1x16x16x32xf32> to vector<256x32xf32>
    %c0_92 = arith.constant 0 : index
    %c2_93 = arith.constant 2 : index
    %c7_94 = arith.constant 7 : index
    %c0_95 = arith.constant 0 : index
    %51 = vector.load %arg9[%c0_92, %c2_93, %c7_94, %c0_95] : memref<1x18x32x32xf32, #tpu.memory_space<vmem>>, vector<1x16x16x32xf32>
    %52 = vector.shape_cast %51 : vector<1x16x16x32xf32> to vector<256x32xf32>
    %c0_96 = arith.constant 0 : index
    %c2_97 = arith.constant 2 : index
    %c8_98 = arith.constant 8 : index
    %c0_99 = arith.constant 0 : index
    %53 = vector.load %arg9[%c0_96, %c2_97, %c8_98, %c0_99] : memref<1x18x32x32xf32, #tpu.memory_space<vmem>>, vector<1x16x16x32xf32>
    %54 = vector.shape_cast %53 : vector<1x16x16x32xf32> to vector<256x32xf32>
    %c0_100 = arith.constant 0 : index
    %c2_101 = arith.constant 2 : index
    %c9_102 = arith.constant 9 : index
    %c0_103 = arith.constant 0 : index
    %55 = vector.load %arg9[%c0_100, %c2_101, %c9_102, %c0_103] : memref<1x18x32x32xf32, #tpu.memory_space<vmem>>, vector<1x16x16x32xf32>
    %56 = vector.shape_cast %55 : vector<1x16x16x32xf32> to vector<256x32xf32>
    %57 = tpu.concatenate %40, %42, %44, %46, %48, %50, %52, %54, %56 in 1 : vector<256x32xf32>, vector<256x32xf32>, vector<256x32xf32>, vector<256x32xf32>, vector<256x32xf32>, vector<256x32xf32>, vector<256x32xf32>, vector<256x32xf32>, vector<256x32xf32> -> vector<256x288xf32>
    %58 = arith.truncf %57 : vector<256x288xf32> to vector<256x288xbf16>
    %c0_104 = arith.constant 0 : index
    %c0_105 = arith.constant 0 : index
    %59 = vector.load %arg4[%c0_104, %c0_105] : memref<288x32xbf16, #tpu.memory_space<vmem>>, vector<288x32xbf16>
    %cst_106 = arith.constant dense<0.000000e+00> : vector<256x32xf32>
    %60 = tpu.matmul %58, %59, %cst_106 {dimension_numbers = #tpu.dot_dimension_numbers<[1], [0], [0], [1], [0, 0, 1, 1], [], []>} : vector<256x288xbf16>, vector<288x32xbf16>, vector<256x32xf32> -> vector<256x32xf32>
    %c0_107 = arith.constant 0 : index
    %c0_108 = arith.constant 0 : index
    %61 = vector.load %arg5[%c0_107, %c0_108] : memref<1x32xf32, #tpu.memory_space<vmem>>, vector<1x32xf32>
    %62 = vector.broadcast %61 : vector<1x32xf32> to vector<256x32xf32>
    %63 = arith.addf %60, %62 : vector<256x32xf32>
    %cst_109 = arith.constant 0.000000e+00 : f32
    %64 = vector.broadcast %cst_109 : f32 to vector<256x32xf32>
    %65 = arith.maximumf %63, %64 : vector<256x32xf32>
    %66 = vector.shape_cast %65 : vector<256x32xf32> to vector<1x16x16x32xf32>
    %c0_110 = arith.constant 0 : index
    %c1_111 = arith.constant 1 : index
    %c8_112 = arith.constant 8 : index
    %c0_113 = arith.constant 0 : index
    %67 = vector.load %arg9[%c0_110, %c1_111, %c8_112, %c0_113] : memref<1x18x32x32xf32, #tpu.memory_space<vmem>>, vector<1x16x16x32xf32>
    tpu.vector_store %arg9[%c0_110, %c1_111, %c8_112, %c0_113], %66 {strides = array<i32>} : memref<1x18x32x32xf32, #tpu.memory_space<vmem>>, vector<1x16x16x32xf32>,
    %c0_114 = arith.constant 0 : index
    %c0_115 = arith.constant 0 : index
    %c7_116 = arith.constant 7 : index
    %c0_117 = arith.constant 0 : index
    %68 = vector.load %arg9[%c0_114, %c0_115, %c7_116, %c0_117] : memref<1x18x32x32xf32, #tpu.memory_space<vmem>>, vector<1x16x16x32xf32>
    %69 = vector.shape_cast %68 : vector<1x16x16x32xf32> to vector<256x32xf32>
    %c0_118 = arith.constant 0 : index
    %c0_119 = arith.constant 0 : index
    %c8_120 = arith.constant 8 : index
    %c0_121 = arith.constant 0 : index
    %70 = vector.load %arg9[%c0_118, %c0_119, %c8_120, %c0_121] : memref<1x18x32x32xf32, #tpu.memory_space<vmem>>, vector<1x16x16x32xf32>
    %71 = vector.shape_cast %70 : vector<1x16x16x32xf32> to vector<256x32xf32>
    %c0_122 = arith.constant 0 : index
    %c0_123 = arith.constant 0 : index
    %c9_124 = arith.constant 9 : index
    %c0_125 = arith.constant 0 : index
    %72 = vector.load %arg9[%c0_122, %c0_123, %c9_124, %c0_125] : memref<1x18x32x32xf32, #tpu.memory_space<vmem>>, vector<1x16x16x32xf32>
    %73 = vector.shape_cast %72 : vector<1x16x16x32xf32> to vector<256x32xf32>
    %c0_126 = arith.constant 0 : index
    %c1_127 = arith.constant 1 : index
    %c7_128 = arith.constant 7 : index
    %c0_129 = arith.constant 0 : index
    %74 = vector.load %arg9[%c0_126, %c1_127, %c7_128, %c0_129] : memref<1x18x32x32xf32, #tpu.memory_space<vmem>>, vector<1x16x16x32xf32>
    %75 = vector.shape_cast %74 : vector<1x16x16x32xf32> to vector<256x32xf32>
    %c0_130 = arith.constant 0 : index
    %c1_131 = arith.constant 1 : index
    %c8_132 = arith.constant 8 : index
    %c0_133 = arith.constant 0 : index
    %76 = vector.load %arg9[%c0_130, %c1_131, %c8_132, %c0_133] : memref<1x18x32x32xf32, #tpu.memory_space<vmem>>, vector<1x16x16x32xf32>
    %77 = vector.shape_cast %76 : vector<1x16x16x32xf32> to vector<256x32xf32>
    %c0_134 = arith.constant 0 : index
    %c1_135 = arith.constant 1 : index
    %c9_136 = arith.constant 9 : index
    %c0_137 = arith.constant 0 : index
    %78 = vector.load %arg9[%c0_134, %c1_135, %c9_136, %c0_137] : memref<1x18x32x32xf32, #tpu.memory_space<vmem>>, vector<1x16x16x32xf32>
    %79 = vector.shape_cast %78 : vector<1x16x16x32xf32> to vector<256x32xf32>
    %c0_138 = arith.constant 0 : index
    %c2_139 = arith.constant 2 : index
    %c7_140 = arith.constant 7 : index
    %c0_141 = arith.constant 0 : index
    %80 = vector.load %arg9[%c0_138, %c2_139, %c7_140, %c0_141] : memref<1x18x32x32xf32, #tpu.memory_space<vmem>>, vector<1x16x16x32xf32>
    %81 = vector.shape_cast %80 : vector<1x16x16x32xf32> to vector<256x32xf32>
    %c0_142 = arith.constant 0 : index
    %c2_143 = arith.constant 2 : index
    %c8_144 = arith.constant 8 : index
    %c0_145 = arith.constant 0 : index
    %82 = vector.load %arg9[%c0_142, %c2_143, %c8_144, %c0_145] : memref<1x18x32x32xf32, #tpu.memory_space<vmem>>, vector<1x16x16x32xf32>
    %83 = vector.shape_cast %82 : vector<1x16x16x32xf32> to vector<256x32xf32>
    %c0_146 = arith.constant 0 : index
    %c2_147 = arith.constant 2 : index
    %c9_148 = arith.constant 9 : index
    %c0_149 = arith.constant 0 : index
    %84 = vector.load %arg9[%c0_146, %c2_147, %c9_148, %c0_149] : memref<1x18x32x32xf32, #tpu.memory_space<vmem>>, vector<1x16x16x32xf32>
    %85 = vector.shape_cast %84 : vector<1x16x16x32xf32> to vector<256x32xf32>
    %86 = tpu.concatenate %69, %71, %73, %75, %77, %79, %81, %83, %85 in 1 : vector<256x32xf32>, vector<256x32xf32>, vector<256x32xf32>, vector<256x32xf32>, vector<256x32xf32>, vector<256x32xf32>, vector<256x32xf32>, vector<256x32xf32>, vector<256x32xf32> -> vector<256x288xf32>
    %87 = arith.truncf %86 : vector<256x288xf32> to vector<256x288xbf16>
    %c0_150 = arith.constant 0 : index
    %c0_151 = arith.constant 0 : index
    %88 = vector.load %arg6[%c0_150, %c0_151] : memref<288x32xbf16, #tpu.memory_space<vmem>>, vector<288x32xbf16>
    %cst_152 = arith.constant dense<0.000000e+00> : vector<256x32xf32>
    %89 = tpu.matmul %87, %88, %cst_152 {dimension_numbers = #tpu.dot_dimension_numbers<[1], [0], [0], [1], [0, 0, 1, 1], [], []>} : vector<256x288xbf16>, vector<288x32xbf16>, vector<256x32xf32> -> vector<256x32xf32>
    %c0_153 = arith.constant 0 : index
    %c0_154 = arith.constant 0 : index
    %90 = vector.load %arg7[%c0_153, %c0_154] : memref<1x32xf32, #tpu.memory_space<vmem>>, vector<1x32xf32>
    %91 = vector.broadcast %90 : vector<1x32xf32> to vector<256x32xf32>
    %92 = arith.addf %89, %91 : vector<256x32xf32>
    %cst_155 = arith.constant 0.000000e+00 : f32
    %93 = vector.broadcast %cst_155 : f32 to vector<256x32xf32>
    %94 = arith.maximumf %92, %93 : vector<256x32xf32>
    %95 = vector.shape_cast %94 : vector<256x32xf32> to vector<1x16x16x32xf32>
    %c0_156 = arith.constant 0 : index
    %c1_157 = arith.constant 1 : index
    %c8_158 = arith.constant 8 : index
    %c0_159 = arith.constant 0 : index
    %96 = vector.load %arg9[%c0_156, %c1_157, %c8_158, %c0_159] : memref<1x18x32x32xf32, #tpu.memory_space<vmem>>, vector<1x16x16x32xf32>
    tpu.vector_store %arg9[%c0_156, %c1_157, %c8_158, %c0_159], %95 {strides = array<i32>} : memref<1x18x32x32xf32, #tpu.memory_space<vmem>>, vector<1x16x16x32xf32>,
    %c0_160 = arith.constant 0 : index
    %c1_161 = arith.constant 1 : index
    %c8_162 = arith.constant 8 : index
    %c0_163 = arith.constant 0 : index
    %97 = tpu.strided_load %arg9[%c0_160, %c1_161, %c8_162, %c0_163] {strides = array<i32: 1, 1, 2, 1>} : memref<1x18x32x32xf32, #tpu.memory_space<vmem>>, vector<1x16x8x32xf32>
    %c0_164 = arith.constant 0 : index
    %c1_165 = arith.constant 1 : index
    %c9_166 = arith.constant 9 : index
    %c0_167 = arith.constant 0 : index
    %98 = tpu.strided_load %arg9[%c0_164, %c1_165, %c9_166, %c0_167] {strides = array<i32: 1, 1, 2, 1>} : memref<1x18x32x32xf32, #tpu.memory_space<vmem>>, vector<1x16x8x32xf32>
    %99 = arith.maximumf %97, %98 : vector<1x16x8x32xf32>
    %100 = vector.shape_cast %99 : vector<1x16x8x32xf32> to vector<1x8x2x8x32xf32>
    %101 = vector.extract_strided_slice %100 {offsets = [0, 0, 0, 0, 0], sizes = [1, 8, 1, 8, 32], strides = [1, 1, 1, 1, 1]} : vector<1x8x2x8x32xf32> to vector<1x8x1x8x32xf32>
    %102 = vector.shape_cast %101 : vector<1x8x1x8x32xf32> to vector<1x8x8x32xf32>
    %103 = vector.extract_strided_slice %100 {offsets = [0, 0, 1, 0, 0], sizes = [1, 8, 1, 8, 32], strides = [1, 1, 1, 1, 1]} : vector<1x8x2x8x32xf32> to vector<1x8x1x8x32xf32>
    %104 = vector.shape_cast %103 : vector<1x8x1x8x32xf32> to vector<1x8x8x32xf32>
    %105 = arith.maximumf %102, %104 : vector<1x8x8x32xf32>
    %c0_168 = arith.constant 0 : index
    %c0_169 = arith.constant 0 : index
    %c0_170 = arith.constant 0 : index
    %c0_171 = arith.constant 0 : index
    %106 = vector.load %arg8[%c0_168, %c0_169, %c0_170, %c0_171] : memref<1x8x8x32xf32, #tpu.memory_space<vmem>>, vector<1x8x8x32xf32>
    tpu.vector_store %arg8[%c0_168, %c0_169, %c0_170, %c0_171], %105 {strides = array<i32>} : memref<1x8x8x32xf32, #tpu.memory_space<vmem>>, vector<1x8x8x32xf32>,
    return
  }
  func.func @transform_0(%arg0: i32) -> (i32, i32, i32, i32) {
    %c0_i32 = arith.constant 0 : i32
    %c0_i32_0 = arith.constant 0 : i32
    %c0_i32_1 = arith.constant 0 : i32
    %c0_i32_2 = arith.constant 0 : i32
    return %arg0, %c0_i32, %c0_i32_0, %c0_i32_1 : i32, i32, i32, i32
  }
  func.func @transform_1(%arg0: i32) -> (i32, i32) {
    %c0_i32 = arith.constant 0 : i32
    %c0_i32_0 = arith.constant 0 : i32
    %c0_i32_1 = arith.constant 0 : i32
    return %c0_i32, %c0_i32_0 : i32, i32
  }
  func.func @transform_2(%arg0: i32) -> (i32, i32) {
    %c0_i32 = arith.constant 0 : i32
    %c0_i32_0 = arith.constant 0 : i32
    %c0_i32_1 = arith.constant 0 : i32
    return %c0_i32, %c0_i32_0 : i32, i32
  }
  func.func @transform_3(%arg0: i32) -> (i32, i32) {
    %c0_i32 = arith.constant 0 : i32
    %c0_i32_0 = arith.constant 0 : i32
    %c0_i32_1 = arith.constant 0 : i32
    return %c0_i32, %c0_i32_0 : i32, i32
  }
  func.func @transform_4(%arg0: i32) -> (i32, i32) {
    %c0_i32 = arith.constant 0 : i32
    %c0_i32_0 = arith.constant 0 : i32
    %c0_i32_1 = arith.constant 0 : i32
    return %c0_i32, %c0_i32_0 : i32, i32
  }
  func.func @transform_5(%arg0: i32) -> (i32, i32) {
    %c0_i32 = arith.constant 0 : i32
    %c0_i32_0 = arith.constant 0 : i32
    %c0_i32_1 = arith.constant 0 : i32
    return %c0_i32, %c0_i32_0 : i32, i32
  }
  func.func @transform_6(%arg0: i32) -> (i32, i32) {
    %c0_i32 = arith.constant 0 : i32
    %c0_i32_0 = arith.constant 0 : i32
    %c0_i32_1 = arith.constant 0 : i32
    return %c0_i32, %c0_i32_0 : i32, i32
  }
  func.func @transform_7(%arg0: i32) -> (i32, i32, i32, i32) {
    %c0_i32 = arith.constant 0 : i32
    %c0_i32_0 = arith.constant 0 : i32
    %c0_i32_1 = arith.constant 0 : i32
    %c0_i32_2 = arith.constant 0 : i32
    return %arg0, %c0_i32, %c0_i32_0, %c0_i32_1 : i32, i32, i32, i32
  }
}

</mosaic_0001>

<bundles_post_ra>
// kernel: vgg16small_part1.1
= control target key start
LH: loop header
LB: loop body
LE: loop exit
PB: predicated region body
PF: predicated region fallthrough
CT: control target
= control target key end

     0   :  { %12 = vsyncpa [#allocation4], 0  ;;  %s11256_s0 = inlined_call_operand.vmem [shape: f32[2,16,16,3], index: 0, kind: input, shape index: {}]   ;;  %s11257_s1 = inlined_call_operand.vmem [shape: bf16[288,32], index: 1, kind: input, shape index: {}]   ;;  %s11258_s2 = inlined_call_operand.vmem [shape: f32[1,32], index: 2, kind: input, shape index: {}]   ;;  %s11259_s3 = inlined_call_operand.vmem [shape: bf16[288,32], index: 3, kind: input, shape index: {}]   ;;  %s11260_s4 = inlined_call_operand.vmem [shape: f32[1,32], index: 4, kind: input, shape index: {}]   ;;  %s11261_s5 = inlined_call_operand.vmem [shape: bf16[288,32], index: 5, kind: input, shape index: {}]   ;;  %s11262_s6 = inlined_call_operand.vmem [shape: f32[1,32], index: 6, kind: input, shape index: {}]   ;;  %s11263_s7 = inlined_call_operand.hbm [shape: f32[2,8,8,32], index: 7, kind: output, shape index: {}]  }
   0x1   :  { %14 = vsyncpa [#allocation4 + $0x1], 0  ;;  %s8568_s24 = smov 0   ;;  %s8570_s25 = smov 0  }
   0x2   :  { %s8572_s26 = smov 0   ;;  %s8574_s27 = smov 0  }
   0x3 LB: > { %s8589_s28 = sadd.s32 4294967295, %s8519_s27   ;;  %s6268_s29 = sadd.s32 4294967294, %s8519_s27   ;;  %s8519_s27 = sphi %s8574_s27, %s11335_s27   ;;  %s8515_s26 = sphi %s8572_s26, %s11334_s26   ;;  %s8511_s25 = sphi %s8570_s25, %s11333_s25   ;;  %s8507_s24 = sphi %s8568_s24, %s11332_s24  }
   0x4   : > { %s8593_s30 = sadd.s32 1, %s8519_s27   ;;  %s179_s8 = sadd.s32 1, %s8515_s26 }
   0x5   : > { %s176_s9 = ssub.s32 %s8519_s27, %s8593_s30  ;;  %p189_p0 = scmp.ne.s32.totalorder %s8515_s26, %s8511_s25 }
   0x6   : > { %p177_p1 = scmp.eq.s32.totalorder %s176_s9, 0  ;;  %p190_p2 = scmp.eq.s32.totalorder %s8589_s28, 1 }
   0x7   : > { %p195_p3 = scmp.ne.s32.totalorder %s8511_s25, %s8507_s24  ;;  %p196_p4 = scmp.eq.s32.totalorder %s6268_s29, 1 }
   0x8   : > { %s8604_s10 = scalar_select %p177_p1, %s8515_s26, %s179_s8  }
   0x9   : > { %p8606_p5 = por %p190_p2, %p189_p0  ;;  %p8610_p6 = por %p196_p4, %p195_p3 }
   0xa   : > { %p6271_p7 = scmp.ge.s32.totalorder %s8519_s27, 1  ;;  %p240_p8 = scmp.lt.s32.totalorder %s8519_s27, 3 }
   0xc   : > { %p241_p9 = pnand %p6271_p7, %p240_p8 }
   0xe   : > { %244 = sbr.rel (%p241_p9) target bundleno = 1508 (0x5e4), region = 48 }
  0x13   : > { %vm278_vm0 = vcmask 261120   ;;  %vm281_vm1 = vcmask 254976   ;;  %p272_p10 = scmp.lt.s32.totalorder %s8589_s28, 1  ;;  %v8521_v0 = vmov 0.0   ;;  %vm288_vm2 = vcmask 253952   ;;  %s8522_s18 = smov 32  }
  0x14   : > { %279 = vst.msk [vmem:[#allocation2 + $0x7] sm:$0xff] %vm278_vm0, %v8521_v0  ;;  %280 = vst.msk [vmem:[#allocation2 + $0xf] sm:$0xff] %vm278_vm0, %v8521_v0  ;;  %vm385_vm3 = vcmask 23552   ;;  %s8523_s15 = smov 64   ;;  %s8524_s22 = smov 96   ;;  %vm1507_vm4 = vcmask 523264  }
  0x15   : > { %282 = vst.msk [vmem:[#allocation2 + $0x17] sm:$0x3] %vm281_vm1, %v8521_v0  ;;  %286 = vst.msk [vmem:[#allocation2 + $0x237] sm:$0x3] %vm281_vm1, %v8521_v0  ;;  %s8694_s13 = scalar_select %p272_p10, %s8589_s28, 1  ;;  %vm1540_vm5 = vcmask 785408  }
  0x16   : > { %284 = vst.msk [vmem:[#allocation2 + $0x227] sm:$0xff] %vm278_vm0, %v8521_v0  ;;  %285 = vst.msk [vmem:[#allocation2 + $0x22f] sm:$0xff] %vm278_vm0, %v8521_v0  ;;  %s6386_s8 = sshll.u32 %s8589_s28, 10  ;;  %s8525_s19 = smov [#allocation3]  }
  0x17   : > { %321 = vst.msk [vmem:[#allocation2 + $0x28] sm:$0xff] %vm278_vm0, %v8521_v0  ;;  %322 = vst.msk [vmem:[#allocation2 + $0x30] sm:$0xff] %vm278_vm0, %v8521_v0  ;;  %s6385_s14 = sshll.u32 %s8694_s13, 8  ;;  %s8463_s20 = sshll.u32 %s8525_s19, 4  ;;  %s8464_s20 = int_to_ptr.vmem [resolvable:$false] %s8463_s20 }
  0x18   : > { %323 = vst.msk [vmem:[#allocation2 + $0x48] sm:$0xff] %vm278_vm0, %v8521_v0  ;;  %324 = vst.msk [vmem:[#allocation2 + $0x50] sm:$0xff] %vm278_vm0, %v8521_v0  ;;  %s8764_s17 = scalar_lea.vmem %s11256_s0, %s6385_s14  ;;  %s8465_s21 = scalar_lea.vmem %s8464_s20, 2048 }
  0x19   : > { %325 = vst.msk [vmem:[#allocation2 + $0x68] sm:$0xff] %vm278_vm0, %v8521_v0  ;;  %326 = vst.msk [vmem:[#allocation2 + $0x70] sm:$0xff] %vm278_vm0, %v8521_v0  ;;  %v355_v1 = vld [vmem:[%s8764_s17 + $0x10] sm:$0xff]  ;;  %v356_v2 = vld [vmem:[%s8764_s17 + $0x18] sm:$0xff] }
  0x1a   : > { %327 = vst.msk [vmem:[#allocation2 + $0x88] sm:$0xff] %vm278_vm0, %v8521_v0  ;;  %328 = vst.msk [vmem:[#allocation2 + $0x90] sm:$0xff] %vm278_vm0, %v8521_v0  ;;  %v353_v3 = vld [vmem:[%s8764_s17] sm:$0xff]  ;;  %v354_v4 = vld [vmem:[%s8764_s17 + $0x8] sm:$0xff] }
  0x1b   : > { %329 = vst.msk [vmem:[#allocation2 + $0xa8] sm:$0xff] %vm278_vm0, %v8521_v0  ;;  %330 = vst.msk [vmem:[#allocation2 + $0xb0] sm:$0xff] %vm278_vm0, %v8521_v0  ;;  %v357_v5 = vld [vmem:[%s8764_s17 + $0x20] sm:$0xff]  ;;  %v358_v6 = vld [vmem:[%s8764_s17 + $0x28] sm:$0xff] }
  0x1c   : > { %331 = vst.msk [vmem:[#allocation2 + $0xc8] sm:$0xff] %vm278_vm0, %v8521_v0  ;;  %332 = vst.msk [vmem:[#allocation2 + $0xd0] sm:$0xff] %vm278_vm0, %v8521_v0  ;;  %v450_v7 = vld [vmem:[#allocation2 + $0x8] sm:$0xff]  ;;  %v451_v8 = vld [vmem:[#allocation2 + $0x10] sm:$0xff] }
  0x1d   : > { %333 = vst.msk [vmem:[#allocation2 + $0xe8] sm:$0xff] %vm278_vm0, %v8521_v0  ;;  %334 = vst.msk [vmem:[#allocation2 + $0xf0] sm:$0xff] %vm278_vm0, %v8521_v0  ;;  %v359_v9 = vld [vmem:[%s8764_s17 + $0x30] sm:$0xff]  ;;  %v6934_v10 = vpack.i.bf16 %v451_v8, %v450_v7  ;;  %v360_v11 = vld [vmem:[%s8764_s17 + $0x38] sm:$0xff] }
  0x1e   : > { %335 = vst.msk [vmem:[#allocation2 + $0x108] sm:$0xff] %vm278_vm0, %v8521_v0  ;;  %336 = vst.msk [vmem:[#allocation2 + $0x110] sm:$0xff] %vm278_vm0, %v8521_v0  ;;  %v361_v12 = vld [vmem:[%s8764_s17 + $0x40] sm:$0xff]  ;;  %v362_v13 = vld [vmem:[%s8764_s17 + $0x48] sm:$0xff] }
  0x1f   : > { %337 = vst.msk [vmem:[#allocation2 + $0x128] sm:$0xff] %vm278_vm0, %v8521_v0  ;;  %338 = vst.msk [vmem:[#allocation2 + $0x130] sm:$0xff] %vm278_vm0, %v8521_v0  ;;  %v363_v14 = vld [vmem:[%s8764_s17 + $0x50] sm:$0xff]  ;;  %v364_v15 = vld [vmem:[%s8764_s17 + $0x58] sm:$0xff]  ;;  %6935 = vrot.lane.b32.xlu0 %v6934_v10, %s8522_s18 }
  0x20   : > { %339 = vst.msk [vmem:[#allocation2 + $0x148] sm:$0xff] %vm278_vm0, %v8521_v0  ;;  %340 = vst.msk [vmem:[#allocation2 + $0x150] sm:$0xff] %vm278_vm0, %v8521_v0  ;;  %v365_v16 = vld [vmem:[%s8764_s17 + $0x60] sm:$0xff]  ;;  %v366_v17 = vld [vmem:[%s8764_s17 + $0x68] sm:$0xff] }
  0x21   : > { %341 = vst.msk [vmem:[#allocation2 + $0x168] sm:$0xff] %vm278_vm0, %v8521_v0  ;;  %342 = vst.msk [vmem:[#allocation2 + $0x170] sm:$0xff] %vm278_vm0, %v8521_v0  ;;  %v367_v18 = vld [vmem:[%s8764_s17 + $0x70] sm:$0xff]  ;;  %v368_v19 = vld [vmem:[%s8764_s17 + $0x78] sm:$0xff] }
  0x22   : > { %343 = vst.msk [vmem:[#allocation2 + $0x188] sm:$0xff] %vm278_vm0, %v8521_v0  ;;  %344 = vst.msk [vmem:[#allocation2 + $0x190] sm:$0xff] %vm278_vm0, %v8521_v0  ;;  %v369_v20 = vld [vmem:[%s8764_s17 + $0x80] sm:$0xff]  ;;  %v370_v21 = vld [vmem:[%s8764_s17 + $0x88] sm:$0xff] }
  0x23   : > { %345 = vst.msk [vmem:[#allocation2 + $0x1a8] sm:$0xff] %vm278_vm0, %v8521_v0  ;;  %346 = vst.msk [vmem:[#allocation2 + $0x1b0] sm:$0xff] %vm278_vm0, %v8521_v0  ;;  %v371_v22 = vld [vmem:[%s8764_s17 + $0x90] sm:$0xff]  ;;  %v372_v23 = vld [vmem:[%s8764_s17 + $0x98] sm:$0xff] }
  0x24   : > { %347 = vst.msk [vmem:[#allocation2 + $0x1c8] sm:$0xff] %vm278_vm0, %v8521_v0  ;;  %348 = vst.msk [vmem:[#allocation2 + $0x1d0] sm:$0xff] %vm278_vm0, %v8521_v0  ;;  %v373_v24 = vld [vmem:[%s8764_s17 + $0xa0] sm:$0xff]  ;;  %v374_v25 = vld [vmem:[%s8764_s17 + $0xa8] sm:$0xff] }
  0x25   : > { %349 = vst.msk [vmem:[#allocation2 + $0x1e8] sm:$0xff] %vm278_vm0, %v8521_v0  ;;  %350 = vst.msk [vmem:[#allocation2 + $0x1f0] sm:$0xff] %vm278_vm0, %v8521_v0  ;;  %v375_v35 = vld [vmem:[%s8764_s17 + $0xb0] sm:$0xff]  ;;  %v376_v36 = vld [vmem:[%s8764_s17 + $0xb8] sm:$0xff] }
  0x26   : > { %351 = vst.msk [vmem:[#allocation2 + $0x208] sm:$0xff] %vm278_vm0, %v8521_v0  ;;  %352 = vst.msk [vmem:[#allocation2 + $0x210] sm:$0xff] %vm278_vm0, %v8521_v0  ;;  %v377_v48 = vld [vmem:[%s8764_s17 + $0xc0] sm:$0xff]  ;;  %v378_v49 = vld [vmem:[%s8764_s17 + $0xc8] sm:$0xff] }
  0x27   : > { %305 = vst.msk [vmem:[#allocation2 + $0x38] sm:$0x1] %vm288_vm2, %v8521_v0  ;;  %289 = vst.msk [vmem:[#allocation2 + $0x27] sm:$0x1] %vm288_vm2, %v8521_v0  ;;  %v379_v50 = vld [vmem:[%s8764_s17 + $0xd0] sm:$0xff]  ;;  %v380_v53 = vld [vmem:[%s8764_s17 + $0xd8] sm:$0xff] }
  0x28   : > { %290 = vst.msk [vmem:[#allocation2 + $0x47] sm:$0x1] %vm288_vm2, %v8521_v0  ;;  %291 = vst.msk [vmem:[#allocation2 + $0x67] sm:$0x1] %vm288_vm2, %v8521_v0 }
  0x29   : > { %292 = vst.msk [vmem:[#allocation2 + $0x87] sm:$0x1] %vm288_vm2, %v8521_v0  ;;  %293 = vst.msk [vmem:[#allocation2 + $0xa7] sm:$0x1] %vm288_vm2, %v8521_v0 }
  0x2a   : > { %294 = vst.msk [vmem:[#allocation2 + $0xc7] sm:$0x1] %vm288_vm2, %v8521_v0  ;;  %295 = vst.msk [vmem:[#allocation2 + $0xe7] sm:$0x1] %vm288_vm2, %v8521_v0 }
  0x2b   : > { %296 = vst.msk [vmem:[#allocation2 + $0x107] sm:$0x1] %vm288_vm2, %v8521_v0  ;;  %297 = vst.msk [vmem:[#allocation2 + $0x127] sm:$0x1] %vm288_vm2, %v8521_v0 }
  0x2c   : > { %298 = vst.msk [vmem:[#allocation2 + $0x147] sm:$0x1] %vm288_vm2, %v8521_v0  ;;  %299 = vst.msk [vmem:[#allocation2 + $0x167] sm:$0x1] %vm288_vm2, %v8521_v0 }
  0x2d   : > { %300 = vst.msk [vmem:[#allocation2 + $0x187] sm:$0x1] %vm288_vm2, %v8521_v0  ;;  %301 = vst.msk [vmem:[#allocation2 + $0x1a7] sm:$0x1] %vm288_vm2, %v8521_v0 }
  0x2e   : > { %302 = vst.msk [vmem:[#allocation2 + $0x1c7] sm:$0x1] %vm288_vm2, %v8521_v0  ;;  %303 = vst.msk [vmem:[#allocation2 + $0x1e7] sm:$0x1] %vm288_vm2, %v8521_v0 }
  0x2f   : > { %304 = vst.msk [vmem:[#allocation2 + $0x207] sm:$0x1] %vm288_vm2, %v8521_v0  ;;  %306 = vst.msk [vmem:[#allocation2 + $0x58] sm:$0x1] %vm288_vm2, %v8521_v0 }
  0x30   : > { %307 = vst.msk [vmem:[#allocation2 + $0x78] sm:$0x1] %vm288_vm2, %v8521_v0  ;;  %308 = vst.msk [vmem:[#allocation2 + $0x98] sm:$0x1] %vm288_vm2, %v8521_v0 }
  0x31   : > { %309 = vst.msk [vmem:[#allocation2 + $0xb8] sm:$0x1] %vm288_vm2, %v8521_v0  ;;  %310 = vst.msk [vmem:[#allocation2 + $0xd8] sm:$0x1] %vm288_vm2, %v8521_v0 }
  0x32   : > { %311 = vst.msk [vmem:[#allocation2 + $0xf8] sm:$0x1] %vm288_vm2, %v8521_v0  ;;  %312 = vst.msk [vmem:[#allocation2 + $0x118] sm:$0x1] %vm288_vm2, %v8521_v0 }
  0x33   : > { %313 = vst.msk [vmem:[#allocation2 + $0x138] sm:$0x1] %vm288_vm2, %v8521_v0  ;;  %314 = vst.msk [vmem:[#allocation2 + $0x158] sm:$0x1] %vm288_vm2, %v8521_v0 }
  0x34   : > { %315 = vst.msk [vmem:[#allocation2 + $0x178] sm:$0x1] %vm288_vm2, %v8521_v0  ;;  %316 = vst.msk [vmem:[#allocation2 + $0x198] sm:$0x1] %vm288_vm2, %v8521_v0 }
  0x35   : > { %317 = vst.msk [vmem:[#allocation2 + $0x1b8] sm:$0x1] %vm288_vm2, %v8521_v0  ;;  %318 = vst.msk [vmem:[#allocation2 + $0x1d8] sm:$0x1] %vm288_vm2, %v8521_v0 }
  0x36   : > { %319 = vst.msk [vmem:[#allocation2 + $0x1f8] sm:$0x1] %vm288_vm2, %v8521_v0  ;;  %320 = vst.msk [vmem:[#allocation2 + $0x218] sm:$0x1] %vm288_vm2, %v8521_v0 }
  0x37   : > { %388 = vst.msk [vmem:[#allocation2 + $0x48] sm:$0xff] %vm385_vm3, %v355_v1  ;;  %389 = vst.msk [vmem:[#allocation2 + $0x50] sm:$0xff] %vm385_vm3, %v356_v2 }
  0x38   : > { %386 = vst.msk [vmem:[#allocation2 + $0x28] sm:$0xff] %vm385_vm3, %v353_v3  ;;  %387 = vst.msk [vmem:[#allocation2 + $0x30] sm:$0xff] %vm385_vm3, %v354_v4 }
  0x39   : > { %390 = vst.msk [vmem:[#allocation2 + $0x68] sm:$0xff] %vm385_vm3, %v357_v5  ;;  %391 = vst.msk [vmem:[#allocation2 + $0x70] sm:$0xff] %vm385_vm3, %v358_v6 }
  0x3a   : > { %392 = vst.msk [vmem:[#allocation2 + $0x88] sm:$0xff] %vm385_vm3, %v359_v9  ;;  %393 = vst.msk [vmem:[#allocation2 + $0x90] sm:$0xff] %vm385_vm3, %v360_v11 }
  0x3b   : > { %394 = vst.msk [vmem:[#allocation2 + $0xa8] sm:$0xff] %vm385_vm3, %v361_v12  ;;  %395 = vst.msk [vmem:[#allocation2 + $0xb0] sm:$0xff] %vm385_vm3, %v362_v13 }
  0x3c   : > { %396 = vst.msk [vmem:[#allocation2 + $0xc8] sm:$0xff] %vm385_vm3, %v363_v14  ;;  %397 = vst.msk [vmem:[#allocation2 + $0xd0] sm:$0xff] %vm385_vm3, %v364_v15  ;;  %v8374_v14 = vld [vmem:[%s11257_s1 + $0x78] sm:$0xff]  }
  0x3d   : > { %398 = vst.msk [vmem:[#allocation2 + $0xe8] sm:$0xff] %vm385_vm3, %v365_v16  ;;  %399 = vst.msk [vmem:[#allocation2 + $0xf0] sm:$0xff] %vm385_vm3, %v366_v17  ;;  %v8375_v16 = vld [vmem:[%s11257_s1 + $0x38] sm:$0xff]   ;;  %v8376_v17 = vld [vmem:[%s11257_s1 + $0x70] sm:$0xff]   ;;  %6387 = vmatprep.subr.bf16.mxu0 %v8374_v14 }
  0x3e   : > { %400 = vst.msk [vmem:[#allocation2 + $0x108] sm:$0xff] %vm385_vm3, %v367_v18  ;;  %401 = vst.msk [vmem:[#allocation2 + $0x110] sm:$0xff] %vm385_vm3, %v368_v19  ;;  %v454_v26 = vld [vmem:[#allocation2 + $0x48] sm:$0xff]  ;;  %v455_v27 = vld [vmem:[#allocation2 + $0x50] sm:$0xff]  ;;  %6388 = vmatpush3.bf16.msra.mxu0 %v8375_v16 }
  0x3f   : > { %402 = vst.msk [vmem:[#allocation2 + $0x128] sm:$0xff] %vm385_vm3, %v369_v20  ;;  %403 = vst.msk [vmem:[#allocation2 + $0x130] sm:$0xff] %vm385_vm3, %v370_v21  ;;  %v452_v28 = vld [vmem:[#allocation2 + $0x28] sm:$0xff]  ;;  %v8811_v29 = vpack.i.bf16 %v455_v27, %v454_v26  ;;  %v453_v30 = vld [vmem:[#allocation2 + $0x30] sm:$0xff]  ;;  %6389 = vmatprep.subr.bf16.mxu0 %v8376_v17 }
  0x40   : > { %404 = vst.msk [vmem:[#allocation2 + $0x148] sm:$0xff] %vm385_vm3, %v371_v22  ;;  %405 = vst.msk [vmem:[#allocation2 + $0x150] sm:$0xff] %vm385_vm3, %v372_v23  ;;  %v456_v31 = vld [vmem:[#allocation2 + $0x68] sm:$0xff]  ;;  %v457_v32 = vld [vmem:[#allocation2 + $0x70] sm:$0xff]  ;;  %v6939_v33 = vpack.i.bf16 %v453_v30, %v452_v28 }
  0x41   : > { %406 = vst.msk [vmem:[#allocation2 + $0x168] sm:$0xff] %vm385_vm3, %v373_v24  ;;  %407 = vst.msk [vmem:[#allocation2 + $0x170] sm:$0xff] %vm385_vm3, %v374_v25  ;;  %v458_v34 = vld [vmem:[#allocation2 + $0x88] sm:$0xff]  ;;  %6945 = vrot.lane.b32.xlu1 %v8811_v29, %s8522_s18  ;;  %v8817_v37 = vpack.i.bf16 %v457_v32, %v456_v31  ;;  %v459_v38 = vld [vmem:[#allocation2 + $0x90] sm:$0xff] }
  0x42   : > { %408 = vst.msk [vmem:[#allocation2 + $0x188] sm:$0xff] %vm385_vm3, %v375_v35  ;;  %409 = vst.msk [vmem:[#allocation2 + $0x190] sm:$0xff] %vm385_vm3, %v376_v36  ;;  %6940 = vrot.lane.b32.xlu0 %v6939_v33, %s8522_s18  ;;  %v8822_v39 = vpack.i.bf16 %v459_v38, %v458_v34  ;;  %v460_v40 = vld [vmem:[#allocation2 + $0xa8] sm:$0xff]  ;;  %v461_v41 = vld [vmem:[#allocation2 + $0xb0] sm:$0xff] }
  0x43   : > { %v462_v42 = vld [vmem:[#allocation2 + $0xc8] sm:$0xff]  ;;  %v463_v43 = vld [vmem:[#allocation2 + $0xd0] sm:$0xff]  ;;  %v8826_v44 = vpack.i.bf16 %v461_v41, %v460_v40  ;;  %410 = vst.msk [vmem:[#allocation2 + $0x1a8] sm:$0xff] %vm385_vm3, %v377_v48  ;;  %411 = vst.msk [vmem:[#allocation2 + $0x1b0] sm:$0xff] %vm385_vm3, %v378_v49 }
  0x44   : > { %v464_v45 = vld [vmem:[#allocation2 + $0xe8] sm:$0xff]  ;;  %v465_v46 = vld [vmem:[#allocation2 + $0xf0] sm:$0xff]  ;;  %v8830_v47 = vpack.i.bf16 %v463_v43, %v462_v42  ;;  %412 = vst.msk [vmem:[#allocation2 + $0x1c8] sm:$0xff] %vm385_vm3, %v379_v50  ;;  %413 = vst.msk [vmem:[#allocation2 + $0x1d0] sm:$0xff] %vm385_vm3, %v380_v53 }
  0x45   : > { %6950 = vrot.lane.b32.xlu1 %v8817_v37, %s8522_s18  ;;  %v466_v51 = vld [vmem:[#allocation2 + $0x108] sm:$0xff]  ;;  %v467_v52 = vld [vmem:[#allocation2 + $0x110] sm:$0xff]  ;;  %v8842_v54 = vpack.i.bf16 %v465_v46, %v464_v45  ;;  %v8380_v30 = vld [vmem:[%s11257_s1 + $0x60] sm:$0xff]  }
  0x46   : > { %6955 = vrot.lane.b32.xlu0 %v8822_v39, %s8522_s18  ;;  %v8846_v55 = vpack.i.bf16 %v467_v52, %v466_v51  ;;  %v468_v56 = vld [vmem:[#allocation2 + $0x128] sm:$0xff]  ;;  %v469_v57 = vld [vmem:[#allocation2 + $0x130] sm:$0xff]  ;;  %v8381_v35 = vld [vmem:[%s11257_s1 + $0x20] sm:$0xff]  }
  0x47   : > { %v470_v58 = vld [vmem:[#allocation2 + $0x148] sm:$0xff]  ;;  %v471_v59 = vld [vmem:[#allocation2 + $0x150] sm:$0xff]  ;;  %v8850_v60 = vpack.i.bf16 %v469_v57, %v468_v56  ;;  %v8382_v36 = vld [vmem:[%s11257_s1 + $0x58] sm:$0xff]  }
  0x48   : > { %v8854_v61 = vpack.i.bf16 %v471_v59, %v470_v58  ;;  %v472_v62 = vld [vmem:[#allocation2 + $0x168] sm:$0xff]  ;;  %v473_v63 = vld [vmem:[#allocation2 + $0x170] sm:$0xff]  ;;  %v8383_v38 = vld [vmem:[%s11257_s1 + $0x18] sm:$0xff]  }
  0x49   : > { %6960 = vrot.lane.b32.xlu1 %v8826_v44, %s8522_s18  ;;  %v474_v0 = vld [vmem:[#allocation2 + $0x188] sm:$0xff]  ;;  %v475_v1 = vld [vmem:[#allocation2 + $0x190] sm:$0xff]  ;;  %v8858_v2 = vpack.i.bf16 %v473_v63, %v472_v62  ;;  %v381_v48 = vld [vmem:[%s8764_s17 + $0xe0] sm:$0xff] }
  0x4a   : > { %6965 = vrot.lane.b32.xlu0 %v8830_v47, %s8522_s18  ;;  %v8862_v3 = vpack.i.bf16 %v475_v1, %v474_v0  ;;  %v476_v4 = vld [vmem:[#allocation2 + $0x1a8] sm:$0xff]  ;;  %v477_v5 = vld [vmem:[#allocation2 + $0x1b0] sm:$0xff]  ;;  %414 = vst.msk [vmem:[#allocation2 + $0x1e8] sm:$0xff] %vm385_vm3, %v381_v48  ;;  %v384_v52 = vld [vmem:[%s8764_s17 + $0xf8] sm:$0xff] }
  0x4b   : > { %v478_v6 = vld [vmem:[#allocation2 + $0x1c8] sm:$0xff]  ;;  %v479_v7 = vld [vmem:[#allocation2 + $0x1d0] sm:$0xff]  ;;  %v8866_v8 = vpack.i.bf16 %v477_v5, %v476_v4  ;;  %417 = vst.msk [vmem:[#allocation2 + $0x210] sm:$0xff] %vm385_vm3, %v384_v52  ;;  %v8388_v58 = vld [vmem:[%s11257_s1 + $0x40] sm:$0xff]  }
  0x4c   : > { %v8870_v9 = vpack.i.bf16 %v479_v7, %v478_v6  ;;  %v578_v10 = vld [vmem:[#allocation2 + $0x29] sm:$0xff]  ;;  %v579_v11 = vld [vmem:[#allocation2 + $0x31] sm:$0xff]  ;;  %v8389_v62 = vld [vmem:[%s11257_s1] sm:$0xff]  }
  0x4d   : > { %6970 = vrot.lane.b32.xlu1 %v8842_v54, %s8522_s18  ;;  %v8872_v12 = vld [vmem:[#allocation2 + $0x47] sm:$0xff]  ;;  %v8874_v13 = vld [vmem:[#allocation2 + $0x4f] sm:$0xff]  ;;  %v7009_v15 = vpack.i.bf16 %v579_v11, %v578_v10 }
  0x4e   : > { %6975 = vrot.lane.b32.xlu0 %v8846_v55, %s8522_s18  ;;  %v7014_v18 = vpack.i.bf16 %v8874_v13, %v8872_v12  ;;  %v482_v19 = vld [vmem:[#allocation2 + $0x9] sm:$0xff]  ;;  %v483_v20 = vld [vmem:[#allocation2 + $0x11] sm:$0xff] }
  0x4f   : > { %v8377_v21 = vld [vmem:[%s11257_s1 + $0x30] sm:$0xff]   ;;  %v8378_v22 = vld [vmem:[%s11257_s1 + $0x68] sm:$0xff]   ;;  %v7019_v23 = vpack.i.bf16 %v483_v20, %v482_v19 }
  0x50   : > { %v8898_v24 = vld [vmem:[#allocation2 + $0x27] sm:$0xff]  ;;  %v8901_v25 = vld [vmem:[#allocation2 + $0x2f] sm:$0xff]  ;;  %6390 = vmatpush3.bf16.msra.mxu0 %v8377_v21 }
  0x51   : > { %6980 = vrot.lane.b32.xlu1 %v8850_v60, %s8522_s18  ;;  %v580_v26 = vld [vmem:[#allocation2 + $0x49] sm:$0xff]  ;;  %v581_v27 = vld [vmem:[#allocation2 + $0x51] sm:$0xff]  ;;  %6391 = vmatprep.subr.bf16.mxu0 %v8378_v22  ;;  %v7029_v31 = vpack.i.bf16 %v8901_v25, %v8898_v24 }
  0x52   : > { %6985 = vrot.lane.b32.xlu0 %v8854_v61, %s8522_s18  ;;  %v8379_v28 = vld [vmem:[%s11257_s1 + $0x28] sm:$0xff]   ;;  %v7034_v33 = vpack.i.bf16 %v581_v27, %v580_v26  ;;  %v8384_v40 = vld [vmem:[%s11257_s1 + $0x50] sm:$0xff]  }
  0x53   : > { %v8912_v32 = vld [vmem:[#allocation2 + $0x67] sm:$0xff]  ;;  %v8916_v34 = vld [vmem:[#allocation2 + $0x6f] sm:$0xff] }
  0x54   : > { %6392 = vmatpush3.bf16.msra.mxu0 %v8379_v28  ;;  %v582_v41 = vld [vmem:[#allocation2 + $0x69] sm:$0xff]  ;;  %v583_v42 = vld [vmem:[#allocation2 + $0x71] sm:$0xff] }
  0x55   : > { %6990 = vrot.lane.b32.xlu1 %v8858_v2, %s8522_s18  ;;  %6393 = vmatprep.subr.bf16.mxu0 %v8380_v30  ;;  %v8936_v43 = vld [vmem:[#allocation2 + $0x87] sm:$0xff]  ;;  %v8938_v45 = vld [vmem:[#allocation2 + $0x8f] sm:$0xff]  ;;  %v7059_v53 = vpack.i.bf16 %v583_v42, %v582_v41 }
  0x56   : > { %6995 = vrot.lane.b32.xlu0 %v8862_v3, %s8522_s18  ;;  %v8385_v46 = vld [vmem:[%s11257_s1 + $0x10] sm:$0xff]   ;;  %v382_v49 = vld [vmem:[%s8764_s17 + $0xe8] sm:$0xff]  ;;  %v7064_v57 = vpack.i.bf16 %v8938_v45, %v8936_v43 }
  0x57   : > { %v8386_v50 = vld [vmem:[%s11257_s1 + $0x48] sm:$0xff]   ;;  %415 = vst.msk [vmem:[#allocation2 + $0x1f0] sm:$0xff] %vm385_vm3, %v382_v49  ;;  %v383_v51 = vld [vmem:[%s8764_s17 + $0xf0] sm:$0xff]  ;;  %s11208_s17 = scalar_lea.hbm %s11263_s7, %s6386_s8 }
  0x58   : > { %6394 = vmatpush3.bf16.msra.mxu0 %v8381_v35  ;;  %v8387_v56 = vld [vmem:[%s11257_s1 + $0x8] sm:$0xff]   ;;  %416 = vst.msk [vmem:[#allocation2 + $0x208] sm:$0xff] %vm385_vm3, %v383_v51  ;;  %v585_v59 = vld [vmem:[#allocation2 + $0x91] sm:$0xff] }
  0x59   : > { %7000 = vrot.lane.b32.xlu1 %v8866_v8, %s8522_s18  ;;  %6395 = vmatprep.subr.bf16.mxu0 %v8382_v36  ;;  %v8973_v0 = vld [vmem:[#allocation2 + $0xa7] sm:$0xff]  ;;  %v8975_v1 = vld [vmem:[#allocation2 + $0xaf] sm:$0xff] }
  0x5a   : > { %7005 = vrot.lane.b32.xlu0 %v8870_v9, %s8522_s18  ;;  %v7089_v4 = vpack.i.bf16 %v8975_v1, %v8973_v0  ;;  %v586_v5 = vld [vmem:[#allocation2 + $0xa9] sm:$0xff]  ;;  %v587_v6 = vld [vmem:[#allocation2 + $0xb1] sm:$0xff] }
  0x5b   : > { %v8982_v7 = vld [vmem:[#allocation2 + $0xc7] sm:$0xff]  ;;  %v7109_v11 = vpack.i.bf16 %v587_v6, %v586_v5  ;;  %v589_v17 = vld [vmem:[#allocation2 + $0xd1] sm:$0xff] }
  0x5c   : > { %6396 = vmatpush3.bf16.msra.mxu0 %v8383_v38  ;;  %v8989_v10 = vld [vmem:[%s11257_s1 + $0x88] sm:$0xff]   ;;  %v686_v21 = vld [vmem:[#allocation2 + $0xf1] sm:$0xff] }
  0x5d   : > { %7010 = vrot.lane.b32.xlu1 %v7009_v15, %s8522_s18  ;;  %6397 = vmatprep.subr.bf16.mxu0 %v8384_v40  ;;  %v588_v16 = vld [vmem:[#allocation2 + $0xc9] sm:$0xff]  ;;  %v688_v40 = vld [vmem:[#allocation2 + $0x111] sm:$0xff] }
  0x5e   : > { %7015 = vrot.lane.b32.xlu0 %v7014_v18, %s8523_s15  ;;  %6885 = vmatprep.subr.bf16.mxu1 %v8989_v10  ;;  %v685_v20 = vld [vmem:[#allocation2 + $0xe9] sm:$0xff]  ;;  %v7134_v27 = vpack.i.bf16 %v589_v17, %v588_v16  ;;  %v593_v41 = vld [vmem:[#allocation2 + $0x111] sm:$0xff] }
  0x5f   : > { %6887 = vmatpush3.bf16.msra.mxu1 %v8989_v10  ;;  %v1686_v22 = vpack.c.bf16 %v686_v21, %v685_v20  ;;  %v9012_v26 = vld [vmem:[#allocation2 + $0xef] sm:$0xff]  ;;  %v629_v17 = vld [vmem:[#allocation2 + $0x167] sm:$0xff] }
  0x60   : > { %6398 = vmatpush3.bf16.msra.mxu0 %v8385_v46  ;;  %v590_v30 = vld [vmem:[#allocation2 + $0xe9] sm:$0xff]  ;;  %v690_v48 = vld [vmem:[#allocation2 + $0x131] sm:$0xff] }
  0x61   : > { %7020 = vrot.lane.b32.xlu1 %v7019_v23, %s8523_s15  ;;  %6399 = vmatprep.subr.bf16.mxu0 %v8386_v50  ;;  %v9010_v23 = vld [vmem:[#allocation2 + $0xe7] sm:$0xff]  ;;  %v9026_v35 = vld [vmem:[#allocation2 + $0x10f] sm:$0xff] }
  0x62   : > { %7025 = vrot.lane.b32.xlu0 %v8811_v29, %s8524_s22  ;;  %v7039_v29 = vpack.i.bf16 %v8916_v34, %v8912_v32  ;;  %v7139_v28 = vpack.i.bf16 %v9012_v26, %v9010_v23  ;;  %v687_v38 = vld [vmem:[#allocation2 + $0x109] sm:$0xff]  ;;  %v597_v5 = vld [vmem:[#allocation2 + $0x151] sm:$0xff] }
  0x63   : > { %v1689_v42 = vpack.c.bf16 %v688_v40, %v687_v38  ;;  %v689_v46 = vld [vmem:[#allocation2 + $0x129] sm:$0xff] }
  0x64   : > { %6400 = vmatpush3.bf16.msra.mxu0 %v8387_v56  ;;  %v1692_v49 = vpack.c.bf16 %v690_v48, %v689_v46  ;;  %v9039_v50 = vld [vmem:[#allocation2 + $0x127] sm:$0xff]  ;;  %v9041_v51 = vld [vmem:[#allocation2 + $0x12f] sm:$0xff] }
  0x65   : > { %7030 = vrot.lane.b32.xlu1 %v7029_v31, %s8524_s22  ;;  %6401 = vmatprep.subr.bf16.mxu0 %v8388_v58  ;;  %v591_v31 = vld [vmem:[#allocation2 + $0xf1] sm:$0xff]  ;;  %v7189_v52 = vpack.i.bf16 %v9041_v51, %v9039_v50  ;;  %v627_v56 = vld [vmem:[#allocation2 + $0x147] sm:$0xff] }
  0x66   : > { %7035 = vrot.lane.b32.xlu0 %v7034_v33, %s8522_s18  ;;  %v696_v46 = vld [vmem:[#allocation2 + $0x191] sm:$0xff] }
  0x68   : > { %6402 = vmatpush3.bf16.msra.mxu0 %v8389_v62  ;;  %v596_v62 = vld [vmem:[#allocation2 + $0x149] sm:$0xff] }
  0x69   : > { %7040 = vrot.lane.b32.xlu1 %v7039_v29, %s8523_s15  ;;  %6777 = vmatprep.subr.bf16.mxu0 %v8989_v10 }
  0x6a   : > { %7045 = vrot.lane.b32.xlu0 %v7009_v15, %s8523_s15  ;;  %v9003_v15 = vld [vmem:[%s11257_s1 + $0x80] sm:$0xff]  }
  0x6b   : > { %6886 = vmatprep.subr.bf16.mxu1 %v9003_v15 }
  0x6c   : > { %6888 = vmatpush3.bf16.msra.mxu1 %v9003_v15 }
  0x6d   : > { %7050 = vrot.lane.b32.xlu1 %v8817_v37, %s8524_s22  ;;  %v584_v37 = vld [vmem:[#allocation2 + $0x89] sm:$0xff] }
  0x6e   : > { %7055 = vrot.lane.b32.xlu0 %v7014_v18, %s8524_s22  ;;  %v7084_v63 = vpack.i.bf16 %v585_v59, %v584_v37  ;;  %v684_v18 = vld [vmem:[#allocation2 + $0xd1] sm:$0xff] }
  0x71   : > { %7060 = vrot.lane.b32.xlu1 %v7059_v53, %s8522_s18 }
  0x72   : > { %7065 = vrot.lane.b32.xlu0 %v7064_v57, %s8523_s15 }
  0x75   : > { %7070 = vrot.lane.b32.xlu1 %v7034_v33, %s8523_s15  ;;  %v9024_v33 = vld [vmem:[#allocation2 + $0x107] sm:$0xff] }
  0x76   : > { %7075 = vrot.lane.b32.xlu0 %v8822_v39, %s8524_s22  ;;  %v8984_v39 = vld [vmem:[#allocation2 + $0xcf] sm:$0xff]  ;;  %v7164_v36 = vpack.i.bf16 %v9026_v35, %v9024_v33 }
  0x77   : > { %v7114_v14 = vpack.i.bf16 %v8984_v39, %v8982_v7 }
  0x79   : > { %7080 = vrot.lane.b32.xlu1 %v7039_v29, %s8524_s22  ;;  %v592_v29 = vld [vmem:[#allocation2 + $0x109] sm:$0xff] }
  0x7a   : > { %7085 = vrot.lane.b32.xlu0 %v7084_v63, %s8522_s18 }
  0x7d   : > { %7090 = vrot.lane.b32.xlu1 %v7089_v4, %s8523_s15 }
  0x7e   : > { %7095 = vrot.lane.b32.xlu0 %v7059_v53, %s8523_s15  ;;  %v594_v53 = vld [vmem:[#allocation2 + $0x129] sm:$0xff] }
  0x81   : > { %7100 = vrot.lane.b32.xlu1 %v8826_v44, %s8524_s22  ;;  %v683_v44 = vld [vmem:[#allocation2 + $0xc9] sm:$0xff] }
  0x82   : > { %7105 = vrot.lane.b32.xlu0 %v7064_v57, %s8524_s22  ;;  %v1683_v19 = vpack.c.bf16 %v684_v18, %v683_v44  ;;  %v628_v57 = vld [vmem:[#allocation2 + $0x14f] sm:$0xff] }
  0x83   : > { %v7214_v37 = vpack.i.bf16 %v628_v57, %v627_v56  ;;  %v630_v44 = vld [vmem:[#allocation2 + $0x16f] sm:$0xff]  ;;  %v444_v57 = vld [vmem:[#allocation2 + $0x1a7] sm:$0xff] }
  0x84   : > { %6789 = vmatprep.mubr.msk.bf16.mxu1 %vm278_vm0, %v1683_v19  ;;  %v7239_v20 = vpack.i.bf16 %v630_v44, %v629_v17  ;;  %v446_v17 = vld [vmem:[#allocation2 + $0x1c7] sm:$0xff]  ;;  %v447_v44 = vld [vmem:[#allocation2 + $0x1cf] sm:$0xff] }
  0x85   : > { %7110 = vrot.lane.b32.xlu1 %v7109_v11, %s8522_s18  ;;  %6790 = vmatmul.mubr.msk.bf16.vlgmr.msra.gmra.mxu1 %vm278_vm0, %v1686_v22 }
  0x86   : > { %7115 = vrot.lane.b32.xlu0 %v7114_v14, %s8523_s15  ;;  %6793 = vmatprep.mubr.msk.bf16.mxu1 %vm278_vm0, %v1689_v42  ;;  %v695_v42 = vld [vmem:[#allocation2 + $0x189] sm:$0xff] }
  0x89   : > { %7120 = vrot.lane.b32.xlu1 %v7084_v63, %s8523_s15  ;;  %v691_v63 = vld [vmem:[#allocation2 + $0x149] sm:$0xff] }
  0x8a   : > { %7125 = vrot.lane.b32.xlu0 %v8830_v47, %s8524_s22  ;;  %v7159_v47 = vpack.i.bf16 %v591_v31, %v590_v30  ;;  %v631_v30 = vld [vmem:[#allocation2 + $0x187] sm:$0xff]  ;;  %v632_v31 = vld [vmem:[#allocation2 + $0x18f] sm:$0xff] }
  0x8d   : > { %7130 = vrot.lane.b32.xlu1 %v7089_v4, %s8524_s22  ;;  %6794 = vmatmul.mubr.msk.bf16.gmra.mxu1 %vm278_vm0, %v1692_v49  ;;  %v692_v4 = vld [vmem:[#allocation2 + $0x151] sm:$0xff] }
  0x8e   : > { %7135 = vrot.lane.b32.xlu0 %v7134_v27, %s8522_s18  ;;  %v1695_v6 = vpack.c.bf16 %v692_v4, %v691_v63  ;;  %v601_v49 = vld [vmem:[#allocation2 + $0x191] sm:$0xff] }
  0x90   : > { %6797 = vmatprep.mubr.msk.bf16.mxu1 %vm278_vm0, %v1695_v6 }
  0x91   : > { %7140 = vrot.lane.b32.xlu1 %v7139_v28, %s8523_s15  ;;  %v9055_v59 = vpop.permute.xlu0 %6935 }
  0x92   : > { %7145 = vrot.lane.b32.xlu0 %v7109_v11, %s8523_s15  ;;  %v693_v11 = vld [vmem:[#allocation2 + $0x169] sm:$0xff] }
  0x95   : > { %7150 = vrot.lane.b32.xlu1 %v8842_v54, %s8524_s22  ;;  %v7184_v54 = vpack.i.bf16 %v593_v41, %v592_v29  ;;  %v7264_v29 = vpack.i.bf16 %v632_v31, %v631_v30  ;;  %v600_v41 = vld [vmem:[#allocation2 + $0x189] sm:$0xff]  ;;  %v9117_v31 = vpack.i.bf16 %v447_v44, %v446_v17  ;;  %v9134_v44 = vld [vmem:[#allocation2 + $0x1f1] sm:$0xff] }
  0x96   : > { %7155 = vrot.lane.b32.xlu0 %v7114_v14, %s8524_s22  ;;  %v694_v14 = vld [vmem:[#allocation2 + $0x171] sm:$0xff]  ;;  %v7284_v56 = vpack.i.bf16 %v601_v49, %v600_v41  ;;  %v6937_v41 = vunpack.i.l.bf16 %v9055_v59  ;;  %v9132_v17 = vld [vmem:[#allocation2 + $0x1e9] sm:$0xff] }
  0x97   : > { %v1698_v16 = vpack.c.bf16 %v694_v14, %v693_v11 }
  0x99   : > { %7160 = vrot.lane.b32.xlu1 %v7159_v47, %s8522_s18  ;;  %6798 = vmatmul.mubr.msk.bf16.gmra.mxu1 %vm278_vm0, %v1698_v16  ;;  %v546_v16 = vld [vmem:[#allocation2 + $0x28] sm:$0xff] }
  0x9a   : > { %7165 = vrot.lane.b32.xlu0 %v7164_v36, %s8523_s15 }
  0x9d   : > { %7170 = vrot.lane.b32.xlu1 %v7134_v27, %s8523_s15  ;;  %v599_v27 = vld [vmem:[#allocation2 + $0x171] sm:$0xff] }
  0x9e   : > { %7175 = vrot.lane.b32.xlu0 %v8846_v55, %s8524_s22  ;;  %v595_v55 = vld [vmem:[#allocation2 + $0x131] sm:$0xff] }
  0x9f   : > { %v7209_v58 = vpack.i.bf16 %v595_v55, %v594_v53 }
  0xa1   : > { %7180 = vrot.lane.b32.xlu1 %v7139_v28, %s8524_s22 }
  0xa2   : > { %7185 = vrot.lane.b32.xlu0 %v7184_v54, %s8522_s18 }
  0xa5   : > { %7190 = vrot.lane.b32.xlu1 %v7189_v52, %s8523_s15 }
  0xa6   : > { %7195 = vrot.lane.b32.xlu0 %v7159_v47, %s8523_s15 }
  0xa9   : > { %7200 = vrot.lane.b32.xlu1 %v8850_v60, %s8524_s22  ;;  %v7234_v60 = vpack.i.bf16 %v597_v5, %v596_v62 }
  0xaa   : > { %7205 = vrot.lane.b32.xlu0 %v7164_v36, %s8524_s22 }
  0xad   : > { %7210 = vrot.lane.b32.xlu1 %v7209_v58, %s8522_s18 }
  0xae   : > { %7215 = vrot.lane.b32.xlu0 %v7214_v37, %s8523_s15 }
  0xb1   : > { %7220 = vrot.lane.b32.xlu1 %v7184_v54, %s8523_s15  ;;  %v602_v54 = vld [vmem:[#allocation2 + $0x1a9] sm:$0xff] }
  0xb2   : > { %7225 = vrot.lane.b32.xlu0 %v8854_v61, %s8524_s22  ;;  %v598_v61 = vld [vmem:[#allocation2 + $0x169] sm:$0xff] }
  0xb3   : > { %v9062_v18 = vpop.permute.xlu1 %6945  ;;  %v7259_v36 = vpack.i.bf16 %v599_v27, %v598_v61  ;;  %v6938_v61 = vunpack.i.h.bf16 %v9055_v59 }
  0xb4   : > { %v9064_v19 = vpop.permute.xlu0 %6940 }
  0xb5   : > { %7230 = vrot.lane.b32.xlu1 %v7189_v52, %s8524_s22  ;;  %v1701_v52 = vpack.c.bf16 %v696_v46, %v695_v42 }
  0xb6   : > { %7235 = vrot.lane.b32.xlu0 %v7234_v60, %s8522_s18 }
  0xb7   : > { %v9068_v21 = vpop.permute.xlu1 %6950  ;;  %6801 = vmatprep.mubr.msk.bf16.mxu1 %vm278_vm0, %v1701_v52 }
  0xb8   : > { %v9070_v22 = vpop.permute.xlu0 %6955 }
  0xb9   : > { %7240 = vrot.lane.b32.xlu1 %v7239_v20, %s8523_s15 }
  0xba   : > { %7245 = vrot.lane.b32.xlu0 %v7209_v58, %s8523_s15  ;;  %v445_v58 = vld [vmem:[#allocation2 + $0x1af] sm:$0xff] }
  0xbb   : > { %v9074_v28 = vpop.permute.xlu1 %6960  ;;  %v9101_v63 = vpack.i.bf16 %v445_v58, %v444_v57 }
  0xbc   : > { %v9076_v47 = vpop.permute.xlu0 %6965 }
  0xbd   : > { %7250 = vrot.lane.b32.xlu1 %v8858_v2, %s8524_s22  ;;  %v603_v2 = vld [vmem:[#allocation2 + $0x1b1] sm:$0xff] }
  0xbe   : > { %7255 = vrot.lane.b32.xlu0 %v7214_v37, %s8524_s22  ;;  %v1704_v55 = vpack.c.bf16 %v603_v2, %v602_v54 }
  0xbf   : > { %v9081_v38 = vpop.permute.xlu1 %6970 }
  0xc0   : > { %v9083_v40 = vpop.permute.xlu0 %6975  ;;  %6802 = vmatmul.mubr.msk.bf16.gmra.mxu1 %vm278_vm0, %v1704_v55 }
  0xc1   : > { %7260 = vrot.lane.b32.xlu1 %v7259_v36, %s8522_s18 }
  0xc2   : > { %7265 = vrot.lane.b32.xlu0 %v7264_v29, %s8523_s15 }
  0xc3   : > { %v9087_v48 = vpop.permute.xlu1 %6980 }
  0xc4   : > { %v9089_v53 = vpop.permute.xlu0 %6985 }
  0xc5   : > { %7270 = vrot.lane.b32.xlu1 %v7234_v60, %s8523_s15  ;;  %v547_v60 = vld [vmem:[#allocation2 + $0x30] sm:$0xff] }
  0xc6   : > { %7275 = vrot.lane.b32.xlu0 %v8862_v3, %s8524_s22 }
  0xc7   : > { %v9096_v37 = vpop.permute.xlu1 %6990 }
  0xc8   : > { %v9098_v62 = vpop.permute.xlu0 %6995 }
  0xc9   : > { %7280 = vrot.lane.b32.xlu1 %v7239_v20, %s8524_s22  ;;  %v9113_v20 = vpack.i.bf16 %v603_v2, %v602_v54 }
  0xca   : > { %7285 = vrot.lane.b32.xlu0 %v7284_v56, %s8522_s18 }
  0xcb   : > { %v9104_v4 = vpop.permute.xlu1 %7000 }
  0xcc   : > { %v9106_v5 = vpop.permute.xlu0 %7005 }
  0xcd   : > { %7290 = vrot.lane.b32.xlu1 %v9101_v63, %s8523_s15 }
  0xce   : > { %7295 = vrot.lane.b32.xlu0 %v7259_v36, %s8523_s15  ;;  %v419_v36 = vld [vmem:[#allocation2 + $0xf] sm:$0xff] }
  0xcf   : > { %v7011_v3 = vpop.permute.xlu1 %7010 }
  0xd0   : > { %v7013_v6 = vunpack.i.h.bf16 %v7011_v3  ;;  %v7012_v11 = vunpack.i.l.bf16 %v7011_v3  ;;  %v7016_v14 = vpop.permute.xlu0 %7015  ;;  %v604_v3 = vld [vmem:[#allocation2 + $0x1c9] sm:$0xff] }
  0xd1   : > { %7300 = vrot.lane.b32.xlu1 %v8866_v8, %s8524_s22  ;;  %v7018_v27 = vunpack.i.h.bf16 %v7016_v14  ;;  %v7017_v30 = vunpack.i.l.bf16 %v7016_v14  ;;  %v418_v8 = vld [vmem:[#allocation2 + $0x7] sm:$0xff] }
  0xd2   : > { %7305 = vrot.lane.b32.xlu0 %v7264_v29, %s8524_s22  ;;  %v1573_v46 = vsel %vm278_vm0, %v546_v16, %v7012_v11  ;;  %v1574_v49 = vsel %vm278_vm0, %v547_v60, %v7013_v6  ;;  %v1476_v29 = vsel %vm278_vm0, %v419_v36, %v6938_v61  ;;  %v605_v6 = vld [vmem:[#allocation2 + $0x1d1] sm:$0xff]  ;;  %v1475_v11 = vsel %vm278_vm0, %v418_v8, %v6937_v41  ;;  %v548_v8 = vld [vmem:[#allocation2 + $0x48] sm:$0xff] }
  0xd3   : > { %v7021_v42 = vpop.permute.xlu1 %7020  ;;  %v1605_v59 = vsel %vm1507_vm4, %v1573_v46, %v7017_v30  ;;  %v1606_v58 = vsel %vm1507_vm4, %v1574_v49, %v7018_v27  ;;  %v1707_v61 = vpack.c.bf16 %v605_v6, %v604_v3  ;;  %v1710_v27 = vpack.c.bf16 %v9134_v44, %v9132_v17 }
  0xd4   : > { %v7026_v54 = vpop.permute.xlu0 %7025  ;;  %v7023_v2 = vunpack.i.h.bf16 %v7021_v42  ;;  %v7022_v52 = vunpack.i.l.bf16 %v7021_v42 }
  0xd5   : > { %v7028_v55 = vunpack.i.h.bf16 %v7026_v54  ;;  %v7027_v57 = vunpack.i.l.bf16 %v7026_v54  ;;  %7310 = vrot.lane.b32.xlu1 %v9113_v20, %s8522_s18  ;;  %6805 = vmatprep.mubr.msk.bf16.mxu1 %vm278_vm0, %v1707_v61  ;;  %v9151_v61 = vld [vmem:[#allocation2 + $0x1e8] sm:$0xff] }
  0xd6   : > { %7315 = vrot.lane.b32.xlu0 %v9117_v31, %s8523_s15  ;;  %v1508_v41 = vsel %vm1507_vm4, %v1475_v11, %v7022_v52  ;;  %v1509_v49 = vsel %vm1507_vm4, %v1476_v29, %v7023_v2  ;;  %v6942_v52 = vunpack.i.l.bf16 %v9064_v19  ;;  %v549_v11 = vld [vmem:[#allocation2 + $0x50] sm:$0xff]  ;;  %6806 = vmatmul.mubr.msk.bf16.gmra.mxu1 %vm278_vm0, %v1710_v27 }
  0xd7   : > { %v7031_v14 = vpop.permute.xlu1 %7030  ;;  %v1637_v16 = vsel %vm1540_vm5, %v1605_v59, %v7027_v57  ;;  %v1638_v60 = vsel %vm1540_vm5, %v1606_v58, %v7028_v55  ;;  %v9144_v57 = vpack.i.bf16 %v605_v6, %v604_v3  ;;  %v9153_v3 = vld [vmem:[#allocation2 + $0x1f0] sm:$0xff] }
  0xd8   : > { %v7033_v36 = vunpack.i.h.bf16 %v7031_v14  ;;  %v7032_v42 = vunpack.i.l.bf16 %v7031_v14  ;;  %v7036_v54 = vpop.permute.xlu0 %7035  ;;  %v1670_v30 = vpack.c.bf16 %v1638_v60, %v1637_v16  ;;  %v637_v14 = vld [vmem:[#allocation2 + $0x1e7] sm:$0xff]  ;;  %v6943_v16 = vunpack.i.h.bf16 %v9064_v19 }
  0xd9   : > { %v7037_v46 = vunpack.i.l.bf16 %v7036_v54  ;;  %7320 = vrot.lane.b32.xlu1 %v7284_v56, %s8523_s15  ;;  %v7038_v55 = vunpack.i.h.bf16 %v7036_v54  ;;  %v638_v56 = vld [vmem:[#allocation2 + $0x1ef] sm:$0xff]  ;;  %v1477_v19 = vsel %vm278_vm0, %v8898_v24, %v6942_v52 }
  0xda   : > { %7325 = vrot.lane.b32.xlu0 %v8870_v9, %s8524_s22  ;;  %1948 = vmatprep.mubr.bf16.mxu0 %v1670_v30  ;;  %v1541_v59 = vsel %vm1540_vm5, %v1508_v41, %v7032_v42  ;;  %v1542_v58 = vsel %vm1540_vm5, %v1509_v49, %v7033_v36  ;;  %v9158_v54 = vpack.i.bf16 %v638_v56, %v637_v14 }
  0xdb   : > { %v7041_v2 = vpop.permute.xlu1 %7040  ;;  %v1669_v29 = vpack.c.bf16 %v1542_v58, %v1541_v59  ;;  %v1575_v6 = vsel %vm278_vm0, %v548_v8, %v7037_v46  ;;  %v1576_v30 = vsel %vm278_vm0, %v549_v11, %v7038_v55  ;;  %v9168_v41 = vpack.i.bf16 %v9153_v3, %v9151_v61 }
  0xdc   : > { %v7042_v60 = vunpack.i.l.bf16 %v7041_v2  ;;  %v7046_v9 = vpop.permute.xlu0 %7045  ;;  %v7043_v36 = vunpack.i.h.bf16 %v7041_v2 }
  0xdd   : > { %v7047_v42 = vunpack.i.l.bf16 %v7046_v9  ;;  %7330 = vrot.lane.b32.xlu1 %v9101_v63, %s8524_s22  ;;  %1949 = vmatmul.mubr.bf16.vlgmr.msra.gmra.mxu0 %v1669_v29  ;;  %v7048_v27 = vunpack.i.h.bf16 %v7046_v9  ;;  %v1478_v63 = vsel %vm278_vm0, %v8901_v25, %v6943_v16  ;;  %v640_v9 = vld [vmem:[#allocation2 + $0x20f] sm:$0xff] }
  0xde   : > { %7335 = vrot.lane.b32.xlu0 %v9144_v57, %s8522_s18  ;;  %6778 = vmatpush3.bf16.msra.mxu0 %v8989_v10  ;;  %v1607_v59 = vsel %vm1507_vm4, %v1575_v6, %v7042_v60  ;;  %v1608_v24 = vsel %vm1507_vm4, %v1576_v30, %v7043_v36  ;;  %v639_v60 = vld [vmem:[#allocation2 + $0x207] sm:$0xff]  ;;  %v551_v36 = vld [vmem:[#allocation2 + $0x70] sm:$0xff] }
  0xdf   : > { %v7051_v46 = vpop.permute.xlu1 %7050  ;;  %6779 = vmatprep.subr.bf16.mxu0 %v9003_v15  ;;  %v1510_v14 = vsel %vm1507_vm4, %v1477_v19, %v7047_v42  ;;  %v1511_v52 = vsel %vm1507_vm4, %v1478_v63, %v7048_v27  ;;  %v550_v6 = vld [vmem:[#allocation2 + $0x68] sm:$0xff]  ;;  %v6947_v27 = vunpack.i.l.bf16 %v9062_v18 }
  0xe0   : > { %v7053_v49 = vunpack.i.h.bf16 %v7051_v46  ;;  %v7052_v8 = vunpack.i.l.bf16 %v7051_v46  ;;  %v7056_v55 = vpop.permute.xlu0 %7055 }
  0xe1   : > { %v7058_v58 = vunpack.i.h.bf16 %v7056_v55  ;;  %v7057_v10 = vunpack.i.l.bf16 %v7056_v55  ;;  %7340 = vrot.lane.b32.xlu1 %v9158_v54, %s8523_s15 }
  0xe2   : > { %7345 = vrot.lane.b32.xlu0 %v9113_v20, %s8523_s15  ;;  %v1639_v56 = vsel %vm1540_vm5, %v1607_v59, %v7052_v8  ;;  %v1640_v25 = vsel %vm1540_vm5, %v1608_v24, %v7053_v49  ;;  %6780 = vmatpush3.bf16.msra.mxu0 %v9003_v15  ;;  %v9190_v15 = vpack.i.bf16 %v9134_v44, %v9132_v17  ;;  %v6948_v8 = vunpack.i.h.bf16 %v9062_v18  ;;  %v9202_v17 = vld [vmem:[#allocation2 + $0x210] sm:$0xff] }
  0xe3   : > { %v7061_v11 = vpop.permute.xlu1 %7060  ;;  %v1673_v2 = vpack.c.bf16 %v1640_v25, %v1639_v56  ;;  %v1543_v29 = vsel %vm1540_vm5, %v1510_v14, %v7057_v10  ;;  %v1544_v16 = vsel %vm1540_vm5, %v1511_v52, %v7058_v58  ;;  %v9195_v49 = vpack.i.bf16 %v640_v9, %v639_v60  ;;  %v9200_v10 = vld [vmem:[#allocation2 + $0x208] sm:$0xff] }
  0xe4   : > { %v7063_v42 = vunpack.i.h.bf16 %v7061_v11  ;;  %v7062_v20 = vunpack.i.l.bf16 %v7061_v11  ;;  %v7066_v30 = vpop.permute.xlu0 %7065  ;;  %v1672_v19 = vpack.c.bf16 %v1544_v16, %v1543_v29  ;;  %v1479_v18 = vsel %vm278_vm0, %v8872_v12, %v6947_v27  ;;  %v609_v29 = vld [vmem:[#allocation2 + $0x211] sm:$0xff] }
  0xe5   : > { %7350 = vrot.lane.b32.xlu1 %v9168_v41, %s8524_s22  ;;  %1956 = vmatprep.mubr.bf16.mxu0 %v1673_v2  ;;  %v7068_v46 = vunpack.i.h.bf16 %v7066_v30  ;;  %v7067_v63 = vunpack.i.l.bf16 %v7066_v30  ;;  %v608_v2 = vld [vmem:[#allocation2 + $0x209] sm:$0xff]  ;;  %v1480_v16 = vsel %vm278_vm0, %v8874_v13, %v6948_v8 }
  0xe6   : > { %7355 = vrot.lane.b32.xlu0 %v9117_v31, %s8524_s22  ;;  %1957 = vmatmul.mubr.bf16.gmra.mxu0 %v1672_v19  ;;  %v1578_v55 = vsel %vm278_vm0, %v551_v36, %v7063_v42  ;;  %v1577_v59 = vsel %vm278_vm0, %v550_v6, %v7062_v20  ;;  %v7374_v31 = vpack.i.bf16 %v9202_v17, %v9200_v10  ;;  %v705_v36 = vld [vmem:[#allocation2 + $0x229] sm:$0xff]  ;;  %v706_v42 = vld [vmem:[#allocation2 + $0x231] sm:$0xff] }
  0xe7   : > { %v7071_v58 = vpop.permute.xlu1 %7070  ;;  %v1609_v52 = vsel %vm1507_vm4, %v1577_v59, %v7067_v63  ;;  %v1610_v11 = vsel %vm1507_vm4, %v1578_v55, %v7068_v46  ;;  %v1713_v6 = vpack.c.bf16 %v609_v29, %v608_v2  ;;  %v1716_v63 = vpack.c.bf16 %v706_v42, %v705_v36 }
  0xe8   : > { %v7076_v44 = vpop.permute.xlu0 %7075  ;;  %v7073_v24 = vunpack.i.h.bf16 %v7071_v58  ;;  %v7072_v14 = vunpack.i.l.bf16 %v7071_v58  ;;  %v7384_v46 = vpack.i.bf16 %v609_v29, %v608_v2  ;;  %v673_v29 = vld [vmem:[#allocation2 + $0x228] sm:$0xff] }
  0xe9   : > { %v7078_v56 = vunpack.i.h.bf16 %v7076_v44  ;;  %v7077_v25 = vunpack.i.l.bf16 %v7076_v44  ;;  %7360 = vrot.lane.b32.xlu1 %v9190_v15, %s8522_s18  ;;  %6809 = vmatprep.mubr.msk.bf16.mxu1 %vm278_vm0, %v1713_v6 }
  0xea   : > { %7365 = vrot.lane.b32.xlu0 %v9195_v49, %s8523_s15  ;;  %v1512_v55 = vsel %vm1507_vm4, %v1479_v18, %v7072_v14  ;;  %v1513_v13 = vsel %vm1507_vm4, %v1480_v16, %v7073_v24  ;;  %6810 = vmatmul.mubr.msk.bf16.gmra.mxu1 %vm278_vm0, %v1716_v63  ;;  %v6953_v24 = vunpack.i.h.bf16 %v9068_v21  ;;  %v6952_v14 = vunpack.i.l.bf16 %v9068_v21 }
  0xeb   : > { %v7081_v60 = vpop.permute.xlu1 %7080  ;;  %v1641_v9 = vsel %vm1540_vm5, %v1609_v52, %v7077_v25  ;;  %v1642_v12 = vsel %vm1540_vm5, %v1610_v11, %v7078_v56  ;;  %v641_v56 = vld [vmem:[#allocation2 + $0x227] sm:$0xff]  ;;  %v642_v25 = vld [vmem:[#allocation2 + $0x22f] sm:$0xff] }
  0xec   : > { %v7083_v20 = vunpack.i.h.bf16 %v7081_v60  ;;  %v7082_v30 = vunpack.i.l.bf16 %v7081_v60  ;;  %v7086_v19 = vpop.permute.xlu0 %7085  ;;  %v1676_v27 = vpack.c.bf16 %v1642_v12, %v1641_v9  ;;  %v552_v52 = vld [vmem:[#allocation2 + $0x88] sm:$0xff]  ;;  %v7394_v9 = vpack.i.bf16 %v642_v25, %v641_v56 }
  0xed   : > { %7370 = vrot.lane.b32.xlu1 %v9144_v57, %s8523_s15  ;;  %v7088_v8 = vunpack.i.h.bf16 %v7086_v19  ;;  %v7087_v59 = vunpack.i.l.bf16 %v7086_v19  ;;  %v553_v57 = vld [vmem:[#allocation2 + $0x90] sm:$0xff]  ;;  %v1481_v19 = vsel %vm278_vm0, %v8912_v32, %v6952_v14 }
  0xee   : > { %7375 = vrot.lane.b32.xlu0 %v7374_v31, %s8524_s22  ;;  %1964 = vmatprep.mubr.bf16.mxu0 %v1676_v27  ;;  %v1545_v58 = vsel %vm1540_vm5, %v1512_v55, %v7082_v30  ;;  %v1546_v44 = vsel %vm1540_vm5, %v1513_v13, %v7083_v20  ;;  %v674_v31 = vld [vmem:[#allocation2 + $0x230] sm:$0xff]  ;;  %v1482_v30 = vsel %vm278_vm0, %v8916_v34, %v6953_v24 }
  0xef   : > { %v7091_v11 = vpop.permute.xlu1 %7090  ;;  %v1675_v2 = vpack.c.bf16 %v1546_v44, %v1545_v58  ;;  %v1580_v12 = vsel %vm278_vm0, %v553_v57, %v7088_v8  ;;  %v1579_v6 = vsel %vm278_vm0, %v552_v52, %v7087_v59  ;;  %v7404_v21 = vpack.i.bf16 %v674_v31, %v673_v29  ;;  %v554_v52 = vld [vmem:[#allocation2 + $0xa8] sm:$0xff]  ;;  %v555_v57 = vld [vmem:[#allocation2 + $0xb0] sm:$0xff] }
  0xf0   : > { %v7096_v18 = vpop.permute.xlu0 %7095  ;;  %v7093_v16 = vunpack.i.h.bf16 %v7091_v11  ;;  %v7092_v60 = vunpack.i.l.bf16 %v7091_v11  ;;  %v6958_v31 = vunpack.i.h.bf16 %v9070_v22 }
  0xf1   : > { %7380 = vrot.lane.b32.xlu1 %v9158_v54, %s8524_s22  ;;  %1965 = vmatmul.mubr.bf16.gmra.mxu0 %v1675_v2  ;;  %v7098_v36 = vunpack.i.h.bf16 %v7096_v18  ;;  %v7097_v42 = vunpack.i.l.bf16 %v7096_v18 }
  0xf2   : > { %7385 = vrot.lane.b32.xlu0 %v7384_v46, %s8522_s18  ;;  %v1611_v8 = vsel %vm1507_vm4, %v1579_v6, %v7092_v60  ;;  %v1612_v46 = vsel %vm1507_vm4, %v1580_v12, %v7093_v16  ;;  %v6957_v12 = vunpack.i.l.bf16 %v9070_v22 }
  0xf3   : > { %v7101_v20 = vpop.permute.xlu1 %7100  ;;  %v1514_v32 = vsel %vm1507_vm4, %v1481_v19, %v7097_v42  ;;  %v1515_v58 = vsel %vm1507_vm4, %v1482_v30, %v7098_v36  ;;  %v1484_v19 = vsel %vm278_vm0, %v8938_v45, %v6958_v31 }
  0xf4   : > { %v7103_v27 = vunpack.i.h.bf16 %v7101_v20  ;;  %v7102_v54 = vunpack.i.l.bf16 %v7101_v20  ;;  %v7106_v63 = vpop.permute.xlu0 %7105 }
  0xf5   : > { %v7108_v55 = vunpack.i.h.bf16 %v7106_v63  ;;  %v7107_v13 = vunpack.i.l.bf16 %v7106_v63  ;;  %7390 = vrot.lane.b32.xlu1 %v9168_v41, %s8522_s18  ;;  %v1483_v63 = vsel %vm278_vm0, %v8936_v43, %v6957_v12  ;;  %v6963_v43 = vunpack.i.h.bf16 %v9074_v28 }
  0xf6   : > { %7395 = vrot.lane.b32.xlu0 %v7394_v9, %s8523_s15  ;;  %v1643_v59 = vsel %vm1540_vm5, %v1611_v8, %v7102_v54  ;;  %v1644_v34 = vsel %vm1540_vm5, %v1612_v46, %v7103_v27 }
  0xf7   : > { %v7111_v44 = vpop.permute.xlu1 %7110  ;;  %v1679_v56 = vpack.c.bf16 %v1644_v34, %v1643_v59  ;;  %v1547_v25 = vsel %vm1540_vm5, %v1514_v32, %v7107_v13  ;;  %v1548_v41 = vsel %vm1540_vm5, %v1515_v58, %v7108_v55 }
  0xf8   : > { %v7113_v11 = vunpack.i.h.bf16 %v7111_v44  ;;  %v7112_v2 = vunpack.i.l.bf16 %v7111_v44  ;;  %v7116_v24 = vpop.permute.xlu0 %7115  ;;  %v1678_v14 = vpack.c.bf16 %v1548_v41, %v1547_v25  ;;  %v556_v44 = vld [vmem:[#allocation2 + $0xc8] sm:$0xff] }
  0xf9   : > { %7400 = vrot.lane.b32.xlu1 %v9190_v15, %s8523_s15  ;;  %1972 = vmatprep.mubr.bf16.mxu0 %v1679_v56  ;;  %v7118_v18 = vunpack.i.h.bf16 %v7116_v24  ;;  %v7117_v29 = vunpack.i.l.bf16 %v7116_v24  ;;  %v557_v56 = vld [vmem:[#allocation2 + $0xd0] sm:$0xff] }
  0xfa   : > { %7405 = vrot.lane.b32.xlu0 %v7404_v21, %s8524_s22  ;;  %1973 = vmatmul.mubr.bf16.gmra.mxu0 %v1678_v14  ;;  %v1582_v16 = vsel %vm278_vm0, %v555_v57, %v7113_v11  ;;  %v1581_v60 = vsel %vm278_vm0, %v554_v52, %v7112_v2  ;;  %v6962_v52 = vunpack.i.l.bf16 %v9074_v28 }
  0xfb   : > { %v7121_v9 = vpop.permute.xlu1 %7120  ;;  %v1613_v21 = vsel %vm1507_vm4, %v1581_v60, %v7117_v29  ;;  %v1614_v30 = vsel %vm1507_vm4, %v1582_v16, %v7118_v18  ;;  %v1486_v16 = vsel %vm278_vm0, %v8975_v1, %v6963_v43 }
  0xfc   : > { %v7126_v6 = vpop.permute.xlu0 %7125  ;;  %v7123_v36 = vunpack.i.h.bf16 %v7121_v9  ;;  %v7122_v42 = vunpack.i.l.bf16 %v7121_v9  ;;  %v1485_v60 = vsel %vm278_vm0, %v8973_v0, %v6962_v52 }
  0xfd   : > { %v7128_v20 = vunpack.i.h.bf16 %v7126_v6  ;;  %v7127_v15 = vunpack.i.l.bf16 %v7126_v6  ;;  %7410 = vrot.lane.b32.xlu1 %v9195_v49, %s8524_s22 }
  0xfe   : > { %v1516_v49 = vsel %vm1507_vm4, %v1483_v63, %v7122_v42  ;;  %v1517_v59 = vsel %vm1507_vm4, %v1484_v19, %v7123_v36  ;;  %v559_v63 = vld [vmem:[#allocation2 + $0xf0] sm:$0xff] }
  0xff   : > { %v7131_v27 = vpop.permute.xlu1 %7130  ;;  %v1645_v54 = vsel %vm1540_vm5, %v1613_v21, %v7127_v15  ;;  %v1646_v22 = vsel %vm1540_vm5, %v1614_v30, %v7128_v20 }
 0x100   : > { %v7133_v55 = vunpack.i.h.bf16 %v7131_v27  ;;  %v7132_v13 = vunpack.i.l.bf16 %v7131_v27  ;;  %v7136_v8 = vpop.permute.xlu0 %7135  ;;  %v1682_v46 = vpack.c.bf16 %v1646_v22, %v1645_v54  ;;  %v558_v22 = vld [vmem:[#allocation2 + $0xe8] sm:$0xff] }
 0x101   : > { %v7138_v34 = vunpack.i.h.bf16 %v7136_v8  ;;  %v7137_v32 = vunpack.i.l.bf16 %v7136_v8 }
 0x102   : > { %1980 = vmatprep.mubr.bf16.mxu0 %v1682_v46  ;;  %v1549_v45 = vsel %vm1540_vm5, %v1516_v49, %v7132_v13  ;;  %v1550_v58 = vsel %vm1540_vm5, %v1517_v59, %v7133_v55 }
 0x103   : > { %v7141_v25 = vpop.permute.xlu1 %7140  ;;  %v1681_v41 = vpack.c.bf16 %v1550_v58, %v1549_v45  ;;  %v1584_v24 = vsel %vm278_vm0, %v557_v56, %v7138_v34  ;;  %v1583_v14 = vsel %vm278_vm0, %v556_v44, %v7137_v32  ;;  %v6968_v34 = vunpack.i.h.bf16 %v9076_v47 }
 0x104   : > { %v7146_v57 = vpop.permute.xlu0 %7145  ;;  %v7143_v11 = vunpack.i.h.bf16 %v7141_v25  ;;  %v7142_v2 = vunpack.i.l.bf16 %v7141_v25  ;;  %v6967_v44 = vunpack.i.l.bf16 %v9076_v47 }
 0x105   : > { %1981 = vmatmul.mubr.bf16.gmra.mxu0 %v1681_v41  ;;  %v7148_v18 = vunpack.i.h.bf16 %v7146_v57  ;;  %v7147_v29 = vunpack.i.l.bf16 %v7146_v57 }
 0x106   : > { %v1615_v42 = vsel %vm1507_vm4, %v1583_v14, %v7142_v2  ;;  %v1616_v20 = vsel %vm1507_vm4, %v1584_v24, %v7143_v11  ;;  %v1488_v2 = vsel %vm278_vm0, %v8984_v39, %v6968_v34  ;;  %v1487_v47 = vsel %vm278_vm0, %v8982_v7, %v6967_v44 }
 0x107   : > { %v7151_v31 = vpop.permute.xlu1 %7150  ;;  %v1518_v30 = vsel %vm1507_vm4, %v1485_v60, %v7147_v29  ;;  %v1519_v1 = vsel %vm1507_vm4, %v1486_v16, %v7148_v18  ;;  %v6973_v7 = vunpack.i.h.bf16 %v9081_v38 }
 0x108   : > { %v7153_v9 = vunpack.i.h.bf16 %v7151_v31  ;;  %v7152_v12 = vunpack.i.l.bf16 %v7151_v31  ;;  %v7156_v28 = vpop.permute.xlu0 %7155 }
 0x109   : > { %v7158_v6 = vunpack.i.h.bf16 %v7156_v28  ;;  %v7157_v36 = vunpack.i.l.bf16 %v7156_v28 }
 0x10a   : > { %v1647_v15 = vsel %vm1540_vm5, %v1615_v42, %v7152_v12  ;;  %v1648_v21 = vsel %vm1540_vm5, %v1616_v20, %v7153_v9  ;;  %v560_v42 = vld [vmem:[#allocation2 + $0x108] sm:$0xff]  ;;  %v561_v20 = vld [vmem:[#allocation2 + $0x110] sm:$0xff] }
 0x10b   : > { %v7161_v19 = vpop.permute.xlu1 %7160  ;;  %v1685_v27 = vpack.c.bf16 %v1648_v21, %v1647_v15  ;;  %v1551_v0 = vsel %vm1540_vm5, %v1518_v30, %v7157_v36  ;;  %v1552_v54 = vsel %vm1540_vm5, %v1519_v1, %v7158_v6  ;;  %v6972_v30 = vunpack.i.l.bf16 %v9081_v38 }
 0x10c   : > { %v7163_v55 = vunpack.i.h.bf16 %v7161_v19  ;;  %v7162_v13 = vunpack.i.l.bf16 %v7161_v19  ;;  %v7166_v8 = vpop.permute.xlu0 %7165  ;;  %v1684_v46 = vpack.c.bf16 %v1552_v54, %v1551_v0 }
 0x10d   : > { %1988 = vmatprep.mubr.bf16.mxu0 %v1685_v27  ;;  %v7168_v49 = vunpack.i.h.bf16 %v7166_v8  ;;  %v7167_v59 = vunpack.i.l.bf16 %v7166_v8  ;;  %v1489_v8 = vsel %vm278_vm0, %v9010_v23, %v6972_v30 }
 0x10e   : > { %1989 = vmatmul.mubr.bf16.gmra.mxu0 %v1684_v46  ;;  %v1586_v32 = vsel %vm278_vm0, %v559_v63, %v7163_v55  ;;  %v1585_v45 = vsel %vm278_vm0, %v558_v22, %v7162_v13  ;;  %v1490_v13 = vsel %vm278_vm0, %v9012_v26, %v6973_v7 }
 0x10f   : > { %v7171_v58 = vpop.permute.xlu1 %7170  ;;  %v1617_v57 = vsel %vm1507_vm4, %v1585_v45, %v7167_v59  ;;  %v1618_v11 = vsel %vm1507_vm4, %v1586_v32, %v7168_v49 }
 0x110   : > { %v7176_v56 = vpop.permute.xlu0 %7175  ;;  %v7173_v25 = vunpack.i.h.bf16 %v7171_v58  ;;  %v7172_v41 = vunpack.i.l.bf16 %v7171_v58 }
 0x111   : > { %v7178_v43 = vunpack.i.h.bf16 %v7176_v56  ;;  %v7177_v52 = vunpack.i.l.bf16 %v7176_v56 }
 0x112   : > { %v1520_v9 = vsel %vm1507_vm4, %v1487_v47, %v7172_v41  ;;  %v1521_v12 = vsel %vm1507_vm4, %v1488_v2, %v7173_v25 }
 0x113   : > { %v7181_v24 = vpop.permute.xlu1 %7180  ;;  %v1649_v14 = vsel %vm1540_vm5, %v1617_v57, %v7177_v52  ;;  %v1650_v18 = vsel %vm1540_vm5, %v1618_v11, %v7178_v43  ;;  %v562_v52 = vld [vmem:[#allocation2 + $0x128] sm:$0xff]  ;;  %v563_v57 = vld [vmem:[#allocation2 + $0x130] sm:$0xff] }
 0x114   : > { %v7183_v29 = vunpack.i.h.bf16 %v7181_v24  ;;  %v7182_v31 = vunpack.i.l.bf16 %v7181_v24  ;;  %v7186_v16 = vpop.permute.xlu0 %7185  ;;  %v1688_v60 = vpack.c.bf16 %v1650_v18, %v1649_v14 }
 0x115   : > { %v7188_v28 = vunpack.i.h.bf16 %v7186_v16  ;;  %v7187_v6 = vunpack.i.l.bf16 %v7186_v16 }
 0x116   : > { %1996 = vmatprep.mubr.bf16.mxu0 %v1688_v60  ;;  %v1553_v39 = vsel %vm1540_vm5, %v1520_v9, %v7182_v31  ;;  %v1554_v36 = vsel %vm1540_vm5, %v1521_v12, %v7183_v29  ;;  %v6978_v29 = vunpack.i.h.bf16 %v9083_v40  ;;  %v6977_v9 = vunpack.i.l.bf16 %v9083_v40 }
 0x117   : > { %v7191_v15 = vpop.permute.xlu1 %7190  ;;  %v1687_v21 = vpack.c.bf16 %v1554_v36, %v1553_v39  ;;  %v1588_v0 = vsel %vm278_vm0, %v561_v20, %v7188_v28  ;;  %v1587_v54 = vsel %vm278_vm0, %v560_v42, %v7187_v6 }
 0x118   : > { %v7196_v1 = vpop.permute.xlu0 %7195  ;;  %v7193_v19 = vunpack.i.h.bf16 %v7191_v15  ;;  %v7192_v27 = vunpack.i.l.bf16 %v7191_v15  ;;  %v1492_v15 = vsel %vm278_vm0, %v9026_v35, %v6978_v29  ;;  %v1491_v40 = vsel %vm278_vm0, %v9024_v33, %v6977_v9  ;;  %v567_v9 = vld [vmem:[#allocation2 + $0x170] sm:$0xff] }
 0x119   : > { %1997 = vmatmul.mubr.bf16.gmra.mxu0 %v1687_v21  ;;  %v7198_v22 = vunpack.i.h.bf16 %v7196_v1  ;;  %v7197_v63 = vunpack.i.l.bf16 %v7196_v1  ;;  %v6983_v33 = vunpack.i.h.bf16 %v9087_v48 }
 0x11a   : > { %v1619_v32 = vsel %vm1507_vm4, %v1587_v54, %v7192_v27  ;;  %v1620_v45 = vsel %vm1507_vm4, %v1588_v0, %v7193_v19 }
 0x11b   : > { %v7201_v55 = vpop.permute.xlu1 %7200  ;;  %v1522_v56 = vsel %vm1507_vm4, %v1489_v8, %v7197_v63  ;;  %v1523_v26 = vsel %vm1507_vm4, %v1490_v13, %v7198_v22  ;;  %v564_v8 = vld [vmem:[#allocation2 + $0x148] sm:$0xff] }
 0x11c   : > { %v7203_v46 = vunpack.i.h.bf16 %v7201_v55  ;;  %v7202_v49 = vunpack.i.l.bf16 %v7201_v55  ;;  %v7206_v38 = vpop.permute.xlu0 %7205 }
 0x11d   : > { %v7208_v59 = vunpack.i.h.bf16 %v7206_v38  ;;  %v7207_v34 = vunpack.i.l.bf16 %v7206_v38 }
 0x11e   : > { %v1651_v58 = vsel %vm1540_vm5, %v1619_v32, %v7202_v49  ;;  %v1652_v44 = vsel %vm1540_vm5, %v1620_v45, %v7203_v46  ;;  %v565_v46 = vld [vmem:[#allocation2 + $0x150] sm:$0xff] }
 0x11f   : > { %v7211_v25 = vpop.permute.xlu1 %7210  ;;  %v1691_v41 = vpack.c.bf16 %v1652_v44, %v1651_v58  ;;  %v1555_v23 = vsel %vm1540_vm5, %v1522_v56, %v7207_v34  ;;  %v1556_v43 = vsel %vm1540_vm5, %v1523_v26, %v7208_v59  ;;  %v6982_v59 = vunpack.i.l.bf16 %v9087_v48 }
 0x120   : > { %v7213_v11 = vunpack.i.h.bf16 %v7211_v25  ;;  %v7212_v2 = vunpack.i.l.bf16 %v7211_v25  ;;  %v7216_v24 = vpop.permute.xlu0 %7215  ;;  %v1690_v14 = vpack.c.bf16 %v1556_v43, %v1555_v23 }
 0x121   : > { %2004 = vmatprep.mubr.bf16.mxu0 %v1691_v41  ;;  %v7218_v18 = vunpack.i.h.bf16 %v7216_v24  ;;  %v7217_v47 = vunpack.i.l.bf16 %v7216_v24  ;;  %v1494_v41 = vsel %vm278_vm0, %v9041_v51, %v6983_v33  ;;  %v1493_v23 = vsel %vm278_vm0, %v9039_v50, %v6982_v59 }
 0x122   : > { %2005 = vmatmul.mubr.bf16.gmra.mxu0 %v1690_v14  ;;  %v1590_v31 = vsel %vm278_vm0, %v563_v57, %v7213_v11  ;;  %v1589_v16 = vsel %vm278_vm0, %v562_v52, %v7212_v2 }
 0x123   : > { %v7221_v60 = vpop.permute.xlu1 %7220  ;;  %v1621_v42 = vsel %vm1507_vm4, %v1589_v16, %v7217_v47  ;;  %v1622_v20 = vsel %vm1507_vm4, %v1590_v31, %v7218_v18 }
 0x124   : > { %v7226_v12 = vpop.permute.xlu0 %7225  ;;  %v7223_v28 = vunpack.i.h.bf16 %v7221_v60  ;;  %v7222_v6 = vunpack.i.l.bf16 %v7221_v60  ;;  %v566_v60 = vld [vmem:[#allocation2 + $0x168] sm:$0xff] }
 0x125   : > { %v7228_v39 = vunpack.i.h.bf16 %v7226_v12  ;;  %v7227_v36 = vunpack.i.l.bf16 %v7226_v12 }
 0x126   : > { %v1524_v54 = vsel %vm1507_vm4, %v1491_v40, %v7222_v6  ;;  %v1525_v22 = vsel %vm1507_vm4, %v1492_v15, %v7223_v28 }
 0x127   : > { %v7231_v21 = vpop.permute.xlu1 %7230  ;;  %v1653_v7 = vsel %vm1540_vm5, %v1621_v42, %v7227_v36  ;;  %v1654_v30 = vsel %vm1540_vm5, %v1622_v20, %v7228_v39  ;;  %v6988_v20 = vunpack.i.h.bf16 %v9089_v53 }
 0x128   : > { %v7233_v1 = vunpack.i.h.bf16 %v7231_v21  ;;  %v7232_v19 = vunpack.i.l.bf16 %v7231_v21  ;;  %v7236_v27 = vpop.permute.xlu0 %7235  ;;  %v1694_v0 = vpack.c.bf16 %v1654_v30, %v1653_v7  ;;  %v6987_v30 = vunpack.i.l.bf16 %v9089_v53 }
 0x129   : > { %v7238_v63 = vunpack.i.h.bf16 %v7236_v27  ;;  %v7237_v55 = vunpack.i.l.bf16 %v7236_v27 }
 0x12a   : > { %2012 = vmatprep.mubr.bf16.mxu0 %v1694_v0  ;;  %v1557_v35 = vsel %vm1540_vm5, %v1524_v54, %v7232_v19  ;;  %v1558_v13 = vsel %vm1540_vm5, %v1525_v22, %v7233_v1 }
 0x12b   : > { %v7241_v49 = vpop.permute.xlu1 %7240  ;;  %v1693_v38 = vpack.c.bf16 %v1558_v13, %v1557_v35  ;;  %v1592_v58 = vsel %vm278_vm0, %v565_v46, %v7238_v63  ;;  %v1591_v44 = vsel %vm278_vm0, %v564_v8, %v7237_v55  ;;  %v8428_v63 = vld [vmem:[#allocation2 + $0x14f] sm:$0xff]  ;;  %v8429_v46 = vld [vmem:[#allocation2 + $0x147] sm:$0xff] }
 0x12c   : > { %v7246_v34 = vpop.permute.xlu0 %7245  ;;  %v7243_v32 = vunpack.i.h.bf16 %v7241_v49  ;;  %v7242_v45 = vunpack.i.l.bf16 %v7241_v49  ;;  %v1496_v55 = vsel %vm278_vm0, %v8428_v63, %v6988_v20  ;;  %v1495_v53 = vsel %vm278_vm0, %v8429_v46, %v6987_v30 }
 0x12d   : > { %2013 = vmatmul.mubr.bf16.gmra.mxu0 %v1693_v38  ;;  %v7248_v56 = vunpack.i.h.bf16 %v7246_v34  ;;  %v7247_v26 = vunpack.i.l.bf16 %v7246_v34  ;;  %v6997_v46 = vunpack.i.l.bf16 %v9098_v62 }
 0x12e   : > { %v1623_v2 = vsel %vm1507_vm4, %v1591_v44, %v7242_v45  ;;  %v1624_v24 = vsel %vm1507_vm4, %v1592_v58, %v7243_v32 }
 0x12f   : > { %v7251_v25 = vpop.permute.xlu1 %7250  ;;  %v1526_v47 = vsel %vm1507_vm4, %v1493_v23, %v7247_v26  ;;  %v1527_v51 = vsel %vm1507_vm4, %v1494_v41, %v7248_v56  ;;  %v568_v26 = vld [vmem:[#allocation2 + $0x188] sm:$0xff] }
 0x130   : > { %v7253_v43 = vunpack.i.h.bf16 %v7251_v25  ;;  %v7252_v52 = vunpack.i.l.bf16 %v7251_v25  ;;  %v7256_v48 = vpop.permute.xlu0 %7255  ;;  %v569_v25 = vld [vmem:[#allocation2 + $0x190] sm:$0xff] }
 0x131   : > { %v7258_v57 = vunpack.i.h.bf16 %v7256_v48  ;;  %v7257_v11 = vunpack.i.l.bf16 %v7256_v48 }
 0x132   : > { %v1655_v14 = vsel %vm1540_vm5, %v1623_v2, %v7252_v52  ;;  %v1656_v18 = vsel %vm1540_vm5, %v1624_v24, %v7253_v43  ;;  %v6993_v43 = vunpack.i.h.bf16 %v9096_v37  ;;  %v6992_v52 = vunpack.i.l.bf16 %v9096_v37 }
 0x133   : > { %v7261_v29 = vpop.permute.xlu1 %7260  ;;  %v1697_v31 = vpack.c.bf16 %v1656_v18, %v1655_v14  ;;  %v1559_v50 = vsel %vm1540_vm5, %v1526_v47, %v7257_v11  ;;  %v1560_v16 = vsel %vm1540_vm5, %v1527_v51, %v7258_v57  ;;  %v8430_v51 = vld [vmem:[#allocation2 + $0x16f] sm:$0xff] }
 0x134   : > { %v7263_v12 = vunpack.i.h.bf16 %v7261_v29  ;;  %v7262_v28 = vunpack.i.l.bf16 %v7261_v29  ;;  %v7266_v6 = vpop.permute.xlu0 %7265  ;;  %v1696_v39 = vpack.c.bf16 %v1560_v16, %v1559_v50  ;;  %v1498_v29 = vsel %vm278_vm0, %v8430_v51, %v6993_v43  ;;  %v573_v51 = vld [vmem:[#allocation2 + $0x1d0] sm:$0xff] }
 0x135   : > { %2020 = vmatprep.mubr.bf16.mxu0 %v1697_v31  ;;  %v7268_v36 = vunpack.i.h.bf16 %v7266_v6  ;;  %v7267_v42 = vunpack.i.l.bf16 %v7266_v6  ;;  %v8431_v31 = vld [vmem:[#allocation2 + $0x167] sm:$0xff] }
 0x136   : > { %2021 = vmatmul.mubr.bf16.gmra.mxu0 %v1696_v39  ;;  %v1594_v15 = vsel %vm278_vm0, %v567_v9, %v7263_v12  ;;  %v1593_v21 = vsel %vm278_vm0, %v566_v60, %v7262_v28  ;;  %v1497_v50 = vsel %vm278_vm0, %v8431_v31, %v6992_v52 }
 0x137   : > { %v7271_v7 = vpop.permute.xlu1 %7270  ;;  %v1625_v54 = vsel %vm1507_vm4, %v1593_v21, %v7267_v42  ;;  %v1626_v22 = vsel %vm1507_vm4, %v1594_v15, %v7268_v36 }
 0x138   : > { %v7276_v40 = vpop.permute.xlu0 %7275  ;;  %v7273_v1 = vunpack.i.h.bf16 %v7271_v7  ;;  %v7272_v19 = vunpack.i.l.bf16 %v7271_v7 }
 0x139   : > { %v7278_v27 = vunpack.i.h.bf16 %v7276_v40  ;;  %v7277_v0 = vunpack.i.l.bf16 %v7276_v40  ;;  %v570_v40 = vld [vmem:[#allocation2 + $0x1a8] sm:$0xff] }
 0x13a   : > { %v1528_v34 = vsel %vm1507_vm4, %v1495_v53, %v7272_v19  ;;  %v1529_v32 = vsel %vm1507_vm4, %v1496_v55, %v7273_v1  ;;  %v571_v1 = vld [vmem:[#allocation2 + $0x1b0] sm:$0xff]  ;;  %v6998_v55 = vunpack.i.h.bf16 %v9098_v62 }
 0x13b   : > { %v7281_v35 = vpop.permute.xlu1 %7280  ;;  %v1657_v13 = vsel %vm1540_vm5, %v1625_v54, %v7277_v0  ;;  %v1658_v8 = vsel %vm1540_vm5, %v1626_v22, %v7278_v27 }
 0x13c   : > { %v7283_v49 = vunpack.i.h.bf16 %v7281_v35  ;;  %v7282_v38 = vunpack.i.l.bf16 %v7281_v35  ;;  %v7286_v33 = vpop.permute.xlu0 %7285  ;;  %v1700_v59 = vpack.c.bf16 %v1658_v8, %v1657_v13 }
 0x13d   : > { %v7288_v45 = vunpack.i.h.bf16 %v7286_v33  ;;  %v7287_v58 = vunpack.i.l.bf16 %v7286_v33 }
 0x13e   : > { %2028 = vmatprep.mubr.bf16.mxu0 %v1700_v59  ;;  %v1561_v44 = vsel %vm1540_vm5, %v1528_v34, %v7282_v38  ;;  %v1562_v56 = vsel %vm1540_vm5, %v1529_v32, %v7283_v49 }
 0x13f   : > { %v7291_v41 = vpop.permute.xlu1 %7290  ;;  %v1699_v23 = vpack.c.bf16 %v1562_v56, %v1561_v44  ;;  %v1596_v2 = vsel %vm278_vm0, %v569_v25, %v7288_v45  ;;  %v1595_v24 = vsel %vm278_vm0, %v568_v26, %v7287_v58  ;;  %v8432_v45 = vld [vmem:[#allocation2 + $0x18f] sm:$0xff]  ;;  %v8433_v25 = vld [vmem:[#allocation2 + $0x187] sm:$0xff] }
 0x140   : > { %v7296_v48 = vpop.permute.xlu0 %7295  ;;  %v7293_v57 = vunpack.i.h.bf16 %v7291_v41  ;;  %v7292_v11 = vunpack.i.l.bf16 %v7291_v41  ;;  %v1500_v58 = vsel %vm278_vm0, %v8432_v45, %v6998_v55  ;;  %v1499_v62 = vsel %vm278_vm0, %v8433_v25, %v6997_v46 }
 0x141   : > { %2029 = vmatmul.mubr.bf16.gmra.mxu0 %v1699_v23  ;;  %v7298_v14 = vunpack.i.h.bf16 %v7296_v48  ;;  %v7297_v18 = vunpack.i.l.bf16 %v7296_v48 }
 0x142   : > { %v1627_v28 = vsel %vm1507_vm4, %v1595_v24, %v7292_v11  ;;  %v1628_v6 = vsel %vm1507_vm4, %v1596_v2, %v7293_v57  ;;  %v572_v2 = vld [vmem:[#allocation2 + $0x1c8] sm:$0xff] }
 0x143   : > { %v7301_v47 = vpop.permute.xlu1 %7300  ;;  %v1530_v42 = vsel %vm1507_vm4, %v1497_v50, %v7297_v18  ;;  %v1531_v20 = vsel %vm1507_vm4, %v1498_v29, %v7298_v14  ;;  %v7002_v50 = vunpack.i.l.bf16 %v9104_v4 }
 0x144   : > { %v7303_v16 = vunpack.i.h.bf16 %v7301_v47  ;;  %v7302_v60 = vunpack.i.l.bf16 %v7301_v47  ;;  %v7306_v37 = vpop.permute.xlu0 %7305  ;;  %v7003_v47 = vunpack.i.h.bf16 %v9104_v4  ;;  %v8435_v4 = vld [vmem:[#allocation2 + $0x1a7] sm:$0xff] }
 0x145   : > { %v7308_v9 = vunpack.i.h.bf16 %v7306_v37  ;;  %v7307_v12 = vunpack.i.l.bf16 %v7306_v37  ;;  %v2334_v37 = vld [vmem:[#allocation2 + $0x8] sm:$0xff] }
 0x146   : > { %v1659_v39 = vsel %vm1540_vm5, %v1627_v28, %v7302_v60  ;;  %v1660_v36 = vsel %vm1540_vm5, %v1628_v6, %v7303_v16 }
 0x147   : > { %v7311_v15 = vpop.permute.xlu1 %7310  ;;  %v1703_v21 = vpack.c.bf16 %v1660_v36, %v1659_v39  ;;  %v1563_v7 = vsel %vm1540_vm5, %v1530_v42, %v7307_v12  ;;  %v1564_v30 = vsel %vm1540_vm5, %v1531_v20, %v7308_v9  ;;  %v2335_v9 = vld [vmem:[#allocation2 + $0x10] sm:$0xff] }
 0x148   : > { %v7313_v19 = vunpack.i.h.bf16 %v7311_v15  ;;  %v7312_v27 = vunpack.i.l.bf16 %v7311_v15  ;;  %v7316_v0 = vpop.permute.xlu0 %7315  ;;  %v1702_v54 = vpack.c.bf16 %v1564_v30, %v1563_v7  ;;  %v7414_v6 = vpack.i.bf16 %v2335_v9, %v2334_v37  ;;  %v8434_v20 = vld [vmem:[#allocation2 + $0x1af] sm:$0xff] }
 0x149   : > { %2036 = vmatprep.mubr.bf16.mxu0 %v1703_v21  ;;  %v7318_v22 = vunpack.i.h.bf16 %v7316_v0  ;;  %v7317_v63 = vunpack.i.l.bf16 %v7316_v0  ;;  %v1502_v15 = vsel %vm278_vm0, %v8434_v20, %v7003_v47  ;;  %v1501_v7 = vsel %vm278_vm0, %v8435_v4, %v7002_v50  ;;  %v2367_v0 = vld [vmem:[#allocation2 + $0x11] sm:$0xff]  ;;  %v8437_v47 = vld [vmem:[#allocation2 + $0x1c7] sm:$0xff] }
 0x14a   : > { %2037 = vmatmul.mubr.bf16.gmra.mxu0 %v1702_v54  ;;  %v1598_v35 = vsel %vm278_vm0, %v571_v1, %v7313_v19  ;;  %v1597_v13 = vsel %vm278_vm0, %v570_v40, %v7312_v27  ;;  %7415 = vrot.lane.b32.xlu0 %v7414_v6, %s8522_s18  ;;  %v2366_v27 = vld [vmem:[#allocation2 + $0x9] sm:$0xff] }
 0x14b   : > { %v7321_v8 = vpop.permute.xlu1 %7320  ;;  %v1629_v34 = vsel %vm1507_vm4, %v1597_v13, %v7317_v63  ;;  %v1630_v32 = vsel %vm1507_vm4, %v1598_v35, %v7318_v22  ;;  %v7419_v55 = vpack.i.bf16 %v2367_v0, %v2366_v27 }
 0x14c   : > { %v7326_v53 = vpop.permute.xlu0 %7325  ;;  %v7323_v49 = vunpack.i.h.bf16 %v7321_v8  ;;  %v7322_v38 = vunpack.i.l.bf16 %v7321_v8 }
 0x14d   : > { %v7328_v33 = vunpack.i.h.bf16 %v7326_v53  ;;  %v7327_v59 = vunpack.i.l.bf16 %v7326_v53 }
 0x14e   : > { %v1532_v57 = vsel %vm1507_vm4, %v1499_v62, %v7322_v38  ;;  %v1533_v11 = vsel %vm1507_vm4, %v1500_v58, %v7323_v49  ;;  %7420 = vrot.lane.b32.xlu0 %v7419_v55, %s8523_s15 }
 0x14f   : > { %v7331_v44 = vpop.permute.xlu1 %7330  ;;  %v1661_v56 = vsel %vm1540_vm5, %v1629_v34, %v7327_v59  ;;  %v1662_v26 = vsel %vm1540_vm5, %v1630_v32, %v7328_v33 }
 0x150   : > { %v7333_v41 = vunpack.i.h.bf16 %v7331_v44  ;;  %v7332_v23 = vunpack.i.l.bf16 %v7331_v44  ;;  %v7336_v43 = vpop.permute.xlu0 %7335  ;;  %v1706_v52 = vpack.c.bf16 %v1662_v26, %v1661_v56  ;;  %v7008_v56 = vunpack.i.h.bf16 %v9106_v5 }
 0x151   : > { %v7337_v48 = vunpack.i.l.bf16 %v7336_v43  ;;  %v7338_v24 = vunpack.i.h.bf16 %v7336_v43 }
 0x152   : > { %2044 = vmatprep.mubr.bf16.mxu0 %v1706_v52  ;;  %v1565_v14 = vsel %vm1540_vm5, %v1532_v57, %v7332_v23  ;;  %v1566_v18 = vsel %vm1540_vm5, %v1533_v11, %v7333_v41  ;;  %v7007_v41 = vunpack.i.l.bf16 %v9106_v5 }
 0x153   : > { %v7341_v29 = vpop.permute.xlu1 %7340  ;;  %v1705_v31 = vpack.c.bf16 %v1566_v18, %v1565_v14  ;;  %v1599_v12 = vsel %vm278_vm0, %v572_v2, %v7337_v48  ;;  %v1600_v39 = vsel %vm278_vm0, %v573_v51, %v7338_v24  ;;  %v8436_v24 = vld [vmem:[#allocation2 + $0x1cf] sm:$0xff] }
 0x154   : > { %v7342_v16 = vunpack.i.l.bf16 %v7341_v29  ;;  %v7346_v60 = vpop.permute.xlu0 %7345  ;;  %v7343_v28 = vunpack.i.h.bf16 %v7341_v29  ;;  %v1504_v14 = vsel %vm278_vm0, %v8436_v24, %v7008_v56  ;;  %v1503_v5 = vsel %vm278_vm0, %v8437_v47, %v7007_v41  ;;  %v677_v56 = vld [vmem:[#allocation2 + $0x69] sm:$0xff] }
 0x155   : > { %2045 = vmatmul.mubr.bf16.gmra.mxu0 %v1705_v31  ;;  %v7348_v36 = vunpack.i.h.bf16 %v7346_v60  ;;  %v7347_v42 = vunpack.i.l.bf16 %v7346_v60 }
 0x156   : > { %v1631_v19 = vsel %vm1507_vm4, %v1599_v12, %v7342_v16  ;;  %v1632_v63 = vsel %vm1507_vm4, %v1600_v39, %v7343_v28 }
 0x157   : > { %v7351_v21 = vpop.permute.xlu1 %7350  ;;  %v1534_v8 = vsel %vm1507_vm4, %v1501_v7, %v7347_v42  ;;  %v1535_v46 = vsel %vm1507_vm4, %v1502_v15, %v7348_v36 }
 0x158   : > { %v7353_v30 = vunpack.i.h.bf16 %v7351_v21  ;;  %v7352_v40 = vunpack.i.l.bf16 %v7351_v21  ;;  %v7356_v1 = vpop.permute.xlu0 %7355 }
 0x159   : > { %v7358_v54 = vunpack.i.h.bf16 %v7356_v1  ;;  %v7357_v22 = vunpack.i.l.bf16 %v7356_v1 }
 0x15a   : > { %v1663_v35 = vsel %vm1540_vm5, %v1631_v19, %v7352_v40  ;;  %v1664_v13 = vsel %vm1540_vm5, %v1632_v63, %v7353_v30  ;;  %v449_v30 = vld [vmem:[#allocation2 + $0x1ef] sm:$0xff]  ;;  %v448_v19 = vld [vmem:[#allocation2 + $0x1e7] sm:$0xff] }
 0x15b   : > { %v7361_v53 = vpop.permute.xlu1 %7360  ;;  %v1709_v49 = vpack.c.bf16 %v1664_v13, %v1663_v35  ;;  %v1567_v38 = vsel %vm1540_vm5, %v1534_v8, %v7357_v22  ;;  %v1568_v33 = vsel %vm1540_vm5, %v1535_v46, %v7358_v54  ;;  %v675_v8 = vld [vmem:[#allocation2 + $0x49] sm:$0xff]  ;;  %v676_v46 = vld [vmem:[#allocation2 + $0x51] sm:$0xff] }
 0x15c   : > { %v7363_v59 = vunpack.i.h.bf16 %v7361_v53  ;;  %v7362_v34 = vunpack.i.l.bf16 %v7361_v53  ;;  %v7366_v32 = vpop.permute.xlu0 %7365  ;;  %v1708_v45 = vpack.c.bf16 %v1568_v33, %v1567_v38 }
 0x15d   : > { %2052 = vmatprep.mubr.bf16.mxu0 %v1709_v49  ;;  %v7368_v58 = vunpack.i.h.bf16 %v7366_v32  ;;  %v7367_v44 = vunpack.i.l.bf16 %v7366_v32 }
 0x15e   : > { %2053 = vmatmul.mubr.bf16.gmra.mxu0 %v1708_v45  ;;  %v1602_v26 = vsel %vm278_vm0, %v9153_v3, %v7363_v59  ;;  %v1601_v25 = vsel %vm278_vm0, %v9151_v61, %v7362_v34 }
 0x15f   : > { %v7371_v62 = vpop.permute.xlu1 %7370  ;;  %v1633_v11 = vsel %vm1507_vm4, %v1601_v25, %v7367_v44  ;;  %v1634_v2 = vsel %vm1507_vm4, %v1602_v26, %v7368_v58  ;;  %v1671_v58 = vpack.c.bf16 %v676_v46, %v675_v8  ;;  %v678_v26 = vld [vmem:[#allocation2 + $0x71] sm:$0xff]  ;;  %v679_v25 = vld [vmem:[#allocation2 + $0x89] sm:$0xff] }
 0x160   : > { %v7376_v23 = vpop.permute.xlu0 %7375  ;;  %v7373_v43 = vunpack.i.h.bf16 %v7371_v62  ;;  %v7372_v52 = vunpack.i.l.bf16 %v7371_v62  ;;  %v680_v62 = vld [vmem:[#allocation2 + $0x91] sm:$0xff]  ;;  %v1674_v41 = vpack.c.bf16 %v678_v26, %v677_v56 }
 0x161   : > { %v7378_v48 = vunpack.i.h.bf16 %v7376_v23  ;;  %v7377_v57 = vunpack.i.l.bf16 %v7376_v23  ;;  %v1677_v23 = vpack.c.bf16 %v680_v62, %v679_v25 }
 0x162   : > { %v1536_v16 = vsel %vm1507_vm4, %v1503_v5, %v7372_v52  ;;  %v1537_v60 = vsel %vm1507_vm4, %v1504_v14, %v7373_v43  ;;  %v681_v43 = vld [vmem:[#allocation2 + $0xa9] sm:$0xff]  ;;  %v682_v52 = vld [vmem:[#allocation2 + $0xb1] sm:$0xff] }
 0x163   : > { %v7381_v18 = vpop.permute.xlu1 %7380  ;;  %v1665_v3 = vsel %vm1540_vm5, %v1633_v11, %v7377_v57  ;;  %v1666_v61 = vsel %vm1540_vm5, %v1634_v2, %v7378_v48  ;;  %v1680_v48 = vpack.c.bf16 %v682_v52, %v681_v43 }
 0x164   : > { %v7383_v51 = vunpack.i.h.bf16 %v7381_v18  ;;  %v7382_v29 = vunpack.i.l.bf16 %v7381_v18  ;;  %v7386_v31 = vpop.permute.xlu0 %7385  ;;  %v1712_v50 = vpack.c.bf16 %v1666_v61, %v1665_v3 }
 0x165   : > { %v7388_v12 = vunpack.i.h.bf16 %v7386_v31  ;;  %v7387_v28 = vunpack.i.l.bf16 %v7386_v31 }
 0x166   : > { %2060 = vmatprep.mubr.bf16.mxu0 %v1712_v50  ;;  %v1569_v37 = vsel %vm1540_vm5, %v1536_v16, %v7382_v29  ;;  %v1570_v9 = vsel %vm1540_vm5, %v1537_v60, %v7383_v51 }
 0x167   : > { %v7391_v6 = vpop.permute.xlu1 %7390  ;;  %v1711_v39 = vpack.c.bf16 %v1570_v9, %v1569_v37  ;;  %v1604_v15 = vsel %vm278_vm0, %v9202_v17, %v7388_v12  ;;  %v1603_v21 = vsel %vm278_vm0, %v9200_v10, %v7387_v28  ;;  %v6791_v28 = vpop.f32.mrf.mxu1 }
 0x168   : > { %v7396_v36 = vpop.permute.xlu0 %7395  ;;  %v7393_v4 = vunpack.i.h.bf16 %v7391_v6  ;;  %v7392_v40 = vunpack.i.l.bf16 %v7391_v6 }
 0x169   : > { %2061 = vmatmul.mubr.bf16.gmra.mxu0 %v1711_v39  ;;  %v7398_v42 = vunpack.i.h.bf16 %v7396_v36  ;;  %v7397_v20 = vunpack.i.l.bf16 %v7396_v36  ;;  %v2143_v36 = vpop.f32.mrf.mxu1 }
 0x16a   : > { %v1506_v35 = vsel %vm278_vm0, %v449_v30, %v7393_v4  ;;  %v1505_v53 = vsel %vm278_vm0, %v448_v19, %v7392_v40 }
 0x16b   : > { %v7401_v7 = vpop.permute.xlu1 %7400  ;;  %v1635_v63 = vsel %vm1507_vm4, %v1603_v21, %v7397_v20  ;;  %v1636_v55 = vsel %vm1507_vm4, %v1604_v15, %v7398_v42  ;;  %v9469_v21 = vld [vmem:[%s11258_s2] ss:$0 sm:$0xff]  ;;  %v6792_v4 = vpop.f32.mrf.mxu1 }
 0x16c   : > { %v7406_v1 = vpop.permute.xlu0 %7405  ;;  %v7403_v27 = vunpack.i.h.bf16 %v7401_v7  ;;  %v7402_v0 = vunpack.i.l.bf16 %v7401_v7 }
 0x16d   : > { %v7408_v54 = vunpack.i.h.bf16 %v7406_v1  ;;  %v7407_v22 = vunpack.i.l.bf16 %v7406_v1  ;;  %v2146_v19 = vpop.f32.mrf.mxu1 }
 0x16e   : > { %v1538_v59 = vsel %vm1507_vm4, %v1505_v53, %v7402_v0  ;;  %v1539_v34 = vsel %vm1507_vm4, %v1506_v35, %v7403_v27  ;;  %v8392_v35 = vld [vmem:[%s11259_s3 + $0x88] sm:$0xff]  }
 0x16f   : > { %v7411_v17 = vpop.permute.xlu1 %7410  ;;  %v1667_v13 = vsel %vm1540_vm5, %v1635_v63, %v7407_v22  ;;  %v1668_v10 = vsel %vm1540_vm5, %v1636_v55, %v7408_v54  ;;  %6813 = vmatprep.subr.bf16.mxu0 %v8392_v35 }
 0x170   : > { %v7413_v49 = vunpack.i.h.bf16 %v7411_v17  ;;  %v7412_v38 = vunpack.i.l.bf16 %v7411_v17  ;;  %v1715_v33 = vpack.c.bf16 %v1668_v10, %v1667_v13 }
 0x172   : > { %2068 = vmatprep.mubr.bf16.mxu0 %v1715_v33  ;;  %v1571_v32 = vsel %vm1540_vm5, %v1538_v59, %v7412_v38  ;;  %v1572_v45 = vsel %vm1540_vm5, %v1539_v34, %v7413_v49  ;;  %v6795_v49 = vpop.f32.mrf.mxu1  ;;  %v8393_v38 = vld [vmem:[%s11259_s3 + $0x80] sm:$0xff]  }
 0x173   : > { %v1714_v44 = vpack.c.bf16 %v1572_v45, %v1571_v32 }
 0x174   : > { %v2159_v45 = vpop.f32.mrf.mxu1 }
 0x175   : > { %2069 = vmatmul.mubr.bf16.gmra.mxu0 %v1714_v44 }
 0x176   : > { %6781 = vmatprep.mubr.msk.bf16.mxu0 %vm278_vm0, %v1671_v58 }
 0x17d   : > { %6782 = vmatmul.mubr.msk.bf16.vlgmr.msra.gmra.mxu0 %vm278_vm0, %v1674_v41 }
 0x17e   : > { %6785 = vmatprep.mubr.msk.bf16.mxu0 %vm278_vm0, %v1677_v23  ;;  %6814 = vmatpush3.bf16.msra.mxu0 %v8392_v35  ;;  %v6796_v23 = vpop.f32.mrf.mxu1 }
 0x17f   : > { %6815 = vmatprep.subr.bf16.mxu0 %v8393_v38 }
 0x182   : > { %6816 = vmatpush3.bf16.msra.mxu0 %v8393_v38 }
 0x185   : > { %6786 = vmatmul.mubr.msk.bf16.gmra.mxu0 %vm278_vm0, %v1680_v48 }
 0x19d   : > { %v6403_v57 = vpop.f32.mrf.mxu0 }
 0x19f   : > { %v6404_v11 = vpop.f32.mrf.mxu0 }
 0x1a0   : > { %v9442_v2 = vadd.f32 %v6404_v11, %v6403_v57 }
 0x1a1   : > { %v9444_v24 = vpop.f32.mrf.mxu0 }
 0x1a3   : > { %v9446_v14 = vpop.f32.mrf.mxu0 }
 0x1a6   : > { %v6409_v18 = vpop.f32.mrf.mxu0 }
 0x1a8   : > { %v6410_v3 = vpop.f32.mrf.mxu0 }
 0x1a9   : > { %v9448_v61 = vadd.f32 %v6410_v3, %v6409_v18 }
 0x1aa   : > { %v9450_v47 = vpop.f32.mrf.mxu0 }
 0x1ac   : > { %v9452_v5 = vpop.f32.mrf.mxu0 }
 0x1b1   : > { %v6415_v51 = vpop.f32.mrf.mxu0 }
 0x1b3   : > { %v6416_v29 = vpop.f32.mrf.mxu0 }
 0x1b4   : > { %v9454_v31 = vadd.f32 %v6416_v29, %v6415_v51  ;;  %v2162_v51 = vpop.f32.mrf.mxu1 }
 0x1b5   : > { %v9456_v50 = vpop.f32.mrf.mxu0 }
 0x1b6   : > { %v6799_v35 = vpop.f32.mrf.mxu1 }
 0x1b7   : > { %v9458_v16 = vpop.f32.mrf.mxu0 }
 0x1b8   : > { %v2175_v38 = vpop.f32.mrf.mxu1 }
 0x1ba   : > { %v6421_v60 = vpop.f32.mrf.mxu0 }
 0x1bc   : > { %v6422_v37 = vpop.f32.mrf.mxu0 }
 0x1bd   : > { %v9460_v9 = vadd.f32 %v6422_v37, %v6421_v60 }
 0x1be   : > { %v9462_v12 = vpop.f32.mrf.mxu0 }
 0x1c0   : > { %v9464_v6 = vpop.f32.mrf.mxu0 }
 0x1c5   : > { %v6427_v39 = vpop.f32.mrf.mxu0 }
 0x1c7   : > { %v6428_v42 = vpop.f32.mrf.mxu0 }
 0x1c8   : > { %v6429_v20 = vadd.f32 %v6428_v42, %v6427_v39 }
 0x1c9   : > { %v6430_v15 = vpop.f32.mrf.mxu0 }
 0x1ca   : > { %v1983_v7 = vadd.f32 %v6429_v20, %v9469_v21 }
 0x1cb   : > { %v6431_v30 = vpop.f32.mrf.mxu0 }
 0x1cc   : > { %v6432_v40 = vadd.f32 %v6431_v30, %v6430_v15  ;;  %v2144_v1 = vadd.f32 %v2143_v36, %v1983_v7 }
 0x1ce   : > { %v2246_v27 = vmax.f32 %v2144_v1, 0.0  ;;  %v6433_v0 = vpop.f32.mrf.mxu0  ;;  %v1986_v54 = vadd.f32 %v6432_v40, %v9469_v21 }
 0x1d0   : > { %2278 = vst.msk [vmem:[#allocation2 + $0xa8] sm:$0xff] %vm278_vm0, %v2246_v27  ;;  %v2147_v22 = vadd.f32 %v2146_v19, %v1986_v54  ;;  %v6434_v63 = vpop.f32.mrf.mxu0 }
 0x1d1   : > { %v6435_v55 = vadd.f32 %v6434_v63, %v6433_v0 }
 0x1d2   : > { %v2247_v17 = vmax.f32 %v2147_v22, 0.0  ;;  %v6436_v13 = vpop.f32.mrf.mxu0 }
 0x1d3   : > { %v1991_v10 = vadd.f32 %v6435_v55, %v9469_v21 }
 0x1d4   : > { %2279 = vst.msk [vmem:[#allocation2 + $0xb0] sm:$0xff] %vm278_vm0, %v2247_v17  ;;  %v6437_v8 = vpop.f32.mrf.mxu0 }
 0x1d5   : > { %v2152_v46 = vadd.f32 %v6791_v28, %v1991_v10  ;;  %v6438_v53 = vadd.f32 %v6437_v8, %v6436_v13 }
 0x1d7   : > { %v2248_v33 = vmax.f32 %v2152_v46, 0.0  ;;  %v1994_v59 = vadd.f32 %v6438_v53, %v9469_v21  ;;  %v2532_v56 = vld [vmem:[#allocation2 + $0xa8] sm:$0xff] }
 0x1d8   : > { %v9501_v39 = vld [vmem:[#allocation2 + $0xa7] sm:$0xff] }
 0x1d9   : > { %2280 = vst.msk [vmem:[#allocation2 + $0xc8] sm:$0xff] %vm278_vm0, %v2248_v33  ;;  %v2155_v34 = vadd.f32 %v6792_v4, %v1994_v59  ;;  %v6439_v32 = vpop.f32.mrf.mxu0 }
 0x1db   : > { %v2249_v58 = vmax.f32 %v2155_v34, 0.0  ;;  %v6440_v44 = vpop.f32.mrf.mxu0  ;;  %v2533_v26 = vld [vmem:[#allocation2 + $0xb0] sm:$0xff] }
 0x1dc   : > { %v6441_v25 = vadd.f32 %v6440_v44, %v6439_v32  ;;  %v7429_v62 = vpack.i.bf16 %v2533_v26, %v2532_v56  ;;  %v9485_v43 = vld [vmem:[#allocation2 + $0xa9] sm:$0xff]  ;;  %v9487_v52 = vld [vmem:[#allocation2 + $0xb1] sm:$0xff]  ;;  %v6800_v56 = vpop.f32.mrf.mxu1 }
 0x1dd   : > { %2281 = vst.msk [vmem:[#allocation2 + $0xd0] sm:$0xff] %vm278_vm0, %v2249_v58  ;;  %v6442_v41 = vpop.f32.mrf.mxu0  ;;  %v9494_v3 = vpack.i.bf16 %v9487_v52, %v9485_v43  ;;  %v9496_v29 = vld [vmem:[#allocation2 + $0xaf] sm:$0xff] }
 0x1de   : > { %7430 = vrot.lane.b32.xlu0 %v7429_v62, %s8524_s22  ;;  %7425 = vrot.lane.b32.xlu1 %v7429_v62, %s8522_s18  ;;  %v1999_v48 = vadd.f32 %v6441_v25, %v9469_v21  ;;  %v7439_v20 = vpack.i.bf16 %v9496_v29, %v9501_v39 }
 0x1df   : > { %v6443_v57 = vpop.f32.mrf.mxu0 }
 0x1e0   : > { %v6444_v11 = vadd.f32 %v6443_v57, %v6442_v41  ;;  %v2160_v18 = vadd.f32 %v2159_v45, %v1999_v48  ;;  %v2502_v15 = vld [vmem:[#allocation2 + $0xc7] sm:$0xff] }
 0x1e1   : > { %v2346_v0 = vld [vmem:[#allocation2 + $0xc8] sm:$0xff] }
 0x1e2   : > { %v2002_v60 = vadd.f32 %v6444_v11, %v9469_v21  ;;  %v2250_v37 = vmax.f32 %v2160_v18, 0.0  ;;  %v6445_v28 = vpop.f32.mrf.mxu0  ;;  %7435 = vrot.lane.b32.xlu0 %v9494_v3, %s8522_s18 }
 0x1e4   : > { %2282 = vst.msk [vmem:[#allocation2 + $0xe8] sm:$0xff] %vm278_vm0, %v2250_v37  ;;  %v2163_v36 = vadd.f32 %v2162_v51, %v2002_v60  ;;  %v6446_v42 = vpop.f32.mrf.mxu0  ;;  %v2503_v4 = vld [vmem:[#allocation2 + $0xcf] sm:$0xff] }
 0x1e5   : > { %v6447_v7 = vadd.f32 %v6446_v42, %v6445_v28  ;;  %v9506_v30 = vpack.i.bf16 %v2503_v4, %v2502_v15  ;;  %v2347_v40 = vld [vmem:[#allocation2 + $0xd0] sm:$0xff] }
 0x1e6   : > { %v2251_v1 = vmax.f32 %v2163_v36, 0.0  ;;  %v6448_v19 = vpop.f32.mrf.mxu0  ;;  %7440 = vrot.lane.b32.xlu0 %v7439_v20, %s8524_s22  ;;  %v7444_v22 = vpack.i.bf16 %v2347_v40, %v2346_v0  ;;  %v9514_v17 = vld [vmem:[#allocation2 + $0xc9] sm:$0xff]  ;;  %v9516_v13 = vld [vmem:[#allocation2 + $0xd1] sm:$0xff] }
 0x1e7   : > { %v2007_v27 = vadd.f32 %v6447_v7, %v9469_v21  ;;  %7450 = vrot.lane.b32.xlu1 %v9506_v30, %s8523_s15 }
 0x1e8   : > { %2283 = vst.msk [vmem:[#allocation2 + $0xf0] sm:$0xff] %vm278_vm0, %v2251_v1  ;;  %v6449_v54 = vpop.f32.mrf.mxu0 }
 0x1e9   : > { %v2168_v63 = vadd.f32 %v6795_v49, %v2007_v27  ;;  %v6450_v55 = vadd.f32 %v6449_v54, %v6448_v19  ;;  %v9523_v49 = vpack.i.bf16 %v9516_v13, %v9514_v17 }
 0x1ea   : > { %7445 = vrot.lane.b32.xlu0 %v7444_v22, %s8522_s18 }
 0x1eb   : > { %v2252_v10 = vmax.f32 %v2168_v63, 0.0  ;;  %v2010_v8 = vadd.f32 %v6450_v55, %v9469_v21  ;;  %7455 = vrot.lane.b32.xlu1 %v7444_v22, %s8524_s22  ;;  %v2348_v34 = vld [vmem:[#allocation2 + $0xe8] sm:$0xff] }
 0x1ed   : > { %2284 = vst.msk [vmem:[#allocation2 + $0x108] sm:$0xff] %vm278_vm0, %v2252_v10  ;;  %v2171_v46 = vadd.f32 %v6796_v23, %v2010_v8  ;;  %v6451_v53 = vpop.f32.mrf.mxu0  ;;  %v2178_v23 = vpop.f32.mrf.mxu1 }
 0x1ef   : > { %v2253_v33 = vmax.f32 %v2171_v46, 0.0  ;;  %v6452_v59 = vpop.f32.mrf.mxu0  ;;  %7460 = vrot.lane.b32.xlu1 %v9523_v49, %s8522_s18  ;;  %v2349_v32 = vld [vmem:[#allocation2 + $0xf0] sm:$0xff]  ;;  %v6803_v1 = vpop.f32.mrf.mxu1 }
 0x1f0   : > { %v6453_v45 = vadd.f32 %v6452_v59, %v6451_v53  ;;  %v9527_v58 = vpack.i.bf16 %v2349_v32, %v2348_v34 }
 0x1f1   : > { %2285 = vst.msk [vmem:[#allocation2 + $0x110] sm:$0xff] %vm278_vm0, %v2253_v33  ;;  %v6454_v44 = vpop.f32.mrf.mxu0  ;;  %v2191_v22 = vpop.f32.mrf.mxu1 }
 0x1f2   : > { %v2015_v26 = vadd.f32 %v6453_v45, %v9469_v21 }
 0x1f3   : > { %v6455_v25 = vpop.f32.mrf.mxu0  ;;  %7465 = vrot.lane.b32.xlu1 %v9527_v58, %s8522_s18 }
 0x1f4   : > { %v6456_v62 = vadd.f32 %v6455_v25, %v6454_v44  ;;  %v2176_v41 = vadd.f32 %v2175_v38, %v2015_v26  ;;  %v2350_v60 = vld [vmem:[#allocation2 + $0x108] sm:$0xff]  ;;  %v6804_v38 = vpop.f32.mrf.mxu1 }
 0x1f6   : > { %v2018_v48 = vadd.f32 %v6456_v62, %v9469_v21  ;;  %v2254_v57 = vmax.f32 %v2176_v41, 0.0  ;;  %v6457_v11 = vpop.f32.mrf.mxu0  ;;  %v2194_v45 = vpop.f32.mrf.mxu1 }
 0x1f8   : > { %2286 = vst.msk [vmem:[#allocation2 + $0x128] sm:$0xff] %vm278_vm0, %v2254_v57  ;;  %v2179_v18 = vadd.f32 %v2178_v23, %v2018_v48  ;;  %v6458_v51 = vpop.f32.mrf.mxu0  ;;  %v2351_v37 = vld [vmem:[#allocation2 + $0x110] sm:$0xff] }
 0x1f9   : > { %v6459_v28 = vadd.f32 %v6458_v51, %v6457_v11  ;;  %v9535_v36 = vpack.i.bf16 %v2351_v37, %v2350_v60 }
 0x1fa   : > { %v2255_v42 = vmax.f32 %v2179_v18, 0.0  ;;  %v6460_v20 = vpop.f32.mrf.mxu0 }
 0x1fb   : > { %v2023_v15 = vadd.f32 %v6459_v28, %v9469_v21  ;;  %7470 = vrot.lane.b32.xlu0 %v9535_v36, %s8522_s18 }
 0x1fc   : > { %2287 = vst.msk [vmem:[#allocation2 + $0x130] sm:$0xff] %vm278_vm0, %v2255_v42  ;;  %v6461_v4 = vpop.f32.mrf.mxu0  ;;  %v6807_v42 = vpop.f32.mrf.mxu1 }
 0x1fd   : > { %v2184_v7 = vadd.f32 %v6799_v35, %v2023_v15  ;;  %v6462_v40 = vadd.f32 %v6461_v4, %v6460_v20 }
 0x1ff   : > { %v2256_v19 = vmax.f32 %v2184_v7, 0.0  ;;  %v2026_v27 = vadd.f32 %v6462_v40, %v9469_v21  ;;  %v2352_v10 = vld [vmem:[#allocation2 + $0x128] sm:$0xff]  ;;  %v2207_v40 = vpop.f32.mrf.mxu1 }
 0x201   : > { %2288 = vst.msk [vmem:[#allocation2 + $0x148] sm:$0xff] %vm278_vm0, %v2256_v19  ;;  %v2187_v0 = vadd.f32 %v6800_v56, %v2026_v27  ;;  %v6463_v54 = vpop.f32.mrf.mxu0 }
 0x203   : > { %v2257_v63 = vmax.f32 %v2187_v0, 0.0  ;;  %v6464_v55 = vpop.f32.mrf.mxu0  ;;  %v2353_v8 = vld [vmem:[#allocation2 + $0x130] sm:$0xff] }
 0x204   : > { %v6465_v46 = vadd.f32 %v6464_v55, %v6463_v54  ;;  %v9543_v53 = vpack.i.bf16 %v2353_v8, %v2352_v10  ;;  %v6808_v55 = vpop.f32.mrf.mxu1 }
 0x205   : > { %2289 = vst.msk [vmem:[#allocation2 + $0x150] sm:$0xff] %vm278_vm0, %v2257_v63  ;;  %v6466_v35 = vpop.f32.mrf.mxu0 }
 0x206   : > { %7475 = vrot.lane.b32.xlu1 %v9543_v53, %s8522_s18  ;;  %v2031_v33 = vadd.f32 %v6465_v46, %v9469_v21 }
 0x207   : > { %v6467_v59 = vpop.f32.mrf.mxu0 }
 0x208   : > { %v6468_v34 = vadd.f32 %v6467_v59, %v6466_v35  ;;  %v2192_v32 = vadd.f32 %v2191_v22, %v2031_v33  ;;  %v2354_v41 = vld [vmem:[#allocation2 + $0x148] sm:$0xff] }
 0x20a   : > { %v2034_v44 = vadd.f32 %v6468_v34, %v9469_v21  ;;  %v2258_v56 = vmax.f32 %v2192_v32, 0.0  ;;  %v6469_v26 = vpop.f32.mrf.mxu0 }
 0x20c   : > { %2290 = vst.msk [vmem:[#allocation2 + $0x168] sm:$0xff] %vm278_vm0, %v2258_v56  ;;  %v2195_v25 = vadd.f32 %v2194_v45, %v2034_v44  ;;  %v6470_v62 = vpop.f32.mrf.mxu0  ;;  %v2355_v23 = vld [vmem:[#allocation2 + $0x150] sm:$0xff] }
 0x20d   : > { %v6471_v48 = vadd.f32 %v6470_v62, %v6469_v26  ;;  %v9551_v57 = vpack.i.bf16 %v2355_v23, %v2354_v41 }
 0x20e   : > { %v2259_v11 = vmax.f32 %v2195_v25, 0.0  ;;  %v6472_v18 = vpop.f32.mrf.mxu0 }
 0x20f   : > { %v2039_v51 = vadd.f32 %v6471_v48, %v9469_v21  ;;  %7480 = vrot.lane.b32.xlu0 %v9551_v57, %s8522_s18 }
 0x210   : > { %2291 = vst.msk [vmem:[#allocation2 + $0x170] sm:$0xff] %vm278_vm0, %v2259_v11  ;;  %v6473_v60 = vpop.f32.mrf.mxu0 }
 0x211   : > { %v2200_v37 = vadd.f32 %v6803_v1, %v2039_v51  ;;  %v6474_v28 = vadd.f32 %v6473_v60, %v6472_v18 }
 0x213   : > { %v2260_v20 = vmax.f32 %v2200_v37, 0.0  ;;  %v2042_v15 = vadd.f32 %v6474_v28, %v9469_v21  ;;  %v2356_v0 = vld [vmem:[#allocation2 + $0x168] sm:$0xff] }
 0x215   : > { %2292 = vst.msk [vmem:[#allocation2 + $0x188] sm:$0xff] %vm278_vm0, %v2260_v20  ;;  %v2203_v4 = vadd.f32 %v6804_v38, %v2042_v15  ;;  %v6475_v7 = vpop.f32.mrf.mxu0  ;;  %v2210_v38 = vpop.f32.mrf.mxu1 }
 0x217   : > { %v2261_v19 = vmax.f32 %v2203_v4, 0.0  ;;  %v6476_v27 = vpop.f32.mrf.mxu0  ;;  %v2357_v54 = vld [vmem:[#allocation2 + $0x170] sm:$0xff]  ;;  %v6811_v51 = vpop.f32.mrf.mxu1 }
 0x218   : > { %v6477_v22 = vadd.f32 %v6476_v27, %v6475_v7  ;;  %v9559_v63 = vpack.i.bf16 %v2357_v54, %v2356_v0 }
 0x219   : > { %2293 = vst.msk [vmem:[#allocation2 + $0x190] sm:$0xff] %vm278_vm0, %v2261_v19  ;;  %v6478_v1 = vpop.f32.mrf.mxu0  ;;  %v2223_v15 = vpop.f32.mrf.mxu1 }
 0x21a   : > { %7485 = vrot.lane.b32.xlu1 %v9559_v63, %s8522_s18  ;;  %v2047_v10 = vadd.f32 %v6477_v22, %v9469_v21 }
 0x21b   : > { %v6479_v8 = vpop.f32.mrf.mxu0  ;;  %v6812_v54 = vpop.f32.mrf.mxu1 }
 0x21c   : > { %v6480_v46 = vadd.f32 %v6479_v8, %v6478_v1  ;;  %v2208_v35 = vadd.f32 %v2207_v40, %v2047_v10  ;;  %v2358_v44 = vld [vmem:[#allocation2 + $0x188] sm:$0xff] }
 0x21d   : > { %v2226_v8 = vpop.f32.mrf.mxu1 }
 0x21e   : > { %v2050_v33 = vadd.f32 %v6480_v46, %v9469_v21  ;;  %v2262_v59 = vmax.f32 %v2208_v35, 0.0  ;;  %v6481_v34 = vpop.f32.mrf.mxu0 }
 0x220   : > { %2294 = vst.msk [vmem:[#allocation2 + $0x1a8] sm:$0xff] %vm278_vm0, %v2262_v59  ;;  %v2211_v32 = vadd.f32 %v2210_v38, %v2050_v33  ;;  %v6482_v45 = vpop.f32.mrf.mxu0  ;;  %v2359_v56 = vld [vmem:[#allocation2 + $0x190] sm:$0xff] }
 0x221   : > { %v6483_v26 = vadd.f32 %v6482_v45, %v6481_v34  ;;  %v9567_v25 = vpack.i.bf16 %v2359_v56, %v2358_v44 }
 0x222   : > { %v2263_v62 = vmax.f32 %v2211_v32, 0.0  ;;  %v6484_v41 = vpop.f32.mrf.mxu0 }
 0x223   : > { %v2055_v23 = vadd.f32 %v6483_v26, %v9469_v21  ;;  %7490 = vrot.lane.b32.xlu0 %v9567_v25, %s8522_s18 }
 0x224   : > { %2295 = vst.msk [vmem:[#allocation2 + $0x1b0] sm:$0xff] %vm278_vm0, %v2263_v62  ;;  %v6485_v48 = vpop.f32.mrf.mxu0  ;;  %v8394_v62 = vld [vmem:[%s11259_s3 + $0x78] sm:$0xff]  }
 0x225   : > { %v2216_v11 = vadd.f32 %v6807_v42, %v2055_v23  ;;  %v6486_v18 = vadd.f32 %v6485_v48, %v6484_v41  ;;  %v8395_v41 = vld [vmem:[%s11259_s3 + $0x38] sm:$0xff]   ;;  %v6414_v48 = vadd.f32 %v9452_v5, %v9450_v47  ;;  %6517 = vmatprep.subr.bf16.mxu1 %v8394_v62  ;;  %v8397_v47 = vld [vmem:[%s11259_s3 + $0x30] sm:$0xff]   ;;  %v6408_v5 = vadd.f32 %v9446_v14, %v9444_v24 }
 0x226   : > { %6518 = vmatpush3.bf16.msra.mxu1 %v8395_v41 }
 0x227   : > { %v2264_v60 = vmax.f32 %v2216_v11, 0.0  ;;  %v2058_v37 = vadd.f32 %v6486_v18, %v9469_v21  ;;  %v2360_v40 = vld [vmem:[#allocation2 + $0x1a8] sm:$0xff] }
 0x229   : > { %2296 = vst.msk [vmem:[#allocation2 + $0x1c8] sm:$0xff] %vm278_vm0, %v2264_v60  ;;  %v2219_v28 = vadd.f32 %v6808_v55, %v2058_v37  ;;  %v6487_v20 = vpop.f32.mrf.mxu0  ;;  %v1959_v37 = vadd.f32 %v9448_v61, %v9469_v21 }
 0x22b   : > { %v2265_v4 = vmax.f32 %v2219_v28, 0.0  ;;  %v6488_v7 = vpop.f32.mrf.mxu0  ;;  %v2361_v19 = vld [vmem:[#allocation2 + $0x1b0] sm:$0xff] }
 0x22c   : > { %v6489_v27 = vadd.f32 %v6488_v7, %v6487_v20  ;;  %v9575_v0 = vpack.i.bf16 %v2361_v19, %v2360_v40  ;;  %v1951_v20 = vadd.f32 %v9442_v2, %v9469_v21  ;;  %v1962_v40 = vadd.f32 %v6414_v48, %v9469_v21 }
 0x22d   : > { %2297 = vst.msk [vmem:[#allocation2 + $0x1d0] sm:$0xff] %vm278_vm0, %v2265_v4  ;;  %v6490_v42 = vpop.f32.mrf.mxu0 }
 0x22e   : > { %7495 = vrot.lane.b32.xlu1 %v9575_v0, %s8522_s18  ;;  %v2063_v22 = vadd.f32 %v6489_v27, %v9469_v21 }
 0x22f   : > { %v6491_v1 = vpop.f32.mrf.mxu0 }
 0x230   : > { %v6492_v55 = vadd.f32 %v6491_v1, %v6490_v42  ;;  %v2224_v10 = vadd.f32 %v2223_v15, %v2063_v22  ;;  %v2362_v33 = vld [vmem:[#allocation2 + $0x1c8] sm:$0xff]  ;;  %v8396_v15 = vld [vmem:[%s11259_s3 + $0x70] sm:$0xff]  }
 0x231   : > { %6519 = vmatprep.subr.bf16.mxu1 %v8396_v15 }
 0x232   : > { %v2066_v46 = vadd.f32 %v6492_v55, %v9469_v21  ;;  %v2266_v35 = vmax.f32 %v2224_v10, 0.0  ;;  %6520 = vmatpush3.bf16.msra.mxu1 %v8397_v47 }
 0x234   : > { %2298 = vst.msk [vmem:[#allocation2 + $0x1e8] sm:$0xff] %vm278_vm0, %v2266_v35  ;;  %v2227_v38 = vadd.f32 %v2226_v8, %v2066_v46  ;;  %v2363_v59 = vld [vmem:[#allocation2 + $0x1d0] sm:$0xff]  ;;  %v1954_v8 = vadd.f32 %v6408_v5, %v9469_v21  ;;  %v6426_v35 = vadd.f32 %v9464_v6, %v9462_v12  ;;  %v1967_v12 = vadd.f32 %v9454_v31, %v9469_v21  ;;  %v8398_v6 = vld [vmem:[%s11259_s3 + $0x68] sm:$0xff]  }
 0x235   : > { %v6493_v34 = vpop.f32.mrf.mxu0  ;;  %v7499_v32 = vpack.i.bf16 %v2363_v59, %v2362_v33  ;;  %v1975_v33 = vadd.f32 %v9460_v9, %v9469_v21  ;;  %6521 = vmatprep.subr.bf16.mxu1 %v8398_v6 }
 0x236   : > { %v2267_v45 = vmax.f32 %v2227_v38, 0.0 }
 0x237   : > { %v6494_v44 = vpop.f32.mrf.mxu0  ;;  %7500 = vrot.lane.b32.xlu0 %v7499_v32, %s8522_s18 }
 0x238   : > { %2299 = vst.msk [vmem:[#allocation2 + $0x1f0] sm:$0xff] %vm278_vm0, %v2267_v45  ;;  %v6495_v56 = vadd.f32 %v6494_v44, %v6493_v34  ;;  %v6420_v34 = vadd.f32 %v9458_v16, %v9456_v50  ;;  %v8399_v44 = vld [vmem:[%s11259_s3 + $0x28] sm:$0xff]   ;;  %v1978_v16 = vadd.f32 %v6426_v35, %v9469_v21 }
 0x239   : > { %v6496_v26 = vpop.f32.mrf.mxu0  ;;  %6522 = vmatpush3.bf16.msra.mxu1 %v8399_v44 }
 0x23a   : > { %v2071_v23 = vadd.f32 %v6495_v56, %v9469_v21  ;;  %v1970_v41 = vadd.f32 %v6420_v34, %v9469_v21  ;;  %v8405_v34 = vld [vmem:[%s11259_s3 + $0x10] sm:$0xff]  }
 0x23b   : > { %v6497_v11 = vpop.f32.mrf.mxu0  ;;  %v2364_v19 = vld [vmem:[#allocation2 + $0x1e8] sm:$0xff] }
 0x23c   : > { %v2232_v18 = vadd.f32 %v6811_v51, %v2071_v23  ;;  %v6498_v60 = vadd.f32 %v6497_v11, %v6496_v26 }
 0x23d   : > { %v6783_v28 = vpop.f32.mrf.mxu0 }
 0x23e   : > { %v2268_v51 = vmax.f32 %v2232_v18, 0.0  ;;  %v2074_v4 = vadd.f32 %v6498_v60, %v9469_v21  ;;  %v2120_v61 = vadd.f32 %v6783_v28, %v1959_v37  ;;  %v8400_v60 = vld [vmem:[%s11259_s3 + $0x60] sm:$0xff]  }
 0x23f   : > { %v2111_v7 = vpop.f32.mrf.mxu0  ;;  %v2365_v2 = vld [vmem:[#allocation2 + $0x1f0] sm:$0xff]  ;;  %v8401_v37 = vld [vmem:[%s11259_s3 + $0x20] sm:$0xff]   ;;  %6523 = vmatprep.subr.bf16.mxu1 %v8400_v60 }
 0x240   : > { %2300 = vst.msk [vmem:[#allocation2 + $0x208] sm:$0xff] %vm278_vm0, %v2268_v51  ;;  %v2235_v27 = vadd.f32 %v6812_v54, %v2074_v4  ;;  %v2240_v42 = vmax.f32 %v2120_v61, 0.0  ;;  %v2112_v22 = vadd.f32 %v2111_v7, %v1951_v20  ;;  %v7504_v1 = vpack.i.bf16 %v2365_v2, %v2364_v19  ;;  %6524 = vmatpush3.bf16.msra.mxu1 %v8401_v37  ;;  %v8402_v2 = vld [vmem:[%s11259_s3 + $0x58] sm:$0xff]  }
 0x241   : > { %v6784_v55 = vpop.f32.mrf.mxu0  ;;  %6525 = vmatprep.subr.bf16.mxu1 %v8402_v2 }
 0x242   : > { %v2269_v10 = vmax.f32 %v2235_v27, 0.0  ;;  %2272 = vst.msk [vmem:[#allocation2 + $0x48] sm:$0xff] %vm278_vm0, %v2240_v42  ;;  %v2238_v24 = vmax.f32 %v2112_v22, 0.0  ;;  %v2123_v14 = vadd.f32 %v6784_v55, %v1962_v40  ;;  %7505 = vrot.lane.b32.xlu1 %v7504_v1, %s8522_s18  ;;  %v8403_v27 = vld [vmem:[%s11259_s3 + $0x18] sm:$0xff]  }
 0x243   : > { %v2114_v46 = vpop.f32.mrf.mxu0 }
 0x244   : > { %2301 = vst.msk [vmem:[#allocation2 + $0x210] sm:$0xff] %vm278_vm0, %v2269_v10  ;;  %2270 = vst.msk [vmem:[#allocation2 + $0x28] sm:$0xff] %vm278_vm0, %v2238_v24  ;;  %v2241_v54 = vmax.f32 %v2123_v14, 0.0  ;;  %v2115_v38 = vadd.f32 %v2114_v46, %v1954_v8  ;;  %6526 = vmatpush3.bf16.msra.mxu1 %v8403_v27 }
 0x245   : > { %v6787_v59 = vpop.f32.mrf.mxu0 }
 0x246   : > { %2273 = vst.msk [vmem:[#allocation2 + $0x50] sm:$0xff] %vm278_vm0, %v2241_v54  ;;  %v2239_v32 = vmax.f32 %v2115_v38, 0.0  ;;  %v2136_v45 = vadd.f32 %v6787_v59, %v1975_v33  ;;  %v8404_v59 = vld [vmem:[%s11259_s3 + $0x50] sm:$0xff]  }
 0x247   : > { %v2127_v9 = vpop.f32.mrf.mxu0  ;;  %6527 = vmatprep.subr.bf16.mxu1 %v8404_v59 }
 0x248   : > { %2271 = vst.msk [vmem:[#allocation2 + $0x30] sm:$0xff] %vm278_vm0, %v2239_v32  ;;  %v2244_v56 = vmax.f32 %v2136_v45, 0.0  ;;  %v2128_v50 = vadd.f32 %v2127_v9, %v1967_v12  ;;  %6528 = vmatpush3.bf16.msra.mxu1 %v8405_v34  ;;  %v8406_v45 = vld [vmem:[%s11259_s3 + $0x48] sm:$0xff]   ;;  %v3561_v9 = vpack.c.bf16 %v9487_v52, %v9485_v43  ;;  %v8408_v52 = vld [vmem:[%s11259_s3 + $0x40] sm:$0xff]  }
 0x249   : > { %v6788_v26 = vpop.f32.mrf.mxu0  ;;  %v9634_v18 = vld [vmem:[#allocation2 + $0x47] sm:$0xff]  ;;  %6529 = vmatprep.subr.bf16.mxu1 %v8406_v45  ;;  %v9810_v45 = vld [vmem:[#allocation2 + $0x1b1] sm:$0xff] }
 0x24a   : > { %2276 = vst.msk [vmem:[#allocation2 + $0x88] sm:$0xff] %vm278_vm0, %v2244_v56  ;;  %v2242_v31 = vmax.f32 %v2128_v50, 0.0  ;;  %v2139_v62 = vadd.f32 %v6788_v26, %v1978_v16  ;;  %v9647_v51 = vld [vmem:[#allocation2 + $0x48] sm:$0xff]  ;;  %v3564_v50 = vpack.c.bf16 %v9516_v13, %v9514_v17  ;;  %v8409_v17 = vld [vmem:[%s11259_s3] sm:$0xff]  }
 0x24b   : > { %v2130_v23 = vpop.f32.mrf.mxu0  ;;  %v9659_v40 = vld [vmem:[#allocation2 + $0x28] sm:$0xff] }
 0x24c   : > { %2274 = vst.msk [vmem:[#allocation2 + $0x68] sm:$0xff] %vm278_vm0, %v2242_v31  ;;  %v2245_v48 = vmax.f32 %v2139_v62, 0.0  ;;  %v2131_v11 = vadd.f32 %v2130_v23, %v1970_v41  ;;  %v9681_v38 = vld [vmem:[#allocation2 + $0x27] sm:$0xff]  ;;  %v2569_v31 = vld [vmem:[#allocation2 + $0xf1] sm:$0xff] }
 0x24d   : > { %v2558_v28 = vld [vmem:[#allocation2 + $0x49] sm:$0xff]  ;;  %v2559_v20 = vld [vmem:[#allocation2 + $0x51] sm:$0xff] }
 0x24e   : > { %v9642_v15 = vld [vmem:[#allocation2 + $0x4f] sm:$0xff]  ;;  %2277 = vst.msk [vmem:[#allocation2 + $0x90] sm:$0xff] %vm278_vm0, %v2245_v48  ;;  %v2243_v21 = vmax.f32 %v2131_v11, 0.0  ;;  %v3552_v47 = vpack.c.bf16 %v2559_v20, %v2558_v28  ;;  %v7514_v42 = vpack.i.bf16 %v2559_v20, %v2558_v28  ;;  %v9799_v34 = vld [vmem:[#allocation2 + $0xe7] sm:$0xff] }
 0x24f   : > { %v7529_v5 = vpack.i.bf16 %v9642_v15, %v9634_v18  ;;  %v9649_v4 = vld [vmem:[#allocation2 + $0x50] sm:$0xff]  ;;  %v8407_v12 = vld [vmem:[%s11259_s3 + $0x8] sm:$0xff]   ;;  %11289 = vst [vmem:[#allocation7_spill] sm:$0xff] %v9799_v34 }
 0x250   : > { %v7509_v61 = vpack.i.bf16 %v9649_v4, %v9647_v51  ;;  %v9653_v7 = vld [vmem:[#allocation2 + $0x30] sm:$0xff]  ;;  %2275 = vst.msk [vmem:[#allocation2 + $0x70] sm:$0xff] %vm278_vm0, %v2243_v21  ;;  %6817 = vmatprep.mubr.msk.bf16.mxu0 %vm278_vm0, %v3552_v47  ;;  %6530 = vmatpush3.bf16.msra.mxu1 %v8407_v12 }
 0x251   : > { %7530 = vrot.lane.b32.xlu1 %v7529_v5, %s8524_s22  ;;  %v7534_v19 = vpack.i.bf16 %v9653_v7, %v9659_v40  ;;  %v2368_v22 = vld [vmem:[#allocation2 + $0x29] sm:$0xff]  ;;  %v2369_v1 = vld [vmem:[#allocation2 + $0x31] sm:$0xff]  ;;  %6531 = vmatprep.subr.bf16.mxu1 %v8408_v52 }
 0x252   : > { %7510 = vrot.lane.b32.xlu0 %v7509_v61, %s8522_s18  ;;  %v7539_v55 = vpack.i.bf16 %v2369_v1, %v2368_v22  ;;  %v9675_v46 = vld [vmem:[#allocation2 + $0x2f] sm:$0xff] }
 0x253   : > { %v7549_v33 = vpack.i.bf16 %v9675_v46, %v9681_v38  ;;  %v9693_v32 = vld [vmem:[#allocation2 + $0x67] sm:$0xff]  ;;  %v9739_v23 = vld [vmem:[#allocation2 + $0x111] sm:$0xff] }
 0x254   : > { %v7554_v6 = vpack.i.bf16 %v9693_v32, %v9642_v15  ;;  %v9718_v26 = vld [vmem:[#allocation2 + $0x88] sm:$0xff]  ;;  %6532 = vmatpush3.bf16.msra.mxu1 %v8409_v17  ;;  %v9758_v47 = vld [vmem:[#allocation2 + $0x131] sm:$0xff] }
 0x255   : > { %7535 = vrot.lane.b32.xlu1 %v7534_v19, %s8522_s18  ;;  %v2562_v10 = vld [vmem:[#allocation2 + $0x89] sm:$0xff]  ;;  %v2563_v24 = vld [vmem:[#allocation2 + $0x91] sm:$0xff] }
 0x256   : > { %7515 = vrot.lane.b32.xlu0 %v7514_v42, %s8523_s15  ;;  %v3558_v54 = vpack.c.bf16 %v2563_v24, %v2562_v10  ;;  %v9705_v44 = vld [vmem:[#allocation2 + $0x8f] sm:$0xff]  ;;  %v7574_v20 = vpack.i.bf16 %v2563_v24, %v2562_v10  ;;  %v9833_v17 = vld [vmem:[#allocation2 + $0x107] sm:$0xff] }
 0x257   : > { %v9671_v14 = vld [vmem:[#allocation2 + $0x69] sm:$0xff]  ;;  %v9673_v8 = vld [vmem:[#allocation2 + $0x71] sm:$0xff]  ;;  %v7564_v16 = vpack.i.bf16 %v9501_v39, %v9705_v44  ;;  %11291 = vst [vmem:[#allocation9_spill] sm:$0xff] %v9833_v17 }
 0x258   : > { %v3555_v35 = vpack.c.bf16 %v9673_v8, %v9671_v14  ;;  %v9710_v56 = vld [vmem:[#allocation2 + $0x90] sm:$0xff]  ;;  %v9731_v39 = vld [vmem:[#allocation2 + $0x87] sm:$0xff]  ;;  %v7594_v5 = vpack.i.bf16 %v9634_v18, %v9671_v14 }
 0x259   : > { %7540 = vrot.lane.b32.xlu1 %v7539_v55, %s8523_s15  ;;  %v7559_v43 = vpack.i.bf16 %v9710_v56, %v9718_v26  ;;  %v9733_v13 = vld [vmem:[#allocation2 + $0xe9] sm:$0xff]  ;;  %v7579_v62 = vpack.i.bf16 %v9705_v44, %v9731_v39  ;;  %v9764_v19 = vld [vmem:[#allocation2 + $0x151] sm:$0xff] }
 0x25a   : > { %7520 = vrot.lane.b32.xlu0 %v7509_v61, %s8524_s22  ;;  %6818 = vmatmul.mubr.msk.bf16.vlgmr.msra.gmra.mxu0 %vm278_vm0, %v3555_v35  ;;  %v9737_v41 = vld [vmem:[#allocation2 + $0x109] sm:$0xff]  ;;  %v3567_v11 = vpack.c.bf16 %v2569_v31, %v9733_v13  ;;  %v9786_v24 = vld [vmem:[#allocation2 + $0x191] sm:$0xff]  ;;  %v7609_v35 = vpack.i.bf16 %v9673_v8, %v9671_v14  ;;  %v7634_v52 = vpack.i.bf16 %v2569_v31, %v9733_v13 }
 0x25b   : > { %6821 = vmatprep.mubr.msk.bf16.mxu0 %vm278_vm0, %v3558_v54  ;;  %v9741_v48 = vld [vmem:[#allocation2 + $0x70] sm:$0xff]  ;;  %v3570_v60 = vpack.c.bf16 %v9739_v23, %v9737_v41  ;;  %v9748_v37 = vld [vmem:[#allocation2 + $0x68] sm:$0xff] }
 0x25c   : > { %v7589_v28 = vpack.i.bf16 %v9741_v48, %v9748_v37  ;;  %v9756_v21 = vld [vmem:[#allocation2 + $0x129] sm:$0xff] }
 0x25d   : > { %7550 = vrot.lane.b32.xlu1 %v7549_v33, %s8524_s22  ;;  %v9762_v61 = vld [vmem:[#allocation2 + $0x149] sm:$0xff]  ;;  %v3573_v27 = vpack.c.bf16 %v9758_v47, %v9756_v21 }
 0x25e   : > { %7525 = vrot.lane.b32.xlu0 %v7514_v42, %s8522_s18  ;;  %v9766_v2 = vld [vmem:[#allocation2 + $0x6f] sm:$0xff]  ;;  %v3576_v42 = vpack.c.bf16 %v9764_v19, %v9762_v61 }
 0x25f   : > { %v7599_v22 = vpack.i.bf16 %v9731_v39, %v9766_v2  ;;  %v9780_v1 = vld [vmem:[#allocation2 + $0x169] sm:$0xff]  ;;  %v7639_v12 = vpack.i.bf16 %v9766_v2, %v9693_v32 }
 0x260   : > { %v9784_v10 = vld [vmem:[#allocation2 + $0x189] sm:$0xff] }
 0x261   : > { %7555 = vrot.lane.b32.xlu1 %v7554_v6, %s8523_s15  ;;  %v9790_v54 = vld [vmem:[#allocation2 + $0xef] sm:$0xff]  ;;  %v3582_v59 = vpack.c.bf16 %v9786_v24, %v9784_v10 }
 0x262   : > { %7545 = vrot.lane.b32.xlu0 %v7539_v55, %s8522_s18  ;;  %6822 = vmatmul.mubr.msk.bf16.gmra.mxu0 %vm278_vm0, %v3561_v9  ;;  %v9782_v55 = vld [vmem:[#allocation2 + $0x171] sm:$0xff]  ;;  %11288 = vst [vmem:[#allocation6_spill] sm:$0xff] %v9790_v54  ;;  %v7614_v14 = vpack.i.bf16 %v9790_v54, %v9799_v34  ;;  %v9814_v6 = vld [vmem:[#allocation2 + $0x1c9] sm:$0xff] }
 0x263   : > { %6825 = vmatprep.mubr.msk.bf16.mxu0 %vm278_vm0, %v3564_v50  ;;  %v3579_v33 = vpack.c.bf16 %v9782_v55, %v9780_v1  ;;  %v9816_v9 = vld [vmem:[#allocation2 + $0x1d1] sm:$0xff] }
 0x265   : > { %7565 = vrot.lane.b32.xlu1 %v7564_v16, %s8523_s15  ;;  %v7644_v16 = vpack.i.bf16 %v9673_v8, %v9496_v29  ;;  %v9842_v29 = vld [vmem:[#allocation2 + $0x209] sm:$0xff]  ;;  %v9844_v8 = vld [vmem:[#allocation2 + $0x211] sm:$0xff] }
 0x266   : > { %7560 = vrot.lane.b32.xlu0 %v7559_v43, %s8522_s18  ;;  %v3594_v31 = vpack.c.bf16 %v9844_v8, %v9842_v29 }
 0x269   : > { %7580 = vrot.lane.b32.xlu1 %v7579_v62, %s8524_s22  ;;  %v9838_v62 = vld [vmem:[#allocation2 + $0x1f1] sm:$0xff] }
 0x26a   : > { %7570 = vrot.lane.b32.xlu0 %v7559_v43, %s8524_s22  ;;  %6826 = vmatmul.mubr.msk.bf16.gmra.mxu0 %vm278_vm0, %v3567_v11  ;;  %v9828_v43 = vld [vmem:[#allocation2 + $0x10f] sm:$0xff] }
 0x26b   : > { %6829 = vmatprep.mubr.msk.bf16.mxu0 %vm278_vm0, %v3570_v60  ;;  %11290 = vst [vmem:[#allocation8_spill] sm:$0xff] %v9828_v43  ;;  %v7649_v11 = vpack.i.bf16 %v9828_v43, %v9833_v17  ;;  %v9855_v60 = vld [vmem:[#allocation2 + $0x12f] sm:$0xff] }
 0x26c   : > { %11292 = vst [vmem:[#allocation10_spill] sm:$0xff] %v9855_v60  ;;  %v2556_v43 = vld [vmem:[#allocation2 + $0x228] sm:$0xff] }
 0x26d   : > { %7590 = vrot.lane.b32.xlu1 %v7589_v28, %s8522_s18 }
 0x26e   : > { %7575 = vrot.lane.b32.xlu0 %v7574_v20, %s8522_s18 }
 0x271   : > { %7595 = vrot.lane.b32.xlu1 %v7594_v5, %s8523_s15  ;;  %v9867_v5 = vpop.permute.xlu0 %7415 }
 0x272   : > { %7585 = vrot.lane.b32.xlu0 %v7574_v20, %s8523_s15  ;;  %6830 = vmatmul.mubr.msk.bf16.gmra.mxu0 %vm278_vm0, %v3573_v27  ;;  %v7669_v20 = vpack.i.bf16 %v9739_v23, %v9737_v41  ;;  %v9875_v27 = vld [vmem:[#allocation2 + $0x14f] sm:$0xff]  ;;  %v7694_v41 = vpack.i.bf16 %v9758_v47, %v9756_v21  ;;  %v9879_v23 = vpop.permute.xlu1 %7425 }
 0x273   : > { %6833 = vmatprep.mubr.msk.bf16.mxu0 %vm278_vm0, %v3576_v42  ;;  %11294 = vst [vmem:[#allocation12_spill] sm:$0xff] %v9875_v27  ;;  %v9882_v42 = vld [vmem:[#allocation2 + $0x147] sm:$0xff]  ;;  %v9893_v21 = vld [vmem:[#allocation2 + $0x16f] sm:$0xff] }
 0x274   : > { %11295 = vst [vmem:[#allocation13_spill] sm:$0xff] %v9882_v42  ;;  %11296 = vst [vmem:[#allocation14_spill] sm:$0xff] %v9893_v21 }
 0x275   : > { %7600 = vrot.lane.b32.xlu1 %v7599_v22, %s8523_s15  ;;  %v7699_v22 = vpack.i.bf16 %v9875_v27, %v9882_v42  ;;  %v7418_v42 = vunpack.i.h.bf16 %v9867_v5  ;;  %v7417_v27 = vunpack.i.l.bf16 %v9867_v5  ;;  %v7869_v5 = vpack.i.bf16 %v9844_v8, %v9842_v29 }
 0x276   : > { %7605 = vrot.lane.b32.xlu0 %v7589_v28, %s8524_s22  ;;  %v9860_v28 = vld [vmem:[#allocation2 + $0x127] sm:$0xff] }
 0x277   : > { %11293 = vst [vmem:[#allocation11_spill] sm:$0xff] %v9860_v28 }
 0x279   : > { %7620 = vrot.lane.b32.xlu1 %v9494_v3, %s8523_s15  ;;  %v9808_v3 = vld [vmem:[#allocation2 + $0x1a9] sm:$0xff] }
 0x27a   : > { %7610 = vrot.lane.b32.xlu0 %v7609_v35, %s8522_s18  ;;  %6834 = vmatmul.mubr.msk.bf16.gmra.mxu0 %vm278_vm0, %v3579_v33  ;;  %v3585_v50 = vpack.c.bf16 %v9810_v45, %v9808_v3  ;;  %v9887_v35 = vpop.permute.xlu1 %7450  ;;  %v9900_v33 = vld [vmem:[#allocation2 + $0x167] sm:$0xff] }
 0x27b   : > { %6837 = vmatprep.mubr.msk.bf16.mxu0 %vm278_vm0, %v3582_v59  ;;  %11297 = vst [vmem:[#allocation15_spill] sm:$0xff] %v9900_v33  ;;  %v7719_v59 = vpack.i.bf16 %v9764_v19, %v9762_v61  ;;  %v7744_v61 = vpack.i.bf16 %v9782_v55, %v9780_v1  ;;  %v2326_v19 = vld [vmem:[#allocation2 + $0x187] sm:$0xff] }
 0x27c   : > { %v2328_v55 = vld [vmem:[#allocation2 + $0x1a7] sm:$0xff] }
 0x27d   : > { %7630 = vrot.lane.b32.xlu1 %v9506_v30, %s8524_s22  ;;  %v3588_v30 = vpack.c.bf16 %v9816_v9, %v9814_v6 }
 0x27e   : > { %7615 = vrot.lane.b32.xlu0 %v7614_v14, %s8523_s15  ;;  %v9898_v47 = vpop.permute.xlu1 %7455 }
 0x281   : > { %7640 = vrot.lane.b32.xlu1 %v7639_v12, %s8524_s22  ;;  %v7724_v12 = vpack.i.bf16 %v9893_v21, %v9900_v33 }
 0x282   : > { %7625 = vrot.lane.b32.xlu0 %v9527_v58, %s8524_s22  ;;  %6838 = vmatmul.mubr.msk.bf16.gmra.mxu0 %vm278_vm0, %v3585_v50  ;;  %v9836_v58 = vld [vmem:[#allocation2 + $0x1e9] sm:$0xff]  ;;  %v9910_v50 = vpop.permute.xlu1 %7460 }
 0x283   : > { %6841 = vmatprep.mubr.msk.bf16.mxu0 %vm278_vm0, %v3588_v30  ;;  %v3591_v13 = vpack.c.bf16 %v9838_v62, %v9836_v58  ;;  %v2327_v30 = vld [vmem:[#allocation2 + $0x18f] sm:$0xff] }
 0x285   : > { %7645 = vrot.lane.b32.xlu1 %v7644_v16, %s8523_s15 }
 0x286   : > { %7635 = vrot.lane.b32.xlu0 %v7634_v52, %s8522_s18  ;;  %v9921_v16 = vpop.permute.xlu1 %7465 }
 0x287   : > { %11298 = vst [vmem:[#allocation16_spill] sm:$0xff] %v9921_v16 }
 0x289   : > { %7650 = vrot.lane.b32.xlu1 %v7649_v11, %s8523_s15 }
 0x28a   : > { %7655 = vrot.lane.b32.xlu0 %v9523_v49, %s8523_s15  ;;  %6842 = vmatmul.mubr.msk.bf16.gmra.mxu0 %vm278_vm0, %v3591_v13  ;;  %v7674_v49 = vpack.i.bf16 %v9855_v60, %v9860_v28  ;;  %v9927_v13 = vpop.permute.xlu1 %7475  ;;  %v2588_v60 = vld [vmem:[#allocation2 + $0x229] sm:$0xff] }
 0x28b   : > { %6845 = vmatprep.mubr.msk.bf16.mxu0 %vm278_vm0, %v3594_v31  ;;  %11300 = vst [vmem:[#allocation18_spill] sm:$0xff] %v9927_v13  ;;  %v2329_v31 = vld [vmem:[#allocation2 + $0x1af] sm:$0xff] }
 0x28c   : > { %v2589_v13 = vld [vmem:[#allocation2 + $0x231] sm:$0xff] }
 0x28d   : > { %7660 = vrot.lane.b32.xlu1 %v9535_v36, %s8524_s22  ;;  %v9873_v36 = vpop.permute.xlu0 %7420  ;;  %v3597_v34 = vpack.c.bf16 %v2589_v13, %v2588_v60 }
 0x28e   : > { %7665 = vrot.lane.b32.xlu0 %v7614_v14, %s8524_s22  ;;  %v9934_v1 = vpop.permute.xlu1 %7485 }
 0x28f   : > { %11302 = vst [vmem:[#allocation20_spill] sm:$0xff] %v9934_v1 }
 0x291   : > { %7670 = vrot.lane.b32.xlu1 %v7669_v20, %s8522_s18 }
 0x292   : > { %7675 = vrot.lane.b32.xlu0 %v7674_v49, %s8523_s15  ;;  %6846 = vmatmul.mubr.msk.bf16.gmra.mxu0 %vm278_vm0, %v3597_v34 }
 0x295   : > { %7680 = vrot.lane.b32.xlu1 %v7634_v52, %s8523_s15  ;;  %v7749_v52 = vpack.i.bf16 %v2327_v30, %v2326_v19  ;;  %v2330_v30 = vld [vmem:[#allocation2 + $0x1c7] sm:$0xff] }
 0x296   : > { %7685 = vrot.lane.b32.xlu0 %v9543_v53, %s8524_s22  ;;  %v9890_v53 = vpop.permute.xlu0 %7430 }
 0x299   : > { %7690 = vrot.lane.b32.xlu1 %v7649_v11, %s8524_s22 }
 0x29a   : > { %7695 = vrot.lane.b32.xlu0 %v7694_v41, %s8522_s18  ;;  %v9904_v14 = vpop.permute.xlu0 %7435 }
 0x29d   : > { %7700 = vrot.lane.b32.xlu1 %v7699_v22, %s8523_s15 }
 0x29e   : > { %7705 = vrot.lane.b32.xlu0 %v7669_v20, %s8523_s15  ;;  %v7769_v20 = vpack.i.bf16 %v9786_v24, %v9784_v10  ;;  %v7794_v24 = vpack.i.bf16 %v9810_v45, %v9808_v3 }
 0x2a1   : > { %7710 = vrot.lane.b32.xlu1 %v9551_v57, %s8524_s22  ;;  %v9913_v57 = vpop.permute.xlu0 %7440 }
 0x2a2   : > { %7715 = vrot.lane.b32.xlu0 %v7674_v49, %s8524_s22 }
 0x2a5   : > { %7720 = vrot.lane.b32.xlu1 %v7719_v59, %s8522_s18  ;;  %v9923_v11 = vpop.permute.xlu0 %7445 }
 0x2a6   : > { %7725 = vrot.lane.b32.xlu0 %v7724_v12, %s8523_s15  ;;  %11299 = vst [vmem:[#allocation17_spill] sm:$0xff] %v9923_v11 }
 0x2a9   : > { %7730 = vrot.lane.b32.xlu1 %v7694_v41, %s8523_s15  ;;  %v7774_v41 = vpack.i.bf16 %v2329_v31, %v2328_v55  ;;  %v9961_v55 = vld [vmem:[#allocation2 + $0x1d0] sm:$0xff] }
 0x2aa   : > { %7735 = vrot.lane.b32.xlu0 %v9559_v63, %s8524_s22  ;;  %v9929_v63 = vpop.permute.xlu0 %7470  ;;  %11308 = vst [vmem:[#allocation26_spill] sm:$0xff] %v9961_v55 }
 0x2ab   : > { %11301 = vst [vmem:[#allocation19_spill] sm:$0xff] %v9929_v63  ;;  %v2557_v63 = vld [vmem:[#allocation2 + $0x230] sm:$0xff] }
 0x2ac   : > { %v7884_v29 = vpack.i.bf16 %v2557_v63, %v2556_v43 }
 0x2ad   : > { %7740 = vrot.lane.b32.xlu1 %v7699_v22, %s8524_s22  ;;  %v9942_v22 = vpop.permute.xlu1 %7495 }
 0x2ae   : > { %7745 = vrot.lane.b32.xlu0 %v7744_v61, %s8522_s18  ;;  %v9938_v49 = vpop.permute.xlu0 %7480  ;;  %11304 = vst [vmem:[#allocation22_spill] sm:$0xff] %v9942_v22 }
 0x2af   : > { %11303 = vst [vmem:[#allocation21_spill] sm:$0xff] %v9938_v49  ;;  %v2303_v49 = vld [vmem:[#allocation2 + $0xf] sm:$0xff] }
 0x2b0   : > { %v3359_v54 = vsel %vm278_vm0, %v2303_v49, %v7418_v42 }
 0x2b1   : > { %7750 = vrot.lane.b32.xlu1 %v7749_v52, %s8523_s15 }
 0x2b2   : > { %7755 = vrot.lane.b32.xlu0 %v7719_v59, %s8523_s15  ;;  %v9944_v59 = vpop.permute.xlu0 %7490 }
 0x2b3   : > { %11305 = vst [vmem:[#allocation23_spill] sm:$0xff] %v9944_v59  ;;  %v2553_v59 = vld [vmem:[#allocation2 + $0x1f0] sm:$0xff] }
 0x2b5   : > { %7760 = vrot.lane.b32.xlu1 %v9567_v25, %s8524_s22  ;;  %v9949_v25 = vpop.permute.xlu1 %7505 }
 0x2b6   : > { %7765 = vrot.lane.b32.xlu0 %v7724_v12, %s8524_s22  ;;  %11306 = vst [vmem:[#allocation24_spill] sm:$0xff] %v9949_v25  ;;  %v2331_v12 = vld [vmem:[#allocation2 + $0x1cf] sm:$0xff]  ;;  %v9951_v10 = vpop.permute.xlu0 %7500 }
 0x2b7   : > { %11307 = vst [vmem:[#allocation25_spill] sm:$0xff] %v9951_v10  ;;  %v7799_v31 = vpack.i.bf16 %v2331_v12, %v2330_v30  ;;  %v2332_v12 = vld [vmem:[#allocation2 + $0x1e7] sm:$0xff] }
 0x2b9   : > { %7770 = vrot.lane.b32.xlu1 %v7769_v20, %s8522_s18 }
 0x2ba   : > { %7775 = vrot.lane.b32.xlu0 %v7774_v41, %s8523_s15 }
 0x2bd   : > { %7780 = vrot.lane.b32.xlu1 %v7744_v61, %s8523_s15 }
 0x2be   : > { %7785 = vrot.lane.b32.xlu0 %v9575_v0, %s8524_s22  ;;  %v9965_v0 = vld [vmem:[#allocation2 + $0x1c8] sm:$0xff] }
 0x2bf   : > { %11309 = vst [vmem:[#allocation27_spill] sm:$0xff] %v9965_v0  ;;  %v7809_v3 = vpack.i.bf16 %v9961_v55, %v9965_v0  ;;  %v2552_v55 = vld [vmem:[#allocation2 + $0x1e8] sm:$0xff] }
 0x2c1   : > { %7790 = vrot.lane.b32.xlu1 %v7749_v52, %s8524_s22  ;;  %v2333_v52 = vld [vmem:[#allocation2 + $0x1ef] sm:$0xff] }
 0x2c2   : > { %7795 = vrot.lane.b32.xlu0 %v7794_v24, %s8522_s18  ;;  %v7824_v22 = vpack.i.bf16 %v2333_v52, %v2332_v12  ;;  %v2523_v52 = vld [vmem:[#allocation2 + $0x20f] sm:$0xff]  ;;  %v2522_v12 = vld [vmem:[#allocation2 + $0x207] sm:$0xff] }
 0x2c3   : > { %v9957_v19 = vpop.permute.xlu1 %7530  ;;  %v9997_v1 = vpack.i.bf16 %v2523_v52, %v2522_v12  ;;  %v2302_v12 = vld [vmem:[#allocation2 + $0x7] sm:$0xff] }
 0x2c4   : > { %v9959_v61 = vpop.permute.xlu0 %7510 }
 0x2c5   : > { %7800 = vrot.lane.b32.xlu1 %v7799_v31, %s8523_s15 }
 0x2c6   : > { %7805 = vrot.lane.b32.xlu0 %v7769_v20, %s8523_s15  ;;  %v7819_v20 = vpack.i.bf16 %v9816_v9, %v9814_v6  ;;  %v7844_v9 = vpack.i.bf16 %v9838_v62, %v9836_v58 }
 0x2c7   : > { %v9967_v25 = vpop.permute.xlu1 %7535 }
 0x2c8   : > { %v9971_v45 = vpop.permute.xlu0 %7515 }
 0x2c9   : > { %7810 = vrot.lane.b32.xlu1 %v7809_v3, %s8524_s22 }
 0x2ca   : > { %7815 = vrot.lane.b32.xlu0 %v7774_v41, %s8524_s22  ;;  %v7834_v41 = vpack.i.bf16 %v2553_v59, %v2552_v55  ;;  %v2554_v55 = vld [vmem:[#allocation2 + $0x208] sm:$0xff] }
 0x2cb   : > { %v9975_v30 = vpop.permute.xlu1 %7540 }
 0x2cc   : > { %v9979_v10 = vpop.permute.xlu0 %7520 }
 0x2cd   : > { %7820 = vrot.lane.b32.xlu1 %v7819_v20, %s8522_s18  ;;  %v7522_v13 = vunpack.i.l.bf16 %v9979_v10 }
 0x2ce   : > { %7825 = vrot.lane.b32.xlu0 %v7824_v22, %s8523_s15 }
 0x2cf   : > { %v9983_v0 = vpop.permute.xlu1 %7550 }
 0x2d0   : > { %v9985_v3 = vpop.permute.xlu0 %7525 }
 0x2d1   : > { %7830 = vrot.lane.b32.xlu1 %v7794_v24, %s8523_s15  ;;  %v2555_v24 = vld [vmem:[#allocation2 + $0x210] sm:$0xff] }
 0x2d2   : > { %7835 = vrot.lane.b32.xlu0 %v7834_v41, %s8524_s22  ;;  %v7859_v62 = vpack.i.bf16 %v2555_v24, %v2554_v55  ;;  %v2525_v41 = vld [vmem:[#allocation2 + $0x22f] sm:$0xff]  ;;  %v7423_v24 = vunpack.i.h.bf16 %v9873_v36  ;;  %v7422_v55 = vunpack.i.l.bf16 %v9873_v36  ;;  %v7552_v36 = vunpack.i.l.bf16 %v9983_v0 }
 0x2d3   : > { %v9989_v21 = vpop.permute.xlu1 %7555 }
 0x2d4   : > { %v7546_v6 = vpop.permute.xlu0 %7545  ;;  %v3391_v60 = vsel %vm1507_vm4, %v3359_v54, %v7423_v24  ;;  %v7527_v54 = vunpack.i.l.bf16 %v9985_v3  ;;  %v7542_v24 = vunpack.i.l.bf16 %v9975_v30 }
 0x2d5   : > { %7840 = vrot.lane.b32.xlu1 %v7799_v31, %s8524_s22  ;;  %v2524_v31 = vld [vmem:[#allocation2 + $0x227] sm:$0xff]  ;;  %v7548_v28 = vunpack.i.h.bf16 %v7546_v6  ;;  %v7547_v11 = vunpack.i.l.bf16 %v7546_v6  ;;  %v7537_v6 = vunpack.i.l.bf16 %v9967_v25 }
 0x2d6   : > { %7845 = vrot.lane.b32.xlu0 %v7844_v9, %s8522_s18 }
 0x2d7   : > { %v9995_v33 = vpop.permute.xlu1 %7565  ;;  %v3455_v16 = vsel %vm278_vm0, %v9653_v7, %v7548_v28  ;;  %v7528_v7 = vunpack.i.h.bf16 %v9985_v3 }
 0x2d8   : > { %v9999_v59 = vpop.permute.xlu0 %7560 }
 0x2d9   : > { %7850 = vrot.lane.b32.xlu1 %v9997_v1, %s8523_s15 }
 0x2da   : > { %7855 = vrot.lane.b32.xlu0 %v7819_v20, %s8523_s15  ;;  %v7874_v20 = vpack.i.bf16 %v2525_v41, %v2524_v31  ;;  %v7553_v41 = vunpack.i.h.bf16 %v9983_v0  ;;  %v3454_v0 = vsel %vm278_vm0, %v9659_v40, %v7547_v11 }
 0x2db   : > { %v10004_v58 = vpop.permute.xlu1 %7580 }
 0x2dc   : > { %v10008_v52 = vpop.permute.xlu0 %7570  ;;  %v3423_v43 = vsel %vm1540_vm5, %v3391_v60, %v7553_v41 }
 0x2dd   : > { %7860 = vrot.lane.b32.xlu1 %v7859_v62, %s8524_s22  ;;  %v3358_v62 = vsel %vm278_vm0, %v2302_v12, %v7417_v27  ;;  %v7523_v27 = vunpack.i.h.bf16 %v9979_v10  ;;  %v7538_v10 = vunpack.i.h.bf16 %v9967_v25  ;;  %v7558_v12 = vunpack.i.h.bf16 %v9989_v21 }
 0x2de   : > { %7865 = vrot.lane.b32.xlu0 %v7824_v22, %s8524_s22  ;;  %v7557_v22 = vunpack.i.l.bf16 %v9989_v21  ;;  %v3390_v8 = vsel %vm1507_vm4, %v3358_v62, %v7422_v55  ;;  %v3457_v21 = vsel %vm278_vm0, %v9649_v4, %v7528_v7  ;;  %v3456_v25 = vsel %vm278_vm0, %v9647_v51, %v7527_v54 }
 0x2df   : > { %v10014_v17 = vpop.permute.xlu1 %7590  ;;  %v3422_v63 = vsel %vm1540_vm5, %v3390_v8, %v7552_v36  ;;  %v3360_v36 = vsel %vm278_vm0, %v9681_v38, %v7537_v6  ;;  %v7532_v38 = vunpack.i.l.bf16 %v9957_v19  ;;  %v7567_v54 = vunpack.i.l.bf16 %v9995_v33 }
 0x2e0   : > { %v10021_v31 = vpop.permute.xlu0 %7575  ;;  %v3487_v34 = vsel %vm1507_vm4, %v3455_v16, %v7557_v22  ;;  %v3550_v11 = vpack.c.bf16 %v3423_v43, %v3422_v63 }
 0x2e1   : > { %7870 = vrot.lane.b32.xlu1 %v7869_v5, %s8522_s18  ;;  %v3519_v40 = vsel %vm1540_vm5, %v3487_v34, %v7523_v27  ;;  %v7512_v34 = vunpack.i.l.bf16 %v9959_v61 }
 0x2e2   : > { %7875 = vrot.lane.b32.xlu0 %v7874_v20, %s8523_s15  ;;  %v7543_v20 = vunpack.i.h.bf16 %v9975_v30  ;;  %v3361_v30 = vsel %vm278_vm0, %v9675_v46, %v7538_v10  ;;  %v7533_v46 = vunpack.i.h.bf16 %v9957_v19  ;;  %v7572_v19 = vunpack.i.l.bf16 %v10008_v52 }
 0x2e3   : > { %v10033_v42 = vpop.permute.xlu1 %7595 }
 0x2e4   : > { %v7598_v28 = vunpack.i.h.bf16 %v10033_v42  ;;  %v10038_v49 = vpop.permute.xlu0 %7585  ;;  %v3393_v27 = vsel %vm1507_vm4, %v3361_v30, %v7543_v20 }
 0x2e5   : > { %7880 = vrot.lane.b32.xlu1 %v7844_v9, %s8523_s15  ;;  %v3425_v6 = vsel %vm1540_vm5, %v3393_v27, %v7533_v46  ;;  %v7568_v27 = vunpack.i.h.bf16 %v9995_v33 }
 0x2e6   : > { %7885 = vrot.lane.b32.xlu0 %v7884_v29, %s8524_s22  ;;  %v3486_v16 = vsel %vm1507_vm4, %v3454_v0, %v7598_v28  ;;  %v3488_v29 = vsel %vm1507_vm4, %v3456_v25, %v7558_v12  ;;  %v7513_v28 = vunpack.i.h.bf16 %v9959_v61  ;;  %v7573_v12 = vunpack.i.h.bf16 %v10008_v52 }
 0x2e7   : > { %v7601_v3 = vpop.permute.xlu1 %7600  ;;  %v3518_v55 = vsel %vm1540_vm5, %v3486_v16, %v7522_v13  ;;  %v7577_v52 = vunpack.i.l.bf16 %v10021_v31  ;;  %v7452_v25 = vunpack.i.l.bf16 %v9887_v35 }
 0x2e8   : > { %v7602_v9 = vunpack.i.l.bf16 %v7601_v3  ;;  %v7606_v5 = vpop.permute.xlu0 %7605  ;;  %v3551_v62 = vpack.c.bf16 %v3519_v40, %v3518_v55  ;;  %v7603_v0 = vunpack.i.h.bf16 %v7601_v3  ;;  %v7517_v3 = vunpack.i.l.bf16 %v9971_v45 }
 0x2e9   : > { %v7608_v22 = vunpack.i.h.bf16 %v7606_v5  ;;  %v7607_v41 = vunpack.i.l.bf16 %v7606_v5  ;;  %7890 = vrot.lane.b32.xlu1 %v9997_v1, %s8524_s22  ;;  %v3392_v1 = vsel %vm1507_vm4, %v3360_v36, %v7542_v24  ;;  %v7518_v24 = vunpack.i.h.bf16 %v9971_v45 }
 0x2ea   : > { %3829 = vmatprep.mubr.bf16.mxu1 %v3551_v62  ;;  %v3489_v8 = vsel %vm1507_vm4, %v3457_v21, %v7602_v9  ;;  %v3424_v10 = vsel %vm1540_vm5, %v3392_v1, %v7532_v38  ;;  %v7433_v62 = vunpack.i.h.bf16 %v9890_v53  ;;  %v7438_v21 = vunpack.i.h.bf16 %v9904_v14 }
 0x2eb   : > { %v10068_v4 = vpop.permute.xlu1 %7620  ;;  %3830 = vmatmul.mubr.bf16.vlgmr.msra.gmra.mxu1 %v3550_v11  ;;  %v3520_v51 = vsel %vm1540_vm5, %v3488_v29, %v7607_v41  ;;  %v3521_v60 = vsel %vm1540_vm5, %v3489_v8, %v7608_v22  ;;  %v3553_v9 = vpack.c.bf16 %v3425_v6, %v3424_v10  ;;  %v7437_v45 = vunpack.i.l.bf16 %v9904_v14 }
 0x2ec   : > { %v7611_v13 = vpop.permute.xlu0 %7610  ;;  %v3554_v7 = vpack.c.bf16 %v3521_v60, %v3520_v51  ;;  %v3362_v41 = vsel %vm278_vm0, %v9634_v18, %v7512_v34  ;;  %v3363_v30 = vsel %vm278_vm0, %v9642_v15, %v7513_v28  ;;  %v7578_v51 = vunpack.i.h.bf16 %v10021_v31 }
 0x2ed   : > { %v7613_v43 = vunpack.i.h.bf16 %v7611_v13  ;;  %v7612_v63 = vunpack.i.l.bf16 %v7611_v13  ;;  %v3460_v14 = vsel %vm278_vm0, %v9718_v26, %v7577_v52  ;;  %v3394_v60 = vsel %vm1507_vm4, %v3362_v41, %v7517_v3  ;;  %v8438_v13 = vld [vmem:[#allocation2 + $0xa8] sm:$0xff] }
 0x2ee   : > { %3837 = vmatprep.mubr.bf16.mxu1 %v3554_v7  ;;  %v3395_v1 = vsel %vm1507_vm4, %v3363_v30, %v7518_v24  ;;  %v7593_v18 = vunpack.i.h.bf16 %v10014_v17  ;;  %v7432_v38 = vunpack.i.l.bf16 %v9890_v53  ;;  %v3462_v31 = vsel %vm278_vm0, %v8438_v13, %v7437_v45 }
 0x2ef   : > { %v3459_v16 = vsel %vm278_vm0, %v9741_v48, %v7613_v43  ;;  %v3458_v61 = vsel %vm278_vm0, %v9748_v37, %v7612_v63  ;;  %v10087_v20 = vpop.permute.xlu1 %7630  ;;  %v7453_v7 = vunpack.i.h.bf16 %v9887_v35  ;;  %v7457_v26 = vunpack.i.l.bf16 %v9898_v47  ;;  %v8439_v35 = vld [vmem:[#allocation2 + $0xb0] sm:$0xff] }
 0x2f0   : > { %v10091_v55 = vpop.permute.xlu0 %7615  ;;  %v3490_v40 = vsel %vm1507_vm4, %v3458_v61, %v7603_v0  ;;  %v3491_v11 = vsel %vm1507_vm4, %v3459_v16, %v7567_v54  ;;  %v7592_v34 = vunpack.i.l.bf16 %v10014_v17  ;;  %v3492_v54 = vsel %vm1507_vm4, %v3460_v14, %v7568_v27 }
 0x2f1   : > { %v3522_v48 = vsel %vm1540_vm5, %v3490_v40, %v7572_v19  ;;  %v3523_v5 = vsel %vm1540_vm5, %v3491_v11, %v7573_v12  ;;  %v7458_v0 = vunpack.i.h.bf16 %v9898_v47  ;;  %v3461_v53 = vsel %vm278_vm0, %v9710_v56, %v7578_v51 }
 0x2f2   : > { %v3557_v37 = vpack.c.bf16 %v3523_v5, %v3522_v48  ;;  %v7597_v10 = vunpack.i.l.bf16 %v10033_v42  ;;  %v3463_v12 = vsel %vm278_vm0, %v8439_v35, %v7438_v21  ;;  %v3365_v17 = vsel %vm278_vm0, %v9766_v2, %v7593_v18 }
 0x2f3   : > { %v7641_v22 = vpop.permute.xlu1 %7640  ;;  %3838 = vmatmul.mubr.bf16.gmra.mxu1 %v3553_v9  ;;  %v3494_v16 = vsel %vm1507_vm4, %v3462_v31, %v7452_v25  ;;  %v3524_v47 = vsel %vm1540_vm5, %v3492_v54, %v7432_v38  ;;  %v3495_v24 = vsel %vm1507_vm4, %v3463_v12, %v7453_v7  ;;  %v7583_v3 = vunpack.i.h.bf16 %v10004_v58  ;;  %v8441_v38 = vld [vmem:[#allocation2 + $0xc8] sm:$0xff] }
 0x2f4   : > { %v7643_v36 = vunpack.i.h.bf16 %v7641_v22  ;;  %v7642_v29 = vunpack.i.l.bf16 %v7641_v22  ;;  %v10106_v8 = vpop.permute.xlu0 %7625  ;;  %3845 = vmatprep.mubr.bf16.mxu1 %v3557_v37  ;;  %v3364_v2 = vsel %vm278_vm0, %v9693_v32, %v7592_v34  ;;  %v3526_v52 = vsel %vm1540_vm5, %v3494_v16, %v7457_v26 }
 0x2f5   : > { %v7563_v9 = vunpack.i.h.bf16 %v9999_v59  ;;  %v7562_v48 = vunpack.i.l.bf16 %v9999_v59  ;;  %v3396_v5 = vsel %vm1507_vm4, %v3364_v2, %v7597_v10  ;;  %v3527_v37 = vsel %vm1540_vm5, %v3495_v24, %v7458_v0  ;;  %v11310_v2 = vld [vmem:[#allocation17_spill] sm:$0xff] }
 0x2f6   : > { %v3426_v15 = vsel %vm1540_vm5, %v3394_v60, %v7642_v29  ;;  %v3427_v46 = vsel %vm1540_vm5, %v3395_v1, %v7643_v36  ;;  %v7588_v21 = vunpack.i.h.bf16 %v10038_v49  ;;  %v7587_v45 = vunpack.i.l.bf16 %v10038_v49 }
 0x2f7   : > { %v7646_v28 = vpop.permute.xlu1 %7645  ;;  %v3556_v6 = vpack.c.bf16 %v3427_v46, %v3426_v15  ;;  %v7463_v22 = vunpack.i.h.bf16 %v9910_v50  ;;  %v3563_v30 = vpack.c.bf16 %v3527_v37, %v3526_v52  ;;  %v7462_v36 = vunpack.i.l.bf16 %v9910_v50  ;;  %v8440_v46 = vld [vmem:[#allocation2 + $0xd0] sm:$0xff]  ;;  %v2442_v52 = vld [vmem:[#allocation2 + $0xe8] sm:$0xff] }
 0x2f8   : > { %v7648_v43 = vunpack.i.h.bf16 %v7646_v28  ;;  %v7647_v33 = vunpack.i.l.bf16 %v7646_v28  ;;  %v10122_v63 = vpop.permute.xlu0 %7635  ;;  %v3366_v49 = vsel %vm278_vm0, %v9731_v39, %v7562_v48  ;;  %v7618_v51 = vunpack.i.h.bf16 %v10091_v55 }
 0x2f9   : > { %v7617_v14 = vunpack.i.l.bf16 %v10091_v55  ;;  %v3398_v60 = vsel %vm1507_vm4, %v3366_v49, %v7587_v45  ;;  %v7443_v27 = vunpack.i.h.bf16 %v9913_v57  ;;  %v7442_v18 = vunpack.i.l.bf16 %v9913_v57 }
 0x2fa   : > { %v3493_v19 = vsel %vm1507_vm4, %v3461_v53, %v7647_v33  ;;  %v3397_v42 = vsel %vm1507_vm4, %v3365_v17, %v7648_v43  ;;  %v7628_v50 = vunpack.i.h.bf16 %v10106_v8  ;;  %v3465_v55 = vsel %vm278_vm0, %v8440_v46, %v7463_v22  ;;  %v2445_v46 = vld [vmem:[#allocation2 + $0x110] sm:$0xff] }
 0x2fb   : > { %v10134_v61 = vpop.permute.xlu1 %7650  ;;  %3846 = vmatmul.mubr.bf16.gmra.mxu1 %v3556_v6  ;;  %v3525_v56 = vsel %vm1540_vm5, %v3493_v19, %v7433_v62  ;;  %v7582_v62 = vunpack.i.l.bf16 %v10004_v58  ;;  %v3429_v32 = vsel %vm1540_vm5, %v3397_v42, %v7583_v3  ;;  %v3367_v58 = vsel %vm278_vm0, %v9705_v44, %v7563_v9  ;;  %v8443_v3 = vld [vmem:[#allocation2 + $0xaf] sm:$0xff] }
 0x2fc   : > { %v10143_v40 = vpop.permute.xlu0 %7655  ;;  %v3560_v11 = vpack.c.bf16 %v3525_v56, %v3524_v47  ;;  %v3399_v1 = vsel %vm1507_vm4, %v3367_v58, %v7588_v21  ;;  %v7627_v44 = vunpack.i.l.bf16 %v10106_v8  ;;  %v3464_v13 = vsel %vm278_vm0, %v8441_v38, %v7462_v36 }
 0x2fd   : > { %v3428_v59 = vsel %vm1540_vm5, %v3396_v5, %v7582_v62  ;;  %v3430_v31 = vsel %vm1540_vm5, %v3398_v60, %v7442_v18  ;;  %v3431_v57 = vsel %vm1540_vm5, %v3399_v1, %v7443_v27  ;;  %v3496_v7 = vsel %vm1507_vm4, %v3464_v13, %v7617_v14  ;;  %v8444_v14 = vld [vmem:[#allocation2 + $0xcf] sm:$0xff] }
 0x2fe   : > { %3853 = vmatprep.mubr.bf16.mxu1 %v3560_v11  ;;  %v3559_v29 = vpack.c.bf16 %v3429_v32, %v3428_v59  ;;  %v3497_v8 = vsel %vm1507_vm4, %v3465_v55, %v7618_v51  ;;  %v3528_v28 = vsel %vm1540_vm5, %v3496_v7, %v7627_v44  ;;  %v7428_v43 = vunpack.i.h.bf16 %v9879_v23 }
 0x2ff   : > { %v10154_v25 = vpop.permute.xlu1 %7660  ;;  %v3529_v34 = vsel %vm1540_vm5, %v3497_v8, %v7628_v50  ;;  %v7427_v33 = vunpack.i.l.bf16 %v9879_v23  ;;  %v7623_v54 = vunpack.i.h.bf16 %v10068_v4  ;;  %v3562_v53 = vpack.c.bf16 %v3431_v57, %v3430_v31  ;;  %v8445_v50 = vld [vmem:[#allocation2 + $0xc7] sm:$0xff] }
 0x300   : > { %v10157_v41 = vpop.permute.xlu0 %7665  ;;  %v7622_v10 = vunpack.i.l.bf16 %v10068_v4  ;;  %v7633_v6 = vunpack.i.h.bf16 %v10087_v20  ;;  %v7638_v35 = vunpack.i.h.bf16 %v10122_v63  ;;  %v7637_v12 = vunpack.i.l.bf16 %v10122_v63  ;;  %v8442_v4 = vld [vmem:[#allocation2 + $0xa7] sm:$0xff] }
 0x301   : > { %v7632_v17 = vunpack.i.l.bf16 %v10087_v20  ;;  %v7653_v19 = vunpack.i.h.bf16 %v10134_v61  ;;  %v7652_v16 = vunpack.i.l.bf16 %v10134_v61  ;;  %v3566_v23 = vpack.c.bf16 %v3529_v34, %v3528_v28  ;;  %v2443_v61 = vld [vmem:[#allocation2 + $0xf0] sm:$0xff] }
 0x302   : > { %v7663_v47 = vunpack.i.h.bf16 %v10154_v25  ;;  %v7662_v56 = vunpack.i.l.bf16 %v10154_v25  ;;  %v3368_v24 = vsel %vm278_vm0, %v8442_v4, %v7427_v33  ;;  %v3369_v63 = vsel %vm278_vm0, %v8443_v3, %v7428_v43 }
 0x303   : > { %v10173_v15 = vpop.permute.xlu1 %7670  ;;  %3854 = vmatmul.mubr.bf16.gmra.mxu1 %v3559_v29  ;;  %v7448_v20 = vunpack.i.h.bf16 %v11310_v2  ;;  %v7447_v11 = vunpack.i.l.bf16 %v11310_v2  ;;  %v3467_v48 = vsel %vm278_vm0, %v2443_v61, %v7638_v35  ;;  %v3466_v5 = vsel %vm278_vm0, %v2442_v52, %v7637_v12  ;;  %v11312_v61 = vld [vmem:[#allocation6_spill] sm:$0xff] }
 0x304   : > { %v10175_v39 = vpop.permute.xlu0 %7675  ;;  %3861 = vmatprep.mubr.bf16.mxu1 %v3563_v30  ;;  %v3400_v37 = vsel %vm1507_vm4, %v3368_v24, %v7622_v10  ;;  %v3401_v62 = vsel %vm1507_vm4, %v3369_v63, %v7623_v54  ;;  %v3498_v32 = vsel %vm1507_vm4, %v3466_v5, %v7652_v16  ;;  %v3499_v25 = vsel %vm1507_vm4, %v3467_v48, %v7653_v19  ;;  %v11313_v48 = vld [vmem:[#allocation7_spill] sm:$0xff] }
 0x305   : > { %v3432_v21 = vsel %vm1540_vm5, %v3400_v37, %v7632_v17  ;;  %v3433_v45 = vsel %vm1540_vm5, %v3401_v62, %v7633_v6  ;;  %v7673_v22 = vunpack.i.h.bf16 %v10173_v15  ;;  %v7672_v59 = vunpack.i.l.bf16 %v10173_v15  ;;  %v2444_v15 = vld [vmem:[#allocation2 + $0x108] sm:$0xff]  ;;  %v11311_v6 = vld [vmem:[#allocation16_spill] sm:$0xff] }
 0x306   : > { %v3530_v36 = vsel %vm1540_vm5, %v3498_v32, %v7662_v56  ;;  %v3531_v58 = vsel %vm1540_vm5, %v3499_v25, %v7663_v47  ;;  %v7658_v49 = vunpack.i.h.bf16 %v10143_v40  ;;  %v7657_v29 = vunpack.i.l.bf16 %v10143_v40  ;;  %v11314_v37 = vld [vmem:[#allocation19_spill] sm:$0xff] }
 0x307   : > { %v10183_v26 = vpop.permute.xlu1 %7680  ;;  %v3371_v60 = vsel %vm278_vm0, %v8444_v14, %v7448_v20  ;;  %v7668_v1 = vunpack.i.h.bf16 %v10157_v41  ;;  %v7667_v27 = vunpack.i.l.bf16 %v10157_v41  ;;  %v3565_v18 = vpack.c.bf16 %v3433_v45, %v3432_v21  ;;  %v2446_v62 = vld [vmem:[#allocation2 + $0x128] sm:$0xff]  ;;  %v2447_v21 = vld [vmem:[#allocation2 + $0x130] sm:$0xff] }
 0x308   : > { %v10190_v0 = vpop.permute.xlu0 %7685  ;;  %v3370_v44 = vsel %vm278_vm0, %v8445_v50, %v7447_v11  ;;  %v7678_v55 = vunpack.i.h.bf16 %v10175_v39  ;;  %v7677_v38 = vunpack.i.l.bf16 %v10175_v39  ;;  %v3569_v40 = vpack.c.bf16 %v3531_v58, %v3530_v36 }
 0x309   : > { %v3469_v13 = vsel %vm278_vm0, %v2445_v46, %v7673_v22  ;;  %v3468_v31 = vsel %vm278_vm0, %v2444_v15, %v7672_v59  ;;  %v7688_v57 = vunpack.i.h.bf16 %v10190_v0  ;;  %v7687_v7 = vunpack.i.l.bf16 %v10190_v0  ;;  %v11315_v15 = vld [vmem:[#allocation8_spill] sm:$0xff] }
 0x30a   : > { %v3402_v28 = vsel %vm1507_vm4, %v3370_v44, %v7657_v29  ;;  %v3403_v34 = vsel %vm1507_vm4, %v3371_v60, %v7658_v49  ;;  %v3500_v33 = vsel %vm1507_vm4, %v3468_v31, %v7677_v38  ;;  %v3501_v54 = vsel %vm1507_vm4, %v3469_v13, %v7678_v55  ;;  %v11316_v13 = vld [vmem:[#allocation9_spill] sm:$0xff] }
 0x30b   : > { %v10201_v42 = vpop.permute.xlu1 %7690  ;;  %3862 = vmatmul.mubr.bf16.gmra.mxu1 %v3562_v53  ;;  %v3434_v39 = vsel %vm1540_vm5, %v3402_v28, %v7667_v27  ;;  %v3435_v43 = vsel %vm1540_vm5, %v3403_v34, %v7668_v1  ;;  %v3532_v0 = vsel %vm1540_vm5, %v3500_v33, %v7687_v7  ;;  %v3533_v10 = vsel %vm1540_vm5, %v3501_v54, %v7688_v57  ;;  %v2448_v57 = vld [vmem:[#allocation2 + $0x148] sm:$0xff]  ;;  %v2449_v7 = vld [vmem:[#allocation2 + $0x150] sm:$0xff] }
 0x30c   : > { %v10207_v9 = vpop.permute.xlu0 %7695  ;;  %3869 = vmatprep.mubr.bf16.mxu1 %v3566_v23  ;;  %v7468_v35 = vunpack.i.h.bf16 %v11311_v6  ;;  %v7467_v12 = vunpack.i.l.bf16 %v11311_v6  ;;  %v7683_v17 = vunpack.i.h.bf16 %v10183_v26  ;;  %v3568_v16 = vpack.c.bf16 %v3435_v43, %v3434_v39 }
 0x30d   : > { %v7682_v23 = vunpack.i.l.bf16 %v10183_v26  ;;  %v7693_v47 = vunpack.i.h.bf16 %v10201_v42  ;;  %v7698_v56 = vunpack.i.h.bf16 %v10207_v9  ;;  %v7697_v4 = vunpack.i.l.bf16 %v10207_v9 }
 0x30e   : > { %v7692_v24 = vunpack.i.l.bf16 %v10201_v42  ;;  %v3572_v2 = vpack.c.bf16 %v3533_v10, %v3532_v0  ;;  %v3373_v26 = vsel %vm278_vm0, %v11312_v61, %v7468_v35  ;;  %v3372_v5 = vsel %vm278_vm0, %v11313_v48, %v7467_v12 }
 0x30f   : > { %v10219_v30 = vpop.permute.xlu1 %7700  ;;  %v7473_v9 = vunpack.i.h.bf16 %v11314_v37  ;;  %v7472_v42 = vunpack.i.l.bf16 %v11314_v37  ;;  %v3471_v32 = vsel %vm278_vm0, %v2447_v21, %v7698_v56  ;;  %v3470_v25 = vsel %vm278_vm0, %v2446_v62, %v7697_v4  ;;  %v11318_v62 = vld [vmem:[#allocation10_spill] sm:$0xff] }
 0x310   : > { %v10225_v51 = vpop.permute.xlu0 %7705  ;;  %v7703_v3 = vunpack.i.h.bf16 %v10219_v30  ;;  %v7702_v63 = vunpack.i.l.bf16 %v10219_v30  ;;  %v3404_v22 = vsel %vm1507_vm4, %v3372_v5, %v7682_v23  ;;  %v3405_v59 = vsel %vm1507_vm4, %v3373_v26, %v7683_v17  ;;  %v11317_v23 = vld [vmem:[#allocation18_spill] sm:$0xff] }
 0x311   : > { %v3436_v30 = vsel %vm1540_vm5, %v3404_v22, %v7692_v24  ;;  %v3437_v36 = vsel %vm1540_vm5, %v3405_v59, %v7693_v47  ;;  %v7707_v50 = vunpack.i.l.bf16 %v10225_v51  ;;  %v3375_v46 = vsel %vm278_vm0, %v11315_v15, %v7473_v9  ;;  %v11320_v15 = vld [vmem:[#allocation21_spill] sm:$0xff] }
 0x312   : > { %v3502_v58 = vsel %vm1507_vm4, %v3470_v25, %v7702_v63  ;;  %v3503_v49 = vsel %vm1507_vm4, %v3471_v32, %v7703_v3  ;;  %v3374_v31 = vsel %vm278_vm0, %v11316_v13, %v7472_v42  ;;  %v7478_v47 = vunpack.i.h.bf16 %v11317_v23  ;;  %v2451_v25 = vld [vmem:[#allocation2 + $0x170] sm:$0xff] }
 0x313   : > { %v7711_v41 = vpop.permute.xlu1 %7710  ;;  %3870 = vmatmul.mubr.bf16.gmra.mxu1 %v3565_v18  ;;  %v7708_v18 = vunpack.i.h.bf16 %v10225_v51  ;;  %v7477_v56 = vunpack.i.l.bf16 %v11317_v23 }
 0x314   : > { %v10237_v8 = vpop.permute.xlu0 %7715  ;;  %3877 = vmatprep.mubr.bf16.mxu1 %v3569_v40  ;;  %v7713_v20 = vunpack.i.h.bf16 %v7711_v41  ;;  %v7712_v11 = vunpack.i.l.bf16 %v7711_v41  ;;  %v3571_v40 = vpack.c.bf16 %v3437_v36, %v3436_v30  ;;  %v3377_v21 = vsel %vm278_vm0, %v11318_v62, %v7478_v47  ;;  %v11324_v62 = vld [vmem:[#allocation15_spill] sm:$0xff] }
 0x315   : > { %v7718_v55 = vunpack.i.h.bf16 %v10237_v8  ;;  %v7717_v38 = vunpack.i.l.bf16 %v10237_v8  ;;  %v3407_v0 = vsel %vm1507_vm4, %v3375_v46, %v7708_v18  ;;  %v7483_v46 = vunpack.i.h.bf16 %v11320_v15 }
 0x316   : > { %v3534_v1 = vsel %vm1540_vm5, %v3502_v58, %v7712_v11  ;;  %v3535_v27 = vsel %vm1540_vm5, %v3503_v49, %v7713_v20 }
 0x317   : > { %v7721_v53 = vpop.permute.xlu1 %7720  ;;  %v3575_v34 = vpack.c.bf16 %v3535_v27, %v3534_v1  ;;  %v3439_v6 = vsel %vm1540_vm5, %v3407_v0, %v7718_v55  ;;  %v7482_v55 = vunpack.i.l.bf16 %v11320_v15 }
 0x318   : > { %v10250_v19 = vpop.permute.xlu0 %7725  ;;  %v7723_v29 = vunpack.i.h.bf16 %v7721_v53  ;;  %v7722_v14 = vunpack.i.l.bf16 %v7721_v53  ;;  %v3406_v53 = vsel %vm1507_vm4, %v3374_v31, %v7707_v50 }
 0x319   : > { %v7728_v41 = vunpack.i.h.bf16 %v10250_v19  ;;  %v7727_v28 = vunpack.i.l.bf16 %v10250_v19  ;;  %v3438_v10 = vsel %vm1540_vm5, %v3406_v53, %v7717_v38 }
 0x31a   : > { %v3473_v51 = vsel %vm278_vm0, %v2449_v7, %v7723_v29  ;;  %v3472_v39 = vsel %vm278_vm0, %v2448_v57, %v7722_v14  ;;  %v3574_v3 = vpack.c.bf16 %v3439_v6, %v3438_v10  ;;  %v11321_v10 = vld [vmem:[#allocation12_spill] sm:$0xff] }
 0x31b   : > { %v10259_v52 = vpop.permute.xlu1 %7730  ;;  %3878 = vmatmul.mubr.bf16.gmra.mxu1 %v3568_v16  ;;  %v3504_v35 = vsel %vm1507_vm4, %v3472_v39, %v7727_v28  ;;  %v3505_v12 = vsel %vm1507_vm4, %v3473_v51, %v7728_v41  ;;  %v2452_v41 = vld [vmem:[#allocation2 + $0x188] sm:$0xff]  ;;  %v2453_v28 = vld [vmem:[#allocation2 + $0x190] sm:$0xff]  ;;  %v3379_v6 = vsel %vm278_vm0, %v11321_v10, %v7483_v46 }
 0x31c   : > { %v7736_v45 = vpop.permute.xlu0 %7735  ;;  %3885 = vmatprep.mubr.bf16.mxu1 %v3572_v2  ;;  %v7733_v4 = vunpack.i.h.bf16 %v10259_v52  ;;  %v7732_v63 = vunpack.i.l.bf16 %v10259_v52  ;;  %v2450_v52 = vld [vmem:[#allocation2 + $0x168] sm:$0xff] }
 0x31d   : > { %v7738_v43 = vunpack.i.h.bf16 %v7736_v45  ;;  %v7737_v33 = vunpack.i.l.bf16 %v7736_v45  ;;  %v11319_v45 = vld [vmem:[#allocation11_spill] sm:$0xff] }
 0x31e   : > { %v3376_v32 = vsel %vm278_vm0, %v11319_v45, %v7477_v56  ;;  %v3409_v58 = vsel %vm1507_vm4, %v3377_v21, %v7733_v4 }
 0x31f   : > { %v10275_v60 = vpop.permute.xlu1 %7740  ;;  %v3536_v19 = vsel %vm1540_vm5, %v3504_v35, %v7737_v33  ;;  %v3537_v16 = vsel %vm1540_vm5, %v3505_v12, %v7738_v43  ;;  %v3408_v36 = vsel %vm1507_vm4, %v3376_v32, %v7732_v63 }
 0x320   : > { %v7746_v44 = vpop.permute.xlu0 %7745  ;;  %v7743_v2 = vunpack.i.h.bf16 %v10275_v60  ;;  %v7742_v61 = vunpack.i.l.bf16 %v10275_v60  ;;  %v3578_v5 = vpack.c.bf16 %v3537_v16, %v3536_v19 }
 0x321   : > { %v7748_v20 = vunpack.i.h.bf16 %v7746_v44  ;;  %v7747_v11 = vunpack.i.l.bf16 %v7746_v44 }
 0x322   : > { %v3440_v49 = vsel %vm1540_vm5, %v3408_v36, %v7742_v61  ;;  %v3441_v29 = vsel %vm1540_vm5, %v3409_v58, %v7743_v2  ;;  %v2455_v58 = vld [vmem:[#allocation2 + $0x1b0] sm:$0xff] }
 0x323   : > { %v7751_v54 = vpop.permute.xlu1 %7750  ;;  %3886 = vmatmul.mubr.bf16.gmra.mxu1 %v3571_v40  ;;  %v3475_v59 = vsel %vm278_vm0, %v2451_v25, %v7748_v20  ;;  %v3474_v30 = vsel %vm278_vm0, %v2450_v52, %v7747_v11  ;;  %v3577_v57 = vpack.c.bf16 %v3441_v29, %v3440_v49  ;;  %v11325_v25 = vld [vmem:[#allocation14_spill] sm:$0xff] }
 0x324   : > { %v10291_v8 = vpop.permute.xlu0 %7755  ;;  %3893 = vmatprep.mubr.bf16.mxu1 %v3575_v34  ;;  %v7753_v26 = vunpack.i.h.bf16 %v7751_v54  ;;  %v7752_v48 = vunpack.i.l.bf16 %v7751_v54 }
 0x325   : > { %v7758_v40 = vunpack.i.h.bf16 %v10291_v8  ;;  %v7757_v13 = vunpack.i.l.bf16 %v10291_v8  ;;  %v11322_v8 = vld [vmem:[#allocation13_spill] sm:$0xff] }
 0x326   : > { %v3506_v14 = vsel %vm1507_vm4, %v3474_v30, %v7752_v48  ;;  %v3507_v60 = vsel %vm1507_vm4, %v3475_v59, %v7753_v26  ;;  %v3378_v35 = vsel %vm278_vm0, %v11322_v8, %v7482_v55  ;;  %v2454_v59 = vld [vmem:[#allocation2 + $0x1a8] sm:$0xff] }
 0x327   : > { %v7761_v17 = vpop.permute.xlu1 %7760  ;;  %v3410_v16 = vsel %vm1507_vm4, %v3378_v35, %v7757_v13  ;;  %v3411_v23 = vsel %vm1507_vm4, %v3379_v6, %v7758_v40  ;;  %v11326_v40 = vld [vmem:[#allocation23_spill] sm:$0xff] }
 0x328   : > { %v7766_v24 = vpop.permute.xlu0 %7765  ;;  %v7763_v37 = vunpack.i.h.bf16 %v7761_v17  ;;  %v7762_v9 = vunpack.i.l.bf16 %v7761_v17  ;;  %v11323_v17 = vld [vmem:[#allocation20_spill] sm:$0xff]  ;;  %v7493_v13 = vunpack.i.h.bf16 %v11326_v40 }
 0x329   : > { %v7768_v31 = vunpack.i.h.bf16 %v7766_v24  ;;  %v7767_v7 = vunpack.i.l.bf16 %v7766_v24  ;;  %v7487_v19 = vunpack.i.l.bf16 %v11323_v17  ;;  %v4406_v35 = vld [vmem:[#allocation2 + $0x22f] sm:$0xff] }
 0x32a   : > { %v3538_v50 = vsel %vm1540_vm5, %v3506_v14, %v7762_v9  ;;  %v3539_v44 = vsel %vm1540_vm5, %v3507_v60, %v7763_v37 }
 0x32b   : > { %v7771_v42 = vpop.permute.xlu1 %7770  ;;  %3894 = vmatmul.mubr.bf16.gmra.mxu1 %v3574_v3  ;;  %v3581_v39 = vpack.c.bf16 %v3539_v44, %v3538_v50  ;;  %v3442_v47 = vsel %vm1540_vm5, %v3410_v16, %v7767_v7  ;;  %v3443_v56 = vsel %vm1540_vm5, %v3411_v23, %v7768_v31  ;;  %v7488_v3 = vunpack.i.h.bf16 %v11323_v17  ;;  %v11327_v23 = vld [vmem:[#allocation26_spill] sm:$0xff] }
 0x32c   : > { %v7776_v22 = vpop.permute.xlu0 %7775  ;;  %3901 = vmatprep.mubr.bf16.mxu1 %v3578_v5  ;;  %v7773_v1 = vunpack.i.h.bf16 %v7771_v42  ;;  %v7772_v27 = vunpack.i.l.bf16 %v7771_v42  ;;  %v3580_v42 = vpack.c.bf16 %v3443_v56, %v3442_v47  ;;  %v3380_v21 = vsel %vm278_vm0, %v11324_v62, %v7487_v19  ;;  %v11328_v56 = vld [vmem:[#allocation27_spill] sm:$0xff] }
 0x32d   : > { %v7778_v34 = vunpack.i.h.bf16 %v7776_v22  ;;  %v7777_v51 = vunpack.i.l.bf16 %v7776_v22  ;;  %v3381_v22 = vsel %vm278_vm0, %v11325_v25, %v7488_v3  ;;  %v7492_v31 = vunpack.i.l.bf16 %v11326_v40  ;;  %v8446_v3 = vld [vmem:[#allocation2 + $0x18f] sm:$0xff] }
 0x32e   : > { %v3477_v43 = vsel %vm278_vm0, %v2453_v28, %v7773_v1  ;;  %v3476_v33 = vsel %vm278_vm0, %v2452_v41, %v7772_v27  ;;  %v4215_v27 = vld [vmem:[#allocation2 + $0x8] sm:$0xff] }
 0x32f   : > { %v7781_v18 = vpop.permute.xlu1 %7780  ;;  %v3508_v4 = vsel %vm1507_vm4, %v3476_v33, %v7777_v51  ;;  %v3509_v24 = vsel %vm1507_vm4, %v3477_v43, %v7778_v34  ;;  %v4247_v33 = vld [vmem:[#allocation2 + $0x9] sm:$0xff] }
 0x330   : > { %v7786_v38 = vpop.permute.xlu0 %7785  ;;  %v7782_v63 = vunpack.i.l.bf16 %v7781_v18  ;;  %v7783_v61 = vunpack.i.h.bf16 %v7781_v18  ;;  %v4216_v18 = vld [vmem:[#allocation2 + $0x10] sm:$0xff] }
 0x331   : > { %v7788_v54 = vunpack.i.h.bf16 %v7786_v38  ;;  %v7787_v53 = vunpack.i.l.bf16 %v7786_v38  ;;  %v7894_v46 = vpack.i.bf16 %v4216_v18, %v4215_v27 }
 0x332   : > { %v3412_v36 = vsel %vm1507_vm4, %v3380_v21, %v7782_v63  ;;  %v3413_v60 = vsel %vm1507_vm4, %v3381_v22, %v7783_v61  ;;  %v3383_v63 = vsel %vm278_vm0, %v8446_v3, %v7493_v13  ;;  %v8453_v3 = vld [vmem:[#allocation2 + $0x1c7] sm:$0xff] }
 0x333   : > { %v7791_v0 = vpop.permute.xlu1 %7790  ;;  %3902 = vmatmul.mubr.bf16.gmra.mxu1 %v3577_v57  ;;  %v3540_v20 = vsel %vm1540_vm5, %v3508_v4, %v7787_v53  ;;  %v3541_v11 = vsel %vm1540_vm5, %v3509_v24, %v7788_v54  ;;  %7895 = vrot.lane.b32.xlu1 %v7894_v46, %s8522_s18  ;;  %v4248_v54 = vld [vmem:[#allocation2 + $0x11] sm:$0xff]  ;;  %v4405_v53 = vld [vmem:[#allocation2 + $0x227] sm:$0xff] }
 0x334   : > { %v7796_v12 = vpop.permute.xlu0 %7795  ;;  %3909 = vmatprep.mubr.bf16.mxu1 %v3581_v39  ;;  %v7792_v26 = vunpack.i.l.bf16 %v7791_v0  ;;  %v7793_v5 = vunpack.i.h.bf16 %v7791_v0  ;;  %v3584_v52 = vpack.c.bf16 %v3541_v11, %v3540_v20  ;;  %v7899_v8 = vpack.i.bf16 %v4248_v54, %v4247_v33  ;;  %v11329_v11 = vld [vmem:[#allocation22_spill] sm:$0xff] }
 0x335   : > { %v7798_v37 = vunpack.i.h.bf16 %v7796_v12  ;;  %v7797_v9 = vunpack.i.l.bf16 %v7796_v12  ;;  %v7904_v16 = vpack.i.bf16 %v4406_v35, %v4405_v53  ;;  %v7498_v61 = vunpack.i.h.bf16 %v11329_v11 }
 0x336   : > { %v3444_v1 = vsel %vm1540_vm5, %v3412_v36, %v7792_v26  ;;  %v3445_v15 = vsel %vm1540_vm5, %v3413_v60, %v7793_v5  ;;  %v7497_v26 = vunpack.i.l.bf16 %v11329_v11 }
 0x337   : > { %v7801_v2 = vpop.permute.xlu1 %7800  ;;  %v3479_v50 = vsel %vm278_vm0, %v2455_v58, %v7798_v37  ;;  %v3478_v44 = vsel %vm278_vm0, %v2454_v59, %v7797_v9  ;;  %v3583_v43 = vpack.c.bf16 %v3445_v15, %v3444_v1  ;;  %7900 = vrot.lane.b32.xlu1 %v7899_v8, %s8523_s15  ;;  %7905 = vrot.lane.b32.xlu0 %v7904_v16, %s8523_s15  ;;  %v8449_v1 = vld [vmem:[#allocation2 + $0x1a7] sm:$0xff] }
 0x338   : > { %v10341_v48 = vpop.permute.xlu0 %7805  ;;  %v7803_v45 = vunpack.i.h.bf16 %v7801_v2  ;;  %v7802_v32 = vunpack.i.l.bf16 %v7801_v2  ;;  %v8447_v2 = vld [vmem:[#allocation2 + $0x187] sm:$0xff]  ;;  %v3384_v27 = vsel %vm278_vm0, %v8449_v1, %v7497_v26 }
 0x339   : > { %v7808_v28 = vunpack.i.h.bf16 %v10341_v48  ;;  %v7807_v0 = vunpack.i.l.bf16 %v10341_v48  ;;  %v3382_v20 = vsel %vm278_vm0, %v8447_v2, %v7492_v31 }
 0x33a   : > { %v3510_v55 = vsel %vm1507_vm4, %v3478_v44, %v7802_v32  ;;  %v3511_v38 = vsel %vm1507_vm4, %v3479_v50, %v7803_v45 }
 0x33b   : > { %v7811_v30 = vpop.permute.xlu1 %7810  ;;  %3910 = vmatmul.mubr.bf16.gmra.mxu1 %v3580_v42  ;;  %v3414_v9 = vsel %vm1507_vm4, %v3382_v20, %v7807_v0  ;;  %v3415_v42 = vsel %vm1507_vm4, %v3383_v63, %v7808_v28 }
 0x33c   : > { %v7813_v49 = vunpack.i.h.bf16 %v7811_v30  ;;  %v7812_v29 = vunpack.i.l.bf16 %v7811_v30  ;;  %v7816_v14 = vpop.permute.xlu0 %7815  ;;  %3917 = vmatprep.mubr.bf16.mxu1 %v3584_v52 }
 0x33d   : > { %v7818_v10 = vunpack.i.h.bf16 %v7816_v14  ;;  %v7817_v6 = vunpack.i.l.bf16 %v7816_v14  ;;  %v8448_v14 = vld [vmem:[#allocation2 + $0x1af] sm:$0xff] }
 0x33e   : > { %v3542_v7 = vsel %vm1540_vm5, %v3510_v55, %v7812_v29  ;;  %v3543_v41 = vsel %vm1540_vm5, %v3511_v38, %v7813_v49  ;;  %v3385_v60 = vsel %vm278_vm0, %v8448_v14, %v7498_v61 }
 0x33f   : > { %v7821_v57 = vpop.permute.xlu1 %7820  ;;  %v3587_v19 = vpack.c.bf16 %v3543_v41, %v3542_v7  ;;  %v3446_v62 = vsel %vm1540_vm5, %v3414_v9, %v7817_v6  ;;  %v3447_v21 = vsel %vm1540_vm5, %v3415_v42, %v7818_v10  ;;  %v8410_v7 = vld [vmem:[%s11261_s5 + $0x88] sm:$0xff]   ;;  %v11330_v41 = vld [vmem:[#allocation25_spill] sm:$0xff] }
 0x340   : > { %v7823_v34 = vunpack.i.h.bf16 %v7821_v57  ;;  %v7822_v51 = vunpack.i.l.bf16 %v7821_v57  ;;  %v7826_v39 = vpop.permute.xlu0 %7825  ;;  %v3586_v29 = vpack.c.bf16 %v3447_v21, %v3446_v62  ;;  %v7503_v28 = vunpack.i.h.bf16 %v11330_v41  ;;  %6849 = vmatprep.subr.bf16.mxu0 %v8410_v7  ;;  %v11331_v21 = vld [vmem:[#allocation24_spill] sm:$0xff] }
 0x341   : > { %v7828_v12 = vunpack.i.h.bf16 %v7826_v39  ;;  %v7827_v17 = vunpack.i.l.bf16 %v7826_v39  ;;  %6850 = vmatpush3.bf16.msra.mxu0 %v8410_v7 }
 0x342   : > { %v3481_v47 = vsel %vm278_vm0, %v11327_v23, %v7823_v34  ;;  %v3480_v4 = vsel %vm278_vm0, %v11328_v56, %v7822_v51  ;;  %v7502_v34 = vunpack.i.l.bf16 %v11330_v41  ;;  %v8450_v51 = vld [vmem:[#allocation2 + $0x1f0] sm:$0xff]  ;;  %v8411_v23 = vld [vmem:[%s11261_s5 + $0x80] sm:$0xff]  }
 0x343   : > { %v7831_v24 = vpop.permute.xlu1 %7830  ;;  %3918 = vmatmul.mubr.bf16.gmra.mxu1 %v3583_v43  ;;  %v3512_v45 = vsel %vm1507_vm4, %v3480_v4, %v7827_v17  ;;  %v3513_v32 = vsel %vm1507_vm4, %v3481_v47, %v7828_v12  ;;  %v8451_v43 = vld [vmem:[#allocation2 + $0x1e8] sm:$0xff]  ;;  %6851 = vmatprep.subr.bf16.mxu0 %v8411_v23 }
 0x344   : > { %v7836_v48 = vpop.permute.xlu0 %7835  ;;  %3925 = vmatprep.mubr.bf16.mxu1 %v3587_v19  ;;  %v7833_v52 = vunpack.i.h.bf16 %v7831_v24  ;;  %v7832_v25 = vunpack.i.l.bf16 %v7831_v24  ;;  %v8452_v4 = vld [vmem:[#allocation2 + $0x1cf] sm:$0xff]  ;;  %v3386_v63 = vsel %vm278_vm0, %v8453_v3, %v7502_v34  ;;  %v8419_v3 = vld [vmem:[%s11261_s5 + $0x20] sm:$0xff]  }
 0x345   : > { %v7838_v5 = vunpack.i.h.bf16 %v7836_v48  ;;  %v7837_v37 = vunpack.i.l.bf16 %v7836_v48  ;;  %v3387_v24 = vsel %vm278_vm0, %v8452_v4, %v7503_v28  ;;  %6852 = vmatpush3.bf16.msra.mxu0 %v8411_v23  ;;  %v8418_v4 = vld [vmem:[%s11261_s5 + $0x60] sm:$0xff]  }
 0x346   : > { %v3416_v46 = vsel %vm1507_vm4, %v3384_v27, %v7832_v25  ;;  %v3417_v55 = vsel %vm1507_vm4, %v3385_v60, %v7833_v52  ;;  %v8455_v25 = vld [vmem:[#allocation2 + $0x208] sm:$0xff] }
 0x347   : > { %v7841_v22 = vpop.permute.xlu1 %7840  ;;  %v3544_v59 = vsel %vm1540_vm5, %v3512_v45, %v7837_v37  ;;  %v3545_v30 = vsel %vm1540_vm5, %v3513_v32, %v7838_v5  ;;  %v7508_v45 = vunpack.i.h.bf16 %v11331_v21  ;;  %v8454_v32 = vld [vmem:[#allocation2 + $0x210] sm:$0xff] }
 0x348   : > { %v7843_v36 = vunpack.i.h.bf16 %v7841_v22  ;;  %v7842_v58 = vunpack.i.l.bf16 %v7841_v22  ;;  %v7846_v49 = vpop.permute.xlu0 %7845  ;;  %v3590_v18 = vpack.c.bf16 %v3545_v30, %v3544_v59  ;;  %v7507_v30 = vunpack.i.l.bf16 %v11331_v21 }
 0x349   : > { %v7848_v50 = vunpack.i.h.bf16 %v7846_v49  ;;  %v7847_v44 = vunpack.i.l.bf16 %v7846_v49 }
 0x34a   : > { %v3448_v40 = vsel %vm1540_vm5, %v3416_v46, %v7842_v58  ;;  %v3449_v13 = vsel %vm1540_vm5, %v3417_v55, %v7843_v36  ;;  %v8457_v55 = vld [vmem:[#allocation2 + $0x1e7] sm:$0xff] }
 0x34b   : > { %v7851_v15 = vpop.permute.xlu1 %7850  ;;  %3926 = vmatmul.mubr.bf16.gmra.mxu1 %v3586_v29  ;;  %v3483_v39 = vsel %vm278_vm0, %v8450_v51, %v7848_v50  ;;  %v3482_v33 = vsel %vm278_vm0, %v8451_v43, %v7847_v44  ;;  %v3589_v53 = vpack.c.bf16 %v3449_v13, %v3448_v40  ;;  %v8412_v51 = vld [vmem:[%s11261_s5 + $0x78] sm:$0xff]   ;;  %v8414_v43 = vld [vmem:[%s11261_s5 + $0x70] sm:$0xff]  }
 0x34c   : > { %v7856_v38 = vpop.permute.xlu0 %7855  ;;  %3933 = vmatprep.mubr.bf16.mxu1 %v3590_v18  ;;  %v7853_v31 = vunpack.i.h.bf16 %v7851_v15  ;;  %v7852_v57 = vunpack.i.l.bf16 %v7851_v15  ;;  %v8456_v18 = vld [vmem:[#allocation2 + $0x1ef] sm:$0xff]  ;;  %6647 = vmatprep.subr.bf16.mxu1 %v8412_v51 }
 0x34d   : > { %v7858_v0 = vunpack.i.h.bf16 %v7856_v38  ;;  %v7857_v10 = vunpack.i.l.bf16 %v7856_v38  ;;  %v3389_v50 = vsel %vm278_vm0, %v8456_v18, %v7508_v45  ;;  %v3388_v38 = vsel %vm278_vm0, %v8457_v55, %v7507_v30  ;;  %v8420_v45 = vld [vmem:[%s11261_s5 + $0x58] sm:$0xff]  }
 0x34e   : > { %v3514_v19 = vsel %vm1507_vm4, %v3482_v33, %v7852_v57  ;;  %v3515_v16 = vsel %vm1507_vm4, %v3483_v39, %v7853_v31  ;;  %v8413_v39 = vld [vmem:[%s11261_s5 + $0x38] sm:$0xff]   ;;  %v8415_v33 = vld [vmem:[%s11261_s5 + $0x30] sm:$0xff]  }
 0x34f   : > { %v7861_v54 = vpop.permute.xlu1 %7860  ;;  %v3418_v48 = vsel %vm1507_vm4, %v3386_v63, %v7857_v10  ;;  %v3419_v5 = vsel %vm1507_vm4, %v3387_v24, %v7858_v0  ;;  %6648 = vmatpush3.bf16.msra.mxu1 %v8413_v39  ;;  %v6819_v0 = vpop.f32.mrf.mxu0 }
 0x350   : > { %v7863_v6 = vunpack.i.h.bf16 %v7861_v54  ;;  %v7862_v8 = vunpack.i.l.bf16 %v7861_v54  ;;  %v7866_v35 = vpop.permute.xlu0 %7865  ;;  %6649 = vmatprep.subr.bf16.mxu1 %v8414_v43  ;;  %v8416_v54 = vld [vmem:[%s11261_s5 + $0x68] sm:$0xff]  }
 0x351   : > { %v7868_v12 = vunpack.i.h.bf16 %v7866_v35  ;;  %v7867_v17 = vunpack.i.l.bf16 %v7866_v35 }
 0x352   : > { %v3546_v47 = vsel %vm1540_vm5, %v3514_v19, %v7862_v8  ;;  %v3547_v56 = vsel %vm1540_vm5, %v3515_v16, %v7863_v6  ;;  %v3992_v6 = vpop.f32.mrf.mxu0  ;;  %v10441_v8 = vld [vmem:[%s11260_s4] ss:$0 sm:$0xff] }
 0x353   : > { %v7871_v2 = vpop.permute.xlu1 %7870  ;;  %3934 = vmatmul.mubr.bf16.gmra.mxu1 %v3589_v53  ;;  %v3593_v20 = vpack.c.bf16 %v3547_v56, %v3546_v47  ;;  %v3450_v37 = vsel %vm1540_vm5, %v3418_v48, %v7867_v17  ;;  %v3451_v9 = vsel %vm1540_vm5, %v3419_v5, %v7868_v12  ;;  %v8417_v53 = vld [vmem:[%s11261_s5 + $0x28] sm:$0xff]  }
 0x354   : > { %v7873_v11 = vunpack.i.h.bf16 %v7871_v2  ;;  %v7872_v61 = vunpack.i.l.bf16 %v7871_v2  ;;  %v7876_v26 = vpop.permute.xlu0 %7875  ;;  %v3592_v58 = vpack.c.bf16 %v3451_v9, %v3450_v37  ;;  %6650 = vmatpush3.bf16.msra.mxu1 %v8415_v33  ;;  %v6820_v16 = vpop.f32.mrf.mxu0  ;;  %v8426_v33 = vld [vmem:[%s11261_s5 + $0x40] sm:$0xff]  }
 0x355   : > { %3941 = vmatprep.mubr.bf16.mxu1 %v3593_v20  ;;  %v7878_v42 = vunpack.i.h.bf16 %v7876_v26  ;;  %v7877_v62 = vunpack.i.l.bf16 %v7876_v26  ;;  %6651 = vmatprep.subr.bf16.mxu1 %v8416_v54 }
 0x356   : > { %v3485_v52 = vsel %vm278_vm0, %v8454_v32, %v7873_v11  ;;  %v3484_v22 = vsel %vm278_vm0, %v8455_v25, %v7872_v61  ;;  %v3995_v20 = vpop.f32.mrf.mxu0  ;;  %v8421_v32 = vld [vmem:[%s11261_s5 + $0x18] sm:$0xff]  }
 0x357   : > { %v7881_v59 = vpop.permute.xlu1 %7880  ;;  %v3516_v1 = vsel %vm1507_vm4, %v3484_v22, %v7877_v62  ;;  %v3517_v27 = vsel %vm1507_vm4, %v3485_v52, %v7878_v42 }
 0x358   : > { %v7886_v36 = vpop.permute.xlu0 %7885  ;;  %v7883_v49 = vunpack.i.h.bf16 %v7881_v59  ;;  %v7882_v29 = vunpack.i.l.bf16 %v7881_v59  ;;  %6652 = vmatpush3.bf16.msra.mxu1 %v8417_v53  ;;  %v10453_v9 = vpop.f32.mrf.mxu0 }
 0x359   : > { %v7888_v14 = vunpack.i.h.bf16 %v7886_v36  ;;  %v7887_v60 = vunpack.i.l.bf16 %v7886_v36  ;;  %6653 = vmatprep.subr.bf16.mxu1 %v8418_v4 }
 0x35a   : > { %v3420_v57 = vsel %vm1507_vm4, %v3388_v38, %v7882_v29  ;;  %v3421_v7 = vsel %vm1507_vm4, %v3389_v50, %v7883_v49  ;;  %v4008_v59 = vpop.f32.mrf.mxu0  ;;  %v8422_v49 = vld [vmem:[%s11261_s5 + $0x50] sm:$0xff]  }
 0x35b   : > { %v7891_v44 = vpop.permute.xlu1 %7890  ;;  %3942 = vmatmul.mubr.bf16.gmra.mxu1 %v3592_v58  ;;  %v3548_v15 = vsel %vm1540_vm5, %v3516_v1, %v7887_v60  ;;  %v3549_v46 = vsel %vm1540_vm5, %v3517_v27, %v7888_v14  ;;  %v8423_v29 = vld [vmem:[%s11261_s5 + $0x10] sm:$0xff]  }
 0x35c   : > { %v7893_v40 = vunpack.i.h.bf16 %v7891_v44  ;;  %v7892_v13 = vunpack.i.l.bf16 %v7891_v44  ;;  %v3596_v31 = vpack.c.bf16 %v3549_v46, %v3548_v15  ;;  %6654 = vmatpush3.bf16.msra.mxu1 %v8419_v3  ;;  %v6824_v18 = vpop.f32.mrf.mxu0 }
 0x35d   : > { %6655 = vmatprep.subr.bf16.mxu1 %v8420_v45 }
 0x35e   : > { %3949 = vmatprep.mubr.bf16.mxu1 %v3596_v31  ;;  %v3452_v41 = vsel %vm1540_vm5, %v3420_v57, %v7892_v13  ;;  %v3453_v28 = vsel %vm1540_vm5, %v3421_v7, %v7893_v40  ;;  %v8424_v31 = vld [vmem:[%s11261_s5 + $0x48] sm:$0xff]   ;;  %v4011_v51 = vpop.f32.mrf.mxu0 }
 0x35f   : > { %v3595_v34 = vpack.c.bf16 %v3453_v28, %v3452_v41  ;;  %v8425_v41 = vld [vmem:[%s11261_s5 + $0x8] sm:$0xff]  }
 0x360   : > { %6656 = vmatpush3.bf16.msra.mxu1 %v8421_v32 }
 0x361   : > { %6657 = vmatprep.subr.bf16.mxu1 %v8422_v49 }
 0x363   : > { %3950 = vmatmul.mubr.bf16.gmra.mxu1 %v3595_v34 }
 0x364   : > { %6658 = vmatpush3.bf16.msra.mxu1 %v8423_v29 }
 0x365   : > { %6659 = vmatprep.subr.bf16.mxu1 %v8424_v31 }
 0x368   : > { %6660 = vmatpush3.bf16.msra.mxu1 %v8425_v41 }
 0x369   : > { %6661 = vmatprep.subr.bf16.mxu1 %v8426_v33 }
 0x3ab   : > { %v6533_v10 = vpop.f32.mrf.mxu1 }
 0x3ad   : > { %v6534_v35 = vpop.f32.mrf.mxu1 }
 0x3ae   : > { %v6535_v12 = vadd.f32 %v6534_v35, %v6533_v10  ;;  %v8427_v10 = vld [vmem:[%s11261_s5] sm:$0xff]  }
 0x3af   : > { %v6536_v17 = vpop.f32.mrf.mxu1  ;;  %6662 = vmatpush3.bf16.msra.mxu1 %v8427_v10 }
 0x3b0   : > { %v3832_v19 = vadd.f32 %v6535_v12, %v10441_v8 }
 0x3b1   : > { %v6537_v23 = vpop.f32.mrf.mxu1 }
 0x3b2   : > { %v3993_v47 = vadd.f32 %v3992_v6, %v3832_v19  ;;  %v6538_v56 = vadd.f32 %v6537_v23, %v6536_v17  ;;  %v10493_v19 = vpop.f32.mrf.mxu0 }
 0x3b3   : > { %v6539_v24 = vpop.f32.mrf.mxu1 }
 0x3b4   : > { %v4119_v63 = vmax.f32 %v3993_v47, 0.0  ;;  %v3835_v2 = vadd.f32 %v6538_v56, %v10441_v8 }
 0x3b5   : > { %v6540_v11 = vpop.f32.mrf.mxu1 }
 0x3b6   : > { %4151 = vst.msk [vmem:[#allocation2 + $0x28] sm:$0xff] %vm278_vm0, %v4119_v63  ;;  %v3996_v61 = vadd.f32 %v3995_v20, %v3835_v2  ;;  %v6541_v26 = vadd.f32 %v6540_v11, %v6539_v24 }
 0x3b7   : > { %v6542_v48 = vpop.f32.mrf.mxu1 }
 0x3b8   : > { %v4120_v5 = vmax.f32 %v3996_v61, 0.0  ;;  %v3840_v37 = vadd.f32 %v6541_v26, %v10441_v8  ;;  %v4024_v26 = vpop.f32.mrf.mxu0 }
 0x3b9   : > { %v6543_v42 = vpop.f32.mrf.mxu1 }
 0x3ba   : > { %4152 = vst.msk [vmem:[#allocation2 + $0x30] sm:$0xff] %vm278_vm0, %v4120_v5  ;;  %v4001_v62 = vadd.f32 %v6819_v0, %v3840_v37  ;;  %v6544_v21 = vadd.f32 %v6543_v42, %v6542_v48  ;;  %v6828_v32 = vpop.f32.mrf.mxu0 }
 0x3bb   : > { %v6545_v52 = vpop.f32.mrf.mxu1 }
 0x3bc   : > { %v4121_v25 = vmax.f32 %v4001_v62, 0.0  ;;  %v3843_v22 = vadd.f32 %v6544_v21, %v10441_v8 }
 0x3bd   : > { %v6546_v30 = vpop.f32.mrf.mxu1  ;;  %v4279_v27 = vld [vmem:[#allocation2 + $0x27] sm:$0xff] }
 0x3be   : > { %4153 = vst.msk [vmem:[#allocation2 + $0x48] sm:$0xff] %vm278_vm0, %v4121_v25  ;;  %v4004_v36 = vadd.f32 %v6820_v16, %v3843_v22  ;;  %v6547_v58 = vadd.f32 %v6546_v30, %v6545_v52  ;;  %v4217_v43 = vld [vmem:[#allocation2 + $0x28] sm:$0xff] }
 0x3bf   : > { %v6548_v14 = vpop.f32.mrf.mxu1 }
 0x3c0   : > { %v4122_v60 = vmax.f32 %v4004_v36, 0.0  ;;  %v3848_v1 = vadd.f32 %v6547_v58, %v10441_v8 }
 0x3c1   : > { %v6549_v50 = vpop.f32.mrf.mxu1  ;;  %v4343_v44 = vld [vmem:[#allocation2 + $0x29] sm:$0xff]  ;;  %v4344_v15 = vld [vmem:[#allocation2 + $0x31] sm:$0xff] }
 0x3c2   : > { %v4280_v46 = vld [vmem:[#allocation2 + $0x2f] sm:$0xff]  ;;  %4154 = vst.msk [vmem:[#allocation2 + $0x50] sm:$0xff] %vm278_vm0, %v4122_v60  ;;  %v4009_v55 = vadd.f32 %v4008_v59, %v3848_v1  ;;  %v6550_v38 = vadd.f32 %v6549_v50, %v6548_v14  ;;  %v7909_v40 = vpack.i.bf16 %v4344_v15, %v4343_v44  ;;  %v4027_v1 = vpop.f32.mrf.mxu0 }
 0x3c3   : > { %v7914_v13 = vpack.i.bf16 %v4280_v46, %v4279_v27  ;;  %v6551_v57 = vpop.f32.mrf.mxu1  ;;  %v10475_v7 = vld [vmem:[#allocation2 + $0x30] sm:$0xff] }
 0x3c4   : > { %v4123_v28 = vmax.f32 %v4009_v55, 0.0  ;;  %v3851_v34 = vadd.f32 %v6550_v38, %v10441_v8  ;;  %7910 = vrot.lane.b32.xlu0 %v7909_v40, %s8522_s18  ;;  %v7919_v0 = vpack.i.bf16 %v10475_v7, %v4217_v43 }
 0x3c5   : > { %7915 = vrot.lane.b32.xlu1 %v7914_v13, %s8524_s22  ;;  %v6552_v39 = vpop.f32.mrf.mxu1  ;;  %v4375_v17 = vld [vmem:[#allocation2 + $0x47] sm:$0xff]  ;;  %v10513_v13 = vpop.f32.mrf.mxu0 }
 0x3c6   : > { %4155 = vst.msk [vmem:[#allocation2 + $0x68] sm:$0xff] %vm278_vm0, %v4123_v28  ;;  %v4012_v54 = vadd.f32 %v4011_v51, %v3851_v34  ;;  %v6553_v53 = vadd.f32 %v6552_v39, %v6551_v57 }
 0x3c7   : > { %v6554_v6 = vpop.f32.mrf.mxu1 }
 0x3c8   : > { %v4124_v35 = vmax.f32 %v4012_v54, 0.0  ;;  %v3856_v12 = vadd.f32 %v6553_v53, %v10441_v8 }
 0x3c9   : > { %7920 = vrot.lane.b32.xlu1 %v7919_v0, %s8522_s18  ;;  %v6555_v16 = vpop.f32.mrf.mxu1  ;;  %v4439_v23 = vld [vmem:[#allocation2 + $0x49] sm:$0xff]  ;;  %v4440_v47 = vld [vmem:[#allocation2 + $0x51] sm:$0xff]  ;;  %v4040_v0 = vpop.f32.mrf.mxu0 }
 0x3ca   : > { %v4376_v56 = vld [vmem:[#allocation2 + $0x4f] sm:$0xff]  ;;  %4156 = vst.msk [vmem:[#allocation2 + $0x70] sm:$0xff] %vm278_vm0, %v4124_v35  ;;  %v4017_v4 = vadd.f32 %v10453_v9, %v3856_v12  ;;  %v6556_v24 = vadd.f32 %v6555_v16, %v6554_v6  ;;  %v5433_v3 = vpack.c.bf16 %v4440_v47, %v4439_v23  ;;  %v7939_v49 = vpack.i.bf16 %v4440_v47, %v4439_v23 }
 0x3cb   : > { %v7929_v63 = vpack.i.bf16 %v4376_v56, %v4375_v17  ;;  %v6557_v2 = vpop.f32.mrf.mxu1  ;;  %v4408_v61 = vld [vmem:[#allocation2 + $0x50] sm:$0xff]  ;;  %v4407_v9 = vld [vmem:[#allocation2 + $0x48] sm:$0xff]  ;;  %v6832_v47 = vpop.f32.mrf.mxu0 }
 0x3cc   : > { %v4125_v20 = vmax.f32 %v4017_v4, 0.0  ;;  %v3859_v11 = vadd.f32 %v6556_v24, %v10441_v8  ;;  %6853 = vmatprep.mubr.msk.bf16.mxu0 %vm278_vm0, %v5433_v3  ;;  %v7934_v62 = vpack.i.bf16 %v4408_v61, %v4407_v9 }
 0x3cd   : > { %7925 = vrot.lane.b32.xlu1 %v7909_v40, %s8523_s15  ;;  %7930 = vrot.lane.b32.xlu0 %v7929_v63, %s8523_s15  ;;  %v6558_v48 = vpop.f32.mrf.mxu1  ;;  %v4377_v44 = vld [vmem:[#allocation2 + $0x67] sm:$0xff] }
 0x3ce   : > { %4157 = vst.msk [vmem:[#allocation2 + $0x88] sm:$0xff] %vm278_vm0, %v4125_v20  ;;  %v4020_v5 = vadd.f32 %v6824_v18, %v3859_v11  ;;  %v6559_v37 = vadd.f32 %v6558_v48, %v6557_v2  ;;  %v4409_v39 = vld [vmem:[#allocation2 + $0x68] sm:$0xff] }
 0x3cf   : > { %v6560_v42 = vpop.f32.mrf.mxu1 }
 0x3d0   : > { %v4126_v21 = vmax.f32 %v4020_v5, 0.0  ;;  %v3864_v45 = vadd.f32 %v6559_v37, %v10441_v8  ;;  %v4043_v37 = vpop.f32.mrf.mxu0 }
 0x3d1   : > { %7945 = vrot.lane.b32.xlu1 %v7929_v63, %s8524_s22  ;;  %7935 = vrot.lane.b32.xlu0 %v7934_v62, %s8524_s22  ;;  %v6561_v52 = vpop.f32.mrf.mxu1  ;;  %v4441_v25 = vld [vmem:[#allocation2 + $0x69] sm:$0xff]  ;;  %v4442_v22 = vld [vmem:[#allocation2 + $0x71] sm:$0xff] }
 0x3d2   : > { %4158 = vst.msk [vmem:[#allocation2 + $0x90] sm:$0xff] %vm278_vm0, %v4126_v21  ;;  %v4025_v59 = vadd.f32 %v4024_v26, %v3864_v45  ;;  %v6562_v30 = vadd.f32 %v6561_v52, %v6560_v42  ;;  %v5436_v36 = vpack.c.bf16 %v4442_v22, %v4441_v25  ;;  %v4378_v60 = vld [vmem:[#allocation2 + $0x6f] sm:$0xff]  ;;  %v7969_v17 = vpack.i.bf16 %v4442_v22, %v4441_v25  ;;  %v10546_v22 = vpop.f32.mrf.mxu0 }
 0x3d3   : > { %v6563_v58 = vpop.f32.mrf.mxu1  ;;  %v7959_v46 = vpack.i.bf16 %v4378_v60, %v4377_v44  ;;  %v4410_v40 = vld [vmem:[#allocation2 + $0x70] sm:$0xff] }
 0x3d4   : > { %v4127_v29 = vmax.f32 %v4025_v59, 0.0  ;;  %v3867_v14 = vadd.f32 %v6562_v30, %v10441_v8  ;;  %6854 = vmatmul.mubr.msk.bf16.vlgmr.msra.gmra.mxu0 %vm278_vm0, %v5436_v36  ;;  %v7964_v33 = vpack.i.bf16 %v4410_v40, %v4409_v39 }
 0x3d5   : > { %7950 = vrot.lane.b32.xlu1 %v7934_v62, %s8522_s18  ;;  %7940 = vrot.lane.b32.xlu0 %v7939_v49, %s8522_s18  ;;  %v6564_v27 = vpop.f32.mrf.mxu1  ;;  %v4379_v20 = vld [vmem:[#allocation2 + $0x87] sm:$0xff] }
 0x3d6   : > { %4159 = vst.msk [vmem:[#allocation2 + $0xa8] sm:$0xff] %vm278_vm0, %v4127_v29  ;;  %v4028_v18 = vadd.f32 %v4027_v1, %v3867_v14  ;;  %v6565_v50 = vadd.f32 %v6564_v27, %v6563_v58  ;;  %v4411_v21 = vld [vmem:[#allocation2 + $0x88] sm:$0xff] }
 0x3d7   : > { %v6566_v15 = vpop.f32.mrf.mxu1 }
 0x3d8   : > { %v4128_v55 = vmax.f32 %v4028_v18, 0.0  ;;  %v3872_v38 = vadd.f32 %v6565_v50, %v10441_v8  ;;  %v4056_v50 = vpop.f32.mrf.mxu0 }
 0x3d9   : > { %7955 = vrot.lane.b32.xlu1 %v7939_v49, %s8523_s15  ;;  %7960 = vrot.lane.b32.xlu0 %v7959_v46, %s8523_s15  ;;  %v6567_v31 = vpop.f32.mrf.mxu1  ;;  %v10516_v57 = vld [vmem:[#allocation2 + $0x89] sm:$0xff]  ;;  %v10518_v41 = vld [vmem:[#allocation2 + $0x91] sm:$0xff] }
 0x3da   : > { %4160 = vst.msk [vmem:[#allocation2 + $0xb0] sm:$0xff] %vm278_vm0, %v4128_v55  ;;  %v4033_v28 = vadd.f32 %v10493_v19, %v3872_v38  ;;  %v6568_v34 = vadd.f32 %v6567_v31, %v6566_v15  ;;  %v5439_v51 = vpack.c.bf16 %v10518_v41, %v10516_v57  ;;  %v4380_v23 = vld [vmem:[#allocation2 + $0x8f] sm:$0xff]  ;;  %v7999_v60 = vpack.i.bf16 %v10518_v41, %v10516_v57  ;;  %v6836_v41 = vpop.f32.mrf.mxu0 }
 0x3db   : > { %v6569_v43 = vpop.f32.mrf.mxu1  ;;  %v7989_v61 = vpack.i.bf16 %v4380_v23, %v4379_v20  ;;  %v4412_v5 = vld [vmem:[#allocation2 + $0x90] sm:$0xff] }
 0x3dc   : > { %v4129_v54 = vmax.f32 %v4033_v28, 0.0  ;;  %v3875_v53 = vadd.f32 %v6568_v34, %v10441_v8  ;;  %6857 = vmatprep.mubr.msk.bf16.mxu0 %vm278_vm0, %v5439_v51 }
 0x3dd   : > { %7975 = vrot.lane.b32.xlu1 %v7959_v46, %s8524_s22  ;;  %7965 = vrot.lane.b32.xlu0 %v7964_v33, %s8524_s22  ;;  %v6570_v10 = vpop.f32.mrf.mxu1  ;;  %v4381_v55 = vld [vmem:[#allocation2 + $0xa7] sm:$0xff] }
 0x3de   : > { %4161 = vst.msk [vmem:[#allocation2 + $0xc8] sm:$0xff] %vm278_vm0, %v4129_v54  ;;  %v4036_v6 = vadd.f32 %v6828_v32, %v3875_v53  ;;  %v6571_v35 = vadd.f32 %v6570_v10, %v6569_v43  ;;  %v7994_v32 = vpack.i.bf16 %v4412_v5, %v4411_v21  ;;  %v4413_v54 = vld [vmem:[#allocation2 + $0xa8] sm:$0xff] }
 0x3df   : > { %v6572_v12 = vpop.f32.mrf.mxu1 }
 0x3e0   : > { %v4130_v19 = vmax.f32 %v4036_v6, 0.0  ;;  %v3880_v16 = vadd.f32 %v6571_v35, %v10441_v8  ;;  %v4059_v35 = vpop.f32.mrf.mxu0 }
 0x3e1   : > { %7980 = vrot.lane.b32.xlu1 %v7964_v33, %s8522_s18  ;;  %7970 = vrot.lane.b32.xlu0 %v7969_v17, %s8522_s18  ;;  %v6573_v56 = vpop.f32.mrf.mxu1  ;;  %v10532_v4 = vld [vmem:[#allocation2 + $0xa9] sm:$0xff]  ;;  %v10534_v24 = vld [vmem:[#allocation2 + $0xb1] sm:$0xff] }
 0x3e2   : > { %4162 = vst.msk [vmem:[#allocation2 + $0xd0] sm:$0xff] %vm278_vm0, %v4130_v19  ;;  %v4041_v3 = vadd.f32 %v4040_v0, %v3880_v16  ;;  %v6574_v63 = vadd.f32 %v6573_v56, %v6572_v12  ;;  %v5442_v2 = vpack.c.bf16 %v10534_v24, %v10532_v4  ;;  %v4382_v18 = vld [vmem:[#allocation2 + $0xaf] sm:$0xff]  ;;  %v8029_v23 = vpack.i.bf16 %v10534_v24, %v10532_v4 }
 0x3e3   : > { %v6575_v11 = vpop.f32.mrf.mxu1  ;;  %v8019_v40 = vpack.i.bf16 %v4382_v18, %v4381_v55  ;;  %v4414_v57 = vld [vmem:[#allocation2 + $0xb0] sm:$0xff] }
 0x3e4   : > { %v4131_v26 = vmax.f32 %v4041_v3, 0.0  ;;  %v3883_v48 = vadd.f32 %v6574_v63, %v10441_v8  ;;  %6858 = vmatmul.mubr.msk.bf16.gmra.mxu0 %vm278_vm0, %v5442_v2  ;;  %v8024_v0 = vpack.i.bf16 %v4414_v57, %v4413_v54  ;;  %v10583_v63 = vpop.f32.mrf.mxu0 }
 0x3e5   : > { %7985 = vrot.lane.b32.xlu1 %v7969_v17, %s8523_s15  ;;  %7990 = vrot.lane.b32.xlu0 %v7989_v61, %s8523_s15  ;;  %v6576_v9 = vpop.f32.mrf.mxu1 }
 0x3e6   : > { %4163 = vst.msk [vmem:[#allocation2 + $0xe8] sm:$0xff] %vm278_vm0, %v4131_v26  ;;  %v4044_v42 = vadd.f32 %v4043_v37, %v3883_v48  ;;  %v6577_v62 = vadd.f32 %v6576_v9, %v6575_v11  ;;  %v4383_v26 = vld [vmem:[#allocation2 + $0xc7] sm:$0xff] }
 0x3e7   : > { %v6578_v45 = vpop.f32.mrf.mxu1 }
 0x3e8   : > { %v4132_v52 = vmax.f32 %v4044_v42, 0.0  ;;  %v3888_v25 = vadd.f32 %v6577_v62, %v10441_v8  ;;  %v4072_v62 = vpop.f32.mrf.mxu0 }
 0x3e9   : > { %8005 = vrot.lane.b32.xlu1 %v7989_v61, %s8524_s22  ;;  %7995 = vrot.lane.b32.xlu0 %v7994_v32, %s8524_s22  ;;  %v6579_v59 = vpop.f32.mrf.mxu1  ;;  %v10549_v30 = vld [vmem:[#allocation2 + $0xc9] sm:$0xff]  ;;  %v10551_v36 = vld [vmem:[#allocation2 + $0xd1] sm:$0xff] }
 0x3ea   : > { %4164 = vst.msk [vmem:[#allocation2 + $0xf0] sm:$0xff] %vm278_vm0, %v4132_v52  ;;  %v4049_v58 = vadd.f32 %v10513_v13, %v3888_v25  ;;  %v6580_v49 = vadd.f32 %v6579_v59, %v6578_v45  ;;  %v5445_v29 = vpack.c.bf16 %v10551_v36, %v10549_v30  ;;  %v4384_v3 = vld [vmem:[#allocation2 + $0xcf] sm:$0xff] }
 0x3eb   : > { %v6581_v14 = vpop.f32.mrf.mxu1  ;;  %v8049_v5 = vpack.i.bf16 %v4384_v3, %v4383_v26  ;;  %v4416_v42 = vld [vmem:[#allocation2 + $0xd0] sm:$0xff]  ;;  %v4415_v52 = vld [vmem:[#allocation2 + $0xc8] sm:$0xff] }
 0x3ec   : > { %v4133_v1 = vmax.f32 %v4049_v58, 0.0  ;;  %v3891_v27 = vadd.f32 %v6580_v49, %v10441_v8  ;;  %6861 = vmatprep.mubr.msk.bf16.mxu0 %vm278_vm0, %v5445_v29  ;;  %v6840_v49 = vpop.f32.mrf.mxu0 }
 0x3ed   : > { %8010 = vrot.lane.b32.xlu1 %v7994_v32, %s8522_s18  ;;  %8000 = vrot.lane.b32.xlu0 %v7999_v60, %s8522_s18  ;;  %v6582_v44 = vpop.f32.mrf.mxu1  ;;  %v4385_v57 = vld [vmem:[#allocation2 + $0xe7] sm:$0xff] }
 0x3ee   : > { %4165 = vst.msk [vmem:[#allocation2 + $0x108] sm:$0xff] %vm278_vm0, %v4133_v1  ;;  %v4052_v15 = vadd.f32 %v6832_v47, %v3891_v27  ;;  %v6583_v46 = vadd.f32 %v6582_v44, %v6581_v14  ;;  %v8059_v44 = vpack.i.bf16 %v10551_v36, %v10549_v30 }
 0x3ef   : > { %v6584_v38 = vpop.f32.mrf.mxu1 }
 0x3f0   : > { %v4134_v13 = vmax.f32 %v4052_v15, 0.0  ;;  %v3896_v31 = vadd.f32 %v6583_v46, %v10441_v8 }
 0x3f1   : > { %8015 = vrot.lane.b32.xlu1 %v7999_v60, %s8523_s15  ;;  %8020 = vrot.lane.b32.xlu0 %v8019_v40, %s8523_s15  ;;  %v6585_v28 = vpop.f32.mrf.mxu1  ;;  %v10567_v34 = vld [vmem:[#allocation2 + $0xe9] sm:$0xff]  ;;  %v10569_v51 = vld [vmem:[#allocation2 + $0xf1] sm:$0xff] }
 0x3f2   : > { %4166 = vst.msk [vmem:[#allocation2 + $0x110] sm:$0xff] %vm278_vm0, %v4134_v13  ;;  %v4057_v39 = vadd.f32 %v4056_v50, %v3896_v31  ;;  %v6586_v43 = vadd.f32 %v6585_v28, %v6584_v38  ;;  %v5448_v33 = vpack.c.bf16 %v10569_v51, %v10567_v34  ;;  %v4386_v55 = vld [vmem:[#allocation2 + $0xef] sm:$0xff]  ;;  %v4075_v38 = vpop.f32.mrf.mxu0 }
 0x3f3   : > { %v6587_v53 = vpop.f32.mrf.mxu1  ;;  %v8079_v28 = vpack.i.bf16 %v4386_v55, %v4385_v57 }
 0x3f4   : > { %v4135_v10 = vmax.f32 %v4057_v39, 0.0  ;;  %v3899_v6 = vadd.f32 %v6586_v43, %v10441_v8  ;;  %6862 = vmatmul.mubr.msk.bf16.gmra.mxu0 %vm278_vm0, %v5448_v33  ;;  %v4418_v39 = vld [vmem:[#allocation2 + $0xf0] sm:$0xff]  ;;  %v10618_v43 = vpop.f32.mrf.mxu0 }
 0x3f5   : > { %8035 = vrot.lane.b32.xlu1 %v8019_v40, %s8524_s22  ;;  %8025 = vrot.lane.b32.xlu0 %v8024_v0, %s8524_s22  ;;  %v6588_v12 = vpop.f32.mrf.mxu1 }
 0x3f6   : > { %4167 = vst.msk [vmem:[#allocation2 + $0x128] sm:$0xff] %vm278_vm0, %v4135_v10  ;;  %v4060_v17 = vadd.f32 %v4059_v35, %v3899_v6  ;;  %v6589_v19 = vadd.f32 %v6588_v12, %v6587_v53  ;;  %v4417_v35 = vld [vmem:[#allocation2 + $0xe8] sm:$0xff] }
 0x3f7   : > { %v6590_v16 = vpop.f32.mrf.mxu1 }
 0x3f8   : > { %v4136_v47 = vmax.f32 %v4060_v17, 0.0  ;;  %v3904_v56 = vadd.f32 %v6589_v19, %v10441_v8  ;;  %v8084_v17 = vpack.i.bf16 %v4418_v39, %v4417_v35 }
 0x3f9   : > { %8040 = vrot.lane.b32.xlu1 %v8024_v0, %s8522_s18  ;;  %8030 = vrot.lane.b32.xlu0 %v8029_v23, %s8522_s18  ;;  %v6591_v2 = vpop.f32.mrf.mxu1  ;;  %v10586_v20 = vld [vmem:[#allocation2 + $0x109] sm:$0xff]  ;;  %v10588_v11 = vld [vmem:[#allocation2 + $0x111] sm:$0xff] }
 0x3fa   : > { %4168 = vst.msk [vmem:[#allocation2 + $0x130] sm:$0xff] %vm278_vm0, %v4136_v47  ;;  %v4065_v61 = vadd.f32 %v10546_v22, %v3904_v56  ;;  %v6592_v4 = vadd.f32 %v6591_v2, %v6590_v16  ;;  %v5451_v24 = vpack.c.bf16 %v10588_v11, %v10586_v20  ;;  %v8054_v22 = vpack.i.bf16 %v4416_v42, %v4415_v52  ;;  %v4420_v52 = vld [vmem:[#allocation2 + $0x110] sm:$0xff] }
 0x3fb   : > { %v6593_v48 = vpop.f32.mrf.mxu1  ;;  %v8089_v2 = vpack.i.bf16 %v10569_v51, %v10567_v34  ;;  %v4387_v51 = vld [vmem:[#allocation2 + $0x107] sm:$0xff] }
 0x3fc   : > { %v4137_v37 = vmax.f32 %v4065_v61, 0.0  ;;  %v3907_v9 = vadd.f32 %v6592_v4, %v10441_v8  ;;  %6865 = vmatprep.mubr.msk.bf16.mxu0 %vm278_vm0, %v5451_v24  ;;  %v4388_v24 = vld [vmem:[#allocation2 + $0x10f] sm:$0xff] }
 0x3fd   : > { %8045 = vrot.lane.b32.xlu1 %v8029_v23, %s8523_s15  ;;  %8050 = vrot.lane.b32.xlu0 %v8049_v5, %s8523_s15  ;;  %v6594_v21 = vpop.f32.mrf.mxu1  ;;  %v4088_v23 = vpop.f32.mrf.mxu0 }
 0x3fe   : > { %4169 = vst.msk [vmem:[#allocation2 + $0x148] sm:$0xff] %vm278_vm0, %v4137_v37  ;;  %v4068_v45 = vadd.f32 %v6836_v41, %v3907_v9  ;;  %v6595_v32 = vadd.f32 %v6594_v21, %v6593_v48  ;;  %v8109_v21 = vpack.i.bf16 %v4388_v24, %v4387_v51 }
 0x3ff   : > { %v6596_v25 = vpop.f32.mrf.mxu1  ;;  %v6844_v26 = vpop.f32.mrf.mxu0 }
 0x400   : > { %v4138_v59 = vmax.f32 %v4068_v45, 0.0  ;;  %v3912_v58 = vadd.f32 %v6595_v32, %v10441_v8 }
 0x401   : > { %8065 = vrot.lane.b32.xlu1 %v8049_v5, %s8524_s22  ;;  %8055 = vrot.lane.b32.xlu0 %v8054_v22, %s8524_s22  ;;  %v6597_v29 = vpop.f32.mrf.mxu1  ;;  %v10602_v14 = vld [vmem:[#allocation2 + $0x129] sm:$0xff]  ;;  %v10604_v60 = vld [vmem:[#allocation2 + $0x131] sm:$0xff] }
 0x402   : > { %4170 = vst.msk [vmem:[#allocation2 + $0x150] sm:$0xff] %vm278_vm0, %v4138_v59  ;;  %v4073_v1 = vadd.f32 %v4072_v62, %v3912_v58  ;;  %v6598_v27 = vadd.f32 %v6597_v29, %v6596_v25  ;;  %v5454_v18 = vpack.c.bf16 %v10604_v60, %v10602_v14  ;;  %v4091_v25 = vpop.f32.mrf.mxu0  ;;  %v4422_v35 = vld [vmem:[#allocation2 + $0x130] sm:$0xff] }
 0x403   : > { %v6599_v50 = vpop.f32.mrf.mxu1 }
 0x404   : > { %v4139_v15 = vmax.f32 %v4073_v1, 0.0  ;;  %v3915_v46 = vadd.f32 %v6598_v27, %v10441_v8  ;;  %6866 = vmatmul.mubr.msk.bf16.gmra.mxu0 %vm278_vm0, %v5454_v18  ;;  %v10651_v27 = vpop.f32.mrf.mxu0 }
 0x405   : > { %8070 = vrot.lane.b32.xlu1 %v8054_v22, %s8522_s18  ;;  %8060 = vrot.lane.b32.xlu0 %v8059_v44, %s8522_s18  ;;  %v6600_v40 = vpop.f32.mrf.mxu1 }
 0x406   : > { %4171 = vst.msk [vmem:[#allocation2 + $0x168] sm:$0xff] %vm278_vm0, %v4139_v15  ;;  %v4076_v13 = vadd.f32 %v4075_v38, %v3915_v46  ;;  %v6601_v31 = vadd.f32 %v6600_v40, %v6599_v50  ;;  %v4104_v57 = vpop.f32.mrf.mxu0 }
 0x407   : > { %v6602_v41 = vpop.f32.mrf.mxu1 }
 0x408   : > { %v4140_v30 = vmax.f32 %v4076_v13, 0.0  ;;  %v3920_v36 = vadd.f32 %v6601_v31, %v10441_v8  ;;  %v8119_v31 = vpack.i.bf16 %v10588_v11, %v10586_v20  ;;  %v6848_v20 = vpop.f32.mrf.mxu0 }
 0x409   : > { %8075 = vrot.lane.b32.xlu1 %v8059_v44, %s8523_s15  ;;  %8080 = vrot.lane.b32.xlu0 %v8079_v28, %s8523_s15  ;;  %v6603_v33 = vpop.f32.mrf.mxu1  ;;  %v10621_v54 = vld [vmem:[#allocation2 + $0x149] sm:$0xff]  ;;  %v10623_v53 = vld [vmem:[#allocation2 + $0x151] sm:$0xff] }
 0x40a   : > { %4172 = vst.msk [vmem:[#allocation2 + $0x170] sm:$0xff] %vm278_vm0, %v4140_v30  ;;  %v4081_v0 = vadd.f32 %v10583_v63, %v3920_v36  ;;  %v6604_v10 = vadd.f32 %v6603_v33, %v6602_v41  ;;  %v5457_v6 = vpack.c.bf16 %v10623_v53, %v10621_v54  ;;  %v4390_v30 = vld [vmem:[#allocation2 + $0x12f] sm:$0xff]  ;;  %v4389_v33 = vld [vmem:[#allocation2 + $0x127] sm:$0xff] }
 0x40b   : > { %v6605_v12 = vpop.f32.mrf.mxu1 }
 0x40c   : > { %v4141_v19 = vmax.f32 %v4081_v0, 0.0  ;;  %v3923_v16 = vadd.f32 %v6604_v10, %v10441_v8  ;;  %6869 = vmatprep.mubr.msk.bf16.mxu0 %vm278_vm0, %v5457_v6  ;;  %v8139_v10 = vpack.i.bf16 %v4390_v30, %v4389_v33 }
 0x40d   : > { %8095 = vrot.lane.b32.xlu1 %v8079_v28, %s8524_s22  ;;  %8085 = vrot.lane.b32.xlu0 %v8084_v17, %s8524_s22  ;;  %v6606_v47 = vpop.f32.mrf.mxu1 }
 0x40e   : > { %4173 = vst.msk [vmem:[#allocation2 + $0x188] sm:$0xff] %vm278_vm0, %v4141_v19  ;;  %v4084_v56 = vadd.f32 %v6840_v49, %v3923_v16  ;;  %v6607_v3 = vadd.f32 %v6606_v47, %v6605_v12  ;;  %v4419_v49 = vld [vmem:[#allocation2 + $0x108] sm:$0xff] }
 0x40f   : > { %v6608_v63 = vpop.f32.mrf.mxu1  ;;  %v8114_v1 = vpack.i.bf16 %v4420_v52, %v4419_v49 }
 0x410   : > { %v4142_v61 = vmax.f32 %v4084_v56, 0.0  ;;  %v3928_v4 = vadd.f32 %v6607_v3, %v10441_v8  ;;  %v4421_v56 = vld [vmem:[#allocation2 + $0x128] sm:$0xff] }
 0x411   : > { %8100 = vrot.lane.b32.xlu1 %v8084_v17, %s8522_s18  ;;  %8090 = vrot.lane.b32.xlu0 %v8089_v2, %s8522_s18  ;;  %v6609_v48 = vpop.f32.mrf.mxu1  ;;  %v10639_v5 = vld [vmem:[#allocation2 + $0x169] sm:$0xff]  ;;  %v10641_v37 = vld [vmem:[#allocation2 + $0x171] sm:$0xff] }
 0x412   : > { %4174 = vst.msk [vmem:[#allocation2 + $0x190] sm:$0xff] %vm278_vm0, %v4142_v61  ;;  %v4089_v9 = vadd.f32 %v4088_v23, %v3928_v4  ;;  %v6610_v42 = vadd.f32 %v6609_v48, %v6608_v63  ;;  %v5460_v34 = vpack.c.bf16 %v10641_v37, %v10639_v5  ;;  %v8144_v63 = vpack.i.bf16 %v4422_v35, %v4421_v56  ;;  %v4426_v30 = vld [vmem:[#allocation2 + $0x170] sm:$0xff] }
 0x413   : > { %v6611_v62 = vpop.f32.mrf.mxu1 }
 0x414   : > { %v4143_v45 = vmax.f32 %v4089_v9, 0.0  ;;  %v3931_v32 = vadd.f32 %v6610_v42, %v10441_v8  ;;  %6870 = vmatmul.mubr.msk.bf16.gmra.mxu0 %vm278_vm0, %v5460_v34  ;;  %v8149_v42 = vpack.i.bf16 %v10604_v60, %v10602_v14  ;;  %v4391_v60 = vld [vmem:[#allocation2 + $0x147] sm:$0xff] }
 0x415   : > { %8105 = vrot.lane.b32.xlu1 %v8089_v2, %s8523_s15  ;;  %8110 = vrot.lane.b32.xlu0 %v8109_v21, %s8523_s15  ;;  %v6612_v22 = vpop.f32.mrf.mxu1  ;;  %v4107_v2 = vpop.f32.mrf.mxu0 }
 0x416   : > { %4175 = vst.msk [vmem:[#allocation2 + $0x1a8] sm:$0xff] %vm278_vm0, %v4143_v45  ;;  %v4092_v59 = vadd.f32 %v4091_v25, %v3931_v32  ;;  %v6613_v58 = vadd.f32 %v6612_v22, %v6611_v62  ;;  %v4392_v62 = vld [vmem:[#allocation2 + $0x14f] sm:$0xff]  ;;  %v7896_v22 = vpop.permute.xlu1 %7895 }
 0x417   : > { %v6614_v29 = vpop.f32.mrf.mxu1  ;;  %v7898_v33 = vunpack.i.h.bf16 %v7896_v22 }
 0x418   : > { %v4144_v18 = vmax.f32 %v4092_v59, 0.0  ;;  %v3936_v50 = vadd.f32 %v6613_v58, %v10441_v8  ;;  %v8169_v59 = vpack.i.bf16 %v4392_v62, %v4391_v60  ;;  %v4311_v62 = vld [vmem:[#allocation2 + $0x28] sm:$0xff] }
 0x419   : > { %8125 = vrot.lane.b32.xlu1 %v8109_v21, %s8524_s22  ;;  %8115 = vrot.lane.b32.xlu0 %v8114_v1, %s8524_s22  ;;  %v6615_v44 = vpop.f32.mrf.mxu1  ;;  %v10656_v15 = vld [vmem:[#allocation2 + $0x189] sm:$0xff]  ;;  %v10658_v46 = vld [vmem:[#allocation2 + $0x191] sm:$0xff] }
 0x41a   : > { %4176 = vst.msk [vmem:[#allocation2 + $0x1b0] sm:$0xff] %vm278_vm0, %v4144_v18  ;;  %v4097_v55 = vadd.f32 %v10618_v43, %v3936_v50  ;;  %v6616_v38 = vadd.f32 %v6615_v44, %v6614_v29  ;;  %v5463_v40 = vpack.c.bf16 %v10658_v46, %v10656_v15  ;;  %v4424_v29 = vld [vmem:[#allocation2 + $0x150] sm:$0xff]  ;;  %v7901_v44 = vpop.permute.xlu1 %7900 }
 0x41b   : > { %v6617_v13 = vpop.f32.mrf.mxu1  ;;  %v7903_v35 = vunpack.i.h.bf16 %v7901_v44  ;;  %v10749_v60 = vld [vmem:[#allocation2 + $0x190] sm:$0xff] }
 0x41c   : > { %v4145_v41 = vmax.f32 %v4097_v55, 0.0  ;;  %v3939_v28 = vadd.f32 %v6616_v38, %v10441_v8  ;;  %6873 = vmatprep.mubr.msk.bf16.mxu0 %vm278_vm0, %v5463_v40  ;;  %v8179_v40 = vpack.i.bf16 %v10623_v53, %v10621_v54 }
 0x41d   : > { %8130 = vrot.lane.b32.xlu1 %v8114_v1, %s8522_s18  ;;  %8120 = vrot.lane.b32.xlu0 %v8119_v31, %s8522_s18  ;;  %v6618_v36 = vpop.f32.mrf.mxu1 }
 0x41e   : > { %4177 = vst.msk [vmem:[#allocation2 + $0x1c8] sm:$0xff] %vm278_vm0, %v4145_v41  ;;  %v4100_v39 = vadd.f32 %v6844_v26, %v3939_v28  ;;  %v6619_v43 = vadd.f32 %v6618_v36, %v6617_v13  ;;  %v4394_v13 = vld [vmem:[#allocation2 + $0x16f] sm:$0xff]  ;;  %v4393_v41 = vld [vmem:[#allocation2 + $0x167] sm:$0xff] }
 0x41f   : > { %v6620_v0 = vpop.f32.mrf.mxu1  ;;  %v8199_v28 = vpack.i.bf16 %v4394_v13, %v4393_v41 }
 0x420   : > { %v4146_v11 = vmax.f32 %v4100_v39, 0.0  ;;  %v3944_v6 = vadd.f32 %v6619_v43, %v10441_v8  ;;  %v4425_v43 = vld [vmem:[#allocation2 + $0x168] sm:$0xff] }
 0x421   : > { %8135 = vrot.lane.b32.xlu1 %v8119_v31, %s8523_s15  ;;  %8140 = vrot.lane.b32.xlu0 %v8139_v10, %s8523_s15  ;;  %v6621_v12 = vpop.f32.mrf.mxu1  ;;  %v10674_v17 = vld [vmem:[#allocation2 + $0x1a9] sm:$0xff]  ;;  %v10676_v19 = vld [vmem:[#allocation2 + $0x1b1] sm:$0xff]  ;;  %v10717_v31 = vpop.permute.xlu0 %7905 }
 0x422   : > { %4178 = vst.msk [vmem:[#allocation2 + $0x1d0] sm:$0xff] %vm278_vm0, %v4146_v11  ;;  %v6622_v16 = vadd.f32 %v6621_v12, %v6620_v0  ;;  %v4105_v23 = vadd.f32 %v4104_v57, %v3944_v6  ;;  %v5466_v47 = vpack.c.bf16 %v10676_v19, %v10674_v17  ;;  %v7897_v0 = vunpack.i.l.bf16 %v7896_v22  ;;  %v4183_v11 = vld [vmem:[#allocation2 + $0x7] sm:$0xff]  ;;  %v4184_v6 = vld [vmem:[#allocation2 + $0xf] sm:$0xff] }
 0x423   : > { %v6623_v3 = vpop.f32.mrf.mxu1  ;;  %v7902_v12 = vunpack.i.l.bf16 %v7901_v44 }
 0x424   : > { %v4147_v61 = vmax.f32 %v4105_v23, 0.0  ;;  %6874 = vmatmul.mubr.msk.bf16.gmra.mxu0 %vm278_vm0, %v5466_v47  ;;  %v3947_v4 = vadd.f32 %v6622_v16, %v10441_v8  ;;  %v5240_v23 = vsel %vm278_vm0, %v4184_v6, %v7898_v33  ;;  %v5239_v47 = vsel %vm278_vm0, %v4183_v11, %v7897_v0  ;;  %v4398_v0 = vld [vmem:[#allocation2 + $0x1af] sm:$0xff] }
 0x425   : > { %8155 = vrot.lane.b32.xlu1 %v8139_v10, %s8524_s22  ;;  %8145 = vrot.lane.b32.xlu0 %v8144_v63, %s8524_s22  ;;  %v6624_v24 = vpop.f32.mrf.mxu1 }
 0x426   : > { %4179 = vst.msk [vmem:[#allocation2 + $0x1e8] sm:$0xff] %vm278_vm0, %v4147_v61  ;;  %v6625_v26 = vadd.f32 %v6624_v24, %v6623_v3  ;;  %v4108_v48 = vadd.f32 %v4107_v2, %v3947_v4  ;;  %v8209_v3 = vpack.i.bf16 %v10641_v37, %v10639_v5  ;;  %v4396_v61 = vld [vmem:[#allocation2 + $0x18f] sm:$0xff] }
 0x427   : > { %v6626_v9 = vpop.f32.mrf.mxu1 }
 0x428   : > { %v3952_v34 = vadd.f32 %v6625_v26, %v10441_v8  ;;  %v4148_v51 = vmax.f32 %v4108_v48, 0.0 }
 0x429   : > { %8160 = vrot.lane.b32.xlu1 %v8144_v63, %s8522_s18  ;;  %8150 = vrot.lane.b32.xlu0 %v8149_v42, %s8522_s18  ;;  %v6627_v21 = vpop.f32.mrf.mxu1  ;;  %v10691_v45 = vld [vmem:[#allocation2 + $0x1c9] sm:$0xff]  ;;  %v10693_v32 = vld [vmem:[#allocation2 + $0x1d1] sm:$0xff] }
 0x42a   : > { %v4113_v52 = vadd.f32 %v10651_v27, %v3952_v34  ;;  %4180 = vst.msk [vmem:[#allocation2 + $0x1f0] sm:$0xff] %vm278_vm0, %v4148_v51  ;;  %v6628_v25 = vadd.f32 %v6627_v21, %v6626_v9  ;;  %v5469_v14 = vpack.c.bf16 %v10693_v32, %v10691_v45  ;;  %v4423_v27 = vld [vmem:[#allocation2 + $0x148] sm:$0xff]  ;;  %v5271_v9 = vsel %vm1507_vm4, %v5239_v47, %v7902_v12 }
 0x42b   : > { %v8174_v18 = vpack.i.bf16 %v4424_v29, %v4423_v27  ;;  %v4395_v51 = vld [vmem:[#allocation2 + $0x187] sm:$0xff] }
 0x42c   : > { %v4149_v58 = vmax.f32 %v4113_v52, 0.0  ;;  %v3955_v49 = vadd.f32 %v6628_v25, %v10441_v8  ;;  %6877 = vmatprep.mubr.msk.bf16.mxu0 %vm278_vm0, %v5469_v14  ;;  %v8229_v37 = vpack.i.bf16 %v4396_v61, %v4395_v51  ;;  %v10760_v27 = vld [vmem:[#allocation2 + $0x188] sm:$0xff] }
 0x42d   : > { %8165 = vrot.lane.b32.xlu1 %v8149_v42, %s8523_s15  ;;  %8170 = vrot.lane.b32.xlu0 %v8169_v59, %s8523_s15  ;;  %v5272_v42 = vsel %vm1507_vm4, %v5240_v23, %v7903_v35  ;;  %v8234_v44 = vpack.i.bf16 %v10749_v60, %v10760_v27 }
 0x42e   : > { %4181 = vst.msk [vmem:[#allocation2 + $0x208] sm:$0xff] %vm278_vm0, %v4149_v58  ;;  %v4116_v1 = vadd.f32 %v6848_v20, %v3955_v49  ;;  %v8204_v20 = vpack.i.bf16 %v4426_v30, %v4425_v43 }
 0x430   : > { %v4150_v50 = vmax.f32 %v4116_v1, 0.0 }
 0x431   : > { %8185 = vrot.lane.b32.xlu1 %v8169_v59, %s8524_s22  ;;  %8175 = vrot.lane.b32.xlu0 %v8174_v18, %s8524_s22  ;;  %v10706_v55 = vld [vmem:[#allocation2 + $0x1e9] sm:$0xff]  ;;  %v10708_v8 = vld [vmem:[#allocation2 + $0x1f1] sm:$0xff] }
 0x432   : > { %4182 = vst.msk [vmem:[#allocation2 + $0x210] sm:$0xff] %vm278_vm0, %v4150_v50  ;;  %v5472_v38 = vpack.c.bf16 %v10708_v8, %v10706_v55 }
 0x434   : > { %6878 = vmatmul.mubr.msk.bf16.gmra.mxu0 %vm278_vm0, %v5472_v38 }
 0x435   : > { %8190 = vrot.lane.b32.xlu1 %v8174_v18, %s8522_s18  ;;  %8180 = vrot.lane.b32.xlu0 %v8179_v40, %s8522_s18 }
 0x436   : > { %v7911_v10 = vpop.permute.xlu0 %7910 }
 0x437   : > { %v7916_v57 = vpop.permute.xlu1 %7915  ;;  %v7913_v63 = vunpack.i.h.bf16 %v7911_v10  ;;  %v7912_v2 = vunpack.i.l.bf16 %v7911_v10  ;;  %v4185_v10 = vld [vmem:[#allocation2 + $0x27] sm:$0xff] }
 0x438   : > { %v7918_v4 = vunpack.i.h.bf16 %v7916_v57  ;;  %v7917_v24 = vunpack.i.l.bf16 %v7916_v57 }
 0x439   : > { %8195 = vrot.lane.b32.xlu1 %v8179_v40, %s8523_s15  ;;  %8200 = vrot.lane.b32.xlu0 %v8199_v28, %s8523_s15  ;;  %v10722_v36 = vld [vmem:[#allocation2 + $0x209] sm:$0xff]  ;;  %v10724_v54 = vld [vmem:[#allocation2 + $0x211] sm:$0xff]  ;;  %v5336_v21 = vsel %vm278_vm0, %v10475_v7, %v7913_v63  ;;  %v5335_v52 = vsel %vm278_vm0, %v4311_v62, %v7912_v2 }
 0x43a   : > { %v5475_v39 = vpack.c.bf16 %v10724_v54, %v10722_v36  ;;  %v5304_v22 = vsel %vm1540_vm5, %v5272_v42, %v7918_v4  ;;  %v5303_v59 = vsel %vm1540_vm5, %v5271_v9, %v7917_v24 }
 0x43b   : > { %v10726_v53 = vpop.permute.xlu1 %7920  ;;  %v5431_v38 = vpack.c.bf16 %v5304_v22, %v5303_v59 }
 0x43c   : > { %6881 = vmatprep.mubr.msk.bf16.mxu0 %vm278_vm0, %v5475_v39  ;;  %v7923_v40 = vunpack.i.h.bf16 %v10726_v53  ;;  %v7922_v13 = vunpack.i.l.bf16 %v10726_v53  ;;  %v8239_v39 = vpack.i.bf16 %v10658_v46, %v10656_v15  ;;  %v10782_v46 = vld [vmem:[#allocation2 + $0x1a7] sm:$0xff] }
 0x43d   : > { %8215 = vrot.lane.b32.xlu1 %v8199_v28, %s8524_s22  ;;  %8205 = vrot.lane.b32.xlu0 %v8204_v20, %s8524_s22  ;;  %v8259_v2 = vpack.i.bf16 %v4398_v0, %v10782_v46 }
 0x43e   : > { %v5241_v12 = vsel %vm278_vm0, %v4185_v10, %v7922_v13  ;;  %v4187_v13 = vld [vmem:[#allocation2 + $0x47] sm:$0xff]  ;;  %v4316_v10 = vld [vmem:[#allocation2 + $0x70] sm:$0xff] }
 0x43f   : > { %v10733_v16 = vpop.permute.xlu1 %7925  ;;  %v7931_v56 = vpop.permute.xlu0 %7930 }
 0x440   : > { %v7933_v26 = vunpack.i.h.bf16 %v7931_v56  ;;  %v7932_v48 = vunpack.i.l.bf16 %v7931_v56  ;;  %v7928_v41 = vunpack.i.h.bf16 %v10733_v16  ;;  %v7927_v28 = vunpack.i.l.bf16 %v10733_v16  ;;  %v4314_v56 = vld [vmem:[#allocation2 + $0x50] sm:$0xff] }
 0x441   : > { %8220 = vrot.lane.b32.xlu1 %v8204_v20, %s8522_s18  ;;  %8210 = vrot.lane.b32.xlu0 %v8209_v3, %s8522_s18  ;;  %v4186_v20 = vld [vmem:[#allocation2 + $0x2f] sm:$0xff] }
 0x442   : > { %v5368_v58 = vsel %vm1507_vm4, %v5336_v21, %v7933_v26  ;;  %v5367_v49 = vsel %vm1507_vm4, %v5335_v52, %v7932_v48  ;;  %v5242_v16 = vsel %vm278_vm0, %v4186_v20, %v7923_v40  ;;  %v5273_v23 = vsel %vm1507_vm4, %v5241_v12, %v7927_v28  ;;  %v10790_v48 = vld [vmem:[#allocation2 + $0x1b0] sm:$0xff]  ;;  %v10801_v21 = vld [vmem:[#allocation2 + $0x1a8] sm:$0xff] }
 0x443   : > { %v10743_v34 = vpop.permute.xlu1 %7945  ;;  %v7936_v5 = vpop.permute.xlu0 %7935  ;;  %v5274_v47 = vsel %vm1507_vm4, %v5242_v16, %v7928_v41  ;;  %v10816_v40 = vld [vmem:[#allocation2 + $0x1cf] sm:$0xff] }
 0x444   : > { %v7938_v25 = vunpack.i.h.bf16 %v7936_v5  ;;  %v7937_v14 = vunpack.i.l.bf16 %v7936_v5  ;;  %v7948_v53 = vunpack.i.h.bf16 %v10743_v34  ;;  %v7947_v11 = vunpack.i.l.bf16 %v10743_v34  ;;  %v4188_v41 = vld [vmem:[#allocation2 + $0x4f] sm:$0xff] }
 0x445   : > { %8225 = vrot.lane.b32.xlu1 %v8209_v3, %s8523_s15  ;;  %8230 = vrot.lane.b32.xlu0 %v8229_v37, %s8523_s15  ;;  %v4313_v3 = vld [vmem:[#allocation2 + $0x48] sm:$0xff] }
 0x446   : > { %v5399_v7 = vsel %vm1540_vm5, %v5367_v49, %v7937_v14  ;;  %v5400_v1 = vsel %vm1540_vm5, %v5368_v58, %v7938_v25  ;;  %v5305_v34 = vsel %vm1540_vm5, %v5273_v23, %v7947_v11  ;;  %v5306_v51 = vsel %vm1540_vm5, %v5274_v47, %v7948_v53  ;;  %v4315_v20 = vld [vmem:[#allocation2 + $0x68] sm:$0xff] }
 0x447   : > { %v10756_v29 = vpop.permute.xlu1 %7950  ;;  %v7941_v18 = vpop.permute.xlu0 %7940  ;;  %v5432_v50 = vpack.c.bf16 %v5400_v1, %v5399_v7  ;;  %v8264_v14 = vpack.i.bf16 %v10790_v48, %v10801_v21  ;;  %v5434_v22 = vpack.c.bf16 %v5306_v51, %v5305_v34 }
 0x448   : > { %v7943_v43 = vunpack.i.h.bf16 %v7941_v18  ;;  %v7942_v33 = vunpack.i.l.bf16 %v7941_v18  ;;  %v7953_v59 = vunpack.i.h.bf16 %v10756_v29  ;;  %v7952_v58 = vunpack.i.l.bf16 %v10756_v29 }
 0x449   : > { %8245 = vrot.lane.b32.xlu1 %v8229_v37, %s8524_s22  ;;  %5710 = vmatprep.mubr.bf16.mxu1 %v5432_v50  ;;  %v8269_v50 = vpack.i.bf16 %v10676_v19, %v10674_v17 }
 0x44a   : > { %8235 = vrot.lane.b32.xlu0 %v8234_v44, %s8524_s22  ;;  %5711 = vmatmul.mubr.bf16.vlgmr.msra.gmra.mxu1 %v5431_v38  ;;  %v5338_v61 = vsel %vm278_vm0, %v4314_v56, %v7943_v43  ;;  %v5337_v4 = vsel %vm278_vm0, %v4313_v3, %v7942_v33  ;;  %v5244_v17 = vsel %vm278_vm0, %v4188_v41, %v7953_v59  ;;  %v10825_v43 = vld [vmem:[#allocation2 + $0x1c7] sm:$0xff] }
 0x44b   : > { %v10768_v57 = vpop.permute.xlu1 %7955  ;;  %v7961_v30 = vpop.permute.xlu0 %7960  ;;  %v8289_v11 = vpack.i.bf16 %v10816_v40, %v10825_v43 }
 0x44c   : > { %v7963_v6 = vunpack.i.h.bf16 %v7961_v30  ;;  %v7962_v35 = vunpack.i.l.bf16 %v7961_v30  ;;  %v7958_v7 = vunpack.i.h.bf16 %v10768_v57  ;;  %v7957_v1 = vunpack.i.l.bf16 %v10768_v57 }
 0x44d   : > { %8250 = vrot.lane.b32.xlu1 %v8234_v44, %s8522_s18  ;;  %v5243_v57 = vsel %vm278_vm0, %v4187_v13, %v7952_v58  ;;  %v10860_v58 = vld [vmem:[#allocation2 + $0x1ef] sm:$0xff] }
 0x44e   : > { %8240 = vrot.lane.b32.xlu0 %v8239_v39, %s8522_s18  ;;  %v5370_v9 = vsel %vm1507_vm4, %v5338_v61, %v7963_v6  ;;  %v5369_v42 = vsel %vm1507_vm4, %v5337_v4, %v7962_v35  ;;  %v5275_v33 = vsel %vm1507_vm4, %v5243_v57, %v7957_v1  ;;  %v5276_v0 = vsel %vm1507_vm4, %v5244_v17, %v7958_v7  ;;  %v4189_v7 = vld [vmem:[#allocation2 + $0x67] sm:$0xff]  ;;  %v4190_v1 = vld [vmem:[#allocation2 + $0x6f] sm:$0xff] }
 0x44f   : > { %v10780_v15 = vpop.permute.xlu1 %7975  ;;  %v7966_v63 = vpop.permute.xlu0 %7965 }
 0x450   : > { %v7968_v24 = vunpack.i.h.bf16 %v7966_v63  ;;  %v7967_v26 = vunpack.i.l.bf16 %v7966_v63  ;;  %v7978_v29 = vunpack.i.h.bf16 %v10780_v15  ;;  %v7977_v28 = vunpack.i.l.bf16 %v10780_v15  ;;  %v10834_v15 = vld [vmem:[#allocation2 + $0x1d0] sm:$0xff] }
 0x451   : > { %8255 = vrot.lane.b32.xlu1 %v8239_v39, %s8523_s15 }
 0x452   : > { %8260 = vrot.lane.b32.xlu0 %v8259_v2, %s8523_s15  ;;  %v5401_v5 = vsel %vm1540_vm5, %v5369_v42, %v7967_v26  ;;  %v5402_v37 = vsel %vm1540_vm5, %v5370_v9, %v7968_v24  ;;  %v5307_v56 = vsel %vm1540_vm5, %v5275_v33, %v7977_v28  ;;  %v5308_v3 = vsel %vm1540_vm5, %v5276_v0, %v7978_v29  ;;  %v4317_v29 = vld [vmem:[#allocation2 + $0x88] sm:$0xff]  ;;  %v4318_v28 = vld [vmem:[#allocation2 + $0x90] sm:$0xff] }
 0x453   : > { %v10797_v62 = vpop.permute.xlu1 %7980  ;;  %v7971_v52 = vpop.permute.xlu0 %7970  ;;  %v5435_v25 = vpack.c.bf16 %v5402_v37, %v5401_v5  ;;  %v5437_v42 = vpack.c.bf16 %v5308_v3, %v5307_v56  ;;  %v10878_v0 = vld [vmem:[#allocation2 + $0x1f0] sm:$0xff] }
 0x454   : > { %v7973_v44 = vunpack.i.h.bf16 %v7971_v52  ;;  %v7972_v38 = vunpack.i.l.bf16 %v7971_v52  ;;  %v7983_v34 = vunpack.i.h.bf16 %v10797_v62  ;;  %v7982_v51 = vunpack.i.l.bf16 %v10797_v62 }
 0x455   : > { %8275 = vrot.lane.b32.xlu1 %v8259_v2, %s8524_s22  ;;  %5718 = vmatprep.mubr.bf16.mxu1 %v5435_v25  ;;  %v10843_v2 = vld [vmem:[#allocation2 + $0x1c8] sm:$0xff] }
 0x456   : > { %8265 = vrot.lane.b32.xlu0 %v8264_v14, %s8524_s22  ;;  %5719 = vmatmul.mubr.bf16.gmra.mxu1 %v5434_v22  ;;  %v5340_v6 = vsel %vm278_vm0, %v4316_v10, %v7973_v44  ;;  %v5339_v35 = vsel %vm278_vm0, %v4315_v20, %v7972_v38  ;;  %v8294_v26 = vpack.i.bf16 %v10834_v15, %v10843_v2  ;;  %v10869_v38 = vld [vmem:[#allocation2 + $0x1e7] sm:$0xff] }
 0x457   : > { %v10809_v49 = vpop.permute.xlu1 %7985  ;;  %v7991_v18 = vpop.permute.xlu0 %7990 }
 0x458   : > { %v7993_v30 = vunpack.i.h.bf16 %v7991_v18  ;;  %v7992_v39 = vunpack.i.l.bf16 %v7991_v18  ;;  %v7988_v37 = vunpack.i.h.bf16 %v10809_v49  ;;  %v7987_v52 = vunpack.i.l.bf16 %v10809_v49 }
 0x459   : > { %8280 = vrot.lane.b32.xlu1 %v8264_v14, %s8522_s18  ;;  %v8299_v14 = vpack.i.bf16 %v10693_v32, %v10691_v45  ;;  %v5245_v49 = vsel %vm278_vm0, %v4189_v7, %v7982_v51  ;;  %v5246_v45 = vsel %vm278_vm0, %v4190_v1, %v7983_v34  ;;  %v8329_v51 = vpack.i.bf16 %v10708_v8, %v10706_v55  ;;  %v4403_v8 = vld [vmem:[#allocation2 + $0x207] sm:$0xff] }
 0x45a   : > { %8270 = vrot.lane.b32.xlu0 %v8269_v50, %s8522_s18  ;;  %v5371_v23 = vsel %vm1507_vm4, %v5339_v35, %v7992_v39  ;;  %v5372_v47 = vsel %vm1507_vm4, %v5340_v6, %v7993_v30  ;;  %v5277_v13 = vsel %vm1507_vm4, %v5245_v49, %v7987_v52  ;;  %v5278_v41 = vsel %vm1507_vm4, %v5246_v45, %v7988_v37  ;;  %v10887_v35 = vld [vmem:[#allocation2 + $0x1e8] sm:$0xff] }
 0x45b   : > { %v10823_v19 = vpop.permute.xlu1 %8005  ;;  %v7996_v53 = vpop.permute.xlu0 %7995  ;;  %v8319_v39 = vpack.i.bf16 %v10860_v58, %v10869_v38  ;;  %v4191_v37 = vld [vmem:[#allocation2 + $0x87] sm:$0xff] }
 0x45c   : > { %v7998_v12 = vunpack.i.h.bf16 %v7996_v53  ;;  %v7997_v16 = vunpack.i.l.bf16 %v7996_v53  ;;  %v8008_v62 = vunpack.i.h.bf16 %v10823_v19  ;;  %v8007_v18 = vunpack.i.l.bf16 %v10823_v19 }
 0x45d   : > { %8285 = vrot.lane.b32.xlu1 %v8269_v50, %s8523_s15 }
 0x45e   : > { %8290 = vrot.lane.b32.xlu0 %v8289_v11, %s8523_s15  ;;  %v5403_v61 = vsel %vm1540_vm5, %v5371_v23, %v7997_v16  ;;  %v5404_v4 = vsel %vm1540_vm5, %v5372_v47, %v7998_v12  ;;  %v5309_v53 = vsel %vm1540_vm5, %v5277_v13, %v8007_v18  ;;  %v8324_v47 = vpack.i.bf16 %v10878_v0, %v10887_v35 }
 0x45f   : > { %v10841_v63 = vpop.permute.xlu1 %8010  ;;  %v8001_v24 = vpop.permute.xlu0 %8000  ;;  %v5438_v9 = vpack.c.bf16 %v5404_v4, %v5403_v61 }
 0x460   : > { %v8003_v22 = vunpack.i.h.bf16 %v8001_v24  ;;  %v8002_v59 = vunpack.i.l.bf16 %v8001_v24  ;;  %v8012_v61 = vunpack.i.l.bf16 %v10841_v63  ;;  %v8013_v4 = vunpack.i.h.bf16 %v10841_v63  ;;  %v4192_v63 = vld [vmem:[#allocation2 + $0x8f] sm:$0xff] }
 0x461   : > { %8305 = vrot.lane.b32.xlu1 %v8289_v11, %s8524_s22  ;;  %5726 = vmatprep.mubr.bf16.mxu1 %v5438_v9  ;;  %v5310_v11 = vsel %vm1540_vm5, %v5278_v41, %v8008_v62 }
 0x462   : > { %8295 = vrot.lane.b32.xlu0 %v8294_v26, %s8524_s22  ;;  %5727 = vmatmul.mubr.bf16.gmra.mxu1 %v5437_v42  ;;  %v5342_v57 = vsel %vm278_vm0, %v4318_v28, %v8003_v22  ;;  %v5341_v17 = vsel %vm278_vm0, %v4317_v29, %v8002_v59  ;;  %v5440_v3 = vpack.c.bf16 %v5310_v11, %v5309_v53  ;;  %v10925_v53 = vld [vmem:[#allocation2 + $0x208] sm:$0xff] }
 0x463   : > { %v10853_v5 = vpop.permute.xlu1 %8015  ;;  %v8021_v25 = vpop.permute.xlu0 %8020  ;;  %v5247_v22 = vsel %vm278_vm0, %v4191_v37, %v8012_v61  ;;  %v4438_v61 = vld [vmem:[#allocation2 + $0x230] sm:$0xff]  ;;  %v8359_v37 = vpack.i.bf16 %v10724_v54, %v10722_v36 }
 0x464   : > { %v8023_v50 = vunpack.i.h.bf16 %v8021_v25  ;;  %v8022_v44 = vunpack.i.l.bf16 %v8021_v25  ;;  %v8017_v24 = vunpack.i.l.bf16 %v10853_v5  ;;  %v8018_v9 = vunpack.i.h.bf16 %v10853_v5 }
 0x465   : > { %8310 = vrot.lane.b32.xlu1 %v8294_v26, %s8522_s18  ;;  %v5248_v5 = vsel %vm278_vm0, %v4192_v63, %v8013_v4  ;;  %v4193_v63 = vld [vmem:[#allocation2 + $0xa7] sm:$0xff] }
 0x466   : > { %8300 = vrot.lane.b32.xlu0 %v8299_v14, %s8522_s18  ;;  %v5373_v10 = vsel %vm1507_vm4, %v5341_v17, %v8022_v44  ;;  %v5374_v20 = vsel %vm1507_vm4, %v5342_v57, %v8023_v50  ;;  %v5279_v62 = vsel %vm1507_vm4, %v5247_v22, %v8017_v24  ;;  %v5280_v18 = vsel %vm1507_vm4, %v5248_v5, %v8018_v9  ;;  %v4319_v50 = vld [vmem:[#allocation2 + $0xa8] sm:$0xff]  ;;  %v4320_v44 = vld [vmem:[#allocation2 + $0xb0] sm:$0xff] }
 0x467   : > { %v10867_v32 = vpop.permute.xlu1 %8035  ;;  %v8026_v30 = vpop.permute.xlu0 %8025  ;;  %v4470_v57 = vld [vmem:[#allocation2 + $0x231] sm:$0xff] }
 0x468   : > { %v8028_v19 = vunpack.i.h.bf16 %v8026_v30  ;;  %v8027_v33 = vunpack.i.l.bf16 %v8026_v30  ;;  %v8037_v42 = vunpack.i.l.bf16 %v10867_v32  ;;  %v8038_v59 = vunpack.i.h.bf16 %v10867_v32  ;;  %v10917_v30 = vld [vmem:[#allocation2 + $0x210] sm:$0xff] }
 0x469   : > { %8315 = vrot.lane.b32.xlu1 %v8299_v14, %s8523_s15  ;;  %v4404_v14 = vld [vmem:[#allocation2 + $0x20f] sm:$0xff] }
 0x46a   : > { %8320 = vrot.lane.b32.xlu0 %v8319_v39, %s8523_s15  ;;  %v5405_v12 = vsel %vm1540_vm5, %v5373_v10, %v8027_v33  ;;  %v5406_v16 = vsel %vm1540_vm5, %v5374_v20, %v8028_v19  ;;  %v8349_v45 = vpack.i.bf16 %v4404_v14, %v4403_v8  ;;  %v5311_v13 = vsel %vm1540_vm5, %v5279_v62, %v8037_v42  ;;  %v4194_v22 = vld [vmem:[#allocation2 + $0xaf] sm:$0xff] }
 0x46b   : > { %v10885_v6 = vpop.permute.xlu1 %8040  ;;  %v8031_v23 = vpop.permute.xlu0 %8030  ;;  %v5441_v56 = vpack.c.bf16 %v5406_v16, %v5405_v12  ;;  %v5312_v33 = vsel %vm1540_vm5, %v5280_v18, %v8038_v59  ;;  %v4321_v8 = vld [vmem:[#allocation2 + $0xc8] sm:$0xff]  ;;  %v4322_v18 = vld [vmem:[#allocation2 + $0xd0] sm:$0xff] }
 0x46c   : > { %v8033_v52 = vunpack.i.h.bf16 %v8031_v23  ;;  %v8032_v25 = vunpack.i.l.bf16 %v8031_v23  ;;  %v8354_v23 = vpack.i.bf16 %v10917_v30, %v10925_v53  ;;  %v8043_v4 = vunpack.i.h.bf16 %v10885_v6 }
 0x46d   : > { %8335 = vrot.lane.b32.xlu1 %v8319_v39, %s8524_s22  ;;  %5734 = vmatprep.mubr.bf16.mxu1 %v5441_v56  ;;  %v4469_v39 = vld [vmem:[#allocation2 + $0x229] sm:$0xff]  ;;  %v5443_v56 = vpack.c.bf16 %v5312_v33, %v5311_v13  ;;  %v8042_v24 = vunpack.i.l.bf16 %v10885_v6 }
 0x46e   : > { %8325 = vrot.lane.b32.xlu0 %v8324_v47, %s8524_s22  ;;  %5735 = vmatmul.mubr.bf16.gmra.mxu1 %v5440_v3  ;;  %v5344_v32 = vsel %vm278_vm0, %v4320_v44, %v8033_v52  ;;  %v5343_v41 = vsel %vm278_vm0, %v4319_v50, %v8032_v25  ;;  %v5478_v10 = vpack.c.bf16 %v4470_v57, %v4469_v39  ;;  %v4437_v3 = vld [vmem:[#allocation2 + $0x228] sm:$0xff] }
 0x46f   : > { %v10898_v26 = vpop.permute.xlu1 %8045  ;;  %v8051_v34 = vpop.permute.xlu0 %8050  ;;  %v8364_v14 = vpack.i.bf16 %v4438_v61, %v4437_v3  ;;  %v5250_v5 = vsel %vm278_vm0, %v4194_v22, %v8043_v4  ;;  %v4195_v61 = vld [vmem:[#allocation2 + $0xc7] sm:$0xff]  ;;  %v4196_v4 = vld [vmem:[#allocation2 + $0xcf] sm:$0xff] }
 0x470   : > { %v8053_v7 = vunpack.i.h.bf16 %v8051_v34  ;;  %v8052_v1 = vunpack.i.l.bf16 %v8051_v34  ;;  %6882 = vmatmul.mubr.msk.bf16.gmra.mxu0 %vm278_vm0, %v5478_v10  ;;  %v8048_v42 = vunpack.i.h.bf16 %v10898_v26  ;;  %v8047_v34 = vunpack.i.l.bf16 %v10898_v26 }
 0x471   : > { %8340 = vrot.lane.b32.xlu1 %v8324_v47, %s8522_s18  ;;  %v5249_v26 = vsel %vm278_vm0, %v4193_v63, %v8042_v24  ;;  %v4323_v63 = vld [vmem:[#allocation2 + $0xe8] sm:$0xff] }
 0x472   : > { %8330 = vrot.lane.b32.xlu0 %v8329_v51, %s8522_s18  ;;  %v5375_v17 = vsel %vm1507_vm4, %v5343_v41, %v8052_v1  ;;  %v5376_v19 = vsel %vm1507_vm4, %v5344_v32, %v8053_v7  ;;  %v5281_v36 = vsel %vm1507_vm4, %v5249_v26, %v8047_v34  ;;  %v5282_v54 = vsel %vm1507_vm4, %v5250_v5, %v8048_v42 }
 0x473   : > { %v10910_v55 = vpop.permute.xlu1 %8065  ;;  %v8056_v49 = vpop.permute.xlu0 %8055 }
 0x474   : > { %v8058_v29 = vunpack.i.h.bf16 %v8056_v49  ;;  %v8057_v28 = vunpack.i.l.bf16 %v8056_v49  ;;  %v8068_v59 = vunpack.i.h.bf16 %v10910_v55  ;;  %v8067_v7 = vunpack.i.l.bf16 %v10910_v55 }
 0x475   : > { %8345 = vrot.lane.b32.xlu1 %v8329_v51, %s8523_s15 }
 0x476   : > { %8350 = vrot.lane.b32.xlu0 %v8349_v45, %s8523_s15  ;;  %v5407_v11 = vsel %vm1540_vm5, %v5375_v17, %v8057_v28  ;;  %v5408_v12 = vsel %vm1540_vm5, %v5376_v19, %v8058_v29  ;;  %v5313_v41 = vsel %vm1540_vm5, %v5281_v36, %v8067_v7  ;;  %v5314_v29 = vsel %vm1540_vm5, %v5282_v54, %v8068_v59 }
 0x477   : > { %v10923_v20 = vpop.permute.xlu1 %8070  ;;  %v8061_v16 = vpop.permute.xlu0 %8060  ;;  %v5444_v47 = vpack.c.bf16 %v5408_v12, %v5407_v11  ;;  %v5446_v33 = vpack.c.bf16 %v5314_v29, %v5313_v41 }
 0x478   : > { %v8063_v52 = vunpack.i.h.bf16 %v8061_v16  ;;  %v8062_v25 = vunpack.i.l.bf16 %v8061_v16  ;;  %v8073_v10 = vunpack.i.h.bf16 %v10923_v20  ;;  %v8072_v11 = vunpack.i.l.bf16 %v10923_v20 }
 0x479   : > { %8370 = vrot.lane.b32.xlu1 %v8349_v45, %s8524_s22  ;;  %5742 = vmatprep.mubr.bf16.mxu1 %v5444_v47 }
 0x47a   : > { %8355 = vrot.lane.b32.xlu0 %v8354_v23, %s8524_s22  ;;  %5743 = vmatmul.mubr.bf16.gmra.mxu1 %v5443_v56  ;;  %v5346_v44 = vsel %vm278_vm0, %v4322_v18, %v8063_v52  ;;  %v5345_v55 = vsel %vm278_vm0, %v4321_v8, %v8062_v25  ;;  %v5251_v52 = vsel %vm278_vm0, %v4195_v61, %v8072_v11  ;;  %v4325_v61 = vld [vmem:[#allocation2 + $0x108] sm:$0xff] }
 0x47b   : > { %v8076_v9 = vpop.permute.xlu1 %8075  ;;  %v8081_v51 = vpop.permute.xlu0 %8080 }
 0x47c   : > { %v8083_v6 = vunpack.i.h.bf16 %v8081_v51  ;;  %v8082_v1 = vunpack.i.l.bf16 %v8081_v51  ;;  %v8078_v16 = vunpack.i.h.bf16 %v8076_v9  ;;  %v8077_v23 = vunpack.i.l.bf16 %v8076_v9  ;;  %v4324_v9 = vld [vmem:[#allocation2 + $0xf0] sm:$0xff] }
 0x47e   : > { %8360 = vrot.lane.b32.xlu0 %v8359_v37, %s8522_s18  ;;  %v5377_v13 = vsel %vm1507_vm4, %v5345_v55, %v8082_v1  ;;  %v5378_v32 = vsel %vm1507_vm4, %v5346_v44, %v8083_v6  ;;  %v5252_v37 = vsel %vm278_vm0, %v4196_v4, %v8073_v10  ;;  %v5283_v20 = vsel %vm1507_vm4, %v5251_v52, %v8077_v23 }
 0x47f   : > { %v8096_v62 = vpop.permute.xlu1 %8095  ;;  %v8086_v50 = vpop.permute.xlu0 %8085 }
 0x480   : > { %v8088_v49 = vunpack.i.h.bf16 %v8086_v50  ;;  %v8087_v45 = vunpack.i.l.bf16 %v8086_v50  ;;  %v8098_v24 = vunpack.i.h.bf16 %v8096_v62  ;;  %v8097_v42 = vunpack.i.l.bf16 %v8096_v62 }
 0x482   : > { %8365 = vrot.lane.b32.xlu0 %v8364_v14, %s8524_s22  ;;  %v5409_v39 = vsel %vm1540_vm5, %v5377_v13, %v8087_v45  ;;  %v5410_v57 = vsel %vm1540_vm5, %v5378_v32, %v8088_v49  ;;  %v5284_v14 = vsel %vm1507_vm4, %v5252_v37, %v8078_v16  ;;  %v5315_v5 = vsel %vm1540_vm5, %v5283_v20, %v8097_v42  ;;  %s269_s22 = sand.u32 1, %s8511_s25  }
 0x483   : > { %v10954_v28 = vpop.permute.xlu1 %8100  ;;  %v8091_v17 = vpop.permute.xlu0 %8090  ;;  %v5447_v19 = vpack.c.bf16 %v5410_v57, %v5409_v39  ;;  %v5316_v26 = vsel %vm1540_vm5, %v5284_v14, %v8098_v24  ;;  %s6272_s23 = sshll.u32 %s269_s22, 6  ;;  %s11216_s28 = scalar_lea.sflag [#allocation4], %s269_s22 }
 0x484   : > { %v8093_v56 = vunpack.i.h.bf16 %v8091_v17  ;;  %v8092_v3 = vunpack.i.l.bf16 %v8091_v17  ;;  %v5449_v55 = vpack.c.bf16 %v5316_v26, %v5315_v5  ;;  %v8103_v49 = vunpack.i.h.bf16 %v10954_v28  ;;  %v4197_v17 = vld [vmem:[#allocation2 + $0xe7] sm:$0xff]  ;;  %s11135_s29 = scalar_lea.vmem [#allocation3], %s6272_s23 }
 0x485   : > { %5750 = vmatprep.mubr.bf16.mxu1 %v5447_v19  ;;  %v8102_v45 = vunpack.i.l.bf16 %v10954_v28  ;;  %v4198_v19 = vld [vmem:[#allocation2 + $0xef] sm:$0xff]  ;;  %s6174_s9 = sshll.u32 %s11135_s29, 4  ;;  %s11210_s9 = int_to_ptr.vmem [resolvable:$true] %s6174_s9 }
 0x486   : > { %5751 = vmatmul.mubr.bf16.gmra.mxu1 %v5446_v33  ;;  %v5348_v59 = vsel %vm278_vm0, %v4324_v9, %v8093_v56  ;;  %v5347_v7 = vsel %vm278_vm0, %v4323_v63, %v8092_v3  ;;  %v5254_v23 = vsel %vm278_vm0, %v4198_v19, %v8103_v49  ;;  %s8459_s16 = scalar_lea.vmem %s11210_s9, 1024  ;;  %p8466_p0 = scmp.lt.s32.totalorder %s11210_s9, %s8464_s20 }
 0x487   : > { %v8106_v12 = vpop.permute.xlu1 %8105  ;;  %v8111_v47 = vpop.permute.xlu0 %8110  ;;  %p8460_p11 = scmp.ne.s32.totalorder %s11210_s9, %s8459_s16  ;;  %p8467_p1 = scmp.lt.s32.totalorder %s8465_s21, %s8459_s16 }
 0x488   : > { %v8113_v34 = vunpack.i.h.bf16 %v8111_v47  ;;  %v8112_v51 = vunpack.i.l.bf16 %v8111_v47  ;;  %v8108_v32 = vunpack.i.h.bf16 %v8106_v12  ;;  %v8107_v41 = vunpack.i.l.bf16 %v8106_v12  ;;  %v4326_v12 = vld [vmem:[#allocation2 + $0x110] sm:$0xff] }
 0x489   : > { %v5253_v47 = vsel %vm278_vm0, %v4197_v17, %v8102_v45  ;;  %v4327_v17 = vld [vmem:[#allocation2 + $0x128] sm:$0xff]  ;;  %p8461_p12 = pnand %p8460_p11, %p8606_p5  ;;  %p8468_p2 = por %p8467_p1, %p8466_p0 }
 0x48a   : > { %v5379_v62 = vsel %vm1507_vm4, %v5347_v7, %v8112_v51  ;;  %v5380_v36 = vsel %vm1507_vm4, %v5348_v59, %v8113_v34  ;;  %v5285_v28 = vsel %vm1507_vm4, %v5253_v47, %v8107_v41  ;;  %v5286_v3 = vsel %vm1507_vm4, %v5254_v23, %v8108_v32 }
 0x48b   : > { %v8126_v25 = vpop.permute.xlu1 %8125  ;;  %v8116_v22 = vpop.permute.xlu0 %8115  ;;  %p8462_p13 = pneg %p8461_p12 }
 0x48c   : > { %v8118_v6 = vunpack.i.h.bf16 %v8116_v22  ;;  %v8117_v1 = vunpack.i.l.bf16 %v8116_v22  ;;  %v8128_v33 = vunpack.i.h.bf16 %v8126_v25  ;;  %v8127_v10 = vunpack.i.l.bf16 %v8126_v25 }
 0x48d   : > { %p8469_p3 = pnand %p8468_p2, %p8462_p13 }
 0x48e   : > { %v5411_v8 = vsel %vm1540_vm5, %v5379_v62, %v8117_v1  ;;  %v5412_v18 = vsel %vm1540_vm5, %v5380_v36, %v8118_v6  ;;  %v5317_v37 = vsel %vm1540_vm5, %v5285_v28, %v8127_v10  ;;  %v5318_v52 = vsel %vm1540_vm5, %v5286_v3, %v8128_v33 }
 0x48f   : > { %v10970_v54 = vpop.permute.xlu1 %8130  ;;  %v8121_v50 = vpop.permute.xlu0 %8120  ;;  %v5450_v44 = vpack.c.bf16 %v5412_v18, %v5411_v8  ;;  %v5452_v7 = vpack.c.bf16 %v5318_v52, %v5317_v37 }
 0x490   : > { %v8123_v39 = vunpack.i.h.bf16 %v8121_v50  ;;  %v8122_v57 = vunpack.i.l.bf16 %v8121_v50  ;;  %v8133_v6 = vunpack.i.h.bf16 %v10970_v54  ;;  %v8132_v1 = vunpack.i.l.bf16 %v10970_v54  ;;  %v4199_v50 = vld [vmem:[#allocation2 + $0x107] sm:$0xff] }
 0x491   : > { %5758 = vmatprep.mubr.bf16.mxu1 %v5450_v44  ;;  %v4200_v44 = vld [vmem:[#allocation2 + $0x10f] sm:$0xff] }
 0x492   : > { %5759 = vmatmul.mubr.bf16.gmra.mxu1 %v5449_v55  ;;  %v5350_v24 = vsel %vm278_vm0, %v4326_v12, %v8123_v39  ;;  %v5349_v42 = vsel %vm278_vm0, %v4325_v61, %v8122_v57  ;;  %v5256_v41 = vsel %vm278_vm0, %v4200_v44, %v8133_v6 }
 0x493   : > { %v8136_v13 = vpop.permute.xlu1 %8135  ;;  %v8141_v29 = vpop.permute.xlu0 %8140 }
 0x494   : > { %v8143_v11 = vunpack.i.h.bf16 %v8141_v29  ;;  %v8142_v16 = vunpack.i.l.bf16 %v8141_v29  ;;  %v8138_v26 = vunpack.i.h.bf16 %v8136_v13  ;;  %v8137_v62 = vunpack.i.l.bf16 %v8136_v13  ;;  %v4328_v13 = vld [vmem:[#allocation2 + $0x130] sm:$0xff] }
 0x495   : > { %v5255_v29 = vsel %vm278_vm0, %v4199_v50, %v8132_v1  ;;  %v4329_v50 = vld [vmem:[#allocation2 + $0x148] sm:$0xff] }
 0x496   : > { %v5381_v25 = vsel %vm1507_vm4, %v5349_v42, %v8142_v16  ;;  %v5382_v20 = vsel %vm1507_vm4, %v5350_v24, %v8143_v11  ;;  %v5287_v54 = vsel %vm1507_vm4, %v5255_v29, %v8137_v62  ;;  %v5288_v57 = vsel %vm1507_vm4, %v5256_v41, %v8138_v26 }
 0x497   : > { %v8156_v56 = vpop.permute.xlu1 %8155  ;;  %v8146_v4 = vpop.permute.xlu0 %8145 }
 0x498   : > { %v8148_v34 = vunpack.i.h.bf16 %v8146_v4  ;;  %v8147_v51 = vunpack.i.l.bf16 %v8146_v4  ;;  %v8158_v55 = vunpack.i.h.bf16 %v8156_v56  ;;  %v8157_v49 = vunpack.i.l.bf16 %v8156_v56 }
 0x49a   : > { %v5413_v63 = vsel %vm1540_vm5, %v5381_v25, %v8147_v51  ;;  %v5414_v9 = vsel %vm1540_vm5, %v5382_v20, %v8148_v34  ;;  %v5319_v23 = vsel %vm1540_vm5, %v5287_v54, %v8157_v49  ;;  %v5320_v47 = vsel %vm1540_vm5, %v5288_v57, %v8158_v55 }
 0x49b   : > { %v10986_v14 = vpop.permute.xlu1 %8160  ;;  %v8151_v22 = vpop.permute.xlu0 %8150  ;;  %v5453_v59 = vpack.c.bf16 %v5414_v9, %v5413_v63  ;;  %v5455_v42 = vpack.c.bf16 %v5320_v47, %v5319_v23 }
 0x49c   : > { %v8153_v8 = vunpack.i.h.bf16 %v8151_v22  ;;  %v8152_v18 = vunpack.i.l.bf16 %v8151_v22  ;;  %v8163_v34 = vunpack.i.h.bf16 %v10986_v14  ;;  %v8162_v51 = vunpack.i.l.bf16 %v10986_v14  ;;  %v4201_v22 = vld [vmem:[#allocation2 + $0x127] sm:$0xff] }
 0x49d   : > { %5766 = vmatprep.mubr.bf16.mxu1 %v5453_v59  ;;  %v4202_v59 = vld [vmem:[#allocation2 + $0x12f] sm:$0xff] }
 0x49e   : > { %5767 = vmatmul.mubr.bf16.gmra.mxu1 %v5452_v7  ;;  %v5352_v33 = vsel %vm278_vm0, %v4328_v13, %v8153_v8  ;;  %v5351_v10 = vsel %vm278_vm0, %v4327_v17, %v8152_v18  ;;  %v5258_v62 = vsel %vm278_vm0, %v4202_v59, %v8163_v34 }
 0x49f   : > { %v8166_v5 = vpop.permute.xlu1 %8165  ;;  %v8171_v36 = vpop.permute.xlu0 %8170 }
 0x4a0   : > { %v8173_v45 = vunpack.i.h.bf16 %v8171_v36  ;;  %v8172_v32 = vunpack.i.l.bf16 %v8171_v36  ;;  %v8168_v52 = vunpack.i.h.bf16 %v8166_v5  ;;  %v8167_v25 = vunpack.i.l.bf16 %v8166_v5  ;;  %v4330_v5 = vld [vmem:[#allocation2 + $0x150] sm:$0xff] }
 0x4a1   : > { %v5257_v36 = vsel %vm278_vm0, %v4201_v22, %v8162_v51  ;;  %v4331_v22 = vld [vmem:[#allocation2 + $0x168] sm:$0xff] }
 0x4a2   : > { %v5383_v56 = vsel %vm1507_vm4, %v5351_v10, %v8172_v32  ;;  %v5384_v28 = vsel %vm1507_vm4, %v5352_v33, %v8173_v45  ;;  %v5289_v14 = vsel %vm1507_vm4, %v5257_v36, %v8167_v25  ;;  %v5290_v18 = vsel %vm1507_vm4, %v5258_v62, %v8168_v52 }
 0x4a3   : > { %v8186_v39 = vpop.permute.xlu1 %8185  ;;  %v8176_v19 = vpop.permute.xlu0 %8175 }
 0x4a4   : > { %v8178_v11 = vunpack.i.h.bf16 %v8176_v19  ;;  %v8177_v16 = vunpack.i.l.bf16 %v8176_v19  ;;  %v8188_v7 = vunpack.i.h.bf16 %v8186_v39  ;;  %v8187_v6 = vunpack.i.l.bf16 %v8186_v39 }
 0x4a6   : > { %v5415_v61 = vsel %vm1540_vm5, %v5383_v56, %v8177_v16  ;;  %v5416_v12 = vsel %vm1540_vm5, %v5384_v28, %v8178_v11  ;;  %v5321_v41 = vsel %vm1540_vm5, %v5289_v14, %v8187_v6  ;;  %v5322_v29 = vsel %vm1540_vm5, %v5290_v18, %v8188_v7 }
 0x4a7   : > { %v11002_v3 = vpop.permute.xlu1 %8190  ;;  %v8181_v4 = vpop.permute.xlu0 %8180  ;;  %v5456_v24 = vpack.c.bf16 %v5416_v12, %v5415_v61  ;;  %v5458_v10 = vpack.c.bf16 %v5322_v29, %v5321_v41 }
 0x4a8   : > { %v8183_v63 = vunpack.i.h.bf16 %v8181_v4  ;;  %v8182_v9 = vunpack.i.l.bf16 %v8181_v4  ;;  %v8193_v11 = vunpack.i.h.bf16 %v11002_v3  ;;  %v8192_v16 = vunpack.i.l.bf16 %v11002_v3  ;;  %v4203_v4 = vld [vmem:[#allocation2 + $0x147] sm:$0xff] }
 0x4a9   : > { %5774 = vmatprep.mubr.bf16.mxu1 %v5456_v24  ;;  %v4204_v24 = vld [vmem:[#allocation2 + $0x14f] sm:$0xff] }
 0x4aa   : > { %5775 = vmatmul.mubr.bf16.gmra.mxu1 %v5455_v42  ;;  %v5354_v55 = vsel %vm278_vm0, %v4330_v5, %v8183_v63  ;;  %v5353_v49 = vsel %vm278_vm0, %v4329_v50, %v8182_v9  ;;  %v5260_v25 = vsel %vm278_vm0, %v4204_v24, %v8193_v11 }
 0x4ab   : > { %v8196_v37 = vpop.permute.xlu1 %8195  ;;  %v8201_v20 = vpop.permute.xlu0 %8200 }
 0x4ac   : > { %v8203_v1 = vunpack.i.h.bf16 %v8201_v20  ;;  %v8202_v26 = vunpack.i.l.bf16 %v8201_v20  ;;  %v8198_v47 = vunpack.i.h.bf16 %v8196_v37  ;;  %v8197_v56 = vunpack.i.l.bf16 %v8196_v37  ;;  %v4332_v37 = vld [vmem:[#allocation2 + $0x170] sm:$0xff] }
 0x4ad   : > { %v5259_v20 = vsel %vm278_vm0, %v4203_v4, %v8192_v16 }
 0x4ae   : > { %v5385_v39 = vsel %vm1507_vm4, %v5353_v49, %v8202_v26  ;;  %v5386_v54 = vsel %vm1507_vm4, %v5354_v55, %v8203_v1  ;;  %v5291_v3 = vsel %vm1507_vm4, %v5259_v20, %v8197_v56  ;;  %v5292_v9 = vsel %vm1507_vm4, %v5260_v25, %v8198_v47 }
 0x4af   : > { %v8216_v8 = vpop.permute.xlu1 %8215  ;;  %v8206_v44 = vpop.permute.xlu0 %8205 }
 0x4b0   : > { %v8208_v45 = vunpack.i.h.bf16 %v8206_v44  ;;  %v8207_v32 = vunpack.i.l.bf16 %v8206_v44  ;;  %v8218_v42 = vunpack.i.h.bf16 %v8216_v8  ;;  %v8217_v34 = vunpack.i.l.bf16 %v8216_v8 }
 0x4b2   : > { %v5417_v17 = vsel %vm1540_vm5, %v5385_v39, %v8207_v32  ;;  %v5418_v13 = vsel %vm1540_vm5, %v5386_v54, %v8208_v45  ;;  %v5323_v62 = vsel %vm1540_vm5, %v5291_v3, %v8217_v34  ;;  %v5324_v36 = vsel %vm1540_vm5, %v5292_v9, %v8218_v42 }
 0x4b3   : > { %v11018_v57 = vpop.permute.xlu1 %8220  ;;  %v8211_v19 = vpop.permute.xlu0 %8210  ;;  %v5459_v33 = vpack.c.bf16 %v5418_v13, %v5417_v17  ;;  %v5461_v49 = vpack.c.bf16 %v5324_v36, %v5323_v62 }
 0x4b4   : > { %v8213_v61 = vunpack.i.h.bf16 %v8211_v19  ;;  %v8212_v12 = vunpack.i.l.bf16 %v8211_v19  ;;  %v8223_v45 = vunpack.i.h.bf16 %v11018_v57  ;;  %v8222_v32 = vunpack.i.l.bf16 %v11018_v57  ;;  %v4205_v19 = vld [vmem:[#allocation2 + $0x167] sm:$0xff] }
 0x4b5   : > { %5782 = vmatprep.mubr.bf16.mxu1 %v5459_v33  ;;  %v4206_v33 = vld [vmem:[#allocation2 + $0x16f] sm:$0xff] }
 0x4b6   : > { %5783 = vmatmul.mubr.bf16.gmra.mxu1 %v5458_v10  ;;  %v5356_v7 = vsel %vm278_vm0, %v4332_v37, %v8213_v61  ;;  %v5355_v6 = vsel %vm278_vm0, %v4331_v22, %v8212_v12  ;;  %v5262_v56 = vsel %vm278_vm0, %v4206_v33, %v8223_v45 }
 0x4b7   : > { %v8226_v23 = vpop.permute.xlu1 %8225  ;;  %v8231_v28 = vpop.permute.xlu0 %8230 }
 0x4b8   : > { %v8233_v51 = vunpack.i.h.bf16 %v8231_v28  ;;  %v8232_v52 = vunpack.i.l.bf16 %v8231_v28  ;;  %v8228_v29 = vunpack.i.h.bf16 %v8226_v23  ;;  %v8227_v39 = vunpack.i.l.bf16 %v8226_v23 }
 0x4b9   : > { %v5261_v28 = vsel %vm278_vm0, %v4205_v19, %v8222_v32 }
 0x4ba   : > { %v5387_v8 = vsel %vm1507_vm4, %v5355_v6, %v8232_v52  ;;  %v5388_v14 = vsel %vm1507_vm4, %v5356_v7, %v8233_v51  ;;  %v5293_v57 = vsel %vm1507_vm4, %v5261_v28, %v8227_v39  ;;  %v5294_v12 = vsel %vm1507_vm4, %v5262_v56, %v8228_v29 }
 0x4bb   : > { %v8246_v63 = vpop.permute.xlu1 %8245 }
 0x4bc   : > { %v8236_v59 = vpop.permute.xlu0 %8235  ;;  %v8248_v10 = vunpack.i.h.bf16 %v8246_v63  ;;  %v8247_v11 = vunpack.i.l.bf16 %v8246_v63 }
 0x4bd   : > { %v8238_v1 = vunpack.i.h.bf16 %v8236_v59  ;;  %v8237_v26 = vunpack.i.l.bf16 %v8236_v59 }
 0x4be   : > { %v5325_v51 = vsel %vm1540_vm5, %v5293_v57, %v8247_v11  ;;  %v5326_v52 = vsel %vm1540_vm5, %v5294_v12, %v8248_v10 }
 0x4bf   : > { %v8251_v18 = vpop.permute.xlu1 %8250  ;;  %v5419_v50 = vsel %vm1540_vm5, %v5387_v8, %v8237_v26  ;;  %v5420_v5 = vsel %vm1540_vm5, %v5388_v14, %v8238_v1  ;;  %v5464_v37 = vpack.c.bf16 %v5326_v52, %v5325_v51  ;;  %v4207_v8 = vld [vmem:[#allocation2 + $0x187] sm:$0xff]  ;;  %v4208_v14 = vld [vmem:[#allocation2 + $0x18f] sm:$0xff] }
 0x4c0   : > { %v8241_v44 = vpop.permute.xlu0 %8240  ;;  %v5462_v55 = vpack.c.bf16 %v5420_v5, %v5419_v50  ;;  %v8252_v59 = vunpack.i.l.bf16 %v8251_v18 }
 0x4c1   : > { %v8243_v17 = vunpack.i.h.bf16 %v8241_v44  ;;  %v8242_v13 = vunpack.i.l.bf16 %v8241_v44 }
 0x4c2   : > { %5790 = vmatprep.mubr.bf16.mxu1 %v5462_v55  ;;  %v5263_v45 = vsel %vm278_vm0, %v4207_v8, %v8252_v59 }
 0x4c3   : > { %5791 = vmatmul.mubr.bf16.gmra.mxu1 %v5461_v49  ;;  %v8256_v41 = vpop.permute.xlu1 %8255  ;;  %v5358_v23 = vsel %vm278_vm0, %v10749_v60, %v8243_v17  ;;  %v5357_v24 = vsel %vm278_vm0, %v10760_v27, %v8242_v13  ;;  %v8253_v27 = vunpack.i.h.bf16 %v8251_v18 }
 0x4c4   : > { %v8261_v54 = vpop.permute.xlu0 %8260  ;;  %v8258_v6 = vunpack.i.h.bf16 %v8256_v41  ;;  %v8257_v1 = vunpack.i.l.bf16 %v8256_v41 }
 0x4c5   : > { %v8263_v16 = vunpack.i.h.bf16 %v8261_v54  ;;  %v8262_v47 = vunpack.i.l.bf16 %v8261_v54  ;;  %v5264_v49 = vsel %vm278_vm0, %v4208_v14, %v8253_v27 }
 0x4c6   : > { %v5295_v18 = vsel %vm1507_vm4, %v5263_v45, %v8257_v1  ;;  %v5296_v29 = vsel %vm1507_vm4, %v5264_v49, %v8258_v6 }
 0x4c7   : > { %v8276_v61 = vpop.permute.xlu1 %8275  ;;  %v5389_v25 = vsel %vm1507_vm4, %v5357_v24, %v8262_v47  ;;  %v5390_v20 = vsel %vm1507_vm4, %v5358_v23, %v8263_v16 }
 0x4c8   : > { %v8266_v4 = vpop.permute.xlu0 %8265  ;;  %v8278_v50 = vunpack.i.h.bf16 %v8276_v61  ;;  %v8277_v5 = vunpack.i.l.bf16 %v8276_v61 }
 0x4c9   : > { %v8268_v42 = vunpack.i.h.bf16 %v8266_v4  ;;  %v8267_v34 = vunpack.i.l.bf16 %v8266_v4 }
 0x4ca   : > { %v5327_v19 = vsel %vm1540_vm5, %v5295_v18, %v8277_v5  ;;  %v5328_v33 = vsel %vm1540_vm5, %v5296_v29, %v8278_v50 }
 0x4cb   : > { %v8281_v63 = vpop.permute.xlu1 %8280  ;;  %v5421_v3 = vsel %vm1540_vm5, %v5389_v25, %v8267_v34  ;;  %v5422_v9 = vsel %vm1540_vm5, %v5390_v20, %v8268_v42  ;;  %v5467_v61 = vpack.c.bf16 %v5328_v33, %v5327_v19 }
 0x4cc   : > { %v8271_v22 = vpop.permute.xlu0 %8270  ;;  %v5465_v60 = vpack.c.bf16 %v5422_v9, %v5421_v3  ;;  %v8282_v57 = vunpack.i.l.bf16 %v8281_v63  ;;  %v8458_v3 = vld [vmem:[#allocation2 + $0x1af] sm:$0xff] }
 0x4cd   : > { %v8273_v62 = vunpack.i.h.bf16 %v8271_v22  ;;  %v8272_v36 = vunpack.i.l.bf16 %v8271_v22 }
 0x4ce   : > { %5798 = vmatprep.mubr.bf16.mxu1 %v5465_v60  ;;  %v5265_v22 = vsel %vm278_vm0, %v10782_v46, %v8282_v57 }
 0x4cf   : > { %5799 = vmatmul.mubr.bf16.gmra.mxu1 %v5464_v37  ;;  %v8286_v7 = vpop.permute.xlu1 %8285  ;;  %v5360_v41 = vsel %vm278_vm0, %v10790_v48, %v8273_v62  ;;  %v5359_v54 = vsel %vm278_vm0, %v10801_v21, %v8272_v36  ;;  %v8283_v21 = vunpack.i.h.bf16 %v8281_v63 }
 0x4d0   : > { %v8291_v26 = vpop.permute.xlu0 %8290  ;;  %v8288_v4 = vunpack.i.h.bf16 %v8286_v7  ;;  %v8287_v23 = vunpack.i.l.bf16 %v8286_v7 }
 0x4d1   : > { %v8293_v44 = vunpack.i.h.bf16 %v8291_v26  ;;  %v8292_v55 = vunpack.i.l.bf16 %v8291_v26  ;;  %v5266_v9 = vsel %vm278_vm0, %v8458_v3, %v8283_v21 }
 0x4d2   : > { %v5297_v63 = vsel %vm1507_vm4, %v5265_v22, %v8287_v23  ;;  %v5298_v37 = vsel %vm1507_vm4, %v5266_v9, %v8288_v4 }
 0x4d3   : > { %v8306_v32 = vpop.permute.xlu1 %8305  ;;  %v5391_v10 = vsel %vm1507_vm4, %v5359_v54, %v8292_v55  ;;  %v5392_v11 = vsel %vm1507_vm4, %v5360_v41, %v8293_v44 }
 0x4d4   : > { %v8296_v39 = vpop.permute.xlu0 %8295  ;;  %v8308_v51 = vunpack.i.h.bf16 %v8306_v32  ;;  %v8307_v52 = vunpack.i.l.bf16 %v8306_v32 }
 0x4d5   : > { %v8298_v17 = vunpack.i.h.bf16 %v8296_v39  ;;  %v8297_v13 = vunpack.i.l.bf16 %v8296_v39 }
 0x4d6   : > { %v5329_v26 = vsel %vm1540_vm5, %v5297_v63, %v8307_v52  ;;  %v5330_v62 = vsel %vm1540_vm5, %v5298_v37, %v8308_v51  ;;  %v7907_v63 = vunpack.i.l.bf16 %v10717_v31 }
 0x4d7   : > { %v8311_v16 = vpop.permute.xlu1 %8310  ;;  %v5423_v47 = vsel %vm1540_vm5, %v5391_v10, %v8297_v13  ;;  %v5424_v56 = vsel %vm1540_vm5, %v5392_v11, %v8298_v17  ;;  %v5470_v44 = vpack.c.bf16 %v5330_v62, %v5329_v26 }
 0x4d8   : > { %v8301_v28 = vpop.permute.xlu0 %8300  ;;  %v5468_v48 = vpack.c.bf16 %v5424_v56, %v5423_v47  ;;  %v8313_v55 = vunpack.i.h.bf16 %v8311_v16 }
 0x4d9   : > { %v8303_v42 = vunpack.i.h.bf16 %v8301_v28  ;;  %v8302_v34 = vunpack.i.l.bf16 %v8301_v28 }
 0x4da   : > { %5806 = vmatprep.mubr.bf16.mxu1 %v5468_v48  ;;  %v5268_v17 = vsel %vm278_vm0, %v10816_v40, %v8313_v55 }
 0x4db   : > { %5807 = vmatmul.mubr.bf16.gmra.mxu1 %v5467_v61  ;;  %v8316_v12 = vpop.permute.xlu1 %8315  ;;  %v5362_v59 = vsel %vm278_vm0, %v10834_v15, %v8303_v42  ;;  %v5361_v7 = vsel %vm278_vm0, %v10843_v2, %v8302_v34  ;;  %v8312_v2 = vunpack.i.l.bf16 %v8311_v16 }
 0x4dc   : > { %v8321_v24 = vpop.permute.xlu0 %8320  ;;  %v8318_v49 = vunpack.i.h.bf16 %v8316_v12  ;;  %v8317_v45 = vunpack.i.l.bf16 %v8316_v12 }
 0x4dd   : > { %v8323_v25 = vunpack.i.h.bf16 %v8321_v24  ;;  %v8322_v20 = vunpack.i.l.bf16 %v8321_v24  ;;  %v5267_v13 = vsel %vm278_vm0, %v10825_v43, %v8312_v2 }
 0x4de   : > { %v5299_v10 = vsel %vm1507_vm4, %v5267_v13, %v8317_v45  ;;  %v5300_v11 = vsel %vm1507_vm4, %v5268_v17, %v8318_v49 }
 0x4df   : > { %v8336_v60 = vpop.permute.xlu1 %8335  ;;  %v5393_v46 = vsel %vm1507_vm4, %v5361_v7, %v8322_v20  ;;  %v5394_v36 = vsel %vm1507_vm4, %v5362_v59, %v8323_v25 }
 0x4e0   : > { %v8326_v27 = vpop.permute.xlu0 %8325  ;;  %v8338_v32 = vunpack.i.h.bf16 %v8336_v60  ;;  %v8337_v18 = vunpack.i.l.bf16 %v8336_v60  ;;  %v7908_v60 = vunpack.i.h.bf16 %v10717_v31 }
 0x4e1   : > { %v8328_v6 = vunpack.i.h.bf16 %v8326_v27  ;;  %v8327_v1 = vunpack.i.l.bf16 %v8326_v27 }
 0x4e2   : > { %v5331_v16 = vsel %vm1540_vm5, %v5299_v10, %v8337_v18  ;;  %v5332_v47 = vsel %vm1540_vm5, %v5300_v11, %v8338_v32 }
 0x4e3   : > { %v8341_v8 = vpop.permute.xlu1 %8340  ;;  %v5425_v14 = vsel %vm1540_vm5, %v5393_v46, %v8327_v1  ;;  %v5426_v50 = vsel %vm1540_vm5, %v5394_v36, %v8328_v6  ;;  %v5473_v23 = vpack.c.bf16 %v5332_v47, %v5331_v16 }
 0x4e4   : > { %v8331_v5 = vpop.permute.xlu0 %8330  ;;  %v5471_v15 = vpack.c.bf16 %v5426_v50, %v5425_v14  ;;  %v8343_v24 = vunpack.i.h.bf16 %v8341_v8  ;;  %v8342_v42 = vunpack.i.l.bf16 %v8341_v8  ;;  %v6855_v8 = vpop.f32.mrf.mxu0 }
 0x4e5   : > { %v8333_v39 = vunpack.i.h.bf16 %v8331_v5  ;;  %v8332_v41 = vunpack.i.l.bf16 %v8331_v5  ;;  %v11118_v5 = vld [vmem:[%s11262_s6] ss:$0 sm:$0xff] }
 0x4e6   : > { %5814 = vmatprep.mubr.bf16.mxu1 %v5471_v15  ;;  %v5270_v37 = vsel %vm278_vm0, %v10860_v58, %v8343_v24  ;;  %v5269_v27 = vsel %vm278_vm0, %v10869_v38, %v8342_v42  ;;  %v5873_v50 = vpop.f32.mrf.mxu0 }
 0x4e7   : > { %5815 = vmatmul.mubr.bf16.gmra.mxu1 %v5470_v44  ;;  %v8346_v54 = vpop.permute.xlu1 %8345  ;;  %v5364_v28 = vsel %vm278_vm0, %v10878_v0, %v8333_v39  ;;  %v5363_v40 = vsel %vm278_vm0, %v10887_v35, %v8332_v41 }
 0x4e8   : > { %v8351_v29 = vpop.permute.xlu0 %8350  ;;  %v8348_v0 = vunpack.i.h.bf16 %v8346_v54  ;;  %v8347_v52 = vunpack.i.l.bf16 %v8346_v54  ;;  %v6856_v49 = vpop.f32.mrf.mxu0 }
 0x4e9   : > { %v8353_v19 = vunpack.i.h.bf16 %v8351_v29  ;;  %v8352_v33 = vunpack.i.l.bf16 %v8351_v29 }
 0x4ea   : > { %v5301_v7 = vsel %vm1507_vm4, %v5269_v27, %v8347_v52  ;;  %v5302_v6 = vsel %vm1507_vm4, %v5270_v37, %v8348_v0  ;;  %v5876_v41 = vpop.f32.mrf.mxu0 }
 0x4eb   : > { %v5395_v43 = vsel %vm1507_vm4, %v5363_v40, %v8352_v33  ;;  %v5396_v21 = vsel %vm1507_vm4, %v5364_v28, %v8353_v19  ;;  %v8371_v57 = vpop.permute.xlu1 %8370 }
 0x4ec   : > { %v8356_v56 = vpop.permute.xlu0 %8355  ;;  %v8373_v20 = vunpack.i.h.bf16 %v8371_v57  ;;  %v8372_v3 = vunpack.i.l.bf16 %v8371_v57 }
 0x4ed   : > { %v8358_v48 = vunpack.i.h.bf16 %v8356_v56  ;;  %v8357_v61 = vunpack.i.l.bf16 %v8356_v56 }
 0x4ee   : > { %v5334_v26 = vsel %vm1540_vm5, %v5302_v6, %v8373_v20 }
 0x4ef   : > { %v5427_v12 = vsel %vm1540_vm5, %v5395_v43, %v8357_v61  ;;  %v5428_v4 = vsel %vm1540_vm5, %v5396_v21, %v8358_v48  ;;  %v6859_v48 = vpop.f32.mrf.mxu0 }
 0x4f0   : > { %v8361_v34 = vpop.permute.xlu0 %8360  ;;  %v5474_v51 = vpack.c.bf16 %v5428_v4, %v5427_v12 }
 0x4f1   : > { %v8363_v25 = vunpack.i.h.bf16 %v8361_v34  ;;  %v8362_v35 = vunpack.i.l.bf16 %v8361_v34  ;;  %v5889_v57 = vpop.f32.mrf.mxu0 }
 0x4f2   : > { %5822 = vmatprep.mubr.bf16.mxu1 %v5474_v51 }
 0x4f3   : > { %v5366_v9 = vsel %vm278_vm0, %v10917_v30, %v8363_v25  ;;  %v5365_v22 = vsel %vm278_vm0, %v10925_v53, %v8362_v35  ;;  %5823 = vmatmul.mubr.bf16.gmra.mxu1 %v5473_v23  ;;  %v5333_v53 = vsel %vm1540_vm5, %v5301_v7, %v8372_v3  ;;  %v6860_v42 = vpop.f32.mrf.mxu0 }
 0x4f4   : > { %v8366_v59 = vpop.permute.xlu0 %8365  ;;  %v5397_v62 = vsel %vm1507_vm4, %v5365_v22, %v7907_v63  ;;  %v5398_v31 = vsel %vm1507_vm4, %v5366_v9, %v7908_v60  ;;  %v5476_v36 = vpack.c.bf16 %v5334_v26, %v5333_v53 }
 0x4f5   : > { %v8368_v30 = vunpack.i.h.bf16 %v8366_v59  ;;  %v8367_v1 = vunpack.i.l.bf16 %v8366_v59  ;;  %v5892_v3 = vpop.f32.mrf.mxu0 }
 0x4f7   : > { %v5429_v58 = vsel %vm1540_vm5, %v5397_v62, %v8367_v1  ;;  %v5430_v46 = vsel %vm1540_vm5, %v5398_v31, %v8368_v30 }
 0x4f8   : > { %v5477_v38 = vpack.c.bf16 %v5430_v46, %v5429_v58 }
 0x4fa   : > { %5830 = vmatprep.mubr.bf16.mxu1 %v5477_v38  ;;  %v6863_v38 = vpop.f32.mrf.mxu0 }
 0x4fb   : > { %5831 = vmatmul.mubr.bf16.gmra.mxu1 %v5476_v36 }
 0x50a   : > { %v6663_v14 = vpop.f32.mrf.mxu1 }
 0x50c   : > { %v6664_v15 = vpop.f32.mrf.mxu1 }
 0x50d   : > { %v6665_v44 = vadd.f32 %v6664_v15, %v6663_v14 }
 0x50e   : > { %v6666_v55 = vpop.f32.mrf.mxu1 }
 0x50f   : > { %v5713_v2 = vadd.f32 %v6665_v44, %v11118_v5 }
 0x510   : > { %v6667_v45 = vpop.f32.mrf.mxu1 }
 0x511   : > { %v5874_v32 = vadd.f32 %v5873_v50, %v5713_v2  ;;  %v6668_v18 = vadd.f32 %v6667_v45, %v6666_v55  ;;  %v5905_v50 = vpop.f32.mrf.mxu0 }
 0x513   : > { %v6000_v29 = vmax.f32 %v5874_v32, 0.0  ;;  %v5716_v39 = vadd.f32 %v6668_v18, %v11118_v5 }
 0x515   : > { %6032 = vst.msk [vmem:[#allocation2 + $0x28] sm:$0xff] %vm278_vm0, %v6000_v29  ;;  %v5877_v54 = vadd.f32 %v5876_v41, %v5716_v39 }
 0x516   : > { %v6669_v17 = vpop.f32.mrf.mxu1 }
 0x517   : > { %v6001_v13 = vmax.f32 %v5877_v54, 0.0 }
 0x518   : > { %v6670_v19 = vpop.f32.mrf.mxu1 }
 0x519   : > { %6033 = vst.msk [vmem:[#allocation2 + $0x30] sm:$0xff] %vm278_vm0, %v6001_v13  ;;  %v6671_v33 = vadd.f32 %v6670_v19, %v6669_v17 }
 0x51a   : > { %v6672_v10 = vpop.f32.mrf.mxu1 }
 0x51b   : > { %v5721_v11 = vadd.f32 %v6671_v33, %v11118_v5 }
 0x51c   : > { %v6673_v16 = vpop.f32.mrf.mxu1 }
 0x51d   : > { %v5882_v47 = vadd.f32 %v6855_v8, %v5721_v11  ;;  %v6674_v56 = vadd.f32 %v6673_v16, %v6672_v10 }
 0x51f   : > { %v6002_v28 = vmax.f32 %v5882_v47, 0.0  ;;  %v5724_v40 = vadd.f32 %v6674_v56, %v11118_v5 }
 0x520   : > { %v6065_v52 = vld [vmem:[#allocation2 + $0x28] ss:$2 sm:$0xff]  ;;  %v6097_v25 = vld [vmem:[#allocation2 + $0x29] ss:$2 sm:$0xff] }
 0x521   : > { %6034 = vst.msk [vmem:[#allocation2 + $0x48] sm:$0xff] %vm278_vm0, %v6002_v28  ;;  %v5885_v61 = vadd.f32 %v6856_v49, %v5724_v40  ;;  %v6128_v63 = vmax.f32 %v6065_v52, %v6097_v25  ;;  %v6864_v49 = vpop.f32.mrf.mxu0 }
 0x522   : > { %v6675_v43 = vpop.f32.mrf.mxu1 }
 0x523   : > { %v6003_v21 = vmax.f32 %v5885_v61, 0.0  ;;  %v5908_v17 = vpop.f32.mrf.mxu0 }
 0x524   : > { %v6676_v12 = vpop.f32.mrf.mxu1 }
 0x525   : > { %6035 = vst.msk [vmem:[#allocation2 + $0x50] sm:$0xff] %vm278_vm0, %v6003_v21  ;;  %v6677_v4 = vadd.f32 %v6676_v12, %v6675_v43 }
 0x526   : > { %v6678_v23 = vpop.f32.mrf.mxu1 }
 0x527   : > { %v5729_v24 = vadd.f32 %v6677_v4, %v11118_v5 }
 0x528   : > { %v6679_v34 = vpop.f32.mrf.mxu1 }
 0x529   : > { %v5890_v51 = vadd.f32 %v5889_v57, %v5729_v24  ;;  %v6680_v0 = vadd.f32 %v6679_v34, %v6678_v23  ;;  %v6867_v23 = vpop.f32.mrf.mxu0 }
 0x52b   : > { %v6004_v35 = vmax.f32 %v5890_v51, 0.0  ;;  %v5732_v20 = vadd.f32 %v6680_v0, %v11118_v5  ;;  %v5921_v51 = vpop.f32.mrf.mxu0 }
 0x52c   : > { %v6067_v9 = vld [vmem:[#allocation2 + $0x48] ss:$2 sm:$0xff]  ;;  %v6099_v22 = vld [vmem:[#allocation2 + $0x49] ss:$2 sm:$0xff] }
 0x52d   : > { %6036 = vst.msk [vmem:[#allocation2 + $0x68] sm:$0xff] %vm278_vm0, %v6004_v35  ;;  %v5893_v60 = vadd.f32 %v5892_v3, %v5732_v20  ;;  %v6129_v37 = vmax.f32 %v6067_v9, %v6099_v22  ;;  %v6868_v20 = vpop.f32.mrf.mxu0 }
 0x52e   : > { %v6681_v27 = vpop.f32.mrf.mxu1 }
 0x52f   : > { %v6005_v59 = vmax.f32 %v5893_v60, 0.0  ;;  %v6144_v7 = vmax.f32 %v6128_v63, %v6129_v37 }
 0x530   : > { %v6682_v6 = vpop.f32.mrf.mxu1 }
 0x531   : > { %6037 = vst.msk [vmem:[#allocation2 + $0x70] sm:$0xff] %vm278_vm0, %v6005_v59  ;;  %v6683_v30 = vadd.f32 %v6682_v6, %v6681_v27  ;;  %6152 = vst.msk [vmem:[%s11135_s29] sm:$0xff] %vm278_vm0, %v6144_v7  ;;  %v5924_v59 = vpop.f32.mrf.mxu0 }
 0x532   : > { %v6684_v1 = vpop.f32.mrf.mxu1 }
 0x533   : > { %v5737_v53 = vadd.f32 %v6683_v30, %v11118_v5 }
 0x534   : > { %v6685_v26 = vpop.f32.mrf.mxu1 }
 0x535   : > { %v5898_v62 = vadd.f32 %v6859_v48, %v5737_v53  ;;  %v6686_v31 = vadd.f32 %v6685_v26, %v6684_v1 }
 0x537   : > { %v6006_v58 = vmax.f32 %v5898_v62, 0.0  ;;  %v5740_v46 = vadd.f32 %v6686_v31, %v11118_v5 }
 0x538   : > { %v6069_v29 = vld [vmem:[#allocation2 + $0x68] ss:$2 sm:$0xff]  ;;  %v6101_v39 = vld [vmem:[#allocation2 + $0x69] ss:$2 sm:$0xff] }
 0x539   : > { %6038 = vst.msk [vmem:[#allocation2 + $0x88] sm:$0xff] %vm278_vm0, %v6006_v58  ;;  %v5901_v36 = vadd.f32 %v6860_v42, %v5740_v46  ;;  %v6130_v10 = vmax.f32 %v6069_v29, %v6101_v39 }
 0x53a   : > { %v6687_v8 = vpop.f32.mrf.mxu1 }
 0x53b   : > { %v6007_v14 = vmax.f32 %v5901_v36, 0.0 }
 0x53c   : > { %v6688_v15 = vpop.f32.mrf.mxu1 }
 0x53d   : > { %6039 = vst.msk [vmem:[#allocation2 + $0x90] sm:$0xff] %vm278_vm0, %v6007_v14  ;;  %v6689_v44 = vadd.f32 %v6688_v15, %v6687_v8 }
 0x53e   : > { %v6690_v55 = vpop.f32.mrf.mxu1 }
 0x53f   : > { %v5745_v2 = vadd.f32 %v6689_v44, %v11118_v5 }
 0x540   : > { %v6691_v45 = vpop.f32.mrf.mxu1 }
 0x541   : > { %v5906_v32 = vadd.f32 %v5905_v50, %v5745_v2  ;;  %v6692_v18 = vadd.f32 %v6691_v45, %v6690_v55  ;;  %v6871_v55 = vpop.f32.mrf.mxu0 }
 0x543   : > { %v6008_v41 = vmax.f32 %v5906_v32, 0.0  ;;  %v5748_v54 = vadd.f32 %v6692_v18, %v11118_v5  ;;  %v5937_v32 = vpop.f32.mrf.mxu0 }
 0x544   : > { %v6071_v13 = vld [vmem:[#allocation2 + $0x88] ss:$2 sm:$0xff]  ;;  %v6103_v19 = vld [vmem:[#allocation2 + $0x89] ss:$2 sm:$0xff] }
 0x545   : > { %6040 = vst.msk [vmem:[#allocation2 + $0xa8] sm:$0xff] %vm278_vm0, %v6008_v41  ;;  %v5909_v33 = vadd.f32 %v5908_v17, %v5748_v54  ;;  %v6131_v11 = vmax.f32 %v6071_v13, %v6103_v19  ;;  %v6872_v54 = vpop.f32.mrf.mxu0 }
 0x546   : > { %v6693_v16 = vpop.f32.mrf.mxu1 }
 0x547   : > { %v6009_v47 = vmax.f32 %v5909_v33, 0.0  ;;  %v6145_v56 = vmax.f32 %v6130_v10, %v6131_v11 }
 0x548   : > { %v6694_v28 = vpop.f32.mrf.mxu1 }
 0x549   : > { %6041 = vst.msk [vmem:[#allocation2 + $0xb0] sm:$0xff] %vm278_vm0, %v6009_v47  ;;  %v6695_v40 = vadd.f32 %v6694_v28, %v6693_v16  ;;  %6153 = vst.msk [vmem:[%s11135_s29 + $0x8] sm:$0xff] %vm278_vm0, %v6145_v56  ;;  %v5940_v47 = vpop.f32.mrf.mxu0 }
 0x54a   : > { %v6696_v48 = vpop.f32.mrf.mxu1 }
 0x54b   : > { %v5753_v61 = vadd.f32 %v6695_v40, %v11118_v5 }
 0x54c   : > { %v6697_v43 = vpop.f32.mrf.mxu1 }
 0x54d   : > { %v5914_v21 = vadd.f32 %v6863_v38, %v5753_v61  ;;  %v6698_v57 = vadd.f32 %v6697_v43, %v6696_v48 }
 0x54f   : > { %v6010_v12 = vmax.f32 %v5914_v21, 0.0  ;;  %v5756_v4 = vadd.f32 %v6698_v57, %v11118_v5 }
 0x550   : > { %v6073_v60 = vld [vmem:[#allocation2 + $0xa8] ss:$2 sm:$0xff]  ;;  %v6105_v63 = vld [vmem:[#allocation2 + $0xa9] ss:$2 sm:$0xff] }
 0x551   : > { %6042 = vst.msk [vmem:[#allocation2 + $0xc8] sm:$0xff] %vm278_vm0, %v6010_v12  ;;  %v5917_v24 = vadd.f32 %v6864_v49, %v5756_v4  ;;  %v6132_v1 = vmax.f32 %v6073_v60, %v6105_v63 }
 0x552   : > { %v6699_v42 = vpop.f32.mrf.mxu1 }
 0x553   : > { %v6011_v34 = vmax.f32 %v5917_v24, 0.0 }
 0x554   : > { %v6700_v0 = vpop.f32.mrf.mxu1 }
 0x555   : > { %6043 = vst.msk [vmem:[#allocation2 + $0xd0] sm:$0xff] %vm278_vm0, %v6011_v34  ;;  %v6701_v52 = vadd.f32 %v6700_v0, %v6699_v42 }
 0x556   : > { %v6702_v25 = vpop.f32.mrf.mxu1 }
 0x557   : > { %v5761_v35 = vadd.f32 %v6701_v52, %v11118_v5 }
 0x558   : > { %v6703_v3 = vpop.f32.mrf.mxu1 }
 0x559   : > { %v5922_v9 = vadd.f32 %v5921_v51, %v5761_v35  ;;  %v6704_v22 = vadd.f32 %v6703_v3, %v6702_v25  ;;  %v6875_v25 = vpop.f32.mrf.mxu0 }
 0x55b   : > { %v6012_v37 = vmax.f32 %v5922_v9, 0.0  ;;  %v5764_v27 = vadd.f32 %v6704_v22, %v11118_v5  ;;  %v5953_v9 = vpop.f32.mrf.mxu0 }
 0x55c   : > { %v6075_v7 = vld [vmem:[#allocation2 + $0xc8] ss:$2 sm:$0xff]  ;;  %v6107_v6 = vld [vmem:[#allocation2 + $0xc9] ss:$2 sm:$0xff] }
 0x55d   : > { %6044 = vst.msk [vmem:[#allocation2 + $0xe8] sm:$0xff] %vm278_vm0, %v6012_v37  ;;  %v5925_v30 = vadd.f32 %v5924_v59, %v5764_v27  ;;  %v6133_v53 = vmax.f32 %v6075_v7, %v6107_v6  ;;  %v6876_v27 = vpop.f32.mrf.mxu0 }
 0x55e   : > { %v6705_v26 = vpop.f32.mrf.mxu1 }
 0x55f   : > { %v6013_v62 = vmax.f32 %v5925_v30, 0.0  ;;  %v6146_v31 = vmax.f32 %v6132_v1, %v6133_v53 }
 0x560   : > { %v6706_v58 = vpop.f32.mrf.mxu1 }
 0x561   : > { %6045 = vst.msk [vmem:[#allocation2 + $0xf0] sm:$0xff] %vm278_vm0, %v6013_v62  ;;  %v6707_v46 = vadd.f32 %v6706_v58, %v6705_v26  ;;  %6154 = vst.msk [vmem:[%s11135_s29 + $0x10] sm:$0xff] %vm278_vm0, %v6146_v31  ;;  %v5956_v62 = vpop.f32.mrf.mxu0 }
 0x562   : > { %v6708_v38 = vpop.f32.mrf.mxu1 }
 0x563   : > { %v5769_v36 = vadd.f32 %v6707_v46, %v11118_v5 }
 0x564   : > { %v6709_v8 = vpop.f32.mrf.mxu1 }
 0x565   : > { %v5930_v14 = vadd.f32 %v6867_v23, %v5769_v36  ;;  %v6710_v50 = vadd.f32 %v6709_v8, %v6708_v38 }
 0x567   : > { %v6014_v15 = vmax.f32 %v5930_v14, 0.0  ;;  %v5772_v44 = vadd.f32 %v6710_v50, %v11118_v5 }
 0x568   : > { %v6077_v33 = vld [vmem:[#allocation2 + $0xe8] ss:$2 sm:$0xff]  ;;  %v6109_v10 = vld [vmem:[#allocation2 + $0xe9] ss:$2 sm:$0xff] }
 0x569   : > { %6046 = vst.msk [vmem:[#allocation2 + $0x108] sm:$0xff] %vm278_vm0, %v6014_v15  ;;  %v5933_v2 = vadd.f32 %v6868_v20, %v5772_v44  ;;  %v6134_v48 = vmax.f32 %v6077_v33, %v6109_v10 }
 0x56a   : > { %v6711_v49 = vpop.f32.mrf.mxu1 }
 0x56b   : > { %v6015_v45 = vmax.f32 %v5933_v2, 0.0 }
 0x56c   : > { %v6712_v18 = vpop.f32.mrf.mxu1 }
 0x56d   : > { %6047 = vst.msk [vmem:[#allocation2 + $0x110] sm:$0xff] %vm278_vm0, %v6015_v45  ;;  %v6713_v29 = vadd.f32 %v6712_v18, %v6711_v49 }
 0x56e   : > { %v6714_v39 = vpop.f32.mrf.mxu1 }
 0x56f   : > { %v5777_v41 = vadd.f32 %v6713_v29, %v11118_v5 }
 0x570   : > { %v6715_v17 = vpop.f32.mrf.mxu1 }
 0x571   : > { %v5938_v13 = vadd.f32 %v5937_v32, %v5777_v41  ;;  %v6716_v19 = vadd.f32 %v6715_v17, %v6714_v39  ;;  %v6879_v39 = vpop.f32.mrf.mxu0 }
 0x573   : > { %v6016_v11 = vmax.f32 %v5938_v13, 0.0  ;;  %v5780_v16 = vadd.f32 %v6716_v19, %v11118_v5  ;;  %v5969_v13 = vpop.f32.mrf.mxu0 }
 0x574   : > { %v6079_v56 = vld [vmem:[#allocation2 + $0x108] ss:$2 sm:$0xff]  ;;  %v6111_v28 = vld [vmem:[#allocation2 + $0x109] ss:$2 sm:$0xff] }
 0x575   : > { %6048 = vst.msk [vmem:[#allocation2 + $0x128] sm:$0xff] %vm278_vm0, %v6016_v11  ;;  %v5941_v40 = vadd.f32 %v5940_v47, %v5780_v16  ;;  %v6135_v61 = vmax.f32 %v6079_v56, %v6111_v28  ;;  %v6880_v16 = vpop.f32.mrf.mxu0 }
 0x576   : > { %v6717_v43 = vpop.f32.mrf.mxu1 }
 0x577   : > { %v6017_v21 = vmax.f32 %v5941_v40, 0.0  ;;  %v6147_v57 = vmax.f32 %v6134_v48, %v6135_v61 }
 0x578   : > { %v6718_v12 = vpop.f32.mrf.mxu1 }
 0x579   : > { %6049 = vst.msk [vmem:[#allocation2 + $0x130] sm:$0xff] %vm278_vm0, %v6017_v21  ;;  %v6719_v4 = vadd.f32 %v6718_v12, %v6717_v43  ;;  %6155 = vst.msk [vmem:[%s11135_s29 + $0x18] sm:$0xff] %vm278_vm0, %v6147_v57  ;;  %v5972_v21 = vpop.f32.mrf.mxu0 }
 0x57a   : > { %v6720_v23 = vpop.f32.mrf.mxu1 }
 0x57b   : > { %v5785_v24 = vadd.f32 %v6719_v4, %v11118_v5 }
 0x57c   : > { %v6721_v42 = vpop.f32.mrf.mxu1 }
 0x57d   : > { %v5946_v34 = vadd.f32 %v6871_v55, %v5785_v24  ;;  %v6722_v51 = vadd.f32 %v6721_v42, %v6720_v23 }
 0x57f   : > { %v6018_v0 = vmax.f32 %v5946_v34, 0.0  ;;  %v5788_v52 = vadd.f32 %v6722_v51, %v11118_v5 }
 0x580   : > { %v6081_v30 = vld [vmem:[#allocation2 + $0x128] ss:$2 sm:$0xff]  ;;  %v6113_v1 = vld [vmem:[#allocation2 + $0x129] ss:$2 sm:$0xff] }
 0x581   : > { %6050 = vst.msk [vmem:[#allocation2 + $0x148] sm:$0xff] %vm278_vm0, %v6018_v0  ;;  %v5949_v35 = vadd.f32 %v6872_v54, %v5788_v52  ;;  %v6136_v38 = vmax.f32 %v6081_v30, %v6113_v1 }
 0x583   : > { %v6723_v20 = vpop.f32.mrf.mxu1  ;;  %v6019_v3 = vmax.f32 %v5949_v35, 0.0 }
 0x585   : > { %v6724_v22 = vpop.f32.mrf.mxu1  ;;  %6051 = vst.msk [vmem:[#allocation2 + $0x150] sm:$0xff] %vm278_vm0, %v6019_v3 }
 0x586   : > { %v6725_v60 = vadd.f32 %v6724_v22, %v6723_v20  ;;  %v6883_v22 = vpop.f32.mrf.mxu0 }
 0x587   : > { %v6726_v63 = vpop.f32.mrf.mxu1 }
 0x588   : > { %v5793_v37 = vadd.f32 %v6725_v60, %v11118_v5 }
 0x589   : > { %v6727_v59 = vpop.f32.mrf.mxu1 }
 0x58a   : > { %v5954_v7 = vadd.f32 %v5953_v9, %v5793_v37  ;;  %v6728_v6 = vadd.f32 %v6727_v59, %v6726_v63  ;;  %v5985_v59 = vpop.f32.mrf.mxu0 }
 0x58c   : > { %v6020_v53 = vmax.f32 %v5954_v7, 0.0  ;;  %v5796_v26 = vadd.f32 %v6728_v6, %v11118_v5  ;;  %v6083_v31 = vld [vmem:[#allocation2 + $0x148] ss:$2 sm:$0xff]  ;;  %v6115_v58 = vld [vmem:[#allocation2 + $0x149] ss:$2 sm:$0xff] }
 0x58d   : > { %v6137_v36 = vmax.f32 %v6083_v31, %v6115_v58 }
 0x58e   : > { %6052 = vst.msk [vmem:[#allocation2 + $0x168] sm:$0xff] %vm278_vm0, %v6020_v53  ;;  %v5957_v46 = vadd.f32 %v5956_v62, %v5796_v26  ;;  %v6884_v53 = vpop.f32.mrf.mxu0 }
 0x58f   : > { %v6729_v8 = vpop.f32.mrf.mxu1  ;;  %v6148_v50 = vmax.f32 %v6136_v38, %v6137_v36 }
 0x590   : > { %v6021_v14 = vmax.f32 %v5957_v46, 0.0  ;;  %v5988_v38 = vpop.f32.mrf.mxu0 }
 0x591   : > { %v6730_v15 = vpop.f32.mrf.mxu1  ;;  %6156 = vst.msk [vmem:[%s11135_s29 + $0x20] sm:$0xff] %vm278_vm0, %v6148_v50 }
 0x592   : > { %6053 = vst.msk [vmem:[#allocation2 + $0x170] sm:$0xff] %vm278_vm0, %v6021_v14  ;;  %v6731_v44 = vadd.f32 %v6730_v15, %v6729_v8 }
 0x593   : > { %v6732_v55 = vpop.f32.mrf.mxu1 }
 0x594   : > { %v5801_v2 = vadd.f32 %v6731_v44, %v11118_v5 }
 0x595   : > { %v6733_v49 = vpop.f32.mrf.mxu1 }
 0x596   : > { %v5962_v45 = vadd.f32 %v6875_v25, %v5801_v2  ;;  %v6734_v32 = vadd.f32 %v6733_v49, %v6732_v55 }
 0x598   : > { %v6022_v18 = vmax.f32 %v5962_v45, 0.0  ;;  %v5804_v29 = vadd.f32 %v6734_v32, %v11118_v5 }
 0x599   : > { %v6085_v40 = vld [vmem:[#allocation2 + $0x168] ss:$2 sm:$0xff]  ;;  %v6117_v48 = vld [vmem:[#allocation2 + $0x169] ss:$2 sm:$0xff] }
 0x59a   : > { %6054 = vst.msk [vmem:[#allocation2 + $0x188] sm:$0xff] %vm278_vm0, %v6022_v18  ;;  %v5965_v41 = vadd.f32 %v6876_v27, %v5804_v29  ;;  %v6138_v23 = vmax.f32 %v6085_v40, %v6117_v48 }
 0x59b   : > { %v6735_v54 = vpop.f32.mrf.mxu1 }
 0x59c   : > { %v6023_v17 = vmax.f32 %v5965_v41, 0.0 }
 0x59d   : > { %v6736_v19 = vpop.f32.mrf.mxu1 }
 0x59e   : > { %6055 = vst.msk [vmem:[#allocation2 + $0x190] sm:$0xff] %vm278_vm0, %v6023_v17  ;;  %v6737_v33 = vadd.f32 %v6736_v19, %v6735_v54 }
 0x59f   : > { %v6738_v10 = vpop.f32.mrf.mxu1 }
 0x5a0   : > { %v5809_v11 = vadd.f32 %v6737_v33, %v11118_v5 }
 0x5a1   : > { %v6739_v47 = vpop.f32.mrf.mxu1 }
 0x5a2   : > { %v5970_v56 = vadd.f32 %v5969_v13, %v5809_v11  ;;  %v6740_v28 = vadd.f32 %v6739_v47, %v6738_v10 }
 0x5a4   : > { %v6024_v61 = vmax.f32 %v5970_v56, 0.0  ;;  %v5812_v43 = vadd.f32 %v6740_v28, %v11118_v5 }
 0x5a5   : > { %v6087_v57 = vld [vmem:[#allocation2 + $0x188] ss:$2 sm:$0xff]  ;;  %v6119_v12 = vld [vmem:[#allocation2 + $0x189] ss:$2 sm:$0xff] }
 0x5a6   : > { %6056 = vst.msk [vmem:[#allocation2 + $0x1a8] sm:$0xff] %vm278_vm0, %v6024_v61  ;;  %v5973_v4 = vadd.f32 %v5972_v21, %v5812_v43  ;;  %v6139_v24 = vmax.f32 %v6087_v57, %v6119_v12 }
 0x5a7   : > { %v6741_v42 = vpop.f32.mrf.mxu1 }
 0x5a8   : > { %v6025_v34 = vmax.f32 %v5973_v4, 0.0  ;;  %v6149_v51 = vmax.f32 %v6138_v23, %v6139_v24 }
 0x5a9   : > { %v6742_v0 = vpop.f32.mrf.mxu1 }
 0x5aa   : > { %6057 = vst.msk [vmem:[#allocation2 + $0x1b0] sm:$0xff] %vm278_vm0, %v6025_v34  ;;  %v6743_v52 = vadd.f32 %v6742_v0, %v6741_v42  ;;  %6157 = vst.msk [vmem:[%s11135_s29 + $0x28] sm:$0xff] %vm278_vm0, %v6149_v51 }
 0x5ab   : > { %v6744_v25 = vpop.f32.mrf.mxu1 }
 0x5ac   : > { %v5817_v35 = vadd.f32 %v6743_v52, %v11118_v5 }
 0x5ad   : > { %v6745_v20 = vpop.f32.mrf.mxu1 }
 0x5ae   : > { %v5978_v3 = vadd.f32 %v6879_v39, %v5817_v35  ;;  %v6746_v9 = vadd.f32 %v6745_v20, %v6744_v25 }
 0x5b0   : > { %v6026_v60 = vmax.f32 %v5978_v3, 0.0  ;;  %v5820_v63 = vadd.f32 %v6746_v9, %v11118_v5 }
 0x5b1   : > { %v6089_v36 = vld [vmem:[#allocation2 + $0x1a8] ss:$2 sm:$0xff]  ;;  %v6121_v8 = vld [vmem:[#allocation2 + $0x1a9] ss:$2 sm:$0xff] }
 0x5b2   : > { %6058 = vst.msk [vmem:[#allocation2 + $0x1c8] sm:$0xff] %vm278_vm0, %v6026_v60  ;;  %v5981_v37 = vadd.f32 %v6880_v16, %v5820_v63  ;;  %v6140_v45 = vmax.f32 %v6089_v36, %v6121_v8 }
 0x5b3   : > { %v6747_v27 = vpop.f32.mrf.mxu1 }
 0x5b4   : > { %v6027_v7 = vmax.f32 %v5981_v37, 0.0 }
 0x5b5   : > { %v6748_v6 = vpop.f32.mrf.mxu1 }
 0x5b6   : > { %6059 = vst.msk [vmem:[#allocation2 + $0x1d0] sm:$0xff] %vm278_vm0, %v6027_v7  ;;  %v6749_v30 = vadd.f32 %v6748_v6, %v6747_v27 }
 0x5b7   : > { %v6750_v1 = vpop.f32.mrf.mxu1 }
 0x5b8   : > { %v5825_v26 = vadd.f32 %v6749_v30, %v11118_v5 }
 0x5b9   : > { %v6751_v62 = vpop.f32.mrf.mxu1 }
 0x5ba   : > { %v6752_v31 = vadd.f32 %v6751_v62, %v6750_v1  ;;  %v5986_v58 = vadd.f32 %v5985_v59, %v5825_v26 }
 0x5bb   : > { %v6753_v46 = vpop.f32.mrf.mxu1 }
 0x5bc   : > { %v6028_v14 = vmax.f32 %v5986_v58, 0.0  ;;  %v5828_v50 = vadd.f32 %v6752_v31, %v11118_v5 }
 0x5bd   : > { %v6754_v15 = vpop.f32.mrf.mxu1  ;;  %v6091_v44 = vld [vmem:[#allocation2 + $0x1c8] ss:$2 sm:$0xff]  ;;  %v6123_v55 = vld [vmem:[#allocation2 + $0x1c9] ss:$2 sm:$0xff] }
 0x5be   : > { %6060 = vst.msk [vmem:[#allocation2 + $0x1e8] sm:$0xff] %vm278_vm0, %v6028_v14  ;;  %v6755_v2 = vadd.f32 %v6754_v15, %v6753_v46  ;;  %v5989_v49 = vadd.f32 %v5988_v38, %v5828_v50  ;;  %v6141_v32 = vmax.f32 %v6091_v44, %v6123_v55 }
 0x5bf   : > { %v6756_v18 = vpop.f32.mrf.mxu1 }
 0x5c0   : > { %v5833_v29 = vadd.f32 %v6755_v2, %v11118_v5  ;;  %v6029_v39 = vmax.f32 %v5989_v49, 0.0  ;;  %v6150_v41 = vmax.f32 %v6140_v45, %v6141_v32 }
 0x5c1   : > { %v6757_v54 = vpop.f32.mrf.mxu1 }
 0x5c2   : > { %v5994_v17 = vadd.f32 %v6883_v22, %v5833_v29  ;;  %6061 = vst.msk [vmem:[#allocation2 + $0x1f0] sm:$0xff] %vm278_vm0, %v6029_v39  ;;  %v6758_v13 = vadd.f32 %v6757_v54, %v6756_v18  ;;  %6158 = vst.msk [vmem:[%s11135_s29 + $0x30] sm:$0xff] %vm278_vm0, %v6150_v41 }
 0x5c4   : > { %v6030_v19 = vmax.f32 %v5994_v17, 0.0  ;;  %v5836_v33 = vadd.f32 %v6758_v13, %v11118_v5 }
 0x5c6   : > { %6062 = vst.msk [vmem:[#allocation2 + $0x208] sm:$0xff] %vm278_vm0, %v6030_v19  ;;  %v5997_v10 = vadd.f32 %v6884_v53, %v5836_v33 }
 0x5c8   : > { %v6031_v11 = vmax.f32 %v5997_v10, 0.0 }
 0x5c9   : > { %v6093_v16 = vld [vmem:[#allocation2 + $0x1e8] ss:$2 sm:$0xff]  ;;  %v6125_v47 = vld [vmem:[#allocation2 + $0x1e9] ss:$2 sm:$0xff] }
 0x5ca   : > { %6063 = vst.msk [vmem:[#allocation2 + $0x210] sm:$0xff] %vm278_vm0, %v6031_v11  ;;  %v6142_v40 = vmax.f32 %v6093_v16, %v6125_v47 }
 0x5d1   : > { %v6095_v56 = vld [vmem:[#allocation2 + $0x208] ss:$2 sm:$0xff]  ;;  %v6127_v28 = vld [vmem:[#allocation2 + $0x209] ss:$2 sm:$0xff] }
 0x5d2   : > { %v6143_v48 = vmax.f32 %v6095_v56, %v6127_v28 }
 0x5d4   : > { %v6151_v5 = vmax.f32 %v6142_v40, %v6143_v48 }
 0x5d6   : > { %6159 = vst.msk [vmem:[%s11135_s29 + $0x38] sm:$0xff] %vm278_vm0, %v6151_v5 }
 0x5d7   : > { %8472 = shalt.err (!%p8469_p3)
}
 0x5d8   : > { %s8473_s18 = scalar_lea.hbm %s11208_s17, 1024  ;;  %s8477_s23 = scalar_lea.hbm %s11263_s7, 2048 }
 0x5d9   : > { %p8474_p4 = scmp.ne.s32.totalorder %s11208_s17, %s8473_s18  ;;  %p8478_p9 = scmp.lt.s32.totalorder %s11208_s17, %s11263_s7 }
 0x5da   : > { %p8479_p10 = scmp.lt.s32.totalorder %s8477_s23, %s8473_s18 }
 0x5db   : > { %p8475_p7 = pnand %p8474_p4, %p8606_p5 }
 0x5dc   : > { %p8480_p11 = por %p8479_p10, %p8478_p9 }
 0x5dd   : > { %p8476_p8 = pneg %p8475_p7 }
 0x5df   : > { %p8481_p12 = pnand %p8480_p11, %p8476_p8 }
 0x5e1   : > { %8484 = shalt.err (!%p8481_p12)
}
 0x5e2   : > { %s8526_s13 = smov 128   ;;  %s8527_s14 = smov 8  }
 0x5e3   : > { %6889 = dma.vmem_to_hbm [thread:$0]  (%p8606_p5), %s11210_s9, 1024, %s11208_s17, %s11216_s28, %s8526_s13, %s8526_s13, %s8527_s14  }
 0x5e4 PF: > { %p6895_p13 = scmp.ge.s32.totalorder %s8519_s27, 2  ;;  %s6189_s16 = sand.u32 1, %s8507_s24  }
 0x5e5   : > { %s6190_s19 = scalar_lea.sflag [#allocation4], %s6189_s16 }
 0x5e6   : > { %p6892_p0 = pnand %p6895_p13, %p8610_p6 }
 0x5e8   : > { %p6893_p1 = pneg %p6892_p0 }
 0x5ea   : > { %8502 = dma.done.wait (%p6893_p1), %s6190_s19, 1024  }
 0x5eb   : > { %8504 = vsyncadd (%p6893_p1), %s6190_s19, 4294966272  ;;  %p17_p2 = scmp.ge.s32.totalorder %s8593_s30, 4   ;;  %s11332_s24 = smov %s8511_s25 }
 0x5ec   : > { %s11333_s25 = smov %s8515_s26  ;;  %s11334_s26 = smov %s8604_s10 }
 0x5ed   : > { %s11335_s27 = smov %s8593_s30  ;;  %19 = sbr.rel (!%p17_p2) target bundleno = 3 (0x3), region = 118 }
 0x5f2   :  { %6195 = vsyncpa [#allocation4], 1 }
 0x5f3   :  { %6197 = vsyncpa [#allocation4 + $0x1], 1 }

</bundles_post_ra>
